<compile_context>
chip_gen: v5e
topology: v5e:2x2
jax: 0.10.0
libtpu: 0.0.40
codegen_flags: <defaults>
</compile_context>

<pallas_src>
import functools
import math

import jax
import jax.numpy as jnp
from jax import lax
from jax.experimental import pallas as pl
from jax.experimental.pallas import tpu as pltpu

LN_EPS = 1e-5
_WB_CAP = 16       # max attention windows batched per grid step


def _default_row_tile():
    # 1024-row tiles where VMEM is plentiful (v5e/v6e: 128 MiB), 512 on v7x (64 MiB).
    try:
        info = pltpu.get_tpu_info()
        vmem = int(getattr(info, "vmem_capacity_bytes", 128 << 20))
    except Exception:  # pragma: no cover - conservative fallback
        vmem = 128 << 20
    return 1024 if vmem >= (100 << 20) else 512


_TN = _default_row_tile()


# --------------------------------------------------------------------------
# small helpers usable both in- and outside kernels
# --------------------------------------------------------------------------
def _layer_norm(x, g, b):
    mu = jnp.mean(x, axis=-1, keepdims=True)
    var = jnp.mean((x - mu) ** 2, axis=-1, keepdims=True)
    return (x - mu) * lax.rsqrt(var + LN_EPS) * g + b


def _row_tile(n):
    return min(_TN, ((n + 7) // 8) * 8)


def _pick_wb(n_windows, cap=_WB_CAP, min_tiles=4):
    # keep >= min_tiles steps on the parallel grid axis (2-TC split + pipelining)
    cap = max(1, min(cap, n_windows // min_tiles))
    for wb in range(min(cap, n_windows), 0, -1):
        if n_windows % wb == 0:
            return wb
    return 1


def _nb(*arrs):
    return sum(math.prod(s) * jnp.dtype(d).itemsize for s, d in arrs)


def _mosaic_params(sems, vmem_need=0):
    # 2x double-buffering + headroom, clamped to a v7x-safe window.
    limit = int(min(max(4 * vmem_need + (8 << 20), 32 << 20), 56 << 20))
    return pltpu.CompilerParams(dimension_semantics=sems, vmem_limit_bytes=limit)


# --------------------------------------------------------------------------
# Pallas kernels
# --------------------------------------------------------------------------
def _ln_linear_kernel(x_ref, g_ref, b_ref, w_ref, wb_ref, o_ref):
    x = x_ref[...].astype(jnp.float32)
    h = _layer_norm(x, g_ref[...], b_ref[...])
    y = jnp.dot(h.astype(jnp.bfloat16), w_ref[...],
                preferred_element_type=jnp.float32) + wb_ref[...]
    o_ref[...] = y.astype(o_ref.dtype)


def _ln_only_kernel(x_ref, g_ref, b_ref, o_ref):
    x = x_ref[...].astype(jnp.float32)
    o_ref[...] = _layer_norm(x, g_ref[...], b_ref[...]).astype(o_ref.dtype)


def _linear_residual_kernel(x_ref, w_ref, b_ref, o_ref):
    x = x_ref[...].astype(jnp.float32)
    y = jnp.dot(x.astype(jnp.bfloat16), w_ref[...],
                preferred_element_type=jnp.float32) + b_ref[...]
    o_ref[...] = (y + x).astype(o_ref.dtype)


def _geglu_kernel(x_ref, xb_ref, xf_ref, wv_ref, bv_ref, wg_ref, bg_ref,
                  w2_ref, b2_ref, o_ref):
    # three branch tensors consumed separately; weights are row-split per branch
    # (identical math to Linear([x, xb, xf] concat) without the HBM concat).
    a = x_ref[...].astype(jnp.bfloat16)
    b = xb_ref[...].astype(jnp.bfloat16)
    c = xf_ref[...].astype(jnp.bfloat16)
    val = (jnp.dot(a, wv_ref[0], preferred_element_type=jnp.float32)
           + jnp.dot(b, wv_ref[1], preferred_element_type=jnp.float32)
           + jnp.dot(c, wv_ref[2], preferred_element_type=jnp.float32)
           + bv_ref[...])
    gate = (jnp.dot(a, wg_ref[0], preferred_element_type=jnp.float32)
            + jnp.dot(b, wg_ref[1], preferred_element_type=jnp.float32)
            + jnp.dot(c, wg_ref[2], preferred_element_type=jnp.float32)
            + bg_ref[...])
    # TODO(synk): PyTorch nn.GELU defaults to exact erf; tanh approximation used here.
    h = val * jax.nn.gelu(gate, approximate=True)
    y = jnp.dot(h.astype(jnp.bfloat16), w2_ref[...],
                preferred_element_type=jnp.float32) + b2_ref[...]
    o_ref[...] = y.astype(o_ref.dtype)


def _conv3x3_kernel(x_ref, w_ref, b_ref, o_ref):
    # x_ref: (1, H+2, W+2, C) halo-padded image, w_ref: (9*C, Cout) bf16.
    # im2col strip built in VMEM -> ONE matmul with contraction 9*C (MXU-filling).
    _, hp2, wp2, cin = x_ref.shape
    hh, ww = hp2 - 2, wp2 - 2
    cout = o_ref.shape[3]
    xb = x_ref[0].astype(jnp.bfloat16)
    patches = [xb[dy:dy + hh, dx:dx + ww, :].reshape(hh * ww, cin)
               for dy in range(3) for dx in range(3)]
    im2col = jnp.concatenate(patches, axis=-1)                  # (H*W, 9*C)
    acc = jnp.dot(im2col, w_ref[...], preferred_element_type=jnp.float32) + b_ref[...]
    o_ref[0] = acc.reshape(hh, ww, cout).astype(o_ref.dtype)


def _tmsa_group_kernel(x_ref, ln1g, ln1b, qw, qb, kw, kb, vw, vb, pw, pb,
                       ln2g, ln2b, f1w, f1b, f2w, f2b, rw, rb,
                       o_ref, acc_ref, *, num_heads, wb, win_len):
    # Fused residual group: grid = (window_tiles, depth).  The window-batched
    # activation block stays resident in the f32 VMEM scratch across the depth
    # axis; per-depth weights are streamed in by the BlockSpec index_map; the
    # trailing Linear + residual is applied on the last depth step.
    WB, L = wb, win_len
    _, N, C = x_ref.shape
    hd = C // num_heads
    d = pl.program_id(1)
    nd = pl.num_programs(1)

    @pl.when(d == 0)
    def _init():
        acc_ref[...] = x_ref[0].astype(jnp.float32)

    x = acc_ref[...]                                            # (N, C) f32

    # ---- window multi-head self-attention (heads share fused projections) ----
    h = _layer_norm(x, ln1g[0], ln1b[0])
    hb = h.astype(jnp.bfloat16)
    # single (N,C)x(C,C) matmul per projection (q weight pre-scaled on host)
    q = jnp.dot(hb, qw[0], preferred_element_type=jnp.float32) + qb[0]
    k = jnp.dot(hb, kw[0], preferred_element_type=jnp.float32) + kb[0]
    v = jnp.dot(hb, vw[0], preferred_element_type=jnp.float32) + vb[0]
    heads = []
    for hi in range(num_heads):
        sl = slice(hi * hd, (hi + 1) * hd)
        q3 = q[:, sl].reshape(WB, L, hd).astype(jnp.bfloat16)
        k3 = k[:, sl].reshape(WB, L, hd).astype(jnp.bfloat16)
        v3 = v[:, sl].reshape(WB, L, hd).astype(jnp.bfloat16)
        s = lax.dot_general(q3, k3, (((2,), (2,)), ((0,), (0,))),
                            preferred_element_type=jnp.float32)         # (WB, L, L)
        s = s - jnp.max(s, axis=-1, keepdims=True)
        pe = jnp.exp(s)
        pe = pe * pl.reciprocal(jnp.sum(pe, axis=-1, keepdims=True), approx=True)
        o = lax.dot_general(pe.astype(jnp.bfloat16), v3,
                            (((2,), (1,)), ((0,), (0,))),
                            preferred_element_type=jnp.float32)         # (WB, L, hd)
        heads.append(o.reshape(N, hd))
    attn = jnp.concatenate(heads, axis=-1).astype(jnp.bfloat16)         # (N, C)
    # single (N,C)x(C,C) output projection
    y = jnp.dot(attn, pw[0], preferred_element_type=jnp.float32) + pb[0]
    # TODO(synk): shifted-window offsets, relative-position bias and the
    # mutual-attention TMSA variant are omitted (submodule source not given).
    x = x + y

    # ---- MLP ----
    h = _layer_norm(x, ln2g[0], ln2b[0])
    h = jnp.dot(h.astype(jnp.bfloat16), f1w[0],
                preferred_element_type=jnp.float32) + f1b[0]
    # TODO(synk): PyTorch nn.GELU defaults to exact erf; tanh approximation used here.
    h = jax.nn.gelu(h, approximate=True)
    h = jnp.dot(h.astype(jnp.bfloat16), f2w[0],
                preferred_element_type=jnp.float32) + f2b[0]
    x = x + h

    acc_ref[...] = x

    @pl.when(d == nd - 1)
    def _finalize():
        out = jnp.dot(x.astype(jnp.bfloat16), rw[...],
                      preferred_element_type=jnp.float32) + rb[...]
        out = out + x_ref[0].astype(jnp.float32)                # group residual
        o_ref[0] = out.astype(o_ref.dtype)


# --------------------------------------------------------------------------
# Pallas wrappers
# --------------------------------------------------------------------------
def ln_linear(x, gamma, beta, w, b):
    N, cin = x.shape
    cout = w.shape[1]
    tn = _row_tile(N)
    need = _nb(((tn, cin), x.dtype), ((cin, cout), w.dtype), ((tn, cout), jnp.bfloat16))
    return pl.pallas_call(
        _ln_linear_kernel,
        out_shape=jax.ShapeDtypeStruct((N, cout), jnp.bfloat16),
        grid=(pl.cdiv(N, tn),),
        in_specs=[pl.BlockSpec((tn, cin), lambda i: (i, 0)),
                  pl.BlockSpec((1, cin), lambda i: (0, 0)),
                  pl.BlockSpec((1, cin), lambda i: (0, 0)),
                  pl.BlockSpec((cin, cout), lambda i: (0, 0)),
                  pl.BlockSpec((1, cout), lambda i: (0, 0))],
        out_specs=pl.BlockSpec((tn, cout), lambda i: (i, 0)),
        compiler_params=_mosaic_params(("parallel",), need),
    )(x, gamma, beta, w, b)


def ln_only(x, gamma, beta):
    N, cin = x.shape
    tn = _row_tile(N)
    need = _nb(((tn, cin), x.dtype), ((tn, cin), jnp.bfloat16))
    return pl.pallas_call(
        _ln_only_kernel,
        out_shape=jax.ShapeDtypeStruct((N, cin), jnp.bfloat16),
        grid=(pl.cdiv(N, tn),),
        in_specs=[pl.BlockSpec((tn, cin), lambda i: (i, 0)),
                  pl.BlockSpec((1, cin), lambda i: (0, 0)),
                  pl.BlockSpec((1, cin), lambda i: (0, 0))],
        out_specs=pl.BlockSpec((tn, cin), lambda i: (i, 0)),
        compiler_params=_mosaic_params(("parallel",), need),
    )(x, gamma, beta)


def linear_residual(x, w, b):
    N, cin = x.shape
    tn = _row_tile(N)
    need = _nb(((tn, cin), x.dtype), ((cin, cin), w.dtype), ((tn, cin), jnp.bfloat16))
    return pl.pallas_call(
        _linear_residual_kernel,
        out_shape=jax.ShapeDtypeStruct((N, cin), jnp.bfloat16),
        grid=(pl.cdiv(N, tn),),
        in_specs=[pl.BlockSpec((tn, cin), lambda i: (i, 0)),
                  pl.BlockSpec((cin, cin), lambda i: (0, 0)),
                  pl.BlockSpec((1, cin), lambda i: (0, 0))],
        out_specs=pl.BlockSpec((tn, cin), lambda i: (i, 0)),
        compiler_params=_mosaic_params(("parallel",), need),
    )(x, w, b)


def geglu(x, xb, xf, wv, bv, wg, bg, w2, b2):
    N, cin = x.shape
    hid = wv.shape[2]
    cout = w2.shape[1]
    tn = _row_tile(N)
    need = _nb(((tn, cin), x.dtype)) * 3 + _nb(((3, cin, hid), wv.dtype)) * 2 \
        + _nb(((hid, cout), w2.dtype), ((tn, hid), jnp.float32), ((tn, cout), jnp.float32))
    return pl.pallas_call(
        _geglu_kernel,
        out_shape=jax.ShapeDtypeStruct((N, cout), jnp.float32),
        grid=(pl.cdiv(N, tn),),
        in_specs=[pl.BlockSpec((tn, cin), lambda i: (i, 0)),
                  pl.BlockSpec((tn, cin), lambda i: (i, 0)),
                  pl.BlockSpec((tn, cin), lambda i: (i, 0)),
                  pl.BlockSpec((3, cin, hid), lambda i: (0, 0, 0)),
                  pl.BlockSpec((1, hid), lambda i: (0, 0)),
                  pl.BlockSpec((3, cin, hid), lambda i: (0, 0, 0)),
                  pl.BlockSpec((1, hid), lambda i: (0, 0)),
                  pl.BlockSpec((hid, cout), lambda i: (0, 0)),
                  pl.BlockSpec((1, cout), lambda i: (0, 0))],
        out_specs=pl.BlockSpec((tn, cout), lambda i: (i, 0)),
        compiler_params=_mosaic_params(("parallel",), need),
    )(x, xb, xf, wv, bv, wg, bg, w2, b2)


def conv3x3(x, w, b):
    # x: (N, H, W, C) channels-last; w: (9*C, Cout) bf16; halo-padded per image.
    # TODO(synk): row-tile with halos (and drop the host pad) for production resolutions.
    N, H, W, C = x.shape
    cout = w.shape[1]
    xp = jnp.pad(x, ((0, 0), (1, 1), (1, 1), (0, 0)))
    need = _nb(((1, H + 2, W + 2, C), x.dtype), ((9 * C, cout), w.dtype),
               ((H * W, 9 * C), jnp.bfloat16), ((1, H, W, cout), jnp.bfloat16))
    return pl.pallas_call(
        _conv3x3_kernel,
        out_shape=jax.ShapeDtypeStruct((N, H, W, cout), jnp.bfloat16),
        grid=(N,),
        in_specs=[pl.BlockSpec((1, H + 2, W + 2, C), lambda i: (i, 0, 0, 0)),
                  pl.BlockSpec((9 * C, cout), lambda i: (0, 0)),
                  pl.BlockSpec((1, cout), lambda i: (0, 0))],
        out_specs=pl.BlockSpec((1, H, W, cout), lambda i: (i, 0, 0, 0)),
        compiler_params=_mosaic_params(("parallel",), need),
    )(xp, w, b)


# --------------------------------------------------------------------------
# window partition helpers (pure layout, host side; done once per stage)
# --------------------------------------------------------------------------
def _window_partition(x, ws):
    B, D, H, W, C = x.shape
    wd, wh, ww = ws
    x = x.reshape(B, D // wd, wd, H // wh, wh, W // ww, ww, C)
    x = x.transpose(0, 1, 3, 5, 2, 4, 6, 7)
    return x.reshape(-1, wd * wh * ww, C)


def _window_unpartition(xw, ws, B, D, H, W, C):
    wd, wh, ww = ws
    x = xw.reshape(B, D // wd, H // wh, W // ww, wd, wh, ww, C)
    x = x.transpose(0, 1, 4, 2, 5, 3, 6, 7)
    return x.reshape(B, D, H, W, C)


def _to_window_tiles(x, ws):
    xw = _window_partition(x, ws)                 # (nW, L, C)
    nW, L, C = xw.shape
    WB = _pick_wb(nW)
    return xw.reshape(nW // WB, WB * L, C), WB, L


def _from_window_tiles(xw_t, ws, L, shape):
    B, D, H, W, C = shape
    xw = xw_t.reshape(-1, L, C)
    return _window_unpartition(xw, ws, B, D, H, W, C)


def tmsa_group_windows(xw, g, res_w, res_b, num_heads, wb, win_len):
    # xw: (n_tiles, N = wb * win_len, C) window-batched token tiles.
    n_tiles, N, C = xw.shape
    if g is None:   # empty group -> just trailing linear + residual
        return linear_residual(xw.reshape(-1, C), res_w, res_b).reshape(xw.shape)

    depth = g['f1w'].shape[0]
    hid = g['f1w'].shape[2]
    kernel = functools.partial(_tmsa_group_kernel, num_heads=num_heads,
                               wb=wb, win_len=win_len)
    need = _nb(((N, C), xw.dtype)) * 2 + _nb(((N, C), jnp.float32)) \
        + _nb(((4 * C, C), jnp.bfloat16), ((2 * C, hid), jnp.bfloat16),
              ((C, C), jnp.bfloat16), ((N, hid), jnp.float32))
    # NOTE: a lane-dense (WB, L*C) out-spec would avoid 32-lane masked stores, but
    # needs an in-kernel minor-dim-splitting reshape; kept (N, C) for safe lowering.
    out = pl.pallas_call(
        kernel,
        out_shape=jax.ShapeDtypeStruct((n_tiles, N, C), xw.dtype),
        grid=(n_tiles, depth),
        in_specs=[
            pl.BlockSpec((1, N, C), lambda i, d: (i, 0, 0)),       # group input
            pl.BlockSpec((1, 1, C), lambda i, d: (d, 0, 0)),       # ln1_g
            pl.BlockSpec((1, 1, C), lambda i, d: (d, 0, 0)),       # ln1_b
            pl.BlockSpec((1, C, C), lambda i, d: (d, 0, 0)),       # q w (fused heads)
            pl.BlockSpec((1, 1, C), lambda i, d: (d, 0, 0)),       # q b
            pl.BlockSpec((1, C, C), lambda i, d: (d, 0, 0)),       # k w
            pl.BlockSpec((1, 1, C), lambda i, d: (d, 0, 0)),       # k b
            pl.BlockSpec((1, C, C), lambda i, d: (d, 0, 0)),       # v w
            pl.BlockSpec((1, 1, C), lambda i, d: (d, 0, 0)),       # v b
            pl.BlockSpec((1, C, C), lambda i, d: (d, 0, 0)),       # proj w
            pl.BlockSpec((1, 1, C), lambda i, d: (d, 0, 0)),       # proj b
            pl.BlockSpec((1, 1, C), lambda i, d: (d, 0, 0)),       # ln2_g
            pl.BlockSpec((1, 1, C), lambda i, d: (d, 0, 0)),       # ln2_b
            pl.BlockSpec((1, C, hid), lambda i, d: (d, 0, 0)),     # fc1 w
            pl.BlockSpec((1, 1, hid), lambda i, d: (d, 0, 0)),     # fc1 b
            pl.BlockSpec((1, hid, C), lambda i, d: (d, 0, 0)),     # fc2 w
            pl.BlockSpec((1, 1, C), lambda i, d: (d, 0, 0)),       # fc2 b
            pl.BlockSpec((C, C), lambda i, d: (0, 0)),             # trailing res w
            pl.BlockSpec((1, C), lambda i, d: (0, 0)),             # trailing res b
        ],
        out_specs=pl.BlockSpec((1, N, C), lambda i, d: (i, 0, 0)),
        scratch_shapes=[pltpu.VMEM((N, C), jnp.float32)],
        compiler_params=_mosaic_params(("parallel", "arbitrary"), need),
    )(xw, g['ln1_g'], g['ln1_b'], g['qw'], g['qb'], g['kw'], g['kb'],
      g['vw'], g['vb'], g['pw'], g['pb'], g['ln2_g'], g['ln2_b'],
      g['f1w'], g['f1b'], g['f2w'], g['f2b'], res_w, res_b)
    return out


def tmsa_group_fused(x, g, res_w, res_b, ws, num_heads):
    shape = x.shape
    xw, WB, L = _to_window_tiles(x, ws)
    xw = tmsa_group_windows(xw, g, res_w, res_b, num_heads, WB, L)
    return _from_window_tiles(xw, ws, L, shape)


def run_groups(x, p, front_ws, back_ws, num_heads):
    shape = x.shape
    if front_ws == back_ws:
        # partition ONCE; both residual groups consume the same windowed layout.
        xw, WB, L = _to_window_tiles(x, back_ws)
        xw = tmsa_group_windows(xw, p['front'], p['front_lin_w'], p['front_lin_b'],
                                num_heads, WB, L)
        xw = tmsa_group_windows(xw, p['back'], p['back_lin_w'], p['back_lin_b'],
                                num_heads, WB, L)
        return _from_window_tiles(xw, back_ws, L, shape)
    x = tmsa_group_fused(x, p['front'], p['front_lin_w'], p['front_lin_b'],
                         front_ws, num_heads)
    x = tmsa_group_fused(x, p['back'], p['back_lin_w'], p['back_lin_b'],
                         back_ws, num_heads)
    return x


# --------------------------------------------------------------------------
# alignment path (flow warp in plain JAX, conv in Pallas)
# --------------------------------------------------------------------------
def flow_warp(x, flow):
    # TODO(synk): data-dependent bilinear gather stays in plain JAX (no clean Pallas gather).
    N, H, W, C = x.shape
    ys, xs = jnp.meshgrid(jnp.arange(H, dtype=flow.dtype),
                          jnp.arange(W, dtype=flow.dtype), indexing='ij')
    sx = xs[None] + flow[..., 0]
    sy = ys[None] + flow[..., 1]
    x0 = jnp.floor(sx)
    y0 = jnp.floor(sy)
    x1 = x0 + 1.0
    y1 = y0 + 1.0
    wx = sx - x0
    wy = sy - y0

    def gather(yy, xx):
        valid = (xx >= 0) & (xx <= W - 1) & (yy >= 0) & (yy <= H - 1)
        xi = jnp.clip(xx, 0, W - 1).astype(jnp.int32)
        yi = jnp.clip(yy, 0, H - 1).astype(jnp.int32)
        g = jax.vmap(lambda im, yv, xv: im[yv, xv])(x, yi, xi)     # (N, H, W, C)
        return g.astype(jnp.float32) * valid[..., None].astype(jnp.float32)

    v00, v01 = gather(y0, x0), gather(y0, x1)
    v10, v11 = gather(y1, x0), gather(y1, x1)
    w00 = ((1 - wy) * (1 - wx))[..., None]
    w01 = ((1 - wy) * wx)[..., None]
    w10 = (wy * (1 - wx))[..., None]
    w11 = (wy * wx)[..., None]
    return v00 * w00 + v01 * w01 + v10 * w10 + v11 * w11


def get_aligned_features(p, x, flows_backward, flows_forward):
    # x: (B, D, H, W, C) channels-last; parallel_frames == 2 -> frame == 0 path.
    # TODO(synk): parallel_frames > 2 branches (frame >= 1) are not implemented.
    B, D, H, W, C = x.shape
    zeros = jnp.zeros((B, 1, H, W, C), x.dtype)

    def align(feats, flows):
        # feats: (B, T, H, W, C); flows: (B, T, 2, H, W) -- all T frames batched
        T = feats.shape[1]
        f = feats.reshape(B * T, H, W, C)
        fl = flows.transpose(0, 1, 3, 4, 2).reshape(B * T, H, W, 2)
        warped = flow_warp(f, fl).astype(jnp.bfloat16)
        # TODO(synk): DCNv2PackFlowGuided learned offsets/masks approximated by
        # flow-guided warp + plain 3x3 conv.
        y = conv3x3(warped, p['dcn_w'], p['dcn_b'])
        return y.reshape(B, T, H, W, C).astype(x.dtype)

    x_backward = jnp.concatenate([align(x[:, 1:], flows_backward[0]), zeros], axis=1)
    x_forward = jnp.concatenate([zeros, align(x[:, :-1], flows_forward[0])], axis=1)
    return x_backward, x_forward


# --------------------------------------------------------------------------
# parameter preparation (stacking / fused-head weights / bf16 casting)
# --------------------------------------------------------------------------
def _prep_group(blocks, num_heads):
    if not blocks:
        return None
    C = blocks[0]['qkv_w'].shape[0]
    hd = C // num_heads
    scale = hd ** -0.5
    bf = lambda a: a.astype(jnp.bfloat16)
    st = lambda key: jnp.stack([b[key] for b in blocks], axis=0)

    qkv_w = st('qkv_w')        # (dep, C, 3C)
    qkv_b = st('qkv_b')        # (dep, 1, 3C)

    return {
        'ln1_g': st('ln1_g'), 'ln1_b': st('ln1_b'),
        # fused-head projection weights (q pre-scaled so the kernel skips the mul)
        'qw': bf(qkv_w[:, :, 0:C] * scale), 'qb': qkv_b[:, :, 0:C] * scale,
        'kw': bf(qkv_w[:, :, C:2 * C]), 'kb': qkv_b[:, :, C:2 * C],
        'vw': bf(qkv_w[:, :, 2 * C:3 * C]), 'vb': qkv_b[:, :, 2 * C:3 * C],
        'pw': bf(st('proj_w')), 'pb': st('proj_b'),
        'ln2_g': st('ln2_g'), 'ln2_b': st('ln2_b'),
        'f1w': bf(st('fc1_w')), 'f1b': st('fc1_b'),
        'f2w': bf(st('fc2_w')), 'f2b': st('fc2_b'),
    }


def _prepare_params(params, num_heads, mode):
    bf = lambda a: a.astype(jnp.bfloat16)
    p = {'ln_g': params['ln_g'], 'ln_b': params['ln_b']}
    if mode in ('down', 'up'):
        p['lin_w'] = bf(params['lin_w'])
        p['lin_b'] = params['lin_b']
    p['front'] = _prep_group(params['front_blocks'], num_heads)
    p['back'] = _prep_group(params['back_blocks'], num_heads)
    p['front_lin_w'] = bf(params['front_lin_w'])
    p['front_lin_b'] = params['front_lin_b']
    p['back_lin_w'] = bf(params['back_lin_w'])
    p['back_lin_b'] = params['back_lin_b']
    # conv weight flattened tap-major for the im2col matmul
    k9, cin, cout = params['dcn_w'].shape
    p['dcn_w'] = bf(params['dcn_w'].reshape(k9 * cin, cout))
    p['dcn_b'] = params['dcn_b']
    # GEGLU weights row-split per branch: (3C, hid) -> (3, C, hid)
    wv = params['geglu_wv']
    wg = params['geglu_wg']
    c = wv.shape[0] // 3
    p['geglu_wv'] = bf(wv.reshape(3, c, wv.shape[1]))
    p['geglu_bv'] = params['geglu_bv']
    p['geglu_wg'] = bf(wg.reshape(3, c, wg.shape[1]))
    p['geglu_bg'] = params['geglu_bg']
    p['geglu_w2'] = bf(params['geglu_w2'])
    p['geglu_b2'] = params['geglu_b2']
    return p


# --------------------------------------------------------------------------
# Stage forward
# --------------------------------------------------------------------------
def stage_forward(params, x, flows_backward, flows_forward, *,
                  mode='down', window_size=(2, 4, 4), num_heads=4):
    p = _prepare_params(params, num_heads, mode)
    B, C, D, H, W = x.shape

    # --- reshape_layer: reshape + permute + fused LayerNorm(+Linear) ---
    # (raw reshape exactly as in the provided PyTorch reshape_layer)
    if mode == 'down':
        x = x.reshape(B, C * 4, D, H // 2, W // 2)
    elif mode == 'up':
        x = x.reshape(B, C // 4, D, H * 2, W * 2)
    x = x.transpose(0, 2, 3, 4, 1)                     # (B, D, H', W', C')
    Bn, Dn, Hn, Wn, Cin = x.shape
    if mode in ('down', 'up'):
        xf = ln_linear(x.reshape(-1, Cin), p['ln_g'], p['ln_b'],
                       p['lin_w'], p['lin_b'])
        Cout = p['lin_w'].shape[1]
    else:
        xf = ln_only(x.reshape(-1, Cin), p['ln_g'], p['ln_b'])
        Cout = Cin
    x = xf.reshape(Bn, Dn, Hn, Wn, Cout)               # bf16 activation stream

    # --- front + back residual groups (+ trailing Linear + residual), fused ---
    front_ws = (2, window_size[1], window_size[2])
    x = run_groups(x, p, tuple(front_ws), tuple(window_size), num_heads)

    # --- parallel alignment + GEGLU fusion (channels-last end to end, no concat) ---
    x_backward, x_forward = get_aligned_features(p, x, flows_backward, flows_forward)
    out = geglu(x.reshape(-1, Cout), x_backward.reshape(-1, Cout),
                x_forward.reshape(-1, Cout),
                p['geglu_wv'], p['geglu_bv'], p['geglu_wg'], p['geglu_bg'],
                p['geglu_w2'], p['geglu_b2'])
    out = out.reshape(Bn, Dn, Hn, Wn, Cout).transpose(0, 4, 1, 2, 3)
    return out


# --------------------------------------------------------------------------
# Deterministic parameter init (synthetic, not a checkpoint)
# --------------------------------------------------------------------------
def init_stage_params(key, in_dim, out_dim, depth, num_heads,
                      mlp_ratio=2.0, mul_ratio=0.75, mode='down'):
    keys = iter(jax.random.split(key, 256))

    def nrm(shape, scale=0.02):
        return scale * jax.random.normal(next(keys), shape, jnp.float32)

    if mode == 'down':
        ln_dim = in_dim * 4
    elif mode == 'up':
        ln_dim = in_dim // 4
    else:
        ln_dim = out_dim

    params = {
        'ln_g': jnp.ones((1, ln_dim), jnp.float32),
        'ln_b': jnp.zeros((1, ln_dim), jnp.float32),
    }
    if mode in ('down', 'up'):
        params['lin_w'] = nrm((ln_dim, out_dim))
        params['lin_b'] = jnp.zeros((1, out_dim), jnp.float32)

    def block_params(C):
        hidden = int(C * mlp_ratio)
        return {
            'ln1_g': jnp.ones((1, C), jnp.float32), 'ln1_b': jnp.zeros((1, C), jnp.float32),
            'qkv_w': nrm((C, 3 * C)), 'qkv_b': jnp.zeros((1, 3 * C), jnp.float32),
            'proj_w': nrm((C, C)), 'proj_b': jnp.zeros((1, C), jnp.float32),
            'ln2_g': jnp.ones((1, C), jnp.float32), 'ln2_b': jnp.zeros((1, C), jnp.float32),
            'fc1_w': nrm((C, hidden)), 'fc1_b': jnp.zeros((1, hidden), jnp.float32),
            'fc2_w': nrm((hidden, C)), 'fc2_b': jnp.zeros((1, C), jnp.float32),
        }

    d_front = int(depth * mul_ratio)
    d_back = depth - d_front
    params['front_blocks'] = [block_params(out_dim) for _ in range(d_front)]
    params['back_blocks'] = [block_params(out_dim) for _ in range(d_back)]
    params['front_lin_w'] = nrm((out_dim, out_dim))
    params['front_lin_b'] = jnp.zeros((1, out_dim), jnp.float32)
    params['back_lin_w'] = nrm((out_dim, out_dim))
    params['back_lin_b'] = jnp.zeros((1, out_dim), jnp.float32)
    # DCN approx: 3x3 conv weights as (9, C_in, C_out), taps in (dy, dx) order
    params['dcn_w'] = nrm((9, out_dim, out_dim))
    params['dcn_b'] = jnp.zeros((1, out_dim), jnp.float32)
    # GEGLU fusion: in = hidden = 3*C, out = C (value / gate weights stored split)
    # TODO(synk): value/gate ordering vs. the reference GEGLU checkpoint is assumed.
    params['geglu_wv'] = nrm((3 * out_dim, 3 * out_dim))
    params['geglu_bv'] = jnp.zeros((1, 3 * out_dim), jnp.float32)
    params['geglu_wg'] = nrm((3 * out_dim, 3 * out_dim))
    params['geglu_bg'] = jnp.zeros((1, 3 * out_dim), jnp.float32)
    params['geglu_w2'] = nrm((3 * out_dim, out_dim))
    params['geglu_b2'] = jnp.zeros((1, out_dim), jnp.float32)
    return params


# --------------------------------------------------------------------------
if __name__ == "__main__":
    key = jax.random.PRNGKey(0)
    k_x, k_fb, k_ff, k_p = jax.random.split(key, 4)

    B, C_in, D, H, W = 1, 8, 4, 16, 16           # NCDHW input, mode='down' stage
    out_dim, depth, num_heads = 32, 2, 4
    window_size = (2, 4, 4)
    Hs, Ws = H // 2, W // 2                      # resolution after 'down' reshape

    x = jax.random.normal(k_x, (B, C_in, D, H, W), jnp.float32)
    flows_backward = [0.5 * jax.random.normal(k_fb, (B, D - 1, 2, Hs, Ws), jnp.float32)]
    flows_forward = [0.5 * jax.random.normal(k_ff, (B, D - 1, 2, Hs, Ws), jnp.float32)]

    params = init_stage_params(k_p, C_in, out_dim, depth, num_heads, mode='down')

    fwd = jax.jit(functools.partial(stage_forward, mode='down',
                                    window_size=window_size, num_heads=num_heads))
    out = fwd(params, x, flows_backward, flows_forward)
    jax.block_until_ready(out)
    assert out.shape == (B, out_dim, D, Hs, Ws), out.shape
    assert bool(jnp.all(jnp.isfinite(out)))
    print("KERNEL_OK")
</pallas_src>

<mosaic_0001>
module attributes {stable_mosaic.version = 11 : i64} {
  func.func @_ln_linear_kernel(%arg0: i32, %arg1: memref<256x32xf32, #tpu.memory_space<vmem>>, %arg2: memref<1x32xf32, #tpu.memory_space<vmem>>, %arg3: memref<1x32xf32, #tpu.memory_space<vmem>>, %arg4: memref<32x32xbf16, #tpu.memory_space<vmem>>, %arg5: memref<1x32xf32, #tpu.memory_space<vmem>>, %arg6: memref<256x32xbf16, #tpu.memory_space<vmem>>) attributes {dimension_semantics = [#tpu.dimension_semantics<parallel>], iteration_bounds = array<i64: 1>, scalar_prefetch = 0 : i64, scratch_operands = 0 : i64, tpu.core_type = #tpu.core_type<tc>, window_params = [{transform_indices = @transform_0, window_bounds = array<i64: 256, 32>}, {pipeline_mode = #tpu.pipeline_mode<synchronous>, transform_indices = @transform_1, window_bounds = array<i64: 1, 32>}, {pipeline_mode = #tpu.pipeline_mode<synchronous>, transform_indices = @transform_2, window_bounds = array<i64: 1, 32>}, {pipeline_mode = #tpu.pipeline_mode<synchronous>, transform_indices = @transform_3, window_bounds = array<i64: 32, 32>}, {pipeline_mode = #tpu.pipeline_mode<synchronous>, transform_indices = @transform_4, window_bounds = array<i64: 1, 32>}, {transform_indices = @transform_5, window_bounds = array<i64: 256, 32>}]} {
    %c0 = arith.constant 0 : index
    %c0_0 = arith.constant 0 : index
    %0 = vector.load %arg1[%c0, %c0_0] : memref<256x32xf32, #tpu.memory_space<vmem>>, vector<256x32xf32>
    %c0_1 = arith.constant 0 : index
    %c0_2 = arith.constant 0 : index
    %1 = vector.load %arg2[%c0_1, %c0_2] : memref<1x32xf32, #tpu.memory_space<vmem>>, vector<1x32xf32>
    %c0_3 = arith.constant 0 : index
    %c0_4 = arith.constant 0 : index
    %2 = vector.load %arg3[%c0_3, %c0_4] : memref<1x32xf32, #tpu.memory_space<vmem>>, vector<1x32xf32>
    %cst = arith.constant dense<0.000000e+00> : vector<256xf32>
    %3 = vector.multi_reduction <add>, %0, %cst [1] : vector<256x32xf32> to vector<256xf32>
    %4 = vector.shape_cast %3 : vector<256xf32> to vector<256x1xf32>
    %cst_5 = arith.constant 3.200000e+01 : f32
    %5 = vector.broadcast %cst_5 : f32 to vector<256x1xf32>
    %6 = arith.divf %4, %5 : vector<256x1xf32>
    %7 = vector.broadcast %6 : vector<256x1xf32> to vector<256x32xf32>
    %8 = arith.subf %0, %7 : vector<256x32xf32>
    %9 = arith.mulf %8, %8 : vector<256x32xf32>
    %cst_6 = arith.constant dense<0.000000e+00> : vector<256xf32>
    %10 = vector.multi_reduction <add>, %9, %cst_6 [1] : vector<256x32xf32> to vector<256xf32>
    %11 = vector.shape_cast %10 : vector<256xf32> to vector<256x1xf32>
    %cst_7 = arith.constant 3.200000e+01 : f32
    %12 = vector.broadcast %cst_7 : f32 to vector<256x1xf32>
    %13 = arith.divf %11, %12 : vector<256x1xf32>
    %14 = vector.broadcast %6 : vector<256x1xf32> to vector<256x32xf32>
    %15 = arith.subf %0, %14 : vector<256x32xf32>
    %cst_8 = arith.constant 9.99999974E-6 : f32
    %16 = vector.broadcast %cst_8 : f32 to vector<256x1xf32>
    %17 = arith.addf %13, %16 : vector<256x1xf32>
    %18 = math.rsqrt %17 : vector<256x1xf32>
    %19 = vector.broadcast %18 : vector<256x1xf32> to vector<256x32xf32>
    %20 = arith.mulf %15, %19 : vector<256x32xf32>
    %21 = vector.broadcast %1 : vector<1x32xf32> to vector<256x32xf32>
    %22 = arith.mulf %20, %21 : vector<256x32xf32>
    %23 = vector.broadcast %2 : vector<1x32xf32> to vector<256x32xf32>
    %24 = arith.addf %22, %23 : vector<256x32xf32>
    %25 = arith.truncf %24 : vector<256x32xf32> to vector<256x32xbf16>
    %c0_9 = arith.constant 0 : index
    %c0_10 = arith.constant 0 : index
    %26 = vector.load %arg4[%c0_9, %c0_10] : memref<32x32xbf16, #tpu.memory_space<vmem>>, vector<32x32xbf16>
    %cst_11 = arith.constant dense<0.000000e+00> : vector<256x32xf32>
    %27 = tpu.matmul %25, %26, %cst_11 {dimension_numbers = #tpu.dot_dimension_numbers<[1], [0], [0], [1], [0, 0, 1, 1], [], []>} : vector<256x32xbf16>, vector<32x32xbf16>, vector<256x32xf32> -> vector<256x32xf32>
    %c0_12 = arith.constant 0 : index
    %c0_13 = arith.constant 0 : index
    %28 = vector.load %arg5[%c0_12, %c0_13] : memref<1x32xf32, #tpu.memory_space<vmem>>, vector<1x32xf32>
    %29 = vector.broadcast %28 : vector<1x32xf32> to vector<256x32xf32>
    %30 = arith.addf %27, %29 : vector<256x32xf32>
    %31 = arith.truncf %30 : vector<256x32xf32> to vector<256x32xbf16>
    %c0_14 = arith.constant 0 : index
    %c0_15 = arith.constant 0 : index
    %32 = vector.load %arg6[%c0_14, %c0_15] : memref<256x32xbf16, #tpu.memory_space<vmem>>, vector<256x32xbf16>
    tpu.vector_store %arg6[%c0_14, %c0_15], %31 {strides = array<i32>} : memref<256x32xbf16, #tpu.memory_space<vmem>>, vector<256x32xbf16>,
    return
  }
  func.func @transform_0(%arg0: i32) -> (i32, i32) {
    %c0_i32 = arith.constant 0 : i32
    %c0_i32_0 = arith.constant 0 : i32
    return %arg0, %c0_i32 : i32, i32
  }
  func.func @transform_1(%arg0: i32) -> (i32, i32) {
    %c0_i32 = arith.constant 0 : i32
    %c0_i32_0 = arith.constant 0 : i32
    %c0_i32_1 = arith.constant 0 : i32
    return %c0_i32, %c0_i32_0 : i32, i32
  }
  func.func @transform_2(%arg0: i32) -> (i32, i32) {
    %c0_i32 = arith.constant 0 : i32
    %c0_i32_0 = arith.constant 0 : i32
    %c0_i32_1 = arith.constant 0 : i32
    return %c0_i32, %c0_i32_0 : i32, i32
  }
  func.func @transform_3(%arg0: i32) -> (i32, i32) {
    %c0_i32 = arith.constant 0 : i32
    %c0_i32_0 = arith.constant 0 : i32
    %c0_i32_1 = arith.constant 0 : i32
    return %c0_i32, %c0_i32_0 : i32, i32
  }
  func.func @transform_4(%arg0: i32) -> (i32, i32) {
    %c0_i32 = arith.constant 0 : i32
    %c0_i32_0 = arith.constant 0 : i32
    %c0_i32_1 = arith.constant 0 : i32
    return %c0_i32, %c0_i32_0 : i32, i32
  }
  func.func @transform_5(%arg0: i32) -> (i32, i32) {
    %c0_i32 = arith.constant 0 : i32
    %c0_i32_0 = arith.constant 0 : i32
    return %arg0, %c0_i32 : i32, i32
  }
}

module attributes {stable_mosaic.version = 11 : i64} {
  func.func @_tmsa_group_kernel(%arg0: i32, %arg1: i32, %arg2: memref<1x64x32xbf16, #tpu.memory_space<vmem>>, %arg3: memref<1x1x32xf32, #tpu.memory_space<vmem>>, %arg4: memref<1x1x32xf32, #tpu.memory_space<vmem>>, %arg5: memref<1x32x32xbf16, #tpu.memory_space<vmem>>, %arg6: memref<1x1x32xf32, #tpu.memory_space<vmem>>, %arg7: memref<1x32x32xbf16, #tpu.memory_space<vmem>>, %arg8: memref<1x1x32xf32, #tpu.memory_space<vmem>>, %arg9: memref<1x32x32xbf16, #tpu.memory_space<vmem>>, %arg10: memref<1x1x32xf32, #tpu.memory_space<vmem>>, %arg11: memref<1x32x32xbf16, #tpu.memory_space<vmem>>, %arg12: memref<1x1x32xf32, #tpu.memory_space<vmem>>, %arg13: memref<1x1x32xf32, #tpu.memory_space<vmem>>, %arg14: memref<1x1x32xf32, #tpu.memory_space<vmem>>, %arg15: memref<1x32x64xbf16, #tpu.memory_space<vmem>>, %arg16: memref<1x1x64xf32, #tpu.memory_space<vmem>>, %arg17: memref<1x64x32xbf16, #tpu.memory_space<vmem>>, %arg18: memref<1x1x32xf32, #tpu.memory_space<vmem>>, %arg19: memref<32x32xbf16, #tpu.memory_space<vmem>>, %arg20: memref<1x32xf32, #tpu.memory_space<vmem>>, %arg21: memref<1x64x32xbf16, #tpu.memory_space<vmem>>, %arg22: memref<64x32xf32, #tpu.memory_space<vmem>>) attributes {dimension_semantics = [#tpu.dimension_semantics<parallel>, #tpu.dimension_semantics<arbitrary>], iteration_bounds = array<i64: 4, 1>, scalar_prefetch = 0 : i64, scratch_operands = 1 : i64, tpu.core_type = #tpu.core_type<tc>, window_params = [{transform_indices = @transform_0, window_bounds = array<i64: 1, 64, 32>}, {transform_indices = @transform_1, window_bounds = array<i64: 1, 1, 32>}, {transform_indices = @transform_2, window_bounds = array<i64: 1, 1, 32>}, {transform_indices = @transform_3, window_bounds = array<i64: 1, 32, 32>}, {transform_indices = @transform_4, window_bounds = array<i64: 1, 1, 32>}, {transform_indices = @transform_5, window_bounds = array<i64: 1, 32, 32>}, {transform_indices = @transform_6, window_bounds = array<i64: 1, 1, 32>}, {transform_indices = @transform_7, window_bounds = array<i64: 1, 32, 32>}, {transform_indices = @transform_8, window_bounds = array<i64: 1, 1, 32>}, {transform_indices = @transform_9, window_bounds = array<i64: 1, 32, 32>}, {transform_indices = @transform_10, window_bounds = array<i64: 1, 1, 32>}, {transform_indices = @transform_11, window_bounds = array<i64: 1, 1, 32>}, {transform_indices = @transform_12, window_bounds = array<i64: 1, 1, 32>}, {transform_indices = @transform_13, window_bounds = array<i64: 1, 32, 64>}, {transform_indices = @transform_14, window_bounds = array<i64: 1, 1, 64>}, {transform_indices = @transform_15, window_bounds = array<i64: 1, 64, 32>}, {transform_indices = @transform_16, window_bounds = array<i64: 1, 1, 32>}, {pipeline_mode = #tpu.pipeline_mode<synchronous>, transform_indices = @transform_17, window_bounds = array<i64: 32, 32>}, {pipeline_mode = #tpu.pipeline_mode<synchronous>, transform_indices = @transform_18, window_bounds = array<i64: 1, 32>}, {transform_indices = @transform_19, window_bounds = array<i64: 1, 64, 32>}]} {
    %c0_i32 = arith.constant 0 : i32
    %0 = arith.cmpi eq, %arg1, %c0_i32 : i32
    %1 = arith.extui %0 : i1 to i32
    %c0_i32_0 = arith.constant 0 : i32
    %2 = arith.cmpi ne, %1, %c0_i32_0 : i32
    scf.if %2 {
      %c0_89 = arith.constant 0 : index
      %c0_90 = arith.constant 0 : index
      %c0_91 = arith.constant 0 : index
      %214 = vector.load %arg2[%c0_89, %c0_90, %c0_91] : memref<1x64x32xbf16, #tpu.memory_space<vmem>>, vector<1x64x32xbf16>
      %215 = vector.shape_cast %214 : vector<1x64x32xbf16> to vector<64x32xbf16>
      %216 = arith.extf %215 : vector<64x32xbf16> to vector<64x32xf32>
      %c0_92 = arith.constant 0 : index
      %c0_93 = arith.constant 0 : index
      %217 = vector.load %arg22[%c0_92, %c0_93] : memref<64x32xf32, #tpu.memory_space<vmem>>, vector<64x32xf32>
      tpu.vector_store %arg22[%c0_92, %c0_93], %216 {strides = array<i32>} : memref<64x32xf32, #tpu.memory_space<vmem>>, vector<64x32xf32>,
    } else {
    }
    %c0 = arith.constant 0 : index
    %c0_1 = arith.constant 0 : index
    %3 = vector.load %arg22[%c0, %c0_1] : memref<64x32xf32, #tpu.memory_space<vmem>>, vector<64x32xf32>
    %c0_2 = arith.constant 0 : index
    %c0_3 = arith.constant 0 : index
    %c0_4 = arith.constant 0 : index
    %4 = vector.load %arg3[%c0_2, %c0_3, %c0_4] : memref<1x1x32xf32, #tpu.memory_space<vmem>>, vector<1x1x32xf32>
    %5 = vector.shape_cast %4 : vector<1x1x32xf32> to vector<1x32xf32>
    %c0_5 = arith.constant 0 : index
    %c0_6 = arith.constant 0 : index
    %c0_7 = arith.constant 0 : index
    %6 = vector.load %arg4[%c0_5, %c0_6, %c0_7] : memref<1x1x32xf32, #tpu.memory_space<vmem>>, vector<1x1x32xf32>
    %7 = vector.shape_cast %6 : vector<1x1x32xf32> to vector<1x32xf32>
    %cst = arith.constant dense<0.000000e+00> : vector<64xf32>
    %8 = vector.multi_reduction <add>, %3, %cst [1] : vector<64x32xf32> to vector<64xf32>
    %9 = vector.shape_cast %8 : vector<64xf32> to vector<64x1xf32>
    %cst_8 = arith.constant 3.200000e+01 : f32
    %10 = vector.broadcast %cst_8 : f32 to vector<64x1xf32>
    %11 = arith.divf %9, %10 : vector<64x1xf32>
    %12 = vector.broadcast %11 : vector<64x1xf32> to vector<64x32xf32>
    %13 = arith.subf %3, %12 : vector<64x32xf32>
    %14 = arith.mulf %13, %13 : vector<64x32xf32>
    %cst_9 = arith.constant dense<0.000000e+00> : vector<64xf32>
    %15 = vector.multi_reduction <add>, %14, %cst_9 [1] : vector<64x32xf32> to vector<64xf32>
    %16 = vector.shape_cast %15 : vector<64xf32> to vector<64x1xf32>
    %cst_10 = arith.constant 3.200000e+01 : f32
    %17 = vector.broadcast %cst_10 : f32 to vector<64x1xf32>
    %18 = arith.divf %16, %17 : vector<64x1xf32>
    %19 = vector.broadcast %11 : vector<64x1xf32> to vector<64x32xf32>
    %20 = arith.subf %3, %19 : vector<64x32xf32>
    %cst_11 = arith.constant 9.99999974E-6 : f32
    %21 = vector.broadcast %cst_11 : f32 to vector<64x1xf32>
    %22 = arith.addf %18, %21 : vector<64x1xf32>
    %23 = math.rsqrt %22 : vector<64x1xf32>
    %24 = vector.broadcast %23 : vector<64x1xf32> to vector<64x32xf32>
    %25 = arith.mulf %20, %24 : vector<64x32xf32>
    %26 = vector.broadcast %5 : vector<1x32xf32> to vector<64x32xf32>
    %27 = arith.mulf %25, %26 : vector<64x32xf32>
    %28 = vector.broadcast %7 : vector<1x32xf32> to vector<64x32xf32>
    %29 = arith.addf %27, %28 : vector<64x32xf32>
    %30 = arith.truncf %29 : vector<64x32xf32> to vector<64x32xbf16>
    %c0_12 = arith.constant 0 : index
    %c0_13 = arith.constant 0 : index
    %c0_14 = arith.constant 0 : index
    %31 = vector.load %arg5[%c0_12, %c0_13, %c0_14] : memref<1x32x32xbf16, #tpu.memory_space<vmem>>, vector<1x32x32xbf16>
    %32 = vector.shape_cast %31 : vector<1x32x32xbf16> to vector<32x32xbf16>
    %cst_15 = arith.constant dense<0.000000e+00> : vector<64x32xf32>
    %33 = tpu.matmul %30, %32, %cst_15 {dimension_numbers = #tpu.dot_dimension_numbers<[1], [0], [0], [1], [0, 0, 1, 1], [], []>} : vector<64x32xbf16>, vector<32x32xbf16>, vector<64x32xf32> -> vector<64x32xf32>
    %c0_16 = arith.constant 0 : index
    %c0_17 = arith.constant 0 : index
    %c0_18 = arith.constant 0 : index
    %34 = vector.load %arg6[%c0_16, %c0_17, %c0_18] : memref<1x1x32xf32, #tpu.memory_space<vmem>>, vector<1x1x32xf32>
    %35 = vector.shape_cast %34 : vector<1x1x32xf32> to vector<1x32xf32>
    %36 = vector.broadcast %35 : vector<1x32xf32> to vector<64x32xf32>
    %37 = arith.addf %33, %36 : vector<64x32xf32>
    %c0_19 = arith.constant 0 : index
    %c0_20 = arith.constant 0 : index
    %c0_21 = arith.constant 0 : index
    %38 = vector.load %arg7[%c0_19, %c0_20, %c0_21] : memref<1x32x32xbf16, #tpu.memory_space<vmem>>, vector<1x32x32xbf16>
    %39 = vector.shape_cast %38 : vector<1x32x32xbf16> to vector<32x32xbf16>
    %cst_22 = arith.constant dense<0.000000e+00> : vector<64x32xf32>
    %40 = tpu.matmul %30, %39, %cst_22 {dimension_numbers = #tpu.dot_dimension_numbers<[1], [0], [0], [1], [0, 0, 1, 1], [], []>} : vector<64x32xbf16>, vector<32x32xbf16>, vector<64x32xf32> -> vector<64x32xf32>
    %c0_23 = arith.constant 0 : index
    %c0_24 = arith.constant 0 : index
    %c0_25 = arith.constant 0 : index
    %41 = vector.load %arg8[%c0_23, %c0_24, %c0_25] : memref<1x1x32xf32, #tpu.memory_space<vmem>>, vector<1x1x32xf32>
    %42 = vector.shape_cast %41 : vector<1x1x32xf32> to vector<1x32xf32>
    %43 = vector.broadcast %42 : vector<1x32xf32> to vector<64x32xf32>
    %44 = arith.addf %40, %43 : vector<64x32xf32>
    %c0_26 = arith.constant 0 : index
    %c0_27 = arith.constant 0 : index
    %c0_28 = arith.constant 0 : index
    %45 = vector.load %arg9[%c0_26, %c0_27, %c0_28] : memref<1x32x32xbf16, #tpu.memory_space<vmem>>, vector<1x32x32xbf16>
    %46 = vector.shape_cast %45 : vector<1x32x32xbf16> to vector<32x32xbf16>
    %cst_29 = arith.constant dense<0.000000e+00> : vector<64x32xf32>
    %47 = tpu.matmul %30, %46, %cst_29 {dimension_numbers = #tpu.dot_dimension_numbers<[1], [0], [0], [1], [0, 0, 1, 1], [], []>} : vector<64x32xbf16>, vector<32x32xbf16>, vector<64x32xf32> -> vector<64x32xf32>
    %c0_30 = arith.constant 0 : index
    %c0_31 = arith.constant 0 : index
    %c0_32 = arith.constant 0 : index
    %48 = vector.load %arg10[%c0_30, %c0_31, %c0_32] : memref<1x1x32xf32, #tpu.memory_space<vmem>>, vector<1x1x32xf32>
    %49 = vector.shape_cast %48 : vector<1x1x32xf32> to vector<1x32xf32>
    %50 = vector.broadcast %49 : vector<1x32xf32> to vector<64x32xf32>
    %51 = arith.addf %47, %50 : vector<64x32xf32>
    %52 = vector.extract_strided_slice %37 {offsets = [0, 0], sizes = [64, 8], strides = [1, 1]} : vector<64x32xf32> to vector<64x8xf32>
    %53 = vector.shape_cast %52 : vector<64x8xf32> to vector<2x32x8xf32>
    %54 = arith.truncf %53 : vector<2x32x8xf32> to vector<2x32x8xbf16>
    %55 = vector.extract_strided_slice %44 {offsets = [0, 0], sizes = [64, 8], strides = [1, 1]} : vector<64x32xf32> to vector<64x8xf32>
    %56 = vector.shape_cast %55 : vector<64x8xf32> to vector<2x32x8xf32>
    %57 = arith.truncf %56 : vector<2x32x8xf32> to vector<2x32x8xbf16>
    %58 = vector.extract_strided_slice %51 {offsets = [0, 0], sizes = [64, 8], strides = [1, 1]} : vector<64x32xf32> to vector<64x8xf32>
    %59 = vector.shape_cast %58 : vector<64x8xf32> to vector<2x32x8xf32>
    %60 = arith.truncf %59 : vector<2x32x8xf32> to vector<2x32x8xbf16>
    %cst_33 = arith.constant dense<0.000000e+00> : vector<2x32x32xf32>
    %61 = tpu.matmul %54, %57, %cst_33 {dimension_numbers = #tpu.dot_dimension_numbers<[2], [2], [1], [1], [0, 0, 0, 1, 1, 1], [0], [0]>} : vector<2x32x8xbf16>, vector<2x32x8xbf16>, vector<2x32x32xf32> -> vector<2x32x32xf32>
    %cst_34 = arith.constant dense<0xFF800000> : vector<2x32xf32>
    %62 = vector.multi_reduction <maximumf>, %61, %cst_34 [2] : vector<2x32x32xf32> to vector<2x32xf32>
    %63 = vector.shape_cast %62 : vector<2x32xf32> to vector<2x32x1xf32>
    %64 = vector.broadcast %63 : vector<2x32x1xf32> to vector<2x32x32xf32>
    %65 = arith.subf %61, %64 : vector<2x32x32xf32>
    %66 = math.exp %65 : vector<2x32x32xf32>
    %cst_35 = arith.constant dense<0.000000e+00> : vector<2x32xf32>
    %67 = vector.multi_reduction <add>, %66, %cst_35 [2] : vector<2x32x32xf32> to vector<2x32xf32>
    %68 = vector.shape_cast %67 : vector<2x32xf32> to vector<2x32x1xf32>
    %69 = tpu.reciprocal %68 {approx = true} : vector<2x32x1xf32> -> vector<2x32x1xf32>
    %70 = vector.broadcast %69 : vector<2x32x1xf32> to vector<2x32x32xf32>
    %71 = arith.mulf %66, %70 : vector<2x32x32xf32>
    %72 = arith.truncf %71 : vector<2x32x32xf32> to vector<2x32x32xbf16>
    %cst_36 = arith.constant dense<0.000000e+00> : vector<2x32x8xf32>
    %73 = tpu.matmul %72, %60, %cst_36 {dimension_numbers = #tpu.dot_dimension_numbers<[2], [1], [1], [2], [0, 0, 0, 1, 1, 2], [0], [0]>} : vector<2x32x32xbf16>, vector<2x32x8xbf16>, vector<2x32x8xf32> -> vector<2x32x8xf32>
    %74 = vector.shape_cast %73 : vector<2x32x8xf32> to vector<64x8xf32>
    %75 = vector.extract_strided_slice %37 {offsets = [0, 8], sizes = [64, 8], strides = [1, 1]} : vector<64x32xf32> to vector<64x8xf32>
    %76 = vector.shape_cast %75 : vector<64x8xf32> to vector<2x32x8xf32>
    %77 = arith.truncf %76 : vector<2x32x8xf32> to vector<2x32x8xbf16>
    %78 = vector.extract_strided_slice %44 {offsets = [0, 8], sizes = [64, 8], strides = [1, 1]} : vector<64x32xf32> to vector<64x8xf32>
    %79 = vector.shape_cast %78 : vector<64x8xf32> to vector<2x32x8xf32>
    %80 = arith.truncf %79 : vector<2x32x8xf32> to vector<2x32x8xbf16>
    %81 = vector.extract_strided_slice %51 {offsets = [0, 8], sizes = [64, 8], strides = [1, 1]} : vector<64x32xf32> to vector<64x8xf32>
    %82 = vector.shape_cast %81 : vector<64x8xf32> to vector<2x32x8xf32>
    %83 = arith.truncf %82 : vector<2x32x8xf32> to vector<2x32x8xbf16>
    %cst_37 = arith.constant dense<0.000000e+00> : vector<2x32x32xf32>
    %84 = tpu.matmul %77, %80, %cst_37 {dimension_numbers = #tpu.dot_dimension_numbers<[2], [2], [1], [1], [0, 0, 0, 1, 1, 1], [0], [0]>} : vector<2x32x8xbf16>, vector<2x32x8xbf16>, vector<2x32x32xf32> -> vector<2x32x32xf32>
    %cst_38 = arith.constant dense<0xFF800000> : vector<2x32xf32>
    %85 = vector.multi_reduction <maximumf>, %84, %cst_38 [2] : vector<2x32x32xf32> to vector<2x32xf32>
    %86 = vector.shape_cast %85 : vector<2x32xf32> to vector<2x32x1xf32>
    %87 = vector.broadcast %86 : vector<2x32x1xf32> to vector<2x32x32xf32>
    %88 = arith.subf %84, %87 : vector<2x32x32xf32>
    %89 = math.exp %88 : vector<2x32x32xf32>
    %cst_39 = arith.constant dense<0.000000e+00> : vector<2x32xf32>
    %90 = vector.multi_reduction <add>, %89, %cst_39 [2] : vector<2x32x32xf32> to vector<2x32xf32>
    %91 = vector.shape_cast %90 : vector<2x32xf32> to vector<2x32x1xf32>
    %92 = tpu.reciprocal %91 {approx = true} : vector<2x32x1xf32> -> vector<2x32x1xf32>
    %93 = vector.broadcast %92 : vector<2x32x1xf32> to vector<2x32x32xf32>
    %94 = arith.mulf %89, %93 : vector<2x32x32xf32>
    %95 = arith.truncf %94 : vector<2x32x32xf32> to vector<2x32x32xbf16>
    %cst_40 = arith.constant dense<0.000000e+00> : vector<2x32x8xf32>
    %96 = tpu.matmul %95, %83, %cst_40 {dimension_numbers = #tpu.dot_dimension_numbers<[2], [1], [1], [2], [0, 0, 0, 1, 1, 2], [0], [0]>} : vector<2x32x32xbf16>, vector<2x32x8xbf16>, vector<2x32x8xf32> -> vector<2x32x8xf32>
    %97 = vector.shape_cast %96 : vector<2x32x8xf32> to vector<64x8xf32>
    %98 = vector.extract_strided_slice %37 {offsets = [0, 16], sizes = [64, 8], strides = [1, 1]} : vector<64x32xf32> to vector<64x8xf32>
    %99 = vector.shape_cast %98 : vector<64x8xf32> to vector<2x32x8xf32>
    %100 = arith.truncf %99 : vector<2x32x8xf32> to vector<2x32x8xbf16>
    %101 = vector.extract_strided_slice %44 {offsets = [0, 16], sizes = [64, 8], strides = [1, 1]} : vector<64x32xf32> to vector<64x8xf32>
    %102 = vector.shape_cast %101 : vector<64x8xf32> to vector<2x32x8xf32>
    %103 = arith.truncf %102 : vector<2x32x8xf32> to vector<2x32x8xbf16>
    %104 = vector.extract_strided_slice %51 {offsets = [0, 16], sizes = [64, 8], strides = [1, 1]} : vector<64x32xf32> to vector<64x8xf32>
    %105 = vector.shape_cast %104 : vector<64x8xf32> to vector<2x32x8xf32>
    %106 = arith.truncf %105 : vector<2x32x8xf32> to vector<2x32x8xbf16>
    %cst_41 = arith.constant dense<0.000000e+00> : vector<2x32x32xf32>
    %107 = tpu.matmul %100, %103, %cst_41 {dimension_numbers = #tpu.dot_dimension_numbers<[2], [2], [1], [1], [0, 0, 0, 1, 1, 1], [0], [0]>} : vector<2x32x8xbf16>, vector<2x32x8xbf16>, vector<2x32x32xf32> -> vector<2x32x32xf32>
    %cst_42 = arith.constant dense<0xFF800000> : vector<2x32xf32>
    %108 = vector.multi_reduction <maximumf>, %107, %cst_42 [2] : vector<2x32x32xf32> to vector<2x32xf32>
    %109 = vector.shape_cast %108 : vector<2x32xf32> to vector<2x32x1xf32>
    %110 = vector.broadcast %109 : vector<2x32x1xf32> to vector<2x32x32xf32>
    %111 = arith.subf %107, %110 : vector<2x32x32xf32>
    %112 = math.exp %111 : vector<2x32x32xf32>
    %cst_43 = arith.constant dense<0.000000e+00> : vector<2x32xf32>
    %113 = vector.multi_reduction <add>, %112, %cst_43 [2] : vector<2x32x32xf32> to vector<2x32xf32>
    %114 = vector.shape_cast %113 : vector<2x32xf32> to vector<2x32x1xf32>
    %115 = tpu.reciprocal %114 {approx = true} : vector<2x32x1xf32> -> vector<2x32x1xf32>
    %116 = vector.broadcast %115 : vector<2x32x1xf32> to vector<2x32x32xf32>
    %117 = arith.mulf %112, %116 : vector<2x32x32xf32>
    %118 = arith.truncf %117 : vector<2x32x32xf32> to vector<2x32x32xbf16>
    %cst_44 = arith.constant dense<0.000000e+00> : vector<2x32x8xf32>
    %119 = tpu.matmul %118, %106, %cst_44 {dimension_numbers = #tpu.dot_dimension_numbers<[2], [1], [1], [2], [0, 0, 0, 1, 1, 2], [0], [0]>} : vector<2x32x32xbf16>, vector<2x32x8xbf16>, vector<2x32x8xf32> -> vector<2x32x8xf32>
    %120 = vector.shape_cast %119 : vector<2x32x8xf32> to vector<64x8xf32>
    %121 = vector.extract_strided_slice %37 {offsets = [0, 24], sizes = [64, 8], strides = [1, 1]} : vector<64x32xf32> to vector<64x8xf32>
    %122 = vector.shape_cast %121 : vector<64x8xf32> to vector<2x32x8xf32>
    %123 = arith.truncf %122 : vector<2x32x8xf32> to vector<2x32x8xbf16>
    %124 = vector.extract_strided_slice %44 {offsets = [0, 24], sizes = [64, 8], strides = [1, 1]} : vector<64x32xf32> to vector<64x8xf32>
    %125 = vector.shape_cast %124 : vector<64x8xf32> to vector<2x32x8xf32>
    %126 = arith.truncf %125 : vector<2x32x8xf32> to vector<2x32x8xbf16>
    %127 = vector.extract_strided_slice %51 {offsets = [0, 24], sizes = [64, 8], strides = [1, 1]} : vector<64x32xf32> to vector<64x8xf32>
    %128 = vector.shape_cast %127 : vector<64x8xf32> to vector<2x32x8xf32>
    %129 = arith.truncf %128 : vector<2x32x8xf32> to vector<2x32x8xbf16>
    %cst_45 = arith.constant dense<0.000000e+00> : vector<2x32x32xf32>
    %130 = tpu.matmul %123, %126, %cst_45 {dimension_numbers = #tpu.dot_dimension_numbers<[2], [2], [1], [1], [0, 0, 0, 1, 1, 1], [0], [0]>} : vector<2x32x8xbf16>, vector<2x32x8xbf16>, vector<2x32x32xf32> -> vector<2x32x32xf32>
    %cst_46 = arith.constant dense<0xFF800000> : vector<2x32xf32>
    %131 = vector.multi_reduction <maximumf>, %130, %cst_46 [2] : vector<2x32x32xf32> to vector<2x32xf32>
    %132 = vector.shape_cast %131 : vector<2x32xf32> to vector<2x32x1xf32>
    %133 = vector.broadcast %132 : vector<2x32x1xf32> to vector<2x32x32xf32>
    %134 = arith.subf %130, %133 : vector<2x32x32xf32>
    %135 = math.exp %134 : vector<2x32x32xf32>
    %cst_47 = arith.constant dense<0.000000e+00> : vector<2x32xf32>
    %136 = vector.multi_reduction <add>, %135, %cst_47 [2] : vector<2x32x32xf32> to vector<2x32xf32>
    %137 = vector.shape_cast %136 : vector<2x32xf32> to vector<2x32x1xf32>
    %138 = tpu.reciprocal %137 {approx = true} : vector<2x32x1xf32> -> vector<2x32x1xf32>
    %139 = vector.broadcast %138 : vector<2x32x1xf32> to vector<2x32x32xf32>
    %140 = arith.mulf %135, %139 : vector<2x32x32xf32>
    %141 = arith.truncf %140 : vector<2x32x32xf32> to vector<2x32x32xbf16>
    %cst_48 = arith.constant dense<0.000000e+00> : vector<2x32x8xf32>
    %142 = tpu.matmul %141, %129, %cst_48 {dimension_numbers = #tpu.dot_dimension_numbers<[2], [1], [1], [2], [0, 0, 0, 1, 1, 2], [0], [0]>} : vector<2x32x32xbf16>, vector<2x32x8xbf16>, vector<2x32x8xf32> -> vector<2x32x8xf32>
    %143 = vector.shape_cast %142 : vector<2x32x8xf32> to vector<64x8xf32>
    %144 = tpu.concatenate %74, %97, %120, %143 in 1 : vector<64x8xf32>, vector<64x8xf32>, vector<64x8xf32>, vector<64x8xf32> -> vector<64x32xf32>
    %145 = arith.truncf %144 : vector<64x32xf32> to vector<64x32xbf16>
    %c0_49 = arith.constant 0 : index
    %c0_50 = arith.constant 0 : index
    %c0_51 = arith.constant 0 : index
    %146 = vector.load %arg11[%c0_49, %c0_50, %c0_51] : memref<1x32x32xbf16, #tpu.memory_space<vmem>>, vector<1x32x32xbf16>
    %147 = vector.shape_cast %146 : vector<1x32x32xbf16> to vector<32x32xbf16>
    %cst_52 = arith.constant dense<0.000000e+00> : vector<64x32xf32>
    %148 = tpu.matmul %145, %147, %cst_52 {dimension_numbers = #tpu.dot_dimension_numbers<[1], [0], [0], [1], [0, 0, 1, 1], [], []>} : vector<64x32xbf16>, vector<32x32xbf16>, vector<64x32xf32> -> vector<64x32xf32>
    %c0_53 = arith.constant 0 : index
    %c0_54 = arith.constant 0 : index
    %c0_55 = arith.constant 0 : index
    %149 = vector.load %arg12[%c0_53, %c0_54, %c0_55] : memref<1x1x32xf32, #tpu.memory_space<vmem>>, vector<1x1x32xf32>
    %150 = vector.shape_cast %149 : vector<1x1x32xf32> to vector<1x32xf32>
    %151 = vector.broadcast %150 : vector<1x32xf32> to vector<64x32xf32>
    %152 = arith.addf %148, %151 : vector<64x32xf32>
    %153 = arith.addf %3, %152 : vector<64x32xf32>
    %c0_56 = arith.constant 0 : index
    %c0_57 = arith.constant 0 : index
    %c0_58 = arith.constant 0 : index
    %154 = vector.load %arg13[%c0_56, %c0_57, %c0_58] : memref<1x1x32xf32, #tpu.memory_space<vmem>>, vector<1x1x32xf32>
    %155 = vector.shape_cast %154 : vector<1x1x32xf32> to vector<1x32xf32>
    %c0_59 = arith.constant 0 : index
    %c0_60 = arith.constant 0 : index
    %c0_61 = arith.constant 0 : index
    %156 = vector.load %arg14[%c0_59, %c0_60, %c0_61] : memref<1x1x32xf32, #tpu.memory_space<vmem>>, vector<1x1x32xf32>
    %157 = vector.shape_cast %156 : vector<1x1x32xf32> to vector<1x32xf32>
    %cst_62 = arith.constant dense<0.000000e+00> : vector<64xf32>
    %158 = vector.multi_reduction <add>, %153, %cst_62 [1] : vector<64x32xf32> to vector<64xf32>
    %159 = vector.shape_cast %158 : vector<64xf32> to vector<64x1xf32>
    %cst_63 = arith.constant 3.200000e+01 : f32
    %160 = vector.broadcast %cst_63 : f32 to vector<64x1xf32>
    %161 = arith.divf %159, %160 : vector<64x1xf32>
    %162 = vector.broadcast %161 : vector<64x1xf32> to vector<64x32xf32>
    %163 = arith.subf %153, %162 : vector<64x32xf32>
    %164 = arith.mulf %163, %163 : vector<64x32xf32>
    %cst_64 = arith.constant dense<0.000000e+00> : vector<64xf32>
    %165 = vector.multi_reduction <add>, %164, %cst_64 [1] : vector<64x32xf32> to vector<64xf32>
    %166 = vector.shape_cast %165 : vector<64xf32> to vector<64x1xf32>
    %cst_65 = arith.constant 3.200000e+01 : f32
    %167 = vector.broadcast %cst_65 : f32 to vector<64x1xf32>
    %168 = arith.divf %166, %167 : vector<64x1xf32>
    %169 = vector.broadcast %161 : vector<64x1xf32> to vector<64x32xf32>
    %170 = arith.subf %153, %169 : vector<64x32xf32>
    %cst_66 = arith.constant 9.99999974E-6 : f32
    %171 = vector.broadcast %cst_66 : f32 to vector<64x1xf32>
    %172 = arith.addf %168, %171 : vector<64x1xf32>
    %173 = math.rsqrt %172 : vector<64x1xf32>
    %174 = vector.broadcast %173 : vector<64x1xf32> to vector<64x32xf32>
    %175 = arith.mulf %170, %174 : vector<64x32xf32>
    %176 = vector.broadcast %155 : vector<1x32xf32> to vector<64x32xf32>
    %177 = arith.mulf %175, %176 : vector<64x32xf32>
    %178 = vector.broadcast %157 : vector<1x32xf32> to vector<64x32xf32>
    %179 = arith.addf %177, %178 : vector<64x32xf32>
    %180 = arith.truncf %179 : vector<64x32xf32> to vector<64x32xbf16>
    %c0_67 = arith.constant 0 : index
    %c0_68 = arith.constant 0 : index
    %c0_69 = arith.constant 0 : index
    %181 = vector.load %arg15[%c0_67, %c0_68, %c0_69] : memref<1x32x64xbf16, #tpu.memory_space<vmem>>, vector<1x32x64xbf16>
    %182 = vector.shape_cast %181 : vector<1x32x64xbf16> to vector<32x64xbf16>
    %cst_70 = arith.constant dense<0.000000e+00> : vector<64x64xf32>
    %183 = tpu.matmul %180, %182, %cst_70 {dimension_numbers = #tpu.dot_dimension_numbers<[1], [0], [0], [1], [0, 0, 1, 1], [], []>} : vector<64x32xbf16>, vector<32x64xbf16>, vector<64x64xf32> -> vector<64x64xf32>
    %c0_71 = arith.constant 0 : index
    %c0_72 = arith.constant 0 : index
    %c0_73 = arith.constant 0 : index
    %184 = vector.load %arg16[%c0_71, %c0_72, %c0_73] : memref<1x1x64xf32, #tpu.memory_space<vmem>>, vector<1x1x64xf32>
    %185 = vector.shape_cast %184 : vector<1x1x64xf32> to vector<1x64xf32>
    %186 = vector.broadcast %185 : vector<1x64xf32> to vector<64x64xf32>
    %187 = arith.addf %183, %186 : vector<64x64xf32>
    %188 = arith.mulf %187, %187 : vector<64x64xf32>
    %189 = arith.mulf %187, %188 : vector<64x64xf32>
    %cst_74 = arith.constant 4.471500e-02 : f32
    %190 = vector.broadcast %cst_74 : f32 to vector<64x64xf32>
    %191 = arith.mulf %190, %189 : vector<64x64xf32>
    %192 = arith.addf %187, %191 : vector<64x64xf32>
    %cst_75 = arith.constant 0.797884583 : f32
    %193 = vector.broadcast %cst_75 : f32 to vector<64x64xf32>
    %194 = arith.mulf %193, %192 : vector<64x64xf32>
    %195 = math.tanh %194 : vector<64x64xf32>
    %cst_76 = arith.constant 1.000000e+00 : f32
    %196 = vector.broadcast %cst_76 : f32 to vector<64x64xf32>
    %197 = arith.addf %196, %195 : vector<64x64xf32>
    %cst_77 = arith.constant 5.000000e-01 : f32
    %198 = vector.broadcast %cst_77 : f32 to vector<64x64xf32>
    %199 = arith.mulf %198, %197 : vector<64x64xf32>
    %200 = arith.mulf %187, %199 : vector<64x64xf32>
    %201 = arith.truncf %200 : vector<64x64xf32> to vector<64x64xbf16>
    %c0_78 = arith.constant 0 : index
    %c0_79 = arith.constant 0 : index
    %c0_80 = arith.constant 0 : index
    %202 = vector.load %arg17[%c0_78, %c0_79, %c0_80] : memref<1x64x32xbf16, #tpu.memory_space<vmem>>, vector<1x64x32xbf16>
    %203 = vector.shape_cast %202 : vector<1x64x32xbf16> to vector<64x32xbf16>
    %cst_81 = arith.constant dense<0.000000e+00> : vector<64x32xf32>
    %204 = tpu.matmul %201, %203, %cst_81 {dimension_numbers = #tpu.dot_dimension_numbers<[1], [0], [0], [1], [0, 0, 1, 1], [], []>} : vector<64x64xbf16>, vector<64x32xbf16>, vector<64x32xf32> -> vector<64x32xf32>
    %c0_82 = arith.constant 0 : index
    %c0_83 = arith.constant 0 : index
    %c0_84 = arith.constant 0 : index
    %205 = vector.load %arg18[%c0_82, %c0_83, %c0_84] : memref<1x1x32xf32, #tpu.memory_space<vmem>>, vector<1x1x32xf32>
    %206 = vector.shape_cast %205 : vector<1x1x32xf32> to vector<1x32xf32>
    %207 = vector.broadcast %206 : vector<1x32xf32> to vector<64x32xf32>
    %208 = arith.addf %204, %207 : vector<64x32xf32>
    %209 = arith.addf %153, %208 : vector<64x32xf32>
    %c0_85 = arith.constant 0 : index
    %c0_86 = arith.constant 0 : index
    %210 = vector.load %arg22[%c0_85, %c0_86] : memref<64x32xf32, #tpu.memory_space<vmem>>, vector<64x32xf32>
    tpu.vector_store %arg22[%c0_85, %c0_86], %209 {strides = array<i32>} : memref<64x32xf32, #tpu.memory_space<vmem>>, vector<64x32xf32>,
    %c0_i32_87 = arith.constant 0 : i32
    %211 = arith.cmpi eq, %arg1, %c0_i32_87 : i32
    %212 = arith.extui %211 : i1 to i32
    %c0_i32_88 = arith.constant 0 : i32
    %213 = arith.cmpi ne, %212, %c0_i32_88 : i32
    scf.if %213 {
      %214 = arith.truncf %209 : vector<64x32xf32> to vector<64x32xbf16>
      %c0_89 = arith.constant 0 : index
      %c0_90 = arith.constant 0 : index
      %215 = vector.load %arg19[%c0_89, %c0_90] : memref<32x32xbf16, #tpu.memory_space<vmem>>, vector<32x32xbf16>
      %cst_91 = arith.constant dense<0.000000e+00> : vector<64x32xf32>
      %216 = tpu.matmul %214, %215, %cst_91 {dimension_numbers = #tpu.dot_dimension_numbers<[1], [0], [0], [1], [0, 0, 1, 1], [], []>} : vector<64x32xbf16>, vector<32x32xbf16>, vector<64x32xf32> -> vector<64x32xf32>
      %c0_92 = arith.constant 0 : index
      %c0_93 = arith.constant 0 : index
      %217 = vector.load %arg20[%c0_92, %c0_93] : memref<1x32xf32, #tpu.memory_space<vmem>>, vector<1x32xf32>
      %218 = vector.broadcast %217 : vector<1x32xf32> to vector<64x32xf32>
      %219 = arith.addf %216, %218 : vector<64x32xf32>
      %c0_94 = arith.constant 0 : index
      %c0_95 = arith.constant 0 : index
      %c0_96 = arith.constant 0 : index
      %220 = vector.load %arg2[%c0_94, %c0_95, %c0_96] : memref<1x64x32xbf16, #tpu.memory_space<vmem>>, vector<1x64x32xbf16>
      %221 = vector.shape_cast %220 : vector<1x64x32xbf16> to vector<64x32xbf16>
      %222 = arith.extf %221 : vector<64x32xbf16> to vector<64x32xf32>
      %223 = arith.addf %219, %222 : vector<64x32xf32>
      %224 = arith.truncf %223 : vector<64x32xf32> to vector<64x32xbf16>
      %c0_97 = arith.constant 0 : index
      %c0_98 = arith.constant 0 : index
      %c0_99 = arith.constant 0 : index
      %225 = vector.load %arg21[%c0_97, %c0_98, %c0_99] : memref<1x64x32xbf16, #tpu.memory_space<vmem>>, vector<1x64x32xbf16>
      %226 = vector.shape_cast %225 : vector<1x64x32xbf16> to vector<64x32xbf16>
      %227 = vector.shape_cast %224 : vector<64x32xbf16> to vector<1x64x32xbf16>
      tpu.vector_store %arg21[%c0_97, %c0_98, %c0_99], %227 {strides = array<i32>} : memref<1x64x32xbf16, #tpu.memory_space<vmem>>, vector<1x64x32xbf16>,
    } else {
    }
    return
  }
  func.func @transform_0(%arg0: i32, %arg1: i32) -> (i32, i32, i32) {
    %c0_i32 = arith.constant 0 : i32
    %c0_i32_0 = arith.constant 0 : i32
    %c0_i32_1 = arith.constant 0 : i32
    return %arg0, %c0_i32, %c0_i32_0 : i32, i32, i32
  }
  func.func @transform_1(%arg0: i32, %arg1: i32) -> (i32, i32, i32) {
    %c0_i32 = arith.constant 0 : i32
    %c0_i32_0 = arith.constant 0 : i32
    %c0_i32_1 = arith.constant 0 : i32
    return %arg1, %c0_i32, %c0_i32_0 : i32, i32, i32
  }
  func.func @transform_2(%arg0: i32, %arg1: i32) -> (i32, i32, i32) {
    %c0_i32 = arith.constant 0 : i32
    %c0_i32_0 = arith.constant 0 : i32
    %c0_i32_1 = arith.constant 0 : i32
    return %arg1, %c0_i32, %c0_i32_0 : i32, i32, i32
  }
  func.func @transform_3(%arg0: i32, %arg1: i32) -> (i32, i32, i32) {
    %c0_i32 = arith.constant 0 : i32
    %c0_i32_0 = arith.constant 0 : i32
    %c0_i32_1 = arith.constant 0 : i32
    return %arg1, %c0_i32, %c0_i32_0 : i32, i32, i32
  }
  func.func @transform_4(%arg0: i32, %arg1: i32) -> (i32, i32, i32) {
    %c0_i32 = arith.constant 0 : i32
    %c0_i32_0 = arith.constant 0 : i32
    %c0_i32_1 = arith.constant 0 : i32
    return %arg1, %c0_i32, %c0_i32_0 : i32, i32, i32
  }
  func.func @transform_5(%arg0: i32, %arg1: i32) -> (i32, i32, i32) {
    %c0_i32 = arith.constant 0 : i32
    %c0_i32_0 = arith.constant 0 : i32
    %c0_i32_1 = arith.constant 0 : i32
    return %arg1, %c0_i32, %c0_i32_0 : i32, i32, i32
  }
  func.func @transform_6(%arg0: i32, %arg1: i32) -> (i32, i32, i32) {
    %c0_i32 = arith.constant 0 : i32
    %c0_i32_0 = arith.constant 0 : i32
    %c0_i32_1 = arith.constant 0 : i32
    return %arg1, %c0_i32, %c0_i32_0 : i32, i32, i32
  }
  func.func @transform_7(%arg0: i32, %arg1: i32) -> (i32, i32, i32) {
    %c0_i32 = arith.constant 0 : i32
    %c0_i32_0 = arith.constant 0 : i32
    %c0_i32_1 = arith.constant 0 : i32
    return %arg1, %c0_i32, %c0_i32_0 : i32, i32, i32
  }
  func.func @transform_8(%arg0: i32, %arg1: i32) -> (i32, i32, i32) {
    %c0_i32 = arith.constant 0 : i32
    %c0_i32_0 = arith.constant 0 : i32
    %c0_i32_1 = arith.constant 0 : i32
    return %arg1, %c0_i32, %c0_i32_0 : i32, i32, i32
  }
  func.func @transform_9(%arg0: i32, %arg1: i32) -> (i32, i32, i32) {
    %c0_i32 = arith.constant 0 : i32
    %c0_i32_0 = arith.constant 0 : i32
    %c0_i32_1 = arith.constant 0 : i32
    return %arg1, %c0_i32, %c0_i32_0 : i32, i32, i32
  }
  func.func @transform_10(%arg0: i32, %arg1: i32) -> (i32, i32, i32) {
    %c0_i32 = arith.constant 0 : i32
    %c0_i32_0 = arith.constant 0 : i32
    %c0_i32_1 = arith.constant 0 : i32
    return %arg1, %c0_i32, %c0_i32_0 : i32, i32, i32
  }
  func.func @transform_11(%arg0: i32, %arg1: i32) -> (i32, i32, i32) {
    %c0_i32 = arith.constant 0 : i32
    %c0_i32_0 = arith.constant 0 : i32
    %c0_i32_1 = arith.constant 0 : i32
    return %arg1, %c0_i32, %c0_i32_0 : i32, i32, i32
  }
  func.func @transform_12(%arg0: i32, %arg1: i32) -> (i32, i32, i32) {
    %c0_i32 = arith.constant 0 : i32
    %c0_i32_0 = arith.constant 0 : i32
    %c0_i32_1 = arith.constant 0 : i32
    return %arg1, %c0_i32, %c0_i32_0 : i32, i32, i32
  }
  func.func @transform_13(%arg0: i32, %arg1: i32) -> (i32, i32, i32) {
    %c0_i32 = arith.constant 0 : i32
    %c0_i32_0 = arith.constant 0 : i32
    %c0_i32_1 = arith.constant 0 : i32
    return %arg1, %c0_i32, %c0_i32_0 : i32, i32, i32
  }
  func.func @transform_14(%arg0: i32, %arg1: i32) -> (i32, i32, i32) {
    %c0_i32 = arith.constant 0 : i32
    %c0_i32_0 = arith.constant 0 : i32
    %c0_i32_1 = arith.constant 0 : i32
    return %arg1, %c0_i32, %c0_i32_0 : i32, i32, i32
  }
  func.func @transform_15(%arg0: i32, %arg1: i32) -> (i32, i32, i32) {
    %c0_i32 = arith.constant 0 : i32
    %c0_i32_0 = arith.constant 0 : i32
    %c0_i32_1 = arith.constant 0 : i32
    return %arg1, %c0_i32, %c0_i32_0 : i32, i32, i32
  }
  func.func @transform_16(%arg0: i32, %arg1: i32) -> (i32, i32, i32) {
    %c0_i32 = arith.constant 0 : i32
    %c0_i32_0 = arith.constant 0 : i32
    %c0_i32_1 = arith.constant 0 : i32
    return %arg1, %c0_i32, %c0_i32_0 : i32, i32, i32
  }
  func.func @transform_17(%arg0: i32, %arg1: i32) -> (i32, i32) {
    %c0_i32 = arith.constant 0 : i32
    %c0_i32_0 = arith.constant 0 : i32
    %c0_i32_1 = arith.constant 0 : i32
    return %c0_i32, %c0_i32_0 : i32, i32
  }
  func.func @transform_18(%arg0: i32, %arg1: i32) -> (i32, i32) {
    %c0_i32 = arith.constant 0 : i32
    %c0_i32_0 = arith.constant 0 : i32
    %c0_i32_1 = arith.constant 0 : i32
    return %c0_i32, %c0_i32_0 : i32, i32
  }
  func.func @transform_19(%arg0: i32, %arg1: i32) -> (i32, i32, i32) {
    %c0_i32 = arith.constant 0 : i32
    %c0_i32_0 = arith.constant 0 : i32
    %c0_i32_1 = arith.constant 0 : i32
    return %arg0, %c0_i32, %c0_i32_0 : i32, i32, i32
  }
}

module attributes {stable_mosaic.version = 11 : i64} {
  func.func @_conv3x3_kernel(%arg0: i32, %arg1: memref<1x10x10x32xbf16, #tpu.memory_space<vmem>>, %arg2: memref<288x32xbf16, #tpu.memory_space<vmem>>, %arg3: memref<1x32xf32, #tpu.memory_space<vmem>>, %arg4: memref<1x8x8x32xbf16, #tpu.memory_space<vmem>>) attributes {dimension_semantics = [#tpu.dimension_semantics<parallel>], iteration_bounds = array<i64: 3>, scalar_prefetch = 0 : i64, scratch_operands = 0 : i64, tpu.core_type = #tpu.core_type<tc>, window_params = [{transform_indices = @transform_0, window_bounds = array<i64: 1, 10, 10, 32>}, {pipeline_mode = #tpu.pipeline_mode<synchronous>, transform_indices = @transform_1, window_bounds = array<i64: 288, 32>}, {pipeline_mode = #tpu.pipeline_mode<synchronous>, transform_indices = @transform_2, window_bounds = array<i64: 1, 32>}, {transform_indices = @transform_3, window_bounds = array<i64: 1, 8, 8, 32>}]} {
    %c0 = arith.constant 0 : index
    %c0_0 = arith.constant 0 : index
    %c0_1 = arith.constant 0 : index
    %c0_2 = arith.constant 0 : index
    %0 = vector.load %arg1[%c0, %c0_0, %c0_1, %c0_2] : memref<1x10x10x32xbf16, #tpu.memory_space<vmem>>, vector<1x10x10x32xbf16>
    %1 = vector.shape_cast %0 : vector<1x10x10x32xbf16> to vector<10x10x32xbf16>
    %2 = vector.extract_strided_slice %1 {offsets = [0, 0, 0], sizes = [8, 8, 32], strides = [1, 1, 1]} : vector<10x10x32xbf16> to vector<8x8x32xbf16>
    %3 = vector.shape_cast %2 : vector<8x8x32xbf16> to vector<64x32xbf16>
    %4 = vector.extract_strided_slice %1 {offsets = [0, 1, 0], sizes = [8, 8, 32], strides = [1, 1, 1]} : vector<10x10x32xbf16> to vector<8x8x32xbf16>
    %5 = vector.shape_cast %4 : vector<8x8x32xbf16> to vector<64x32xbf16>
    %6 = vector.extract_strided_slice %1 {offsets = [0, 2, 0], sizes = [8, 8, 32], strides = [1, 1, 1]} : vector<10x10x32xbf16> to vector<8x8x32xbf16>
    %7 = vector.shape_cast %6 : vector<8x8x32xbf16> to vector<64x32xbf16>
    %8 = vector.extract_strided_slice %1 {offsets = [1, 0, 0], sizes = [8, 8, 32], strides = [1, 1, 1]} : vector<10x10x32xbf16> to vector<8x8x32xbf16>
    %9 = vector.shape_cast %8 : vector<8x8x32xbf16> to vector<64x32xbf16>
    %10 = vector.extract_strided_slice %1 {offsets = [1, 1, 0], sizes = [8, 8, 32], strides = [1, 1, 1]} : vector<10x10x32xbf16> to vector<8x8x32xbf16>
    %11 = vector.shape_cast %10 : vector<8x8x32xbf16> to vector<64x32xbf16>
    %12 = vector.extract_strided_slice %1 {offsets = [1, 2, 0], sizes = [8, 8, 32], strides = [1, 1, 1]} : vector<10x10x32xbf16> to vector<8x8x32xbf16>
    %13 = vector.shape_cast %12 : vector<8x8x32xbf16> to vector<64x32xbf16>
    %14 = vector.extract_strided_slice %1 {offsets = [2, 0, 0], sizes = [8, 8, 32], strides = [1, 1, 1]} : vector<10x10x32xbf16> to vector<8x8x32xbf16>
    %15 = vector.shape_cast %14 : vector<8x8x32xbf16> to vector<64x32xbf16>
    %16 = vector.extract_strided_slice %1 {offsets = [2, 1, 0], sizes = [8, 8, 32], strides = [1, 1, 1]} : vector<10x10x32xbf16> to vector<8x8x32xbf16>
    %17 = vector.shape_cast %16 : vector<8x8x32xbf16> to vector<64x32xbf16>
    %18 = vector.extract_strided_slice %1 {offsets = [2, 2, 0], sizes = [8, 8, 32], strides = [1, 1, 1]} : vector<10x10x32xbf16> to vector<8x8x32xbf16>
    %19 = vector.shape_cast %18 : vector<8x8x32xbf16> to vector<64x32xbf16>
    %20 = tpu.concatenate %3, %5, %7, %9, %11, %13, %15, %17, %19 in 1 : vector<64x32xbf16>, vector<64x32xbf16>, vector<64x32xbf16>, vector<64x32xbf16>, vector<64x32xbf16>, vector<64x32xbf16>, vector<64x32xbf16>, vector<64x32xbf16>, vector<64x32xbf16> -> vector<64x288xbf16>
    %c0_3 = arith.constant 0 : index
    %c0_4 = arith.constant 0 : index
    %21 = vector.load %arg2[%c0_3, %c0_4] : memref<288x32xbf16, #tpu.memory_space<vmem>>, vector<288x32xbf16>
    %cst = arith.constant dense<0.000000e+00> : vector<64x32xf32>
    %22 = tpu.matmul %20, %21, %cst {dimension_numbers = #tpu.dot_dimension_numbers<[1], [0], [0], [1], [0, 0, 1, 1], [], []>} : vector<64x288xbf16>, vector<288x32xbf16>, vector<64x32xf32> -> vector<64x32xf32>
    %c0_5 = arith.constant 0 : index
    %c0_6 = arith.constant 0 : index
    %23 = vector.load %arg3[%c0_5, %c0_6] : memref<1x32xf32, #tpu.memory_space<vmem>>, vector<1x32xf32>
    %24 = vector.broadcast %23 : vector<1x32xf32> to vector<64x32xf32>
    %25 = arith.addf %22, %24 : vector<64x32xf32>
    %26 = vector.shape_cast %25 : vector<64x32xf32> to vector<8x8x32xf32>
    %27 = arith.truncf %26 : vector<8x8x32xf32> to vector<8x8x32xbf16>
    %c0_7 = arith.constant 0 : index
    %c0_8 = arith.constant 0 : index
    %c0_9 = arith.constant 0 : index
    %c0_10 = arith.constant 0 : index
    %28 = vector.load %arg4[%c0_7, %c0_8, %c0_9, %c0_10] : memref<1x8x8x32xbf16, #tpu.memory_space<vmem>>, vector<1x8x8x32xbf16>
    %29 = vector.shape_cast %28 : vector<1x8x8x32xbf16> to vector<8x8x32xbf16>
    %30 = vector.shape_cast %27 : vector<8x8x32xbf16> to vector<1x8x8x32xbf16>
    tpu.vector_store %arg4[%c0_7, %c0_8, %c0_9, %c0_10], %30 {strides = array<i32>} : memref<1x8x8x32xbf16, #tpu.memory_space<vmem>>, vector<1x8x8x32xbf16>,
    return
  }
  func.func @transform_0(%arg0: i32) -> (i32, i32, i32, i32) {
    %c0_i32 = arith.constant 0 : i32
    %c0_i32_0 = arith.constant 0 : i32
    %c0_i32_1 = arith.constant 0 : i32
    %c0_i32_2 = arith.constant 0 : i32
    return %arg0, %c0_i32, %c0_i32_0, %c0_i32_1 : i32, i32, i32, i32
  }
  func.func @transform_1(%arg0: i32) -> (i32, i32) {
    %c0_i32 = arith.constant 0 : i32
    %c0_i32_0 = arith.constant 0 : i32
    %c0_i32_1 = arith.constant 0 : i32
    return %c0_i32, %c0_i32_0 : i32, i32
  }
  func.func @transform_2(%arg0: i32) -> (i32, i32) {
    %c0_i32 = arith.constant 0 : i32
    %c0_i32_0 = arith.constant 0 : i32
    %c0_i32_1 = arith.constant 0 : i32
    return %c0_i32, %c0_i32_0 : i32, i32
  }
  func.func @transform_3(%arg0: i32) -> (i32, i32, i32, i32) {
    %c0_i32 = arith.constant 0 : i32
    %c0_i32_0 = arith.constant 0 : i32
    %c0_i32_1 = arith.constant 0 : i32
    %c0_i32_2 = arith.constant 0 : i32
    return %arg0, %c0_i32, %c0_i32_0, %c0_i32_1 : i32, i32, i32, i32
  }
}

module attributes {stable_mosaic.version = 11 : i64} {
  func.func @_geglu_kernel(%arg0: i32, %arg1: memref<256x32xbf16, #tpu.memory_space<vmem>>, %arg2: memref<256x32xbf16, #tpu.memory_space<vmem>>, %arg3: memref<256x32xbf16, #tpu.memory_space<vmem>>, %arg4: memref<3x32x96xbf16, #tpu.memory_space<vmem>>, %arg5: memref<1x96xf32, #tpu.memory_space<vmem>>, %arg6: memref<3x32x96xbf16, #tpu.memory_space<vmem>>, %arg7: memref<1x96xf32, #tpu.memory_space<vmem>>, %arg8: memref<96x32xbf16, #tpu.memory_space<vmem>>, %arg9: memref<1x32xf32, #tpu.memory_space<vmem>>, %arg10: memref<256x32xf32, #tpu.memory_space<vmem>>) attributes {dimension_semantics = [#tpu.dimension_semantics<parallel>], iteration_bounds = array<i64: 1>, scalar_prefetch = 0 : i64, scratch_operands = 0 : i64, tpu.core_type = #tpu.core_type<tc>, window_params = [{transform_indices = @transform_0, window_bounds = array<i64: 256, 32>}, {transform_indices = @transform_1, window_bounds = array<i64: 256, 32>}, {transform_indices = @transform_2, window_bounds = array<i64: 256, 32>}, {pipeline_mode = #tpu.pipeline_mode<synchronous>, transform_indices = @transform_3, window_bounds = array<i64: 3, 32, 96>}, {pipeline_mode = #tpu.pipeline_mode<synchronous>, transform_indices = @transform_4, window_bounds = array<i64: 1, 96>}, {pipeline_mode = #tpu.pipeline_mode<synchronous>, transform_indices = @transform_5, window_bounds = array<i64: 3, 32, 96>}, {pipeline_mode = #tpu.pipeline_mode<synchronous>, transform_indices = @transform_6, window_bounds = array<i64: 1, 96>}, {pipeline_mode = #tpu.pipeline_mode<synchronous>, transform_indices = @transform_7, window_bounds = array<i64: 96, 32>}, {pipeline_mode = #tpu.pipeline_mode<synchronous>, transform_indices = @transform_8, window_bounds = array<i64: 1, 32>}, {transform_indices = @transform_9, window_bounds = array<i64: 256, 32>}]} {
    %c0 = arith.constant 0 : index
    %c0_0 = arith.constant 0 : index
    %0 = vector.load %arg1[%c0, %c0_0] : memref<256x32xbf16, #tpu.memory_space<vmem>>, vector<256x32xbf16>
    %c0_1 = arith.constant 0 : index
    %c0_2 = arith.constant 0 : index
    %1 = vector.load %arg2[%c0_1, %c0_2] : memref<256x32xbf16, #tpu.memory_space<vmem>>, vector<256x32xbf16>
    %c0_3 = arith.constant 0 : index
    %c0_4 = arith.constant 0 : index
    %2 = vector.load %arg3[%c0_3, %c0_4] : memref<256x32xbf16, #tpu.memory_space<vmem>>, vector<256x32xbf16>
    %c0_5 = arith.constant 0 : index
    %c0_6 = arith.constant 0 : index
    %c0_7 = arith.constant 0 : index
    %3 = vector.load %arg4[%c0_5, %c0_6, %c0_7] : memref<3x32x96xbf16, #tpu.memory_space<vmem>>, vector<1x32x96xbf16>
    %4 = vector.shape_cast %3 : vector<1x32x96xbf16> to vector<32x96xbf16>
    %cst = arith.constant dense<0.000000e+00> : vector<256x96xf32>
    %5 = tpu.matmul %0, %4, %cst {dimension_numbers = #tpu.dot_dimension_numbers<[1], [0], [0], [1], [0, 0, 1, 1], [], []>} : vector<256x32xbf16>, vector<32x96xbf16>, vector<256x96xf32> -> vector<256x96xf32>
    %c1 = arith.constant 1 : index
    %c0_8 = arith.constant 0 : index
    %c0_9 = arith.constant 0 : index
    %6 = vector.load %arg4[%c1, %c0_8, %c0_9] : memref<3x32x96xbf16, #tpu.memory_space<vmem>>, vector<1x32x96xbf16>
    %7 = vector.shape_cast %6 : vector<1x32x96xbf16> to vector<32x96xbf16>
    %cst_10 = arith.constant dense<0.000000e+00> : vector<256x96xf32>
    %8 = tpu.matmul %1, %7, %cst_10 {dimension_numbers = #tpu.dot_dimension_numbers<[1], [0], [0], [1], [0, 0, 1, 1], [], []>} : vector<256x32xbf16>, vector<32x96xbf16>, vector<256x96xf32> -> vector<256x96xf32>
    %9 = arith.addf %5, %8 : vector<256x96xf32>
    %c2 = arith.constant 2 : index
    %c0_11 = arith.constant 0 : index
    %c0_12 = arith.constant 0 : index
    %10 = vector.load %arg4[%c2, %c0_11, %c0_12] : memref<3x32x96xbf16, #tpu.memory_space<vmem>>, vector<1x32x96xbf16>
    %11 = vector.shape_cast %10 : vector<1x32x96xbf16> to vector<32x96xbf16>
    %cst_13 = arith.constant dense<0.000000e+00> : vector<256x96xf32>
    %12 = tpu.matmul %2, %11, %cst_13 {dimension_numbers = #tpu.dot_dimension_numbers<[1], [0], [0], [1], [0, 0, 1, 1], [], []>} : vector<256x32xbf16>, vector<32x96xbf16>, vector<256x96xf32> -> vector<256x96xf32>
    %13 = arith.addf %9, %12 : vector<256x96xf32>
    %c0_14 = arith.constant 0 : index
    %c0_15 = arith.constant 0 : index
    %14 = vector.load %arg5[%c0_14, %c0_15] : memref<1x96xf32, #tpu.memory_space<vmem>>, vector<1x96xf32>
    %15 = vector.broadcast %14 : vector<1x96xf32> to vector<256x96xf32>
    %16 = arith.addf %13, %15 : vector<256x96xf32>
    %c0_16 = arith.constant 0 : index
    %c0_17 = arith.constant 0 : index
    %c0_18 = arith.constant 0 : index
    %17 = vector.load %arg6[%c0_16, %c0_17, %c0_18] : memref<3x32x96xbf16, #tpu.memory_space<vmem>>, vector<1x32x96xbf16>
    %18 = vector.shape_cast %17 : vector<1x32x96xbf16> to vector<32x96xbf16>
    %cst_19 = arith.constant dense<0.000000e+00> : vector<256x96xf32>
    %19 = tpu.matmul %0, %18, %cst_19 {dimension_numbers = #tpu.dot_dimension_numbers<[1], [0], [0], [1], [0, 0, 1, 1], [], []>} : vector<256x32xbf16>, vector<32x96xbf16>, vector<256x96xf32> -> vector<256x96xf32>
    %c1_20 = arith.constant 1 : index
    %c0_21 = arith.constant 0 : index
    %c0_22 = arith.constant 0 : index
    %20 = vector.load %arg6[%c1_20, %c0_21, %c0_22] : memref<3x32x96xbf16, #tpu.memory_space<vmem>>, vector<1x32x96xbf16>
    %21 = vector.shape_cast %20 : vector<1x32x96xbf16> to vector<32x96xbf16>
    %cst_23 = arith.constant dense<0.000000e+00> : vector<256x96xf32>
    %22 = tpu.matmul %1, %21, %cst_23 {dimension_numbers = #tpu.dot_dimension_numbers<[1], [0], [0], [1], [0, 0, 1, 1], [], []>} : vector<256x32xbf16>, vector<32x96xbf16>, vector<256x96xf32> -> vector<256x96xf32>
    %23 = arith.addf %19, %22 : vector<256x96xf32>
    %c2_24 = arith.constant 2 : index
    %c0_25 = arith.constant 0 : index
    %c0_26 = arith.constant 0 : index
    %24 = vector.load %arg6[%c2_24, %c0_25, %c0_26] : memref<3x32x96xbf16, #tpu.memory_space<vmem>>, vector<1x32x96xbf16>
    %25 = vector.shape_cast %24 : vector<1x32x96xbf16> to vector<32x96xbf16>
    %cst_27 = arith.constant dense<0.000000e+00> : vector<256x96xf32>
    %26 = tpu.matmul %2, %25, %cst_27 {dimension_numbers = #tpu.dot_dimension_numbers<[1], [0], [0], [1], [0, 0, 1, 1], [], []>} : vector<256x32xbf16>, vector<32x96xbf16>, vector<256x96xf32> -> vector<256x96xf32>
    %27 = arith.addf %23, %26 : vector<256x96xf32>
    %c0_28 = arith.constant 0 : index
    %c0_29 = arith.constant 0 : index
    %28 = vector.load %arg7[%c0_28, %c0_29] : memref<1x96xf32, #tpu.memory_space<vmem>>, vector<1x96xf32>
    %29 = vector.broadcast %28 : vector<1x96xf32> to vector<256x96xf32>
    %30 = arith.addf %27, %29 : vector<256x96xf32>
    %31 = arith.mulf %30, %30 : vector<256x96xf32>
    %32 = arith.mulf %30, %31 : vector<256x96xf32>
    %cst_30 = arith.constant 4.471500e-02 : f32
    %33 = vector.broadcast %cst_30 : f32 to vector<256x96xf32>
    %34 = arith.mulf %33, %32 : vector<256x96xf32>
    %35 = arith.addf %30, %34 : vector<256x96xf32>
    %cst_31 = arith.constant 0.797884583 : f32
    %36 = vector.broadcast %cst_31 : f32 to vector<256x96xf32>
    %37 = arith.mulf %36, %35 : vector<256x96xf32>
    %38 = math.tanh %37 : vector<256x96xf32>
    %cst_32 = arith.constant 1.000000e+00 : f32
    %39 = vector.broadcast %cst_32 : f32 to vector<256x96xf32>
    %40 = arith.addf %39, %38 : vector<256x96xf32>
    %cst_33 = arith.constant 5.000000e-01 : f32
    %41 = vector.broadcast %cst_33 : f32 to vector<256x96xf32>
    %42 = arith.mulf %41, %40 : vector<256x96xf32>
    %43 = arith.mulf %30, %42 : vector<256x96xf32>
    %44 = arith.mulf %16, %43 : vector<256x96xf32>
    %45 = arith.truncf %44 : vector<256x96xf32> to vector<256x96xbf16>
    %c0_34 = arith.constant 0 : index
    %c0_35 = arith.constant 0 : index
    %46 = vector.load %arg8[%c0_34, %c0_35] : memref<96x32xbf16, #tpu.memory_space<vmem>>, vector<96x32xbf16>
    %cst_36 = arith.constant dense<0.000000e+00> : vector<256x32xf32>
    %47 = tpu.matmul %45, %46, %cst_36 {dimension_numbers = #tpu.dot_dimension_numbers<[1], [0], [0], [1], [0, 0, 1, 1], [], []>} : vector<256x96xbf16>, vector<96x32xbf16>, vector<256x32xf32> -> vector<256x32xf32>
    %c0_37 = arith.constant 0 : index
    %c0_38 = arith.constant 0 : index
    %48 = vector.load %arg9[%c0_37, %c0_38] : memref<1x32xf32, #tpu.memory_space<vmem>>, vector<1x32xf32>
    %49 = vector.broadcast %48 : vector<1x32xf32> to vector<256x32xf32>
    %50 = arith.addf %47, %49 : vector<256x32xf32>
    %c0_39 = arith.constant 0 : index
    %c0_40 = arith.constant 0 : index
    %51 = vector.load %arg10[%c0_39, %c0_40] : memref<256x32xf32, #tpu.memory_space<vmem>>, vector<256x32xf32>
    tpu.vector_store %arg10[%c0_39, %c0_40], %50 {strides = array<i32>} : memref<256x32xf32, #tpu.memory_space<vmem>>, vector<256x32xf32>,
    return
  }
  func.func @transform_0(%arg0: i32) -> (i32, i32) {
    %c0_i32 = arith.constant 0 : i32
    %c0_i32_0 = arith.constant 0 : i32
    return %arg0, %c0_i32 : i32, i32
  }
  func.func @transform_1(%arg0: i32) -> (i32, i32) {
    %c0_i32 = arith.constant 0 : i32
    %c0_i32_0 = arith.constant 0 : i32
    return %arg0, %c0_i32 : i32, i32
  }
  func.func @transform_2(%arg0: i32) -> (i32, i32) {
    %c0_i32 = arith.constant 0 : i32
    %c0_i32_0 = arith.constant 0 : i32
    return %arg0, %c0_i32 : i32, i32
  }
  func.func @transform_3(%arg0: i32) -> (i32, i32, i32) {
    %c0_i32 = arith.constant 0 : i32
    %c0_i32_0 = arith.constant 0 : i32
    %c0_i32_1 = arith.constant 0 : i32
    %c0_i32_2 = arith.constant 0 : i32
    return %c0_i32, %c0_i32_0, %c0_i32_1 : i32, i32, i32
  }
  func.func @transform_4(%arg0: i32) -> (i32, i32) {
    %c0_i32 = arith.constant 0 : i32
    %c0_i32_0 = arith.constant 0 : i32
    %c0_i32_1 = arith.constant 0 : i32
    return %c0_i32, %c0_i32_0 : i32, i32
  }
  func.func @transform_5(%arg0: i32) -> (i32, i32, i32) {
    %c0_i32 = arith.constant 0 : i32
    %c0_i32_0 = arith.constant 0 : i32
    %c0_i32_1 = arith.constant 0 : i32
    %c0_i32_2 = arith.constant 0 : i32
    return %c0_i32, %c0_i32_0, %c0_i32_1 : i32, i32, i32
  }
  func.func @transform_6(%arg0: i32) -> (i32, i32) {
    %c0_i32 = arith.constant 0 : i32
    %c0_i32_0 = arith.constant 0 : i32
    %c0_i32_1 = arith.constant 0 : i32
    return %c0_i32, %c0_i32_0 : i32, i32
  }
  func.func @transform_7(%arg0: i32) -> (i32, i32) {
    %c0_i32 = arith.constant 0 : i32
    %c0_i32_0 = arith.constant 0 : i32
    %c0_i32_1 = arith.constant 0 : i32
    return %c0_i32, %c0_i32_0 : i32, i32
  }
  func.func @transform_8(%arg0: i32) -> (i32, i32) {
    %c0_i32 = arith.constant 0 : i32
    %c0_i32_0 = arith.constant 0 : i32
    %c0_i32_1 = arith.constant 0 : i32
    return %c0_i32, %c0_i32_0 : i32, i32
  }
  func.func @transform_9(%arg0: i32) -> (i32, i32) {
    %c0_i32 = arith.constant 0 : i32
    %c0_i32_0 = arith.constant 0 : i32
    return %arg0, %c0_i32 : i32, i32
  }
}

</mosaic_0001>

<bundles_post_ra>
// kernel: stage_forward.6
= control target key start
LH: loop header
LB: loop body
LE: loop exit
PB: predicated region body
PF: predicated region fallthrough
CT: control target
= control target key end

     0   :  { %vm55_vm0 = vcmask 261120   ;;  %s2607_s0 = inlined_call_operand.vmem [shape: f32[256,32], index: 0, kind: input, shape index: {}]   ;;  %s2608_s1 = inlined_call_operand.vmem [shape: f32[1,32], index: 1, kind: input, shape index: {}]   ;;  %s2609_s2 = inlined_call_operand.vmem [shape: f32[1,32], index: 2, kind: input, shape index: {}]   ;;  %s2610_s3 = inlined_call_operand.vmem [shape: bf16[32,32], index: 3, kind: input, shape index: {}]   ;;  %s2611_s4 = inlined_call_operand.vmem [shape: f32[1,32], index: 4, kind: input, shape index: {}]   ;;  %s2612_s5 = inlined_call_operand.vmem [shape: bf16[256,32], index: 5, kind: output, shape index: {}]  }
   0x1   :  { %v1215_v0 = vld [vmem:[%s2607_s0 + $0xc0] sm:$0xff]  ;;  %v1236_v6 = vld [vmem:[%s2607_s0 + $0xc8] sm:$0xff]  ;;  %v1267_v14 = vld [vmem:[%s2607_s0 + $0x90] sm:$0xff] }
   0x2   :  { %v1220_v1 = vld [vmem:[%s2607_s0 + $0x80] sm:$0xff]  ;;  %v128_v3 = vsel %vm55_vm0, %v1215_v0, 0.0  ;;  %v1241_v7 = vld [vmem:[%s2607_s0 + $0x88] sm:$0xff]  ;;  %v131_v9 = vsel %vm55_vm0, %v1236_v6, 0.0  ;;  %v110_v17 = vsel %vm55_vm0, %v1267_v14, 0.0  ;;  %v1278_v18 = vld [vmem:[%s2607_s0 + $0xd0] sm:$0xff] }
   0x3   :  { %v1225_v2 = vld [vmem:[%s2607_s0] sm:$0xff]  ;;  %v104_v4 = vsel %vm55_vm0, %v1220_v1, 0.0  ;;  %129 = vadd.xlane.f32.xlu1 %v128_v3  ;;  %v1246_v8 = vld [vmem:[%s2607_s0 + $0x8] sm:$0xff]  ;;  %v107_v10 = vsel %vm55_vm0, %v1241_v7, 0.0  ;;  %v1283_v19 = vld [vmem:[%s2607_s0 + $0x98] sm:$0xff]  ;;  %v134_v21 = vsel %vm55_vm0, %v1278_v18, 0.0 }
   0x4   :  { %v56_v5 = vsel %vm55_vm0, %v1225_v2, 0.0  ;;  %105 = vadd.xlane.f32.xlu0 %v104_v4  ;;  %v59_v11 = vsel %vm55_vm0, %v1246_v8, 0.0  ;;  %v1257_v12 = vld [vmem:[%s2607_s0 + $0x48] sm:$0xff]  ;;  %v1262_v13 = vld [vmem:[%s2607_s0 + $0x40] sm:$0xff]  ;;  %v1288_v20 = vld [vmem:[%s2607_s0 + $0xd8] sm:$0xff]  ;;  %v113_v22 = vsel %vm55_vm0, %v1283_v19, 0.0 }
   0x5   :  { %57 = vadd.xlane.f32.xlu2 %v56_v5  ;;  %v83_v15 = vsel %vm55_vm0, %v1257_v12, 0.0  ;;  %v80_v16 = vsel %vm55_vm0, %v1262_v13, 0.0  ;;  %v137_v23 = vsel %vm55_vm0, %v1288_v20, 0.0  ;;  %v1299_v24 = vld [vmem:[%s2607_s0 + $0x18] sm:$0xff]  ;;  %v1304_v25 = vld [vmem:[%s2607_s0 + $0x10] sm:$0xff]  ;;  %v1320_v30 = vld [vmem:[%s2607_s0 + $0xa0] sm:$0xff] }
   0x6   :  { %v1309_v26 = vld [vmem:[%s2607_s0 + $0x50] sm:$0xff]  ;;  %v65_v27 = vsel %vm55_vm0, %v1299_v24, 0.0  ;;  %v62_v28 = vsel %vm55_vm0, %v1304_v25, 0.0  ;;  %v1325_v31 = vld [vmem:[%s2607_s0 + $0x58] sm:$0xff]  ;;  %v1330_v32 = vld [vmem:[%s2607_s0 + $0xa8] sm:$0xff]  ;;  %v116_v33 = vsel %vm55_vm0, %v1320_v30, 0.0 }
   0x7   :  { %v86_v29 = vsel %vm55_vm0, %v1309_v26, 0.0  ;;  %v89_v34 = vsel %vm55_vm0, %v1325_v31, 0.0  ;;  %v119_v35 = vsel %vm55_vm0, %v1330_v32, 0.0  ;;  %v1341_v36 = vld [vmem:[%s2607_s0 + $0xe8] sm:$0xff]  ;;  %v1346_v37 = vld [vmem:[%s2607_s0 + $0xe0] sm:$0xff]  ;;  %v1383_v48 = vld [vmem:[%s2607_s0 + $0xb0] sm:$0xff] }
   0x8   :  { %v1351_v38 = vld [vmem:[%s2607_s0 + $0x20] sm:$0xff]  ;;  %v143_v39 = vsel %vm55_vm0, %v1341_v36, 0.0  ;;  %v140_v40 = vsel %vm55_vm0, %v1346_v37, 0.0  ;;  %v1367_v43 = vld [vmem:[%s2607_s0 + $0x28] sm:$0xff]  ;;  %v1388_v49 = vld [vmem:[%s2607_s0 + $0xf0] sm:$0xff]  ;;  %v122_v51 = vsel %vm55_vm0, %v1383_v48, 0.0 }
   0x9   :  { %v68_v41 = vsel %vm55_vm0, %v1351_v38, 0.0  ;;  %v1362_v42 = vld [vmem:[%s2607_s0 + $0x60] sm:$0xff]  ;;  %v1372_v44 = vld [vmem:[%s2607_s0 + $0x68] sm:$0xff]  ;;  %v71_v46 = vsel %vm55_vm0, %v1367_v43, 0.0  ;;  %v1393_v50 = vld [vmem:[%s2607_s0 + $0xb8] sm:$0xff]  ;;  %v146_v52 = vsel %vm55_vm0, %v1388_v49, 0.0 }
   0xa   :  { %v92_v45 = vsel %vm55_vm0, %v1362_v42, 0.0  ;;  %v95_v47 = vsel %vm55_vm0, %v1372_v44, 0.0  ;;  %v125_v53 = vsel %vm55_vm0, %v1393_v50, 0.0  ;;  %v1404_v54 = vld [vmem:[%s2607_s0 + $0xf8] sm:$0xff]  ;;  %v1409_v55 = vld [vmem:[%s2607_s0 + $0x30] sm:$0xff]  ;;  %v1181_v3 = vmov 32.0  }
   0xb   :  { %132 = vadd.xlane.f32.xlu1 %v131_v9  ;;  %v1414_v56 = vld [vmem:[%s2607_s0 + $0x70] sm:$0xff]  ;;  %v149_v57 = vsel %vm55_vm0, %v1404_v54, 0.0  ;;  %v74_v58 = vsel %vm55_vm0, %v1409_v55, 0.0  ;;  %v1425_v60 = vld [vmem:[%s2607_s0 + $0x38] sm:$0xff]  ;;  %1115 = vrcp.f32 %v1181_v3 }
   0xc   :  { %108 = vadd.xlane.f32.xlu0 %v107_v10  ;;  %v98_v59 = vsel %vm55_vm0, %v1414_v56, 0.0  ;;  %v1430_v61 = vld [vmem:[%s2607_s0 + $0x78] sm:$0xff]  ;;  %v77_v62 = vsel %vm55_vm0, %v1425_v60, 0.0 }
   0xd   :  { %60 = vadd.xlane.f32.xlu2 %v59_v11  ;;  %v101_v63 = vsel %vm55_vm0, %v1430_v61, 0.0 }
  0x11   :  { %v1116_v4 = vpop.eup %1115 }
  0x12   :  { %v153_v5 = vmul.f32 32.0, %v1116_v4  ;;  %vm157_vm1 = vweird.f32 %v1116_v4 }
  0x13   :  { %84 = vadd.xlane.f32.xlu1 %v83_v15 }
  0x14   :  { %81 = vadd.xlane.f32.xlu0 %v80_v16  ;;  %v154_v9 = vsub.f32 1.0, %v153_v5 }
  0x15   :  { %111 = vadd.xlane.f32.xlu2 %v110_v17 }
  0x16   :  { %v155_v10 = vmul.f32 %v1116_v4, %v154_v9 }
  0x18   :  { %v156_v11 = vadd.f32 %v1116_v4, %v155_v10 }
  0x1a   :  { %v1436_v15 = vsel %vm157_vm1, %v1116_v4, %v156_v11 }
  0x1b   :  { %135 = vadd.xlane.f32.xlu1 %v134_v21 }
  0x1c   :  { %114 = vadd.xlane.f32.xlu0 %v113_v22 }
  0x1d   :  { %138 = vadd.xlane.f32.xlu2 %v137_v23 }
  0x23   :  { %66 = vadd.xlane.f32.xlu1 %v65_v27 }
  0x24   :  { %63 = vadd.xlane.f32.xlu0 %v62_v28 }
  0x25   :  { %87 = vadd.xlane.f32.xlu2 %v86_v29 }
  0x2b   :  { %117 = vadd.xlane.f32.xlu1 %v116_v33 }
  0x2c   :  { %90 = vadd.xlane.f32.xlu0 %v89_v34 }
  0x2d   :  { %120 = vadd.xlane.f32.xlu2 %v119_v35 }
  0x33   :  { %144 = vadd.xlane.f32.xlu1 %v143_v39 }
  0x34   :  { %141 = vadd.xlane.f32.xlu0 %v140_v40 }
  0x35   :  { %69 = vadd.xlane.f32.xlu2 %v68_v41 }
  0x3b   :  { %93 = vadd.xlane.f32.xlu1 %v92_v45 }
  0x3c   :  { %72 = vadd.xlane.f32.xlu0 %v71_v46 }
  0x3d   :  { %96 = vadd.xlane.f32.xlu2 %v95_v47 }
  0x43   :  { %123 = vadd.xlane.f32.xlu1 %v122_v51 }
  0x44   :  { %147 = vadd.xlane.f32.xlu0 %v146_v52 }
  0x45   :  { %126 = vadd.xlane.f32.xlu2 %v125_v53 }
  0x4b   :  { %150 = vadd.xlane.f32.xlu1 %v149_v57 }
  0x4c   :  { %75 = vadd.xlane.f32.xlu0 %v74_v58 }
  0x4d   :  { %99 = vadd.xlane.f32.xlu2 %v98_v59 }
  0x53   :  { %78 = vadd.xlane.f32.xlu1 %v77_v62 }
  0x54   :  { %102 = vadd.xlane.f32.xlu0 %v101_v63 }
  0x76   :  { %v130_v16 = vpop.xlane.xlu1 %129 }
  0x77   :  { %v106_v17 = vpop.xlane.xlu0 %105  ;;  %v183_v21 = vmul.f32 %v1436_v15, %v130_v16 }
  0x78   :  { %v175_v22 = vmul.f32 %v1436_v15, %v106_v17  ;;  %v58_v23 = vpop.xlane.xlu2 %57 }
  0x79   :  { %v1441_v27 = vsub.f32 %v1215_v0, %v183_v21  ;;  %v159_v29 = vmul.f32 %v1436_v15, %v58_v23 }
  0x7a   :  { %v1444_v28 = vsub.f32 %v1220_v1, %v175_v22 }
  0x7b   :  { %v247_v34 = vmul.f32 %v1441_v27, %v1441_v27  ;;  %v1454_v40 = vsub.f32 %v1225_v2, %v159_v29 }
  0x7c   :  { %v239_v33 = vmul.f32 %v1444_v28, %v1444_v28 }
  0x7d   :  { %v327_v39 = vsel %vm55_vm0, %v247_v34, 0.0  ;;  %v223_v2 = vmul.f32 %v1454_v40, %v1454_v40 }
  0x7e   :  { %v303_v35 = vsel %vm55_vm0, %v239_v33, 0.0  ;;  %v133_v0 = vpop.xlane.xlu1 %132  ;;  %328 = vadd.xlane.f32.xlu2 %v327_v39 }
  0x7f   :  { %v109_v41 = vpop.xlane.xlu0 %108  ;;  %304 = vadd.xlane.f32.xlu0 %v303_v35  ;;  %v184_v1 = vmul.f32 %v1436_v15, %v133_v0  ;;  %v255_v63 = vsel %vm55_vm0, %v223_v2, 0.0 }
  0x80   :  { %v176_v45 = vmul.f32 %v1436_v15, %v109_v41  ;;  %v61_v46 = vpop.xlane.xlu2 %60 }
  0x81   :  { %v1459_v47 = vsub.f32 %v1236_v6, %v184_v1  ;;  %v160_v52 = vmul.f32 %v1436_v15, %v61_v46 }
  0x82   :  { %v1462_v51 = vsub.f32 %v1241_v7, %v176_v45 }
  0x83   :  { %v248_v57 = vmul.f32 %v1459_v47, %v1459_v47  ;;  %v1472_v58 = vsub.f32 %v1246_v8, %v160_v52 }
  0x84   :  { %v240_v53 = vmul.f32 %v1462_v51, %v1462_v51 }
  0x85   :  { %v330_v59 = vsel %vm55_vm0, %v248_v57, 0.0  ;;  %v224_v11 = vmul.f32 %v1472_v58, %v1472_v58 }
  0x86   :  { %v306_v6 = vsel %vm55_vm0, %v240_v53, 0.0  ;;  %v85_v7 = vpop.xlane.xlu1 %84  ;;  %256 = vadd.xlane.f32.xlu2 %v255_v63 }
  0x87   :  { %v82_v62 = vpop.xlane.xlu0 %81  ;;  %307 = vadd.xlane.f32.xlu1 %v306_v6  ;;  %331 = vadd.xlane.f32.xlu0 %v330_v59  ;;  %v168_v3 = vmul.f32 %v1436_v15, %v85_v7 }
  0x88   :  { %v167_v4 = vmul.f32 %v1436_v15, %v82_v62  ;;  %v112_v5 = vpop.xlane.xlu2 %111 }
  0x89   :  { %v1480_v9 = vsub.f32 %v1257_v12, %v168_v3  ;;  %v177_v10 = vmul.f32 %v1436_v15, %v112_v5 }
  0x8a   :  { %v1483_v8 = vsub.f32 %v1262_v13, %v167_v4  ;;  %v258_v13 = vsel %vm55_vm0, %v224_v11, 0.0 }
  0x8b   :  { %v232_v17 = vmul.f32 %v1480_v9, %v1480_v9  ;;  %v1493_v21 = vsub.f32 %v1267_v14, %v177_v10 }
  0x8c   :  { %v231_v16 = vmul.f32 %v1483_v8, %v1483_v8 }
  0x8d   :  { %v282_v22 = vsel %vm55_vm0, %v232_v17, 0.0  ;;  %v241_v41 = vmul.f32 %v1493_v21, %v1493_v21 }
  0x8e   :  { %v279_v12 = vsel %vm55_vm0, %v231_v16, 0.0  ;;  %v136_v23 = vpop.xlane.xlu1 %135  ;;  %283 = vadd.xlane.f32.xlu2 %v282_v22 }
  0x8f   :  { %v115_v29 = vpop.xlane.xlu0 %114  ;;  %280 = vadd.xlane.f32.xlu1 %v279_v12  ;;  %259 = vadd.xlane.f32.xlu0 %v258_v13  ;;  %v185_v33 = vmul.f32 %v1436_v15, %v136_v23 }
  0x90   :  { %v178_v34 = vmul.f32 %v1436_v15, %v115_v29  ;;  %v139_v35 = vpop.xlane.xlu2 %138 }
  0x91   :  { %v1501_v39 = vsub.f32 %v1278_v18, %v185_v33  ;;  %v186_v0 = vmul.f32 %v1436_v15, %v139_v35 }
  0x92   :  { %v1504_v14 = vsub.f32 %v1283_v19, %v178_v34  ;;  %v309_v19 = vsel %vm55_vm0, %v241_v41, 0.0 }
  0x93   :  { %v249_v45 = vmul.f32 %v1501_v39, %v1501_v39  ;;  %v1514_v46 = vsub.f32 %v1288_v20, %v186_v0 }
  0x94   :  { %v242_v1 = vmul.f32 %v1504_v14, %v1504_v14 }
  0x95   :  { %v333_v52 = vsel %vm55_vm0, %v249_v45, 0.0  ;;  %v250_v63 = vmul.f32 %v1514_v46, %v1514_v46 }
  0x96   :  { %v312_v18 = vsel %vm55_vm0, %v242_v1, 0.0  ;;  %v67_v2 = vpop.xlane.xlu1 %66 }
  0x97   :  { %v64_v53 = vpop.xlane.xlu0 %63  ;;  %334 = vadd.xlane.f32.xlu0 %v333_v52  ;;  %310 = vadd.xlane.f32.xlu1 %v309_v19  ;;  %v162_v57 = vmul.f32 %v1436_v15, %v67_v2 }
  0x98   :  { %v161_v6 = vmul.f32 %v1436_v15, %v64_v53  ;;  %313 = vadd.xlane.f32.xlu2 %v312_v18  ;;  %v88_v59 = vpop.xlane.xlu2 %87 }
  0x99   :  { %v1522_v7 = vsub.f32 %v1299_v24, %v162_v57  ;;  %v169_v62 = vmul.f32 %v1436_v15, %v88_v59 }
  0x9a   :  { %v1525_v20 = vsub.f32 %v1304_v25, %v161_v6  ;;  %v336_v25 = vsel %vm55_vm0, %v250_v63, 0.0 }
  0x9b   :  { %v226_v4 = vmul.f32 %v1522_v7, %v1522_v7  ;;  %v1535_v5 = vsub.f32 %v1309_v26, %v169_v62 }
  0x9c   :  { %v225_v3 = vmul.f32 %v1525_v20, %v1525_v20 }
  0x9d   :  { %v264_v10 = vsel %vm55_vm0, %v226_v4, 0.0  ;;  %v233_v29 = vmul.f32 %v1535_v5, %v1535_v5 }
  0x9e   :  { %v261_v24 = vsel %vm55_vm0, %v225_v3, 0.0  ;;  %v118_v11 = vpop.xlane.xlu1 %117 }
  0x9f   :  { %v91_v16 = vpop.xlane.xlu0 %90  ;;  %265 = vadd.xlane.f32.xlu0 %v264_v10  ;;  %337 = vadd.xlane.f32.xlu1 %v336_v25  ;;  %v179_v17 = vmul.f32 %v1436_v15, %v118_v11 }
  0xa0   :  { %v170_v12 = vmul.f32 %v1436_v15, %v91_v16  ;;  %262 = vadd.xlane.f32.xlu2 %v261_v24  ;;  %v121_v22 = vpop.xlane.xlu2 %120 }
  0xa1   :  { %v1543_v13 = vsub.f32 %v1320_v30, %v179_v17  ;;  %v180_v23 = vmul.f32 %v1436_v15, %v121_v22 }
  0xa2   :  { %v1546_v26 = vsub.f32 %v1325_v31, %v170_v12  ;;  %v285_v31 = vsel %vm55_vm0, %v233_v29, 0.0 }
  0xa3   :  { %v243_v34 = vmul.f32 %v1543_v13, %v1543_v13  ;;  %v1556_v35 = vsub.f32 %v1330_v32, %v180_v23 }
  0xa4   :  { %v234_v33 = vmul.f32 %v1546_v26, %v1546_v26 }
  0xa5   :  { %v315_v0 = vsel %vm55_vm0, %v243_v34, 0.0  ;;  %v244_v53 = vmul.f32 %v1556_v35, %v1556_v35 }
  0xa6   :  { %v288_v30 = vsel %vm55_vm0, %v234_v33, 0.0  ;;  %v145_v41 = vpop.xlane.xlu1 %144 }
  0xa7   :  { %v142_v1 = vpop.xlane.xlu0 %141  ;;  %316 = vadd.xlane.f32.xlu0 %v315_v0  ;;  %286 = vadd.xlane.f32.xlu1 %v285_v31  ;;  %v188_v45 = vmul.f32 %v1436_v15, %v145_v41 }
  0xa8   :  { %v187_v18 = vmul.f32 %v1436_v15, %v142_v1  ;;  %289 = vadd.xlane.f32.xlu2 %v288_v30  ;;  %v70_v52 = vpop.xlane.xlu2 %69 }
  0xa9   :  { %v1564_v19 = vsub.f32 %v1341_v36, %v188_v45  ;;  %v163_v2 = vmul.f32 %v1436_v15, %v70_v52 }
  0xaa   :  { %v1567_v32 = vsub.f32 %v1346_v37, %v187_v18  ;;  %v318_v37 = vsel %vm55_vm0, %v244_v53, 0.0 }
  0xab   :  { %v252_v6 = vmul.f32 %v1564_v19, %v1564_v19  ;;  %v1577_v59 = vsub.f32 %v1351_v38, %v163_v2 }
  0xac   :  { %v251_v57 = vmul.f32 %v1567_v32, %v1567_v32 }
  0xad   :  { %v342_v62 = vsel %vm55_vm0, %v252_v6, 0.0  ;;  %v227_v16 = vmul.f32 %v1577_v59, %v1577_v59 }
  0xae   :  { %v339_v36 = vsel %vm55_vm0, %v251_v57, 0.0  ;;  %v94_v63 = vpop.xlane.xlu1 %93 }
  0xaf   :  { %v73_v3 = vpop.xlane.xlu0 %72  ;;  %343 = vadd.xlane.f32.xlu0 %v342_v62  ;;  %319 = vadd.xlane.f32.xlu1 %v318_v37  ;;  %v171_v4 = vmul.f32 %v1436_v15, %v94_v63 }
  0xb0   :  { %v164_v24 = vmul.f32 %v1436_v15, %v73_v3  ;;  %340 = vadd.xlane.f32.xlu2 %v339_v36  ;;  %v97_v10 = vpop.xlane.xlu2 %96 }
  0xb1   :  { %v1585_v25 = vsub.f32 %v1362_v42, %v171_v4  ;;  %v172_v11 = vmul.f32 %v1436_v15, %v97_v10 }
  0xb2   :  { %v1588_v38 = vsub.f32 %v1367_v43, %v164_v24  ;;  %v267_v43 = vsel %vm55_vm0, %v227_v16, 0.0 }
  0xb3   :  { %v235_v12 = vmul.f32 %v1585_v25, %v1585_v25  ;;  %v1598_v22 = vsub.f32 %v1372_v44, %v172_v11 }
  0xb4   :  { %v228_v17 = vmul.f32 %v1588_v38, %v1588_v38 }
  0xb5   :  { %v291_v23 = vsel %vm55_vm0, %v235_v12, 0.0  ;;  %v236_v41 = vmul.f32 %v1598_v22, %v1598_v22 }
  0xb6   :  { %v270_v42 = vsel %vm55_vm0, %v228_v17, 0.0  ;;  %v124_v29 = vpop.xlane.xlu1 %123 }
  0xb7   :  { %v148_v33 = vpop.xlane.xlu0 %147  ;;  %292 = vadd.xlane.f32.xlu0 %v291_v23  ;;  %268 = vadd.xlane.f32.xlu1 %v267_v43  ;;  %v181_v34 = vmul.f32 %v1436_v15, %v124_v29  ;;  %v294_v2 = vsel %vm55_vm0, %v236_v41, 0.0 }
  0xb8   :  { %271 = vadd.xlane.f32.xlu2 %v270_v42  ;;  %v127_v30 = vpop.xlane.xlu2 %126  ;;  %v189_v44 = vmul.f32 %v1436_v15, %v148_v33 }
  0xb9   :  { %v182_v0 = vmul.f32 %v1436_v15, %v127_v30  ;;  %v1606_v31 = vsub.f32 %v1383_v48, %v181_v34 }
  0xba   :  { %v1619_v52 = vsub.f32 %v1388_v49, %v189_v44 }
  0xbb   :  { %v1612_v1 = vsub.f32 %v1393_v50, %v182_v0  ;;  %v245_v45 = vmul.f32 %v1606_v31, %v1606_v31 }
  0xbc   :  { %v253_v3 = vmul.f32 %v1619_v52, %v1619_v52 }
  0xbd   :  { %v246_v18 = vmul.f32 %v1612_v1, %v1612_v1  ;;  %v321_v48 = vsel %vm55_vm0, %v245_v45, 0.0 }
  0xbe   :  { %v151_v53 = vpop.xlane.xlu1 %150 }
  0xbf   :  { %v76_v57 = vpop.xlane.xlu0 %75  ;;  %295 = vadd.xlane.f32.xlu1 %v294_v2  ;;  %v324_v6 = vsel %vm55_vm0, %v246_v18, 0.0  ;;  %v190_v50 = vmul.f32 %v1436_v15, %v151_v53 }
  0xc0   :  { %v165_v36 = vmul.f32 %v1436_v15, %v76_v57  ;;  %322 = vadd.xlane.f32.xlu2 %v321_v48  ;;  %325 = vadd.xlane.f32.xlu0 %v324_v6  ;;  %v100_v62 = vpop.xlane.xlu2 %99  ;;  %v1104_v48 = vld [vmem:[%s2610_s3 + $0x8] sm:$0xff] }
  0xc1   :  { %v173_v37 = vmul.f32 %v1436_v15, %v100_v62  ;;  %v1628_v49 = vsub.f32 %v1404_v54, %v190_v50  ;;  %v345_v54 = vsel %vm55_vm0, %v253_v3, 0.0  ;;  %1106 = vmatpush.bf16.msra.mxu2 %v1104_v48  ;;  %1107 = vmatpush.bf16.msra.mxu3 %v1104_v48  ;;  %v1103_v62 = vld [vmem:[%s2610_s3] sm:$0xff] }
  0xc2   :  { %v1631_v63 = vsub.f32 %v1409_v55, %v165_v36  ;;  %927 = vmatpush.bf16.msra.mxu0 %v1104_v48  ;;  %1105 = vmatpush.bf16.msra.mxu1 %v1104_v48 }
  0xc3   :  { %v254_v4 = vmul.f32 %v1628_v49, %v1628_v49  ;;  %v1640_v10 = vsub.f32 %v1414_v56, %v173_v37 }
  0xc4   :  { %2617 = vst [vmem:[#allocation2_spill] sm:$0xff] %v1631_v63  ;;  %v229_v24 = vmul.f32 %v1631_v63, %v1631_v63 }
  0xc5   :  { %2618 = vst [vmem:[#allocation3_spill] sm:$0xff] %v1640_v10  ;;  %v348_v11 = vsel %vm55_vm0, %v254_v4, 0.0  ;;  %v237_v23 = vmul.f32 %v1640_v10, %v1640_v10  ;;  %1109 = vmatpush.bf16.msra.mxu2 %v1103_v62  ;;  %1110 = vmatpush.bf16.msra.mxu3 %v1103_v62 }
  0xc6   :  { %v273_v16 = vsel %vm55_vm0, %v229_v24, 0.0  ;;  %v79_v55 = vpop.xlane.xlu1 %78  ;;  %928 = vmatpush.bf16.msra.mxu0 %v1103_v62  ;;  %1108 = vmatpush.bf16.msra.mxu1 %v1103_v62 }
  0xc7   :  { %v103_v17 = vpop.xlane.xlu0 %102  ;;  %346 = vadd.xlane.f32.xlu1 %v345_v54  ;;  %v166_v12 = vmul.f32 %v1436_v15, %v79_v55  ;;  %v297_v34 = vsel %vm55_vm0, %v237_v23, 0.0 }
  0xc8   :  { %v174_v42 = vmul.f32 %v1436_v15, %v103_v17  ;;  %349 = vadd.xlane.f32.xlu2 %v348_v11  ;;  %274 = vadd.xlane.f32.xlu0 %v273_v16 }
  0xc9   :  { %v1650_v56 = vsub.f32 %v1425_v60, %v166_v12 }
  0xca   :  { %v1653_v43 = vsub.f32 %v1430_v61, %v174_v42 }
  0xcb   :  { %2619 = vst [vmem:[#allocation4_spill] sm:$0xff] %v1650_v56  ;;  %v230_v29 = vmul.f32 %v1650_v56, %v1650_v56 }
  0xcc   :  { %2620 = vst [vmem:[#allocation5_spill] sm:$0xff] %v1653_v43  ;;  %v238_v33 = vmul.f32 %v1653_v43, %v1653_v43 }
  0xcd   :  { %v276_v30 = vsel %vm55_vm0, %v230_v29, 0.0 }
  0xce   :  { %v300_v0 = vsel %vm55_vm0, %v238_v33, 0.0 }
  0xcf   :  { %277 = vadd.xlane.f32.xlu1 %v276_v30 }
  0xd0   :  { %301 = vadd.xlane.f32.xlu0 %v300_v0  ;;  %298 = vadd.xlane.f32.xlu2 %v297_v34 }
  0xf1   :  { %v329_v44 = vpop.xlane.xlu2 %328 }
  0xf2   :  { %v305_v60 = vpop.xlane.xlu0 %304  ;;  %v375_v41 = vmul.f32 %v329_v44, %v1436_v15 }
  0xf3   :  { %v367_v61 = vmul.f32 %v305_v60, %v1436_v15 }
  0xf4   :  { %v1666_v18 = vadd.f32 1e-05, %v375_v41 }
  0xf5   :  { %v1664_v45 = vadd.f32 1e-05, %v367_v61 }
  0xf6   :  { %vm661_vm7 = vweird.f32 %v1666_v18 }
  0xf7   :  { %1117 = vrsqrt.f32 %v1664_v45  ;;  %vm581_vm2 = vweird.f32 %v1664_v45 }
  0xf8   :  { %1119 = vrsqrt.f32 %v1666_v18 }
  0xf9   :  { %v257_v50 = vpop.xlane.xlu2 %256 }
  0xfa   :  { %v308_v2 = vpop.xlane.xlu1 %307  ;;  %v332_v53 = vpop.xlane.xlu0 %331  ;;  %v351_v36 = vmul.f32 %v257_v50, %v1436_v15 }
  0xfb   :  { %v368_v57 = vmul.f32 %v308_v2, %v1436_v15  ;;  %v376_v6 = vmul.f32 %v332_v53, %v1436_v15 }
  0xfc   :  { %v1689_v54 = vadd.f32 1e-05, %v351_v36 }
  0xfd   :  { %v1679_v37 = vpop.eup %1117  ;;  %v1681_v3 = vadd.f32 1e-05, %v368_v57  ;;  %v1683_v4 = vadd.f32 1e-05, %v376_v6 }
  0xfe   :  { %v1685_v24 = vpop.eup %1119  ;;  %v576_v11 = vmul.f32 %v1679_v37, %v1664_v45  ;;  %vm582_vm3 = vweird.f32 %v1679_v37  ;;  %vm421_vm13 = vweird.f32 %v1689_v54 }
  0xff   :  { %v656_v16 = vmul.f32 %v1685_v24, %v1666_v18  ;;  %1121 = vrsqrt.f32 %v1681_v3  ;;  %vm662_vm4 = vweird.f32 %v1685_v24  ;;  %vm1734_vm6 = vmor %vm581_vm2, %vm582_vm3  ;;  %vm591_vm9 = vweird.f32 %v1681_v3 }
 0x100   :  { %v577_v55 = vmul.f32 %v1679_v37, %v576_v11  ;;  %1123 = vrsqrt.f32 %v1683_v4  ;;  %vm1742_vm8 = vmor %vm661_vm7, %vm662_vm4  ;;  %vm671_vm12 = vweird.f32 %v1683_v4 }
 0x101   :  { %v657_v17 = vmul.f32 %v1685_v24, %v656_v16  ;;  %1125 = vrsqrt.f32 %v1689_v54  ;;  %v284_v34 = vpop.xlane.xlu2 %283 }
 0x102   :  { %v281_v12 = vpop.xlane.xlu1 %280  ;;  %v260_v42 = vpop.xlane.xlu0 %259  ;;  %v578_v23 = vmul.f32 0.5, %v577_v55  ;;  %v360_v0 = vmul.f32 %v284_v34, %v1436_v15 }
 0x103   :  { %v359_v29 = vmul.f32 %v281_v12, %v1436_v15  ;;  %v352_v33 = vmul.f32 %v260_v42, %v1436_v15  ;;  %v658_v30 = vmul.f32 0.5, %v657_v17 }
 0x104   :  { %v579_v53 = vsub.f32 1.5, %v578_v23  ;;  %v1713_v6 = vadd.f32 1e-05, %v360_v0 }
 0x105   :  { %v1122_v60 = vpop.eup %1121  ;;  %v1701_v44 = vadd.f32 1e-05, %v359_v29  ;;  %v1706_v48 = vadd.f32 1e-05, %v352_v33  ;;  %v659_v50 = vsub.f32 1.5, %v658_v30 }
 0x106   :  { %v1703_v61 = vpop.eup %1123  ;;  %v586_v41 = vmul.f32 %v1122_v60, %v1681_v3  ;;  %v580_v42 = vmul.f32 %v1679_v37, %v579_v53  ;;  %vm592_vm5 = vweird.f32 %v1122_v60 }
 0x107   :  { %v1708_v2 = vpop.eup %1125  ;;  %v666_v57 = vmul.f32 %v1703_v61, %v1683_v4  ;;  %1127 = vrsqrt.f32 %v1701_v44  ;;  %v660_v33 = vmul.f32 %v1685_v24, %v659_v50  ;;  %vm1753_vm10 = vmor %vm591_vm9, %vm592_vm5  ;;  %vm672_vm11 = vweird.f32 %v1703_v61  ;;  %v1788_v4 = vld [vmem:[%s2608_s1] ss:$0 sm:$0xff] }
 0x108   :  { %v587_v36 = vmul.f32 %v1122_v60, %v586_v41  ;;  %v416_v62 = vmul.f32 %v1708_v2, %v1689_v54  ;;  %1129 = vrsqrt.f32 %v1706_v48  ;;  %v584_v18 = vsel %vm1734_vm6, %v1679_v37, %v580_v42  ;;  %vm1793_vm14 = vmor %vm671_vm12, %vm672_vm11 }
 0x109   :  { %v667_v11 = vmul.f32 %v1703_v61, %v666_v57  ;;  %1131 = vrsqrt.f32 %v1713_v6  ;;  %v664_v3 = vsel %vm1742_vm8, %v1685_v24, %v660_v33  ;;  %v751_v33 = vmul.f32 %v584_v18, %v1444_v28 }
 0x10a   :  { %v588_v16 = vmul.f32 0.5, %v587_v36  ;;  %v417_v55 = vmul.f32 %v1708_v2, %v416_v62  ;;  %v335_v17 = vpop.xlane.xlu0 %334  ;;  %v311_v12 = vpop.xlane.xlu1 %310  ;;  %vm422_vm15 = vweird.f32 %v1708_v2  ;;  %vm501_vm1 = vweird.f32 %v1701_v44 }
 0x10b   :  { %v668_v23 = vmul.f32 0.5, %v667_v11  ;;  %v314_v29 = vpop.xlane.xlu2 %313  ;;  %v377_v30 = vmul.f32 %v335_v17, %v1436_v15  ;;  %v369_v0 = vmul.f32 %v311_v12, %v1436_v15  ;;  %vm1821_vm2 = vmor %vm421_vm13, %vm422_vm15  ;;  %vm431_vm3 = vweird.f32 %v1706_v48 }
 0x10c   :  { %v589_v34 = vsub.f32 1.5, %v588_v16  ;;  %v418_v36 = vmul.f32 0.5, %v417_v55  ;;  %v370_v50 = vmul.f32 %v314_v29, %v1436_v15  ;;  %vm511_vm5 = vweird.f32 %v1713_v6 }
 0x10d   :  { %v1728_v41 = vpop.eup %1127  ;;  %v669_v57 = vsub.f32 1.5, %v668_v23  ;;  %v1758_v55 = vadd.f32 1e-05, %v377_v30  ;;  %v1768_v42 = vadd.f32 1e-05, %v369_v0 }
 0x10e   :  { %v590_v11 = vmul.f32 %v1122_v60, %v589_v34  ;;  %v496_v45 = vmul.f32 %v1728_v41, %v1701_v44  ;;  %v1760_v17 = vpop.eup %1129  ;;  %v419_v34 = vsub.f32 1.5, %v418_v36  ;;  %v1775_v53 = vadd.f32 1e-05, %v370_v50 }
 0x10f   :  { %v1770_v23 = vpop.eup %1131  ;;  %v670_v29 = vmul.f32 %v1703_v61, %v669_v57  ;;  %v426_v30 = vmul.f32 %v1760_v17, %v1706_v48  ;;  %1133 = vrsqrt.f32 %v1758_v55  ;;  %v759_v50 = vmul.f32 %v664_v3, %v1441_v27 }
 0x110   :  { %v594_v12 = vsel %vm1753_vm10, %v1122_v60, %v590_v11  ;;  %v497_v37 = vmul.f32 %v1728_v41, %v496_v45  ;;  %v506_v60 = vmul.f32 %v1770_v23, %v1713_v6  ;;  %1135 = vrsqrt.f32 %v1768_v42 }
 0x111   :  { %v752_v0 = vmul.f32 %v594_v12, %v1462_v51  ;;  %v427_v57 = vmul.f32 %v1760_v17, %v426_v30  ;;  %v674_v45 = vsel %vm1793_vm14, %v1703_v61, %v670_v29  ;;  %v420_v18 = vmul.f32 %v1708_v2, %v419_v34  ;;  %v1814_v61 = vld [vmem:[%s2609_s2] ss:$0 sm:$0xff] }
 0x112   :  { %v498_v24 = vmul.f32 0.5, %v497_v37  ;;  %v266_v36 = vpop.xlane.xlu0 %265  ;;  %v338_v62 = vpop.xlane.xlu1 %337  ;;  %v507_v28 = vmul.f32 %v1770_v23, %v506_v60  ;;  %1137 = vrsqrt.f32 %v1775_v53  ;;  %v786_v60 = vmul.f32 %v1788_v4, %v751_v33 }
 0x113   :  { %v263_v51 = vpop.xlane.xlu2 %262  ;;  %v428_v16 = vmul.f32 0.5, %v427_v57  ;;  %v354_v3 = vmul.f32 %v266_v36, %v1436_v15  ;;  %v378_v12 = vmul.f32 %v338_v62, %v1436_v15  ;;  %v787_v11 = vmul.f32 %v1788_v4, %v752_v0 }
 0x114   :  { %v499_v27 = vsub.f32 1.5, %v498_v24  ;;  %v508_v37 = vmul.f32 0.5, %v507_v28  ;;  %v353_v30 = vmul.f32 %v263_v51, %v1436_v15  ;;  %v760_v29 = vmul.f32 %v674_v45, %v1459_v47 }
 0x115   :  { %v1826_v24 = vadd.f32 1e-05, %v354_v3  ;;  %v794_v33 = vmul.f32 %v1788_v4, %v759_v50  ;;  %v1829_v0 = vpop.eup %1133  ;;  %v424_v47 = vsel %vm1821_vm2, %v1708_v2, %v420_v18  ;;  %vm502_vm4 = vweird.f32 %v1728_v41 }
 0x116   :  { %v500_v57 = vmul.f32 %v1728_v41, %v499_v27  ;;  %v1837_v54 = vadd.f32 1e-05, %v378_v12  ;;  %v1839_v36 = vpop.eup %1135  ;;  %v429_v62 = vsub.f32 1.5, %v428_v16  ;;  %v676_v50 = vmul.f32 %v1829_v0, %v1758_v55  ;;  %vm1864_vm7 = vmor %vm501_vm1, %vm502_vm4 }
 0x117   :  { %1139 = vrsqrt.f32 %v1826_v24  ;;  %v1844_v28 = vadd.f32 1e-05, %v353_v30  ;;  %v509_v2 = vsub.f32 1.5, %v508_v37  ;;  %v596_v45 = vmul.f32 %v1839_v36, %v1768_v42 }
 0x118   :  { %v1846_v51 = vpop.eup %1137  ;;  %v821_v18 = vadd.f32 %v1814_v61, %v786_v60  ;;  %v822_v27 = vadd.f32 %v1814_v61, %v787_v11  ;;  %vm432_vm6 = vweird.f32 %v1760_v17  ;;  %v677_v16 = vmul.f32 %v1829_v0, %v676_v50 }
 0x119   :  { %v606_v3 = vmul.f32 %v1846_v51, %v1775_v53  ;;  %v795_v12 = vmul.f32 %v1788_v4, %v760_v29  ;;  %v1858_v30 = vmul.f32 %v424_v47, %v1454_v40  ;;  %vm512_vm8 = vweird.f32 %v1770_v23  ;;  %vm1887_vm9 = vmor %vm431_vm3, %vm432_vm6 }
 0x11a   :  { %v597_v60 = vmul.f32 %v1839_v36, %v596_v45  ;;  %1141 = vrsqrt.f32 %v1837_v54  ;;  %v317_v11 = vpop.xlane.xlu0 %316  ;;  %v504_v40 = vsel %vm1864_vm7, %v1728_v41, %v500_v57  ;;  %v430_v29 = vmul.f32 %v1760_v17, %v429_v62  ;;  %v287_v44 = vpop.xlane.xlu1 %286  ;;  %vm1905_vm12 = vmor %vm511_vm5, %vm512_vm8 }
 0x11b   :  { %v607_v34 = vmul.f32 %v1846_v51, %v606_v3  ;;  %1143 = vrsqrt.f32 %v1844_v28  ;;  %v510_v47 = vmul.f32 %v1770_v23, %v509_v2  ;;  %v678_v50 = vmul.f32 0.5, %v677_v16  ;;  %v290_v57 = vpop.xlane.xlu2 %289 }
 0x11c   :  { %v598_v10 = vmul.f32 0.5, %v597_v60  ;;  %v845_v43 = vpack.c.bf16 %v822_v27, %v821_v18  ;;  %v829_v63 = vadd.f32 %v1814_v61, %v794_v33  ;;  %v830_v37 = vadd.f32 %v1814_v61, %v795_v12 }
 0x11d   :  { %v1878_v45 = vpop.eup %1139  ;;  %v608_v56 = vmul.f32 0.5, %v607_v34  ;;  %v371_v41 = vmul.f32 %v317_v11, %v1436_v15  ;;  %vm681_vm10 = vweird.f32 %v1758_v55  ;;  %vm601_vm11 = vweird.f32 %v1768_v42 }
 0x11e   :  { %v446_v33 = vmul.f32 %v1878_v45, %v1826_v24  ;;  %1095 = vmatmul.msk.bf16.vlgmr.msra.gmra.mxu2 %vm55_vm0, %v845_v43  ;;  %v361_v2 = vmul.f32 %v287_v44, %v1436_v15  ;;  %v743_v18 = vmul.f32 %v504_v40, %v1483_v8  ;;  %v434_v48 = vsel %vm1887_vm9, %v1760_v17, %v430_v29 }
 0x11f   :  { %v599_v16 = vsub.f32 1.5, %v598_v10  ;;  %vm611_vm13 = vweird.f32 %v1775_v53  ;;  %v849_v43 = vpack.c.bf16 %v830_v37, %v829_v63  ;;  %v514_v8 = vsel %vm1905_vm12, %v1770_v23, %v510_v47 }
 0x120   :  { %v1910_v3 = vpop.eup %1141  ;;  %v679_v12 = vsub.f32 1.5, %v678_v50  ;;  %v447_v17 = vmul.f32 %v1878_v45, %v446_v33  ;;  %v1916_v60 = vadd.f32 1e-05, %v371_v41  ;;  %vm682_vm14 = vweird.f32 %v1829_v0 }
 0x121   :  { %v1918_v6 = vpop.eup %1143  ;;  %v609_v11 = vsub.f32 1.5, %v608_v56  ;;  %v686_v10 = vmul.f32 %v1910_v3, %v1837_v54  ;;  %1099 = vmatmul.msk.bf16.vlgmr.msra.gmra.mxu3 %vm55_vm0, %v849_v43  ;;  %v1924_v63 = vadd.f32 1e-05, %v361_v2  ;;  %v736_v40 = vmul.f32 %v434_v48, %v1472_v58  ;;  %vm1960_vm5 = vmor %vm681_vm10, %vm682_vm14 }
 0x122   :  { %vm602_vm15 = vweird.f32 %v1839_v36  ;;  %v436_v23 = vmul.f32 %v1918_v6, %v1844_v28  ;;  %v362_v29 = vmul.f32 %v290_v57, %v1436_v15  ;;  %v744_v34 = vmul.f32 %v514_v8, %v1480_v9  ;;  %v344_v2 = vpop.xlane.xlu0 %343  ;;  %v320_v43 = vpop.xlane.xlu1 %319 }
 0x123   :  { %v600_v56 = vmul.f32 %v1839_v36, %v599_v16  ;;  %vm612_vm1 = vweird.f32 %v1846_v51  ;;  %v687_v44 = vmul.f32 %v1910_v3, %v686_v10  ;;  %v1936_v47 = vmul.f32 %v1829_v0, %v679_v12  ;;  %vm1947_vm3 = vmor %vm601_vm11, %vm602_vm15  ;;  %v341_v8 = vpop.xlane.xlu2 %340 }
 0x124   :  { %v448_v50 = vmul.f32 0.5, %v447_v17  ;;  %v437_v58 = vmul.f32 %v1918_v6, %v436_v23  ;;  %1145 = vrsqrt.f32 %v1916_v60  ;;  %v610_v37 = vmul.f32 %v1846_v51, %v609_v11  ;;  %vm1979_vm7 = vmor %vm611_vm13, %vm612_vm1 }
 0x125   :  { %v688_v41 = vmul.f32 0.5, %v687_v44  ;;  %vm441_vm2 = vweird.f32 %v1844_v28  ;;  %1147 = vrsqrt.f32 %v1924_v63  ;;  %vm452_vm4 = vweird.f32 %v1878_v45 }
 0x126   :  { %v438_v57 = vmul.f32 0.5, %v437_v58  ;;  %v1952_v62 = vadd.f32 1e-05, %v362_v29  ;;  %v770_v33 = vmul.f32 %v1788_v4, %v1858_v30  ;;  %v604_v42 = vsel %vm1947_vm3, %v1839_v36, %v600_v56 }
 0x127   :  { %vm451_vm6 = vweird.f32 %v1826_v24  ;;  %v771_v27 = vmul.f32 %v1788_v4, %v736_v40  ;;  %v778_v16 = vmul.f32 %v1788_v4, %v743_v18  ;;  %v779_v30 = vmul.f32 %v1788_v4, %v744_v34 }
 0x128   :  { %v684_v55 = vsel %vm1960_vm5, %v1829_v0, %v1936_v47  ;;  %v449_v12 = vsub.f32 1.5, %v448_v50  ;;  %vm691_vm8 = vweird.f32 %v1837_v54  ;;  %v439_v18 = vsub.f32 1.5, %v438_v57  ;;  %vm2038_vm12 = vmor %vm451_vm6, %vm452_vm4 }
 0x129   :  { %1149 = vrsqrt.f32 %v1952_v62  ;;  %v614_v17 = vsel %vm1979_vm7, %v1846_v51, %v610_v37  ;;  %v689_v11 = vsub.f32 1.5, %v688_v41  ;;  %v805_v0 = vadd.f32 %v1814_v61, %v770_v33 }
 0x12a   :  { %v806_v10 = vadd.f32 %v1814_v61, %v771_v27  ;;  %v1990_v53 = vpop.eup %1145  ;;  %v753_v40 = vmul.f32 %v604_v42, %v1493_v21  ;;  %v813_v23 = vadd.f32 %v1814_v61, %v778_v16  ;;  %v814_v29 = vadd.f32 %v1814_v61, %v779_v30 }
 0x12b   :  { %v380_v34 = vmul.f32 %v344_v2, %v1436_v15  ;;  %v1996_v56 = vpop.eup %1147  ;;  %v440_v44 = vmul.f32 %v1918_v6, %v439_v18  ;;  %vm442_vm9 = vweird.f32 %v1918_v6  ;;  %v616_v51 = vmul.f32 %v1990_v53, %v1916_v60  ;;  %v293_v18 = vpop.xlane.xlu0 %292 }
 0x12c   :  { %v837_v47 = vpack.c.bf16 %v806_v10, %v805_v0  ;;  %v754_v50 = vmul.f32 %v614_v17, %v1504_v14  ;;  %v450_v21 = vmul.f32 %v1878_v45, %v449_v12  ;;  %vm692_vm10 = vweird.f32 %v1910_v3  ;;  %vm2016_vm11 = vmor %vm441_vm2, %vm442_vm9  ;;  %v272_v0 = vpop.xlane.xlu2 %271 }
 0x12d   :  { %v516_v58 = vmul.f32 %v1996_v56, %v1924_v63  ;;  %v690_v37 = vmul.f32 %v1910_v3, %v689_v11  ;;  %v617_v41 = vmul.f32 %v1990_v53, %v616_v51  ;;  %v841_v9 = vpack.c.bf16 %v814_v29, %v813_v23  ;;  %vm2050_vm13 = vmor %vm691_vm8, %vm692_vm10  ;;  %v269_v11 = vpop.xlane.xlu1 %268 }
 0x12e   :  { %1087 = vmatmul.msk.bf16.vlgmr.msra.gmra.mxu0 %vm55_vm0, %v837_v47  ;;  %v2010_v57 = vadd.f32 1e-05, %v380_v34  ;;  %v372_v48 = vmul.f32 %v320_v43, %v1436_v15  ;;  %v379_v42 = vmul.f32 %v341_v8, %v1436_v15  ;;  %v788_v27 = vmul.f32 %v1788_v4, %v753_v40 }
 0x12f   :  { %v2012_v33 = vpop.eup %1149  ;;  %v517_v2 = vmul.f32 %v1996_v56, %v516_v58  ;;  %v444_v16 = vsel %vm2016_vm11, %v1918_v6, %v440_v44  ;;  %v618_v30 = vmul.f32 0.5, %v617_v41  ;;  %1091 = vmatmul.msk.bf16.vlgmr.msra.gmra.mxu1 %vm55_vm0, %v841_v9  ;;  %v2032_v36 = vmul.f32 %v684_v55, %v1501_v39 }
 0x130   :  { %v526_v28 = vmul.f32 %v2012_v33, %v1952_v62  ;;  %1151 = vrsqrt.f32 %v2010_v57  ;;  %v2042_v8 = vadd.f32 1e-05, %v372_v48  ;;  %v2044_v12 = vadd.f32 1e-05, %v379_v42 }
 0x131   :  { %v518_v6 = vmul.f32 0.5, %v517_v2  ;;  %vm621_vm14 = vweird.f32 %v1916_v60  ;;  %v789_v55 = vmul.f32 %v1788_v4, %v754_v50  ;;  %v823_v17 = vadd.f32 %v1814_v61, %v788_v27 }
 0x132   :  { %v527_v24 = vmul.f32 %v2012_v33, %v526_v28  ;;  %v454_v10 = vsel %vm2038_vm12, %v1878_v45, %v450_v21  ;;  %v694_v54 = vsel %vm2050_vm13, %v1910_v3, %v690_v37  ;;  %v737_v40 = vmul.f32 %v444_v16, %v1525_v20 }
 0x133   :  { %1153 = vrsqrt.f32 %v2042_v8  ;;  %v619_v23 = vsub.f32 1.5, %v618_v30  ;;  %v824_v34 = vadd.f32 %v1814_v61, %v789_v55  ;;  %v519_v44 = vsub.f32 1.5, %v518_v6 }
 0x134   :  { %v528_v29 = vmul.f32 0.5, %v527_v24  ;;  %1155 = vrsqrt.f32 %v2044_v12  ;;  %v363_v51 = vmul.f32 %v293_v18, %v1436_v15  ;;  %v355_v47 = vmul.f32 %v269_v11, %v1436_v15 }
 0x135   :  { %v356_v45 = vmul.f32 %v272_v0, %v1436_v15  ;;  %v738_v3 = vmul.f32 %v454_v10, %v1522_v7  ;;  %vm521_vm15 = vweird.f32 %v1924_v63  ;;  %vm531_vm1 = vweird.f32 %v1952_v62  ;;  %v326_v63 = vpop.xlane.xlu0 %325 }
 0x136   :  { %v2071_v50 = vpop.eup %1151  ;;  %v846_v20 = vpack.c.bf16 %v824_v34, %v823_v17  ;;  %v762_v21 = vmul.f32 %v694_v54, %v1514_v46  ;;  %vm622_vm2 = vweird.f32 %v1990_v53  ;;  %v529_v58 = vsub.f32 1.5, %v528_v29  ;;  %v296_v17 = vpop.xlane.xlu1 %295 }
 0x137   :  { %v706_v37 = vmul.f32 %v2071_v50, %v2010_v57  ;;  %v620_v41 = vmul.f32 %v1990_v53, %v619_v23  ;;  %v2082_v9 = vadd.f32 1e-05, %v363_v51  ;;  %v2084_v7 = vadd.f32 1e-05, %v355_v47  ;;  %vm2105_vm5 = vmor %vm621_vm14, %vm622_vm2 }
 0x138   :  { %1096 = vmatmul.msk.bf16.gmra.mxu2 %vm55_vm0, %v846_v20  ;;  %v772_v14 = vmul.f32 %v1788_v4, %v737_v40  ;;  %v520_v46 = vmul.f32 %v1996_v56, %v519_v44  ;;  %vm522_vm3 = vweird.f32 %v1996_v56  ;;  %v2092_v42 = vadd.f32 1e-05, %v356_v45 }
 0x139   :  { %v2087_v2 = vpop.eup %1153  ;;  %v707_v48 = vmul.f32 %v2071_v50, %v706_v37  ;;  %vm532_vm4 = vweird.f32 %v2012_v33  ;;  %1157 = vrsqrt.f32 %v2082_v9  ;;  %v773_v30 = vmul.f32 %v1788_v4, %v738_v3  ;;  %vm2118_vm7 = vmor %vm521_vm15, %vm522_vm3 }
 0x13a   :  { %v2094_v27 = vpop.eup %1155  ;;  %v626_v16 = vmul.f32 %v2087_v2, %v2042_v8  ;;  %v530_v43 = vmul.f32 %v2012_v33, %v529_v58  ;;  %vm711_vm6 = vweird.f32 %v2010_v57  ;;  %v624_v39 = vsel %vm2105_vm5, %v1990_v53, %v620_v41  ;;  %vm2134_vm8 = vmor %vm531_vm1, %vm532_vm4 }
 0x13b   :  { %v708_v6 = vmul.f32 0.5, %v707_v48  ;;  %v696_v18 = vmul.f32 %v2094_v27, %v2044_v12  ;;  %1159 = vrsqrt.f32 %v2084_v7  ;;  %v807_v55 = vadd.f32 %v1814_v61, %v772_v14 }
 0x13c   :  { %v627_v24 = vmul.f32 %v2087_v2, %v626_v16  ;;  %v524_v11 = vsel %vm2118_vm7, %v1996_v56, %v520_v46  ;;  %1161 = vrsqrt.f32 %v2092_v42  ;;  %vm631_vm9 = vweird.f32 %v2042_v8 }
 0x13d   :  { %v709_v0 = vsub.f32 1.5, %v708_v6  ;;  %v697_v53 = vmul.f32 %v2094_v27, %v696_v18  ;;  %v808_v40 = vadd.f32 %v1814_v61, %v773_v30  ;;  %v796_v56 = vmul.f32 %v1788_v4, %v2032_v36 }
 0x13e   :  { %v628_v54 = vmul.f32 0.5, %v627_v24  ;;  %v797_v23 = vmul.f32 %v1788_v4, %v762_v21  ;;  %v2144_v29 = vmul.f32 %v624_v39, %v1543_v13  ;;  %v534_v62 = vsel %vm2134_vm8, %v2012_v33, %v530_v43  ;;  %v323_v21 = vpop.xlane.xlu2 %322 }
 0x13f   :  { %v698_v34 = vmul.f32 0.5, %v697_v53  ;;  %v364_v44 = vmul.f32 %v296_v17, %v1436_v15  ;;  %v2150_v51 = vpop.eup %1157  ;;  %v838_v45 = vpack.c.bf16 %v808_v40, %v807_v55  ;;  %v831_v3 = vadd.f32 %v1814_v61, %v796_v56  ;;  %v347_v53 = vpop.xlane.xlu1 %346 }
 0x140   :  { %v629_v47 = vsub.f32 1.5, %v628_v54  ;;  %v832_v36 = vadd.f32 %v1814_v61, %v797_v23  ;;  %v745_v20 = vmul.f32 %v524_v11, %v1535_v5  ;;  %v710_v13 = vmul.f32 %v2071_v50, %v709_v0 }
 0x141   :  { %vm712_vm10 = vweird.f32 %v2071_v50  ;;  %vm701_vm11 = vweird.f32 %v2044_v12  ;;  %v536_v33 = vmul.f32 %v2150_v51, %v2082_v9  ;;  %v2160_v58 = vpop.eup %1159  ;;  %v699_v37 = vsub.f32 1.5, %v698_v34  ;;  %1088 = vmatmul.msk.bf16.gmra.mxu0 %vm55_vm0, %v838_v45 }
 0x142   :  { %v850_v41 = vpack.c.bf16 %v832_v36, %v831_v3  ;;  %v2163_v14 = vadd.f32 1e-05, %v364_v44  ;;  %v374_v5 = vmul.f32 %v326_v63, %v1436_v15  ;;  %v2166_v46 = vpop.eup %1161  ;;  %v746_v48 = vmul.f32 %v534_v62, %v1546_v26  ;;  %vm2177_vm13 = vmor %vm711_vm6, %vm712_vm10  ;;  %v275_v63 = vpop.xlane.xlu0 %274 }
 0x143   :  { %vm632_vm12 = vweird.f32 %v2087_v2  ;;  %v537_v16 = vmul.f32 %v2150_v51, %v536_v33  ;;  %v456_v30 = vmul.f32 %v2160_v58, %v2084_v7  ;;  %v630_v43 = vmul.f32 %v2087_v2, %v629_v47 }
 0x144   :  { %vm702_vm14 = vweird.f32 %v2094_v27  ;;  %v466_v26 = vmul.f32 %v2166_v46, %v2092_v42  ;;  %1100 = vmatmul.msk.bf16.gmra.mxu3 %vm55_vm0, %v850_v41  ;;  %1163 = vrsqrt.f32 %v2163_v14  ;;  %v714_v6 = vsel %vm2177_vm13, %v2071_v50, %v710_v13  ;;  %vm2202_vm3 = vmor %vm631_vm9, %vm632_vm12 }
 0x145   :  { %v538_v57 = vmul.f32 0.5, %v537_v16  ;;  %vm541_vm15 = vweird.f32 %v2082_v9  ;;  %v457_v18 = vmul.f32 %v2160_v58, %v456_v30  ;;  %v700_v39 = vmul.f32 %v2094_v27, %v699_v37  ;;  %vm2224_vm5 = vmor %vm701_vm11, %vm702_vm14 }
 0x146   :  { %vm542_vm1 = vweird.f32 %v2150_v51  ;;  %vm461_vm2 = vweird.f32 %v2084_v7  ;;  %v467_v60 = vmul.f32 %v2166_v46, %v466_v26  ;;  %v2196_v24 = vadd.f32 1e-05, %v374_v5  ;;  %v350_v13 = vpop.xlane.xlu2 %349 }
 0x147   :  { %v539_v55 = vsub.f32 1.5, %v538_v57  ;;  %v458_v17 = vmul.f32 0.5, %v457_v18  ;;  %v373_v11 = vmul.f32 %v323_v21, %v1436_v15  ;;  %v780_v0 = vmul.f32 %v1788_v4, %v745_v20  ;;  %vm2243_vm7 = vmor %vm541_vm15, %vm542_vm1  ;;  %v278_v50 = vpop.xlane.xlu1 %277 }
 0x148   :  { %v634_v10 = vsel %vm2202_vm3, %v2087_v2, %v630_v43  ;;  %v468_v54 = vmul.f32 0.5, %v467_v60  ;;  %vm471_vm4 = vweird.f32 %v2092_v42  ;;  %1165 = vrsqrt.f32 %v2196_v24 }
 0x149   :  { %v781_v8 = vmul.f32 %v1788_v4, %v746_v48  ;;  %v540_v40 = vmul.f32 %v2150_v51, %v539_v55  ;;  %v459_v56 = vsub.f32 1.5, %v458_v17  ;;  %v2215_v23 = vadd.f32 1e-05, %v373_v11 }
 0x14a   :  { %v815_v62 = vadd.f32 %v1814_v61, %v780_v0  ;;  %v2218_v34 = vpop.eup %1163  ;;  %v469_v44 = vsub.f32 1.5, %v468_v54  ;;  %v381_v45 = vmul.f32 %v347_v53, %v1436_v15  ;;  %v357_v3 = vmul.f32 %v275_v63, %v1436_v15 }
 0x14b   :  { %v816_v47 = vadd.f32 %v1814_v61, %v781_v8  ;;  %v764_v36 = vmul.f32 %v714_v6, %v1564_v19  ;;  %v704_v20 = vsel %vm2224_vm5, %v2094_v27, %v700_v39  ;;  %vm462_vm6 = vweird.f32 %v2160_v58 }
 0x14c   :  { %v546_v12 = vmul.f32 %v2218_v34, %v2163_v14  ;;  %v756_v33 = vmul.f32 %v634_v10, %v1556_v35  ;;  %v460_v19 = vmul.f32 %v2160_v58, %v459_v56  ;;  %vm472_vm8 = vweird.f32 %v2166_v46  ;;  %vm2267_vm9 = vmor %vm461_vm2, %vm462_vm6  ;;  %v302_v56 = vpop.xlane.xlu0 %301 }
 0x14d   :  { %1167 = vrsqrt.f32 %v2215_v23  ;;  %v544_v27 = vsel %vm2243_vm7, %v2150_v51, %v540_v40  ;;  %v842_v37 = vpack.c.bf16 %v816_v47, %v815_v62  ;;  %v2254_v41 = vadd.f32 1e-05, %v381_v45  ;;  %vm2289_vm12 = vmor %vm471_vm4, %vm472_vm8 }
 0x14e   :  { %v547_v35 = vmul.f32 %v2218_v34, %v546_v12  ;;  %v2256_v9 = vpop.eup %1165  ;;  %v763_v5 = vmul.f32 %v704_v20, %v1567_v32  ;;  %v470_v48 = vmul.f32 %v2166_v46, %v469_v44  ;;  %v2260_v16 = vadd.f32 1e-05, %v357_v3 }
 0x14f   :  { %v382_v30 = vmul.f32 %v350_v13, %v1436_v15  ;;  %vm551_vm10 = vweird.f32 %v2163_v14  ;;  %vm552_vm11 = vweird.f32 %v2218_v34  ;;  %v646_v32 = vmul.f32 %v2256_v9, %v2196_v24  ;;  %1092 = vmatmul.msk.bf16.gmra.mxu1 %vm55_vm0, %v842_v37 }
 0x150   :  { %v548_v28 = vmul.f32 0.5, %v547_v35  ;;  %v2277_v43 = vmul.f32 %v544_v27, %v1585_v25  ;;  %v464_v7 = vsel %vm2267_vm9, %v2160_v58, %v460_v19  ;;  %1169 = vrsqrt.f32 %v2254_v41  ;;  %vm2320_vm15 = vmor %vm551_vm10, %vm552_vm11  ;;  %v299_v35 = vpop.xlane.xlu2 %298 }
 0x151   :  { %v2283_v26 = vadd.f32 1e-05, %v382_v30  ;;  %v647_v25 = vmul.f32 %v2256_v9, %v646_v32  ;;  %vm651_vm13 = vweird.f32 %v2196_v24  ;;  %1171 = vrsqrt.f32 %v2260_v16 }
 0x152   :  { %v549_v57 = vsub.f32 1.5, %v548_v28  ;;  %v790_v58 = vmul.f32 %v1788_v4, %v2144_v29  ;;  %v474_v42 = vsel %vm2289_vm12, %v2166_v46, %v470_v48  ;;  %v791_v39 = vmul.f32 %v1788_v4, %v756_v33 }
 0x153   :  { %v2298_v18 = vpop.eup %1167  ;;  %1173 = vrsqrt.f32 %v2283_v26  ;;  %v798_v60 = vmul.f32 %v1788_v4, %v763_v5  ;;  %v739_v55 = vmul.f32 %v464_v7, %v1577_v59  ;;  %v648_v11 = vmul.f32 0.5, %v647_v25 }
 0x154   :  { %v550_v17 = vmul.f32 %v2218_v34, %v549_v57  ;;  %v636_v29 = vmul.f32 %v2298_v18, %v2215_v23  ;;  %vm641_vm14 = vweird.f32 %v2215_v23  ;;  %v825_v0 = vadd.f32 %v1814_v61, %v790_v58 }
 0x155   :  { %v826_v46 = vadd.f32 %v1814_v61, %v791_v39  ;;  %v799_v53 = vmul.f32 %v1788_v4, %v764_v36  ;;  %v833_v63 = vadd.f32 %v1814_v61, %v798_v60  ;;  %v740_v10 = vmul.f32 %v474_v42, %v1588_v38 }
 0x156   :  { %v649_v54 = vsub.f32 1.5, %v648_v11  ;;  %v637_v8 = vmul.f32 %v2298_v18, %v636_v29  ;;  %v358_v40 = vmul.f32 %v278_v50, %v1436_v15  ;;  %v1170_v62 = vpop.eup %1169  ;;  %v554_v2 = vsel %vm2320_vm15, %v2218_v34, %v550_v17 }
 0x157   :  { %vm652_vm1 = vweird.f32 %v2256_v9  ;;  %v847_v38 = vpack.c.bf16 %v826_v46, %v825_v0  ;;  %v834_v14 = vadd.f32 %v1814_v61, %v799_v53  ;;  %v2331_v44 = vpop.eup %1171  ;;  %vm642_vm2 = vweird.f32 %v2298_v18 }
 0x158   :  { %v650_v47 = vmul.f32 %v2256_v9, %v649_v54  ;;  %v638_v45 = vmul.f32 0.5, %v637_v8  ;;  %v716_v3 = vmul.f32 %v1170_v62, %v2254_v41  ;;  %vm721_vm3 = vweird.f32 %v2254_v41  ;;  %vm2350_vm5 = vmor %vm651_vm13, %vm652_vm1 }
 0x159   :  { %v1174_v36 = vpop.eup %1173  ;;  %v476_v34 = vmul.f32 %v2331_v44, %v2260_v16  ;;  %1097 = vmatmul.msk.bf16.gmra.mxu2 %vm55_vm0, %v847_v38  ;;  %v851_v20 = vpack.c.bf16 %v834_v14, %v833_v63  ;;  %v2340_v12 = vadd.f32 1e-05, %v358_v40  ;;  %v366_v13 = vmul.f32 %v302_v56, %v1436_v15  ;;  %vm2366_vm8 = vmor %vm641_vm14, %vm642_vm2 }
 0x15a   :  { %v748_v33 = vmul.f32 %v554_v2, %v1598_v22  ;;  %v639_v21 = vsub.f32 1.5, %v638_v45  ;;  %v717_v19 = vmul.f32 %v1170_v62, %v716_v3  ;;  %v726_v27 = vmul.f32 %v1174_v36, %v2283_v26 }
 0x15b   :  { %vm731_vm4 = vweird.f32 %v2283_v26  ;;  %vm722_vm6 = vweird.f32 %v1170_v62  ;;  %v477_v5 = vmul.f32 %v2331_v44, %v476_v34  ;;  %vm482_vm7 = vweird.f32 %v2331_v44  ;;  %1101 = vmatmul.msk.bf16.gmra.mxu3 %vm55_vm0, %v851_v20 }
 0x15c   :  { %1175 = vrsqrt.f32 %v2340_v12  ;;  %v654_v22 = vsel %vm2350_vm5, %v2256_v9, %v650_v47  ;;  %v640_v48 = vmul.f32 %v2298_v18, %v639_v21  ;;  %v718_v24 = vmul.f32 0.5, %v717_v19  ;;  %vm723_vm10 = vmor %vm721_vm3, %vm722_vm6 }
 0x15d   :  { %v727_v30 = vmul.f32 %v1174_v36, %v726_v27  ;;  %v478_v28 = vmul.f32 0.5, %v477_v5  ;;  %v2370_v32 = vadd.f32 1e-05, %v366_v13  ;;  %v365_v7 = vmul.f32 %v299_v35, %v1436_v15 }
 0x15e   :  { %v774_v6 = vmul.f32 %v1788_v4, %v739_v55  ;;  %v644_v9 = vsel %vm2366_vm8, %v2298_v18, %v640_v48  ;;  %v719_v57 = vsub.f32 1.5, %v718_v24  ;;  %v775_v58 = vmul.f32 %v1788_v4, %v740_v10  ;;  %v2676_v48 = vld [vmem:[#allocation4_spill] sm:$0xff] }
 0x15f   :  { %v728_v25 = vmul.f32 0.5, %v727_v30  ;;  %v758_v23 = vmul.f32 %v654_v22, %v1612_v1  ;;  %v479_v42 = vsub.f32 1.5, %v478_v28  ;;  %vm732_vm9 = vweird.f32 %v1174_v36 }
 0x160   :  { %1177 = vrsqrt.f32 %v2370_v32  ;;  %v720_v39 = vmul.f32 %v1170_v62, %v719_v57  ;;  %v2380_v50 = vadd.f32 1e-05, %v365_v7  ;;  %v809_v15 = vadd.f32 %v1814_v61, %v774_v6  ;;  %vm733_vm11 = vmor %vm731_vm4, %vm732_vm9 }
 0x161   :  { %v729_v60 = vsub.f32 1.5, %v728_v25  ;;  %v757_v17 = vmul.f32 %v644_v9, %v1606_v31  ;;  %v810_v18 = vadd.f32 %v1814_v61, %v775_v58  ;;  %v782_v1 = vmul.f32 %v1788_v4, %v2277_v43  ;;  %v2677_v9 = vld [vmem:[#allocation5_spill] sm:$0xff] }
 0x162   :  { %v1176_v55 = vpop.eup %1175  ;;  %v783_v11 = vmul.f32 %v1788_v4, %v748_v33  ;;  %v724_v29 = vsel %vm723_vm10, %v1170_v62, %v720_v39  ;;  %v480_v0 = vmul.f32 %v2331_v44, %v479_v42  ;;  %1179 = vrsqrt.f32 %v2380_v50 }
 0x163   :  { %v730_v46 = vmul.f32 %v1174_v36, %v729_v60  ;;  %v486_v53 = vmul.f32 %v1176_v55, %v2340_v12  ;;  %v765_v63 = vmul.f32 %v724_v29, %v1619_v52  ;;  %vm481_vm12 = vweird.f32 %v2260_v16  ;;  %v2678_v60 = vld [vmem:[#allocation3_spill] sm:$0xff] }
 0x164   :  { %v839_v43 = vpack.c.bf16 %v810_v18, %v809_v15  ;;  %vm2401_vm13 = vmor %vm481_vm12, %vm482_vm7  ;;  %v817_v54 = vadd.f32 %v1814_v61, %v782_v1  ;;  %v818_v26 = vadd.f32 %v1814_v61, %v783_v11  ;;  %v792_v8 = vmul.f32 %v1788_v4, %v757_v17 }
 0x165   :  { %v734_v31 = vsel %vm733_vm11, %v1174_v36, %v730_v46  ;;  %v487_v41 = vmul.f32 %v1176_v55, %v486_v53  ;;  %v484_v16 = vsel %vm2401_vm13, %v2331_v44, %v480_v0  ;;  %v793_v62 = vmul.f32 %v1788_v4, %v758_v23  ;;  %v2675_v36 = vld [vmem:[#allocation2_spill] sm:$0xff] }
 0x166   :  { %v1178_v10 = vpop.eup %1177  ;;  %v766_v52 = vmul.f32 %v734_v31, %v1628_v49  ;;  %1089 = vmatmul.msk.bf16.gmra.mxu0 %vm55_vm0, %v839_v43  ;;  %v843_v2 = vpack.c.bf16 %v818_v26, %v817_v54  ;;  %v827_v49 = vadd.f32 %v1814_v61, %v792_v8  ;;  %v800_v38 = vmul.f32 %v1788_v4, %v765_v63 }
 0x167   :  { %v488_v40 = vmul.f32 0.5, %v487_v41  ;;  %v566_v56 = vmul.f32 %v1178_v10, %v2370_v32  ;;  %vm492_vm14 = vweird.f32 %v1176_v55  ;;  %v828_v3 = vadd.f32 %v1814_v61, %v793_v62 }
 0x168   :  { %v801_v14 = vmul.f32 %v1788_v4, %v766_v52  ;;  %v1180_v44 = vpop.eup %1179  ;;  %v741_v34 = vmul.f32 %v484_v16, %v2675_v36  ;;  %1093 = vmatmul.msk.bf16.gmra.mxu1 %vm55_vm0, %v843_v2  ;;  %v835_v20 = vadd.f32 %v1814_v61, %v800_v38  ;;  %vm491_vm15 = vweird.f32 %v2340_v12 }
 0x169   :  { %v489_v47 = vsub.f32 1.5, %v488_v40  ;;  %v567_v45 = vmul.f32 %v1178_v10, %v566_v56  ;;  %v556_v19 = vmul.f32 %v1180_v44, %v2380_v50  ;;  %vm493_vm1 = vmor %vm491_vm15, %vm492_vm14  ;;  %v848_v27 = vpack.c.bf16 %v828_v3, %v827_v49 }
 0x16a   :  { %v836_v13 = vadd.f32 %v1814_v61, %v801_v14  ;;  %vm572_vm2 = vweird.f32 %v1178_v10  ;;  %v776_v30 = vmul.f32 %v1788_v4, %v741_v34  ;;  %vm571_vm3 = vweird.f32 %v2370_v32 }
 0x16b   :  { %v490_v33 = vmul.f32 %v1176_v55, %v489_v47  ;;  %v568_v21 = vmul.f32 0.5, %v567_v45  ;;  %v557_v22 = vmul.f32 %v1180_v44, %v556_v19  ;;  %1098 = vmatmul.msk.bf16.gmra.mxu2 %vm55_vm0, %v848_v27  ;;  %vm573_vm4 = vmor %vm571_vm3, %vm572_vm2  ;;  %vm562_vm5 = vweird.f32 %v1180_v44 }
 0x16c   :  { %v852_v35 = vpack.c.bf16 %v836_v13, %v835_v20  ;;  %v811_v25 = vadd.f32 %v1814_v61, %v776_v30  ;;  %vm561_vm6 = vweird.f32 %v2380_v50  ;;  %v2445_v50 = vld [vmem:[%s2611_s4] ss:$0 sm:$0xff]  ;;  %vm1042_vm8 = vcmask 257024  }
 0x16d   :  { %v494_v37 = vsel %vm493_vm1, %v1176_v55, %v490_v33  ;;  %v569_v5 = vsub.f32 1.5, %v568_v21  ;;  %v558_v12 = vmul.f32 0.5, %v557_v22  ;;  %vm563_vm7 = vmor %vm561_vm6, %vm562_vm5 }
 0x16e   :  { %v742_v24 = vmul.f32 %v494_v37, %v2676_v48  ;;  %1102 = vmatmul.msk.bf16.gmra.mxu3 %vm55_vm0, %v852_v35 }
 0x16f   :  { %v570_v51 = vmul.f32 %v1178_v10, %v569_v5  ;;  %v559_v6 = vsub.f32 1.5, %v558_v12 }
 0x170   :  { %v777_v28 = vmul.f32 %v1788_v4, %v742_v24 }
 0x171   :  { %v574_v7 = vsel %vm573_vm4, %v1178_v10, %v570_v51  ;;  %v560_v23 = vmul.f32 %v1180_v44, %v559_v6 }
 0x172   :  { %v750_v57 = vmul.f32 %v574_v7, %v2677_v9  ;;  %v812_v58 = vadd.f32 %v1814_v61, %v777_v28 }
 0x173   :  { %v564_v39 = vsel %vm563_vm7, %v1180_v44, %v560_v23 }
 0x174   :  { %v840_v42 = vpack.c.bf16 %v812_v58, %v811_v25  ;;  %v785_v32 = vmul.f32 %v1788_v4, %v750_v57  ;;  %v749_v15 = vmul.f32 %v564_v39, %v2678_v60 }
 0x176   :  { %1090 = vmatmul.msk.bf16.gmra.mxu0 %vm55_vm0, %v840_v42  ;;  %v784_v55 = vmul.f32 %v1788_v4, %v749_v15  ;;  %v820_v17 = vadd.f32 %v1814_v61, %v785_v32 }
 0x178   :  { %v819_v18 = vadd.f32 %v1814_v61, %v784_v55 }
 0x17a   :  { %v844_v1 = vpack.c.bf16 %v820_v17, %v819_v18 }
 0x17c   :  { %1094 = vmatmul.msk.bf16.gmra.mxu1 %vm55_vm0, %v844_v1 }
 0x1a1   :  { %v970_v11 = vpop.f32.mrf.mxu2 }
 0x1a2   :  { %v971_v29 = vadd.f32 %v2445_v50, %v970_v11 }
 0x1a4   :  { %v1026_v0 = vpack.c.bf16 %v971_v29, %v971_v29  ;;  %v990_v46 = vpop.f32.mrf.mxu3 }
 0x1a5   :  { %v991_v4 = vadd.f32 %v2445_v50, %v990_v46 }
 0x1a6   :  { %1059 = vst.msk [vmem:[%s2612_s5 + $0x40] sm:$0xf] %vm1042_vm8, %v1026_v0 }
 0x1a7   :  { %v1034_v61 = vpack.c.bf16 %v991_v4, %v991_v4 }
 0x1a9   :  { %1067 = vst.msk [vmem:[%s2612_s5 + $0x60] sm:$0xf] %vm1042_vm8, %v1034_v61  ;;  %v972_v53 = vpop.f32.mrf.mxu2 }
 0x1aa   :  { %v973_v31 = vadd.f32 %v2445_v50, %v972_v53 }
 0x1ab   :  { %v930_v63 = vpop.f32.mrf.mxu0 }
 0x1ac   :  { %v931_v41 = vadd.f32 %v2445_v50, %v930_v63  ;;  %v950_v43 = vpop.f32.mrf.mxu1  ;;  %v1027_v10 = vpack.c.bf16 %v973_v31, %v973_v31  ;;  %v992_v59 = vpop.f32.mrf.mxu3 }
 0x1ad   :  { %v951_v54 = vadd.f32 %v2445_v50, %v950_v43  ;;  %v993_v26 = vadd.f32 %v2445_v50, %v992_v59 }
 0x1ae   :  { %v1010_v52 = vpack.c.bf16 %v931_v41, %v931_v41  ;;  %1060 = vst.msk [vmem:[%s2612_s5 + $0x44] sm:$0xf] %vm1042_vm8, %v1027_v10 }
 0x1af   :  { %v1018_v8 = vpack.c.bf16 %v951_v54, %v951_v54  ;;  %v1035_v16 = vpack.c.bf16 %v993_v26, %v993_v26 }
 0x1b0   :  { %1043 = vst.msk [vmem:[%s2612_s5] sm:$0xf] %vm1042_vm8, %v1010_v52 }
 0x1b1   :  { %1051 = vst.msk [vmem:[%s2612_s5 + $0x20] sm:$0xf] %vm1042_vm8, %v1018_v8 }
 0x1b2   :  { %1068 = vst.msk [vmem:[%s2612_s5 + $0x64] sm:$0xf] %vm1042_vm8, %v1035_v16 }
 0x1b3   :  { %v932_v40 = vpop.f32.mrf.mxu0 }
 0x1b4   :  { %v933_v56 = vadd.f32 %v2445_v50, %v932_v40  ;;  %v952_v62 = vpop.f32.mrf.mxu1 }
 0x1b5   :  { %v953_v49 = vadd.f32 %v2445_v50, %v952_v62 }
 0x1b6   :  { %v1011_v2 = vpack.c.bf16 %v933_v56, %v933_v56 }
 0x1b7   :  { %v1019_v38 = vpack.c.bf16 %v953_v49, %v953_v49 }
 0x1b8   :  { %1044 = vst.msk [vmem:[%s2612_s5 + $0x4] sm:$0xf] %vm1042_vm8, %v1011_v2 }
 0x1b9   :  { %1052 = vst.msk [vmem:[%s2612_s5 + $0x24] sm:$0xf] %vm1042_vm8, %v1019_v38 }
 0x1bb   :  { %v975_v14 = vpop.f32.mrf.mxu2 }
 0x1bc   :  { %v976_v47 = vadd.f32 %v2445_v50, %v975_v14 }
 0x1be   :  { %v1028_v45 = vpack.c.bf16 %v976_v47, %v976_v47  ;;  %v935_v3 = vpop.f32.mrf.mxu0 }
 0x1bf   :  { %v936_v44 = vadd.f32 %v2445_v50, %v935_v3 }
 0x1c0   :  { %1061 = vst.msk [vmem:[%s2612_s5 + $0x48] sm:$0xf] %vm1042_vm8, %v1028_v45 }
 0x1c1   :  { %v1012_v36 = vpack.c.bf16 %v936_v44, %v936_v44 }
 0x1c3   :  { %v977_v34 = vpop.f32.mrf.mxu2  ;;  %1045 = vst.msk [vmem:[%s2612_s5 + $0x8] sm:$0xf] %vm1042_vm8, %v1012_v36 }
 0x1c4   :  { %v978_v20 = vadd.f32 %v2445_v50, %v977_v34 }
 0x1c6   :  { %v1029_v13 = vpack.c.bf16 %v978_v20, %v978_v20  ;;  %v937_v21 = vpop.f32.mrf.mxu0 }
 0x1c7   :  { %v995_v33 = vpop.f32.mrf.mxu3  ;;  %v938_v27 = vadd.f32 %v2445_v50, %v937_v21 }
 0x1c8   :  { %1062 = vst.msk [vmem:[%s2612_s5 + $0x4c] sm:$0xf] %vm1042_vm8, %v1029_v13  ;;  %v996_v19 = vadd.f32 %v2445_v50, %v995_v33 }
 0x1c9   :  { %v1013_v37 = vpack.c.bf16 %v938_v27, %v938_v27 }
 0x1ca   :  { %v1036_v35 = vpack.c.bf16 %v996_v19, %v996_v19 }
 0x1cb   :  { %1046 = vst.msk [vmem:[%s2612_s5 + $0xc] sm:$0xf] %vm1042_vm8, %v1013_v37 }
 0x1cc   :  { %1069 = vst.msk [vmem:[%s2612_s5 + $0x68] sm:$0xf] %vm1042_vm8, %v1036_v35  ;;  %v955_v5 = vpop.f32.mrf.mxu1 }
 0x1cd   :  { %v956_v22 = vadd.f32 %v2445_v50, %v955_v5 }
 0x1cf   :  { %v1020_v48 = vpack.c.bf16 %v956_v22, %v956_v22  ;;  %v997_v24 = vpop.f32.mrf.mxu3 }
 0x1d0   :  { %v998_v30 = vadd.f32 %v2445_v50, %v997_v24 }
 0x1d1   :  { %1053 = vst.msk [vmem:[%s2612_s5 + $0x28] sm:$0xf] %vm1042_vm8, %v1020_v48 }
 0x1d2   :  { %v1037_v51 = vpack.c.bf16 %v998_v30, %v998_v30 }
 0x1d4   :  { %1070 = vst.msk [vmem:[%s2612_s5 + $0x6c] sm:$0xf] %vm1042_vm8, %v1037_v51  ;;  %v957_v12 = vpop.f32.mrf.mxu1 }
 0x1d5   :  { %v958_v28 = vadd.f32 %v2445_v50, %v957_v12 }
 0x1d7   :  { %v1021_v7 = vpack.c.bf16 %v958_v28, %v958_v28 }
 0x1d9   :  { %1054 = vst.msk [vmem:[%s2612_s5 + $0x2c] sm:$0xf] %vm1042_vm8, %v1021_v7 }
 0x1dc   :  { %v980_v6 = vpop.f32.mrf.mxu2 }
 0x1dd   :  { %v981_v9 = vadd.f32 %v2445_v50, %v980_v6 }
 0x1de   :  { %v1000_v57 = vpop.f32.mrf.mxu3 }
 0x1df   :  { %v1030_v25 = vpack.c.bf16 %v981_v9, %v981_v9  ;;  %v1001_v58 = vadd.f32 %v2445_v50, %v1000_v57 }
 0x1e1   :  { %1063 = vst.msk [vmem:[%s2612_s5 + $0x50] sm:$0xf] %vm1042_vm8, %v1030_v25  ;;  %v1038_v23 = vpack.c.bf16 %v1001_v58, %v1001_v58 }
 0x1e3   :  { %1071 = vst.msk [vmem:[%s2612_s5 + $0x70] sm:$0xf] %vm1042_vm8, %v1038_v23  ;;  %v940_v42 = vpop.f32.mrf.mxu0 }
 0x1e4   :  { %v941_v32 = vadd.f32 %v2445_v50, %v940_v42  ;;  %v982_v39 = vpop.f32.mrf.mxu2 }
 0x1e5   :  { %v983_v60 = vadd.f32 %v2445_v50, %v982_v39  ;;  %v960_v17 = vpop.f32.mrf.mxu1 }
 0x1e6   :  { %v1014_v15 = vpack.c.bf16 %v941_v32, %v941_v32  ;;  %v1002_v55 = vpop.f32.mrf.mxu3  ;;  %v961_v11 = vadd.f32 %v2445_v50, %v960_v17 }
 0x1e7   :  { %v1031_v18 = vpack.c.bf16 %v983_v60, %v983_v60  ;;  %v1003_v1 = vadd.f32 %v2445_v50, %v1002_v55 }
 0x1e8   :  { %1047 = vst.msk [vmem:[%s2612_s5 + $0x10] sm:$0xf] %vm1042_vm8, %v1014_v15  ;;  %v1022_v0 = vpack.c.bf16 %v961_v11, %v961_v11 }
 0x1e9   :  { %1064 = vst.msk [vmem:[%s2612_s5 + $0x54] sm:$0xf] %vm1042_vm8, %v1031_v18  ;;  %v1039_v29 = vpack.c.bf16 %v1003_v1, %v1003_v1 }
 0x1ea   :  { %1055 = vst.msk [vmem:[%s2612_s5 + $0x30] sm:$0xf] %vm1042_vm8, %v1022_v0 }
 0x1eb   :  { %1072 = vst.msk [vmem:[%s2612_s5 + $0x74] sm:$0xf] %vm1042_vm8, %v1039_v29  ;;  %v942_v46 = vpop.f32.mrf.mxu0 }
 0x1ec   :  { %v943_v4 = vadd.f32 %v2445_v50, %v942_v46 }
 0x1ed   :  { %v962_v53 = vpop.f32.mrf.mxu1 }
 0x1ee   :  { %v1015_v61 = vpack.c.bf16 %v943_v4, %v943_v4  ;;  %v963_v63 = vadd.f32 %v2445_v50, %v962_v53  ;;  %v985_v31 = vpop.f32.mrf.mxu2 }
 0x1ef   :  { %v986_v43 = vadd.f32 %v2445_v50, %v985_v31 }
 0x1f0   :  { %1048 = vst.msk [vmem:[%s2612_s5 + $0x14] sm:$0xf] %vm1042_vm8, %v1015_v61  ;;  %v1023_v10 = vpack.c.bf16 %v963_v63, %v963_v63 }
 0x1f1   :  { %v1005_v41 = vpop.f32.mrf.mxu3  ;;  %v1032_v52 = vpack.c.bf16 %v986_v43, %v986_v43 }
 0x1f2   :  { %v1006_v59 = vadd.f32 %v2445_v50, %v1005_v41  ;;  %1056 = vst.msk [vmem:[%s2612_s5 + $0x34] sm:$0xf] %vm1042_vm8, %v1023_v10 }
 0x1f3   :  { %v945_v26 = vpop.f32.mrf.mxu0  ;;  %1065 = vst.msk [vmem:[%s2612_s5 + $0x58] sm:$0xf] %vm1042_vm8, %v1032_v52 }
 0x1f4   :  { %v1040_v54 = vpack.c.bf16 %v1006_v59, %v1006_v59  ;;  %v946_v8 = vadd.f32 %v2445_v50, %v945_v26 }
 0x1f6   :  { %1073 = vst.msk [vmem:[%s2612_s5 + $0x78] sm:$0xf] %vm1042_vm8, %v1040_v54  ;;  %v1016_v16 = vpack.c.bf16 %v946_v8, %v946_v8  ;;  %v987_v40 = vpop.f32.mrf.mxu2 }
 0x1f7   :  { %v988_v62 = vadd.f32 %v2445_v50, %v987_v40 }
 0x1f8   :  { %1049 = vst.msk [vmem:[%s2612_s5 + $0x18] sm:$0xf] %vm1042_vm8, %v1016_v16 }
 0x1f9   :  { %v1007_v56 = vpop.f32.mrf.mxu3  ;;  %v965_v49 = vpop.f32.mrf.mxu1  ;;  %v1033_v38 = vpack.c.bf16 %v988_v62, %v988_v62 }
 0x1fa   :  { %v1008_v2 = vadd.f32 %v2445_v50, %v1007_v56  ;;  %v966_v14 = vadd.f32 %v2445_v50, %v965_v49 }
 0x1fb   :  { %v947_v45 = vpop.f32.mrf.mxu0  ;;  %1066 = vst.msk [vmem:[%s2612_s5 + $0x5c] sm:$0xf] %vm1042_vm8, %v1033_v38 }
 0x1fc   :  { %v1041_v47 = vpack.c.bf16 %v1008_v2, %v1008_v2  ;;  %v948_v3 = vadd.f32 %v2445_v50, %v947_v45  ;;  %v1024_v44 = vpack.c.bf16 %v966_v14, %v966_v14 }
 0x1fe   :  { %1074 = vst.msk [vmem:[%s2612_s5 + $0x7c] sm:$0xf] %vm1042_vm8, %v1041_v47  ;;  %v1017_v36 = vpack.c.bf16 %v948_v3, %v948_v3 }
 0x1ff   :  { %1057 = vst.msk [vmem:[%s2612_s5 + $0x38] sm:$0xf] %vm1042_vm8, %v1024_v44 }
 0x200   :  { %1050 = vst.msk [vmem:[%s2612_s5 + $0x1c] sm:$0xf] %vm1042_vm8, %v1017_v36 }
 0x201   :  { %v967_v34 = vpop.f32.mrf.mxu1 }
 0x202   :  { %v968_v20 = vadd.f32 %v2445_v50, %v967_v34 }
 0x204   :  { %v1025_v13 = vpack.c.bf16 %v968_v20, %v968_v20 }
 0x206   :  { %1058 = vst.msk [vmem:[%s2612_s5 + $0x3c] sm:$0xf] %vm1042_vm8, %v1025_v13 }

// kernel: stage_forward.7
= control target key start
LH: loop header
LB: loop body
LE: loop exit
PB: predicated region body
PF: predicated region fallthrough
CT: control target
= control target key end

     0   :  { %s4014_s30 = smov 0   ;;  %s4016_s20 = smov 0   ;;  %s5064_s0 = inlined_call_operand.vmem [shape: bf16[4,64,32], index: 0, kind: input, shape index: {}]   ;;  %s5065_s1 = inlined_call_operand.vmem [shape: f32[1,1,32], index: 1, kind: input, shape index: {}]   ;;  %s5066_s2 = inlined_call_operand.vmem [shape: f32[1,1,32], index: 2, kind: input, shape index: {}]   ;;  %s5067_s3 = inlined_call_operand.vmem [shape: bf16[1,32,32], index: 3, kind: input, shape index: {}]   ;;  %s5068_s4 = inlined_call_operand.vmem [shape: f32[1,1,32], index: 4, kind: input, shape index: {}]   ;;  %s5069_s5 = inlined_call_operand.vmem [shape: bf16[1,32,32], index: 5, kind: input, shape index: {}]   ;;  %s5070_s6 = inlined_call_operand.vmem [shape: f32[1,1,32], index: 6, kind: input, shape index: {}]   ;;  %s5071_s7 = inlined_call_operand.vmem [shape: bf16[1,32,32], index: 7, kind: input, shape index: {}]   ;;  %s5072_s8 = inlined_call_operand.vmem [shape: f32[1,1,32], index: 8, kind: input, shape index: {}]   ;;  %s5073_s9 = inlined_call_operand.vmem [shape: bf16[1,32,32], index: 9, kind: input, shape index: {}]   ;;  %s5074_s10 = inlined_call_operand.vmem [shape: f32[1,1,32], index: 10, kind: input, shape index: {}]   ;;  %s5075_s11 = inlined_call_operand.vmem [shape: f32[1,1,32], index: 11, kind: input, shape index: {}]   ;;  %s5076_s12 = inlined_call_operand.vmem [shape: f32[1,1,32], index: 12, kind: input, shape index: {}]   ;;  %s5077_s13 = inlined_call_operand.vmem [shape: bf16[1,32,64], index: 13, kind: input, shape index: {}]   ;;  %s5078_s14 = inlined_call_operand.vmem [shape: f32[1,1,64], index: 14, kind: input, shape index: {}]   ;;  %s5079_s15 = inlined_call_operand.vmem [shape: bf16[1,64,32], index: 15, kind: input, shape index: {}]   ;;  %s5080_s16 = inlined_call_operand.vmem [shape: f32[1,1,32], index: 16, kind: input, shape index: {}]   ;;  %s5081_s17 = inlined_call_operand.vmem [shape: bf16[32,32], index: 17, kind: input, shape index: {}]   ;;  %s5082_s18 = inlined_call_operand.vmem [shape: f32[1,32], index: 18, kind: input, shape index: {}]   ;;  %s5083_s19 = inlined_call_operand.vmem [shape: bf16[4,64,32], index: 19, kind: output, shape index: {}]  }
   0x1   :  { %5086 = sst [smem:[#allocation4_spill]] %s5064_s0  ;;  %s4012_s0 = smov 0  }
   0x2   :  { %5087 = sst [smem:[#allocation5_spill]] %s5065_s1 }
   0x3   :  { %5088 = sst [smem:[#allocation6_spill]] %s5066_s2 }
   0x4   :  { %5089 = sst [smem:[#allocation7_spill]] %s5067_s3 }
   0x5 LB: > { %s41_s21 = sadd.s32 1, %s3899_s30  ;;  %p3402_p0 = scmp.ge.s32.totalorder %s3903_s20, 1  ;;  %s3903_s20 = sphi %s4016_s20, %s29_s20   ;;  %s3899_s30 = sphi %s4014_s30, %s5098_s30   ;;  %s3895_s0 = sphi %s4012_s0, %s5097_s0  }
   0x6   : > { %p43_p1 = scmp.ge.s32.totalorder %s41_s21, 4  ;;  %p689_p2 = scmp.lt.s32.totalorder %s3903_s20, 5 }
   0x8   : > { %s5100_s21 = smov (%p43_p1, %s41_s21), 0  ;;  %p690_p3 = pnand %p3402_p0, %p689_p2 }
   0x9   : > { %5090 = sst [smem:[#allocation3_spill]] %s5100_s21  ;;  %p805_p4 = scmp.lt.s32.totalorder (!%p690_p3), %s3895_s0, 3 }
   0xa   : > { %693 = sbr.rel (%p690_p3) target bundleno = 2898 (0xb52), region = 96  ;;  %s5091_s23 = sld [smem:[#allocation4_spill]] (!%p690_p3) }
   0xb   : > { %s5092_s26 = sld [smem:[#allocation7_spill]] (!%p690_p3)  ;;  %s3906_s21 = smov (!%p690_p3), 120  }
   0xc   : > { %s5093_s27 = sld [smem:[#allocation5_spill]] (!%p690_p3)  ;;  %s3908_s29 = smov (!%p690_p3), 104  }
   0xd   : > { %s5094_s22 = sld [smem:[#allocation6_spill]] (!%p690_p3)  ;;  %s3910_s2 = smov (!%p690_p3), 16  }
   0xf   : > { %s5102_s0 = smov (!%p805_p4, %s3895_s0), 3  ;;  %vm896_vm0 = vcmask 261120   ;;  %v3905_v14 = vmov 32.0   ;;  %v3538_v54 = vld [vmem:[%s5069_s5 + $0x8] sm:$0xff]  ;;  %v3537_v59 = vld [vmem:[%s5069_s5] sm:$0xff] }
  0x10   : > { %s5085_s1 = sshll.u32 %s5102_s0, 5  ;;  %3695 = vrcp.f32 %v3905_v14  ;;  %v3540_v55 = vld [vmem:[%s5071_s7 + $0x8] sm:$0xff]  ;;  %1212 = vmatpush.bf16.msra.mxu1 %v3538_v54  ;;  %v3539_v61 = vld [vmem:[%s5071_s7] sm:$0xff]  ;;  %3589 = vmatpush.bf16.msra.mxu3 %v3538_v54 }
  0x11   : > { %s4038_s24 = scalar_lea.vmem %s5091_s23, %s5085_s1  ;;  %v3536_v53 = vld [vmem:[%s5092_s26 + $0x8] sm:$0xff]  ;;  %v3535_v58 = vld [vmem:[%s5092_s26] sm:$0xff]  ;;  %1261 = vmatpush.bf16.msra.mxu2 %v3540_v55  ;;  %s3907_s1 = smov 112  }
  0x12   : > { %v3583_v0 = vld [vmem:[%s4038_s24 + $0x8] sm:$0xff]   ;;  %v3552_v1 = vld [vmem:[%s4038_s24] sm:$0xff]   ;;  %v3585_v15 = vld [vmem:[%s4038_s24 + $0x18] sm:$0xff]   ;;  %1163 = vmatpush.bf16.msra.mxu0 %v3536_v53  ;;  %s3911_s23 = smov 24  }
  0x13   : > { %v3557_v2 = vunpack.c.l.bf16 %v3583_v0  ;;  %v3553_v3 = vunpack.c.l.bf16 %v3552_v1  ;;  %v3558_v4 = vunpack.c.h.bf16 %v3583_v0  ;;  %v3554_v5 = vunpack.c.h.bf16 %v3552_v1  ;;  %v3584_v18 = vld [vmem:[%s4038_s24 + $0x10] sm:$0xff]  }
  0x14   : > { %v3566_v16 = vunpack.c.h.bf16 %v3585_v15  ;;  %v3561_v20 = vunpack.c.l.bf16 %v3584_v18  ;;  %v3565_v21 = vunpack.c.l.bf16 %v3585_v15  ;;  %v3562_v52 = vunpack.c.h.bf16 %v3584_v18  ;;  %1213 = vmatpush.bf16.msra.mxu1 %v3537_v59  ;;  %3590 = vmatpush.bf16.msra.mxu3 %v3537_v59 }
  0x15   : > { %899 = vst.msk [vmem:[#allocation2 + $0x10] sm:$0xff] %vm896_vm0, %v3557_v2  ;;  %1262 = vmatpush.bf16.msra.mxu2 %v3539_v61 }
  0x16   : > { %897 = vst.msk [vmem:[#allocation2] sm:$0xff] %vm896_vm0, %v3553_v3  ;;  %v3696_v17 = vpop.eup %3695  ;;  %1164 = vmatpush.bf16.msra.mxu0 %v3535_v58 }
  0x17   : > { %900 = vst.msk [vmem:[#allocation2 + $0x18] sm:$0xff] %vm896_vm0, %v3558_v4  ;;  %v941_v19 = vmul.f32 32.0, %v3696_v17  ;;  %vm945_vm1 = vweird.f32 %v3696_v17 }
  0x18   : > { %898 = vst.msk [vmem:[#allocation2 + $0x8] sm:$0xff] %vm896_vm0, %v3554_v5 }
  0x19   : > { %904 = vst.msk [vmem:[#allocation2 + $0x38] sm:$0xff] %vm896_vm0, %v3566_v16  ;;  %v942_v22 = vsub.f32 1.0, %v941_v19 }
  0x1a   : > { %901 = vst.msk [vmem:[#allocation2 + $0x20] sm:$0xff] %vm896_vm0, %v3561_v20 }
  0x1b   : > { %903 = vst.msk [vmem:[#allocation2 + $0x30] sm:$0xff] %vm896_vm0, %v3565_v21  ;;  %v943_v23 = vmul.f32 %v3696_v17, %v942_v22 }
  0x1c   : > { %v907_v6 = vld [vmem:[#allocation2 + $0x10] sm:$0xff]  ;;  %902 = vst.msk [vmem:[#allocation2 + $0x28] sm:$0xff] %vm896_vm0, %v3562_v52 }
  0x1d   : > { %v922_v7 = vsel %vm896_vm0, %v907_v6, 0.0  ;;  %v905_v8 = vld [vmem:[#allocation2] sm:$0xff]  ;;  %v944_v24 = vadd.f32 %v3696_v17, %v943_v23 }
  0x1e   : > { %923 = vadd.xlane.f32.xlu1 %v922_v7  ;;  %v916_v9 = vsel %vm896_vm0, %v905_v8, 0.0  ;;  %v908_v10 = vld [vmem:[#allocation2 + $0x18] sm:$0xff] }
  0x1f   : > { %917 = vadd.xlane.f32.xlu0 %v916_v9  ;;  %v906_v11 = vld [vmem:[#allocation2 + $0x8] sm:$0xff]  ;;  %v925_v12 = vsel %vm896_vm0, %v908_v10, 0.0  ;;  %v4055_v25 = vsel %vm945_vm1, %v3696_v17, %v944_v24 }
  0x20   : > { %v919_v13 = vsel %vm896_vm0, %v906_v11, 0.0  ;;  %v912_v40 = vld [vmem:[#allocation2 + $0x38] sm:$0xff] }
  0x21   : > { %v937_v44 = vsel %vm896_vm0, %v912_v40, 0.0  ;;  %v909_v48 = vld [vmem:[#allocation2 + $0x20] sm:$0xff] }
  0x22   : > { %v911_v49 = vld [vmem:[#allocation2 + $0x30] sm:$0xff]  ;;  %v928_v50 = vsel %vm896_vm0, %v909_v48, 0.0 }
  0x23   : > { %v934_v51 = vsel %vm896_vm0, %v911_v49, 0.0 }
  0x26   : > { %926 = vadd.xlane.f32.xlu1 %v925_v12 }
  0x27   : > { %920 = vadd.xlane.f32.xlu0 %v919_v13 }
  0x91   : > { %v924_v26 = vpop.xlane.xlu1 %923 }
  0x92   : > { %v949_v27 = vmul.f32 %v4055_v25, %v924_v26  ;;  %v918_v28 = vpop.xlane.xlu0 %917 }
  0x93   : > { %v947_v29 = vmul.f32 %v4055_v25, %v918_v28 }
  0x94   : > { %v4059_v30 = vsub.f32 %v907_v6, %v949_v27 }
  0x95   : > { %v4061_v31 = vsub.f32 %v905_v8, %v947_v29 }
  0x96   : > { %v965_v32 = vmul.f32 %v4059_v30, %v4059_v30 }
  0x97   : > { %v963_v33 = vmul.f32 %v4061_v31, %v4061_v31 }
  0x98   : > { %v977_v34 = vsel %vm896_vm0, %v965_v32, 0.0 }
  0x99   : > { %v927_v35 = vpop.xlane.xlu1 %926  ;;  %978 = vadd.xlane.f32.xlu0 %v977_v34  ;;  %v971_v36 = vsel %vm896_vm0, %v963_v33, 0.0 }
  0x9a   : > { %v950_v37 = vmul.f32 %v4055_v25, %v927_v35  ;;  %972 = vadd.xlane.f32.xlu2 %v971_v36  ;;  %v921_v38 = vpop.xlane.xlu0 %920 }
  0x9b   : > { %v948_v39 = vmul.f32 %v4055_v25, %v921_v38 }
  0x9c   : > { %v4071_v41 = vsub.f32 %v908_v10, %v950_v37 }
  0x9d   : > { %v4073_v42 = vsub.f32 %v906_v11, %v948_v39 }
  0x9e   : > { %v966_v43 = vmul.f32 %v4071_v41, %v4071_v41 }
  0x9f   : > { %v964_v45 = vmul.f32 %v4073_v42, %v4073_v42 }
  0xa0   : > { %v980_v46 = vsel %vm896_vm0, %v966_v43, 0.0 }
  0xa1   : > { %981 = vadd.xlane.f32.xlu1 %v980_v46  ;;  %938 = vadd.xlane.f32.xlu0 %v937_v44  ;;  %v974_v47 = vsel %vm896_vm0, %v964_v45, 0.0  ;;  %v910_v46 = vld [vmem:[#allocation2 + $0x28] sm:$0xff] }
  0xa2   : > { %975 = vadd.xlane.f32.xlu2 %v974_v47 }
  0xa9   : > { %929 = vadd.xlane.f32.xlu0 %v928_v50 }
  0xaa   : > { %935 = vadd.xlane.f32.xlu2 %v934_v51  ;;  %v931_v51 = vsel %vm896_vm0, %v910_v46, 0.0 }
 0x10c   : > { %v979_v56 = vpop.xlane.xlu0 %978 }
 0x10d   : > { %v973_v57 = vpop.xlane.xlu2 %972  ;;  %v997_v62 = vmul.f32 %v979_v56, %v4055_v25 }
 0x10e   : > { %v995_v60 = vmul.f32 %v973_v57, %v4055_v25 }
 0x10f   : > { %v4105_v0 = vadd.f32 1e-05, %v997_v62 }
 0x110   : > { %v1003_v63 = vadd.f32 1e-05, %v995_v60 }
 0x111   : > { %vm1037_vm10 = vweird.f32 %v4105_v0 }
 0x112   : > { %3697 = vrsqrt.f32 %v1003_v63  ;;  %vm1017_vm3 = vweird.f32 %v1003_v63 }
 0x113   : > { %3699 = vrsqrt.f32 %v4105_v0 }
 0x114   : > { %v982_v1 = vpop.xlane.xlu1 %981  ;;  %v939_v2 = vpop.xlane.xlu0 %938 }
 0x115   : > { %v998_v3 = vmul.f32 %v982_v1, %v4055_v25  ;;  %v976_v4 = vpop.xlane.xlu2 %975  ;;  %v954_v5 = vmul.f32 %v4055_v25, %v939_v2 }
 0x116   : > { %v996_v6 = vmul.f32 %v976_v4, %v4055_v25 }
 0x117   : > { %v4111_v7 = vadd.f32 1e-05, %v998_v3  ;;  %v4113_v8 = vsub.f32 %v912_v40, %v954_v5 }
 0x118   : > { %v3698_v9 = vpop.eup %3697  ;;  %v1004_v10 = vadd.f32 1e-05, %v996_v6 }
 0x119   : > { %v1012_v11 = vmul.f32 %v3698_v9, %v1003_v63  ;;  %3701 = vrsqrt.f32 %v4111_v7  ;;  %v970_v12 = vmul.f32 %v4113_v8, %v4113_v8  ;;  %v4119_v16 = vpop.eup %3699  ;;  %vm1018_vm2 = vweird.f32 %v3698_v9 }
 0x11a   : > { %3703 = vrsqrt.f32 %v1004_v10  ;;  %v1032_v26 = vmul.f32 %v4119_v16, %v4105_v0  ;;  %vm1019_vm4 = vmor %vm1017_vm3, %vm1018_vm2  ;;  %vm1027_vm6 = vweird.f32 %v1004_v10  ;;  %vm1047_vm8 = vweird.f32 %v4111_v7 }
 0x11b   : > { %v1013_v13 = vmul.f32 %v3698_v9, %v1012_v11  ;;  %v992_v14 = vsel %vm896_vm0, %v970_v12, 0.0  ;;  %vm1038_vm11 = vweird.f32 %v4119_v16 }
 0x11c   : > { %v930_v15 = vpop.xlane.xlu0 %929  ;;  %993 = vadd.xlane.f32.xlu2 %v992_v14  ;;  %v1033_v40 = vmul.f32 %v4119_v16, %v1032_v26  ;;  %vm1039_vm13 = vmor %vm1037_vm10, %vm1038_vm11 }
 0x11d   : > { %v1014_v17 = vmul.f32 0.5, %v1013_v13  ;;  %v936_v18 = vpop.xlane.xlu2 %935  ;;  %v951_v19 = vmul.f32 %v4055_v25, %v930_v15 }
 0x11e   : > { %v953_v20 = vmul.f32 %v4055_v25, %v936_v18 }
 0x11f   : > { %v3702_v21 = vpop.eup %3701  ;;  %v1015_v22 = vsub.f32 1.5, %v1014_v17  ;;  %v4123_v23 = vsub.f32 %v909_v48, %v951_v19  ;;  %v4141_v48 = vld [vmem:[%s5093_s27] ss:$0 sm:$0xff] }
 0x120   : > { %v3704_v24 = vpop.eup %3703  ;;  %v1042_v27 = vmul.f32 %v3702_v21, %v4111_v7  ;;  %v4128_v28 = vsub.f32 %v911_v49, %v953_v20  ;;  %v1034_v49 = vmul.f32 0.5, %v1033_v40  ;;  %vm1048_vm9 = vweird.f32 %v3702_v21 }
 0x121   : > { %v1016_v29 = vmul.f32 %v3698_v9, %v1015_v22  ;;  %v1022_v32 = vmul.f32 %v3704_v24, %v1004_v10  ;;  %v967_v33 = vmul.f32 %v4123_v23, %v4123_v23  ;;  %vm1028_vm5 = vweird.f32 %v3704_v24  ;;  %vm1049_vm12 = vmor %vm1047_vm8, %vm1048_vm9 }
 0x122   : > { %v969_v34 = vmul.f32 %v4128_v28, %v4128_v28  ;;  %v1043_v35 = vmul.f32 %v3702_v21, %v1042_v27  ;;  %vm1029_vm7 = vmor %vm1027_vm6, %vm1028_vm5  ;;  %v1035_v56 = vsub.f32 1.5, %v1034_v49  ;;  %vm1328_vm5 = vcmask 64512  }
 0x123   : > { %v1023_v36 = vmul.f32 %v3704_v24, %v1022_v32  ;;  %v983_v37 = vsel %vm896_vm0, %v967_v33, 0.0  ;;  %v1020_v39 = vsel %vm1019_vm4, %v3698_v9, %v1016_v29 }
 0x124   : > { %v989_v38 = vsel %vm896_vm0, %v969_v34, 0.0  ;;  %984 = vadd.xlane.f32.xlu2 %v983_v37  ;;  %v1044_v44 = vmul.f32 0.5, %v1043_v35  ;;  %v1091_v47 = vmul.f32 %v1020_v39, %v4061_v31  ;;  %v4149_v31 = vld [vmem:[%s5094_s22] ss:$0 sm:$0xff]  ;;  %v1036_v60 = vmul.f32 %v4119_v16, %v1035_v56  ;;  %s3909_s22 = smov 8  }
 0x125   : > { %v1024_v43 = vmul.f32 0.5, %v1023_v36  ;;  %990 = vadd.xlane.f32.xlu1 %v989_v38 }
 0x126   : > { %v1045_v52 = vsub.f32 1.5, %v1044_v44  ;;  %v1102_v55 = vmul.f32 %v4141_v48, %v1091_v47  ;;  %v1040_v63 = vsel %vm1039_vm13, %v4119_v16, %v1036_v60  ;;  %v4186_v44 = vld [vmem:[%s5068_s4] ss:$0 sm:$0xff]  ;;  %vm2482_vm13 = vcmask 195584  }
 0x127   : > { %v1025_v45 = vsub.f32 1.5, %v1024_v43  ;;  %v1093_v1 = vmul.f32 %v1040_v63, %v4059_v30 }
 0x128   : > { %v1046_v58 = vmul.f32 %v3702_v21, %v1045_v52 }
 0x129   : > { %v1026_v50 = vmul.f32 %v3704_v24, %v1025_v45  ;;  %v1104_v3 = vmul.f32 %v4141_v48, %v1093_v1 }
 0x12a   : > { %v1050_v62 = vsel %vm1049_vm12, %v3702_v21, %v1046_v58  ;;  %vm2473_vm12 = vcmask 130048  }
 0x12b   : > { %v1030_v53 = vsel %vm1029_vm7, %v3704_v24, %v1026_v50  ;;  %v1094_v0 = vmul.f32 %v1050_v62, %v4071_v41  ;;  %v1115_v5 = vadd.f32 %v4149_v31, %v1104_v3 }
 0x12c   : > { %v1092_v54 = vmul.f32 %v1030_v53, %v4073_v42  ;;  %v1113_v42 = vadd.f32 %v4149_v31, %v1102_v55 }
 0x12d   : > { %932 = vadd.xlane.f32.xlu1 %v931_v51  ;;  %v1105_v2 = vmul.f32 %v4141_v48, %v1094_v0 }
 0x12e   : > { %v1103_v57 = vmul.f32 %v4141_v48, %v1092_v54 }
 0x12f   : > { %v1116_v4 = vadd.f32 %v4149_v31, %v1105_v2 }
 0x130   : > { %v1114_v59 = vadd.f32 %v4149_v31, %v1103_v57 }
 0x131   : > { %v1122_v6 = vpack.c.bf16 %v1116_v4, %v1115_v5 }
 0x132   : > { %v1121_v61 = vpack.c.bf16 %v1114_v59, %v1113_v42 }
 0x134   : > { %3415 = vmatmul.msk.bf16.vlgmr.msra.gmra.mxu0 %vm896_vm0, %v1121_v61  ;;  %3427 = vmatmul.msk.bf16.vlgmr.msra.gmra.mxu1 %vm896_vm0, %v1121_v61 }
 0x135   : > { %3439 = vmatmul.msk.bf16.vlgmr.msra.gmra.mxu2 %vm896_vm0, %v1121_v61 }
 0x144   : > { %3416 = vmatmul.msk.bf16.gmra.mxu0 %vm896_vm0, %v1122_v6  ;;  %3428 = vmatmul.msk.bf16.gmra.mxu1 %vm896_vm0, %v1122_v6 }
 0x145   : > { %3440 = vmatmul.msk.bf16.gmra.mxu2 %vm896_vm0, %v1122_v6 }
 0x18f   : > { %v994_v7 = vpop.xlane.xlu2 %993 }
 0x190   : > { %v1002_v41 = vmul.f32 %v994_v7, %v4055_v25 }
 0x192   : > { %v1010_v9 = vadd.f32 1e-05, %v1002_v41 }
 0x194   : > { %3705 = vrsqrt.f32 %v1010_v9  ;;  %vm1087_vm14 = vweird.f32 %v1010_v9 }
 0x198   : > { %v991_v30 = vpop.xlane.xlu1 %990 }
 0x199   : > { %v1001_v10 = vmul.f32 %v991_v30, %v4055_v25 }
 0x19a   : > { %v3706_v11 = vpop.eup %3705 }
 0x19b   : > { %v1009_v12 = vadd.f32 1e-05, %v1001_v10  ;;  %v1082_v13 = vmul.f32 %v3706_v11, %v1010_v9  ;;  %vm1088_vm15 = vweird.f32 %v3706_v11  ;;  %v4220_v9 = vld [vmem:[%s5072_s8] ss:$0 sm:$0xff] }
 0x19c   : > { %vm1089_vm1 = vmor %vm1087_vm14, %vm1088_vm15 }
 0x19d   : > { %3707 = vrsqrt.f32 %v1009_v12  ;;  %v1083_v14 = vmul.f32 %v3706_v11, %v1082_v13  ;;  %vm1077_vm3 = vweird.f32 %v1009_v12 }
 0x19f   : > { %v1084_v15 = vmul.f32 0.5, %v1083_v14 }
 0x1a0   : > { %v933_v16 = vpop.xlane.xlu1 %932 }
 0x1a1   : > { %v952_v17 = vmul.f32 %v4055_v25, %v933_v16  ;;  %v1085_v18 = vsub.f32 1.5, %v1084_v15 }
 0x1a3   : > { %v3708_v19 = vpop.eup %3707  ;;  %v4174_v20 = vsub.f32 %v910_v46, %v952_v17  ;;  %v1086_v21 = vmul.f32 %v3706_v11, %v1085_v18 }
 0x1a4   : > { %v1072_v22 = vmul.f32 %v3708_v19, %v1009_v12  ;;  %vm1078_vm2 = vweird.f32 %v3708_v19 }
 0x1a5   : > { %v968_v24 = vmul.f32 %v4174_v20, %v4174_v20  ;;  %v1090_v29 = vsel %vm1089_vm1, %v3706_v11, %v1086_v21  ;;  %vm1079_vm4 = vmor %vm1077_vm3, %vm1078_vm2 }
 0x1a6   : > { %v1073_v26 = vmul.f32 %v3708_v19, %v1072_v22  ;;  %v1098_v34 = vmul.f32 %v1090_v29, %v4113_v8  ;;  %v4191_v8 = vld [vmem:[%s5070_s6] ss:$0 sm:$0xff] }
 0x1a7   : > { %v986_v27 = vsel %vm896_vm0, %v968_v24, 0.0 }
 0x1a8   : > { %v1074_v32 = vmul.f32 0.5, %v1073_v26  ;;  %987 = vadd.xlane.f32.xlu0 %v986_v27  ;;  %v1109_v38 = vmul.f32 %v4141_v48, %v1098_v34 }
 0x1aa   : > { %v1075_v33 = vsub.f32 1.5, %v1074_v32 }
 0x1ac   : > { %v1076_v35 = vmul.f32 %v3708_v19, %v1075_v33 }
 0x1ae   : > { %v1080_v36 = vsel %vm1079_vm4, %v3708_v19, %v1076_v35 }
 0x1af   : > { %v1097_v37 = vmul.f32 %v1080_v36, %v4128_v28  ;;  %v1120_v28 = vadd.f32 %v4149_v31, %v1109_v38 }
 0x1b1   : > { %v1166_v39 = vpop.f32.mrf.mxu0  ;;  %v1215_v40 = vpop.f32.mrf.mxu1  ;;  %v1108_v43 = vmul.f32 %v4141_v48, %v1097_v37 }
 0x1b2   : > { %v1167_v47 = vadd.f32 %v4186_v44, %v1166_v39  ;;  %v1216_v49 = vadd.f32 %v4191_v8, %v1215_v40 }
 0x1b3   : > { %v1119_v45 = vadd.f32 %v4149_v31, %v1108_v43 }
 0x1b4   : > { %v1284_v53 = vpack.c.bf16 %v1167_v47, %v1167_v47  ;;  %v1292_v54 = vpack.c.bf16 %v1216_v49, %v1216_v49 }
 0x1b5   : > { %v4195_v46 = vpack.c.bf16 %v1120_v28, %v1119_v45  ;;  %v985_v28 = vpop.xlane.xlu2 %984 }
 0x1b6   : > { %v1312_v42 = vunpack.c.l.b16 %v1284_v53  ;;  %v1322_v59 = vunpack.c.l.b16 %v1292_v54  ;;  %v999_v47 = vmul.f32 %v985_v28, %v4055_v25 }
 0x1b7   : > { %3430 = vmatmul.msk.bf16.vlgmr.msra.gmra.mxu3 %vm896_vm0, %v4195_v46 }
 0x1b8   : > { %v1264_v50 = vpop.f32.mrf.mxu2  ;;  %v1007_v49 = vadd.f32 1e-05, %v999_v47 }
 0x1b9   : > { %v1168_v51 = vpop.f32.mrf.mxu0  ;;  %v1217_v52 = vpop.f32.mrf.mxu1  ;;  %v1265_v19 = vadd.f32 %v4220_v9, %v1264_v50 }
 0x1ba   : > { %v1169_v55 = vadd.f32 %v4186_v44, %v1168_v51  ;;  %v1218_v56 = vadd.f32 %v4191_v8, %v1217_v52  ;;  %3709 = vrsqrt.f32 %v1007_v49  ;;  %vm1057_vm6 = vweird.f32 %v1007_v49 }
 0x1bb   : > { %v1300_v33 = vpack.c.bf16 %v1265_v19, %v1265_v19 }
 0x1bc   : > { %v1285_v57 = vpack.c.bf16 %v1169_v55, %v1169_v55  ;;  %v1293_v58 = vpack.c.bf16 %v1218_v56, %v1218_v56 }
 0x1bd   : > { %v1521_v40 = vunpack.c.l.b16 %v1300_v33 }
 0x1be   : > { %v1313_v60 = vunpack.c.l.b16 %v1285_v57  ;;  %v1323_v61 = vunpack.c.l.b16 %v1293_v58 }
 0x1c0   : > { %v4203_v62 = vpack.c.b16 %v1313_v60, %v1312_v42  ;;  %v4205_v63 = vpack.c.b16 %v1323_v61, %v1322_v59  ;;  %v1266_v0 = vpop.f32.mrf.mxu2  ;;  %v3710_v50 = vpop.eup %3709 }
 0x1c1   : > { %v1171_v1 = vpop.f32.mrf.mxu0  ;;  %v1220_v2 = vpop.f32.mrf.mxu1  ;;  %v1267_v15 = vadd.f32 %v4220_v9, %v1266_v0  ;;  %v1052_v51 = vmul.f32 %v3710_v50, %v1007_v49  ;;  %vm1058_vm7 = vweird.f32 %v3710_v50 }
 0x1c2   : > { %1601 = vrot.lane.b32.xlu1 %v4203_v62, %s3906_s21  ;;  %1605 = vrot.lane.b32.xlu0 %v4205_v63, %s3906_s21  ;;  %v1221_v3 = vadd.f32 %v4191_v8, %v1220_v2  ;;  %v1172_v12 = vadd.f32 %v4186_v44, %v1171_v1  ;;  %v1336_v43 = vsel %vm1328_vm5, %v4205_v63, 0  ;;  %vm1059_vm8 = vmor %vm1057_vm6, %vm1058_vm7 }
 0x1c3   : > { %v1301_v27 = vpack.c.bf16 %v1267_v15, %v1267_v15  ;;  %v1053_v52 = vmul.f32 %v3710_v50, %v1052_v51 }
 0x1c4   : > { %v1294_v7 = vpack.c.bf16 %v1221_v3, %v1221_v3  ;;  %v1286_v24 = vpack.c.bf16 %v1172_v12, %v1172_v12 }
 0x1c5   : > { %v1522_v37 = vunpack.c.l.b16 %v1301_v27  ;;  %v1054_v56 = vmul.f32 0.5, %v1053_v52 }
 0x1c6   : > { %v1324_v13 = vunpack.c.l.b16 %v1294_v7  ;;  %v1314_v36 = vunpack.c.l.b16 %v1286_v24 }
 0x1c7   : > { %v4244_v45 = vpack.c.b16 %v1522_v37, %v1521_v40  ;;  %v1055_v57 = vsub.f32 1.5, %v1054_v56 }
 0x1c8   : > { %v1269_v4 = vpop.f32.mrf.mxu2 }
 0x1c9   : > { %v1173_v5 = vpop.f32.mrf.mxu0  ;;  %v1222_v6 = vpop.f32.mrf.mxu1  ;;  %v1270_v11 = vadd.f32 %v4220_v9, %v1269_v4  ;;  %v1056_v42 = vmul.f32 %v3710_v50, %v1055_v57 }
 0x1ca   : > { %v1223_v41 = vadd.f32 %v4191_v8, %v1222_v6  ;;  %1857 = vrot.lane.b32.xlu1 %v4203_v62, %s3907_s1  ;;  %1861 = vrot.lane.b32.xlu0 %v4205_v63, %s3907_s1  ;;  %v1174_v30 = vadd.f32 %v4186_v44, %v1173_v5 }
 0x1cb   : > { %v1302_v21 = vpack.c.bf16 %v1270_v11, %v1270_v11  ;;  %v1060_v61 = vsel %vm1059_vm8, %v3710_v50, %v1056_v42 }
 0x1cc   : > { %v1295_v10 = vpack.c.bf16 %v1223_v41, %v1223_v41  ;;  %v1287_v16 = vpack.c.bf16 %v1174_v30, %v1174_v30  ;;  %v1095_v4 = vmul.f32 %v1060_v61, %v4123_v23 }
 0x1cd   : > { %v1523_v34 = vunpack.c.l.b16 %v1302_v21 }
 0x1ce   : > { %v1325_v14 = vunpack.c.l.b16 %v1295_v10  ;;  %v1315_v32 = vunpack.c.l.b16 %v1287_v16  ;;  %v1106_v41 = vmul.f32 %v4141_v48, %v1095_v4 }
 0x1d0   : > { %v4226_v17 = vpack.c.b16 %v1325_v14, %v1324_v13  ;;  %v1271_v18 = vpop.f32.mrf.mxu2  ;;  %v4236_v39 = vpack.c.b16 %v1315_v32, %v1314_v36  ;;  %v1117_v12 = vadd.f32 %v4149_v31, %v1106_v41 }
 0x1d1   : > { %v1272_v22 = vadd.f32 %v4220_v9, %v1271_v18 }
 0x1d2   : > { %1607 = vrot.lane.b32.xlu2 %v4226_v17, %s3906_s21  ;;  %v1339_v26 = vsel %vm1328_vm5, %v4226_v17, 0 }
 0x1d3   : > { %v1303_v29 = vpack.c.bf16 %v1272_v22, %v1272_v22  ;;  %1347 = vmatpush.bf16.xpose.msrb.mxu3 %v1339_v26 }
 0x1d5   : > { %v1524_v35 = vunpack.c.l.b16 %v1303_v29 }
 0x1d7   : > { %v4234_v38 = vpack.c.b16 %v1524_v35, %v1523_v34 }
 0x1d9   : > { %1541 = vmatpush.bf16.msrb.mxu0 %v4234_v38  ;;  %3591 = vmatpush.bf16.msrb.mxu2 %v4234_v38 }
 0x1da   : > { %1603 = vrot.lane.b32.xlu2 %v4236_v39, %s3906_s21 }
 0x1db   : > { %1348 = vmatpush.bf16.xpose.msrb.mxu3 %v1336_v43 }
 0x1dd   : > { %1542 = vmatpush.bf16.msrb.mxu0 %v4244_v45  ;;  %3592 = vmatpush.bf16.msrb.mxu2 %v4244_v45 }
 0x1e2   : > { %3443 = vmatmul.msk.bf16.vlgmr.msrb.gmra.mxu3 %vm1328_vm5, %v4203_v62  ;;  %1863 = vrot.lane.b32.xlu2 %v4226_v17, %s3907_s1 }
 0x1ea   : > { %1859 = vrot.lane.b32.xlu2 %v4236_v39, %s3907_s1 }
 0x1f2   : > { %3444 = vmatmul.msk.bf16.gmra.mxu3 %vm1328_vm5, %v4236_v39 }
 0x21b   : > { %v988_v53 = vpop.xlane.xlu0 %987 }
 0x21c   : > { %v1000_v54 = vmul.f32 %v988_v53, %v4055_v25 }
 0x21e   : > { %v1008_v55 = vadd.f32 1e-05, %v1000_v54 }
 0x220   : > { %3711 = vrsqrt.f32 %v1008_v55  ;;  %vm1067_vm10 = vweird.f32 %v1008_v55 }
 0x226   : > { %v3712_v58 = vpop.eup %3711 }
 0x227   : > { %v1062_v59 = vmul.f32 %v3712_v58, %v1008_v55  ;;  %vm1068_vm9 = vweird.f32 %v3712_v58 }
 0x228   : > { %vm1069_vm11 = vmor %vm1067_vm10, %vm1068_vm9 }
 0x229   : > { %v1063_v60 = vmul.f32 %v3712_v58, %v1062_v59 }
 0x22b   : > { %v1064_v0 = vmul.f32 0.5, %v1063_v60 }
 0x22c   : > { %v1608_v1 = vpop.permute.xlu2 %1607 }
 0x22d   : > { %v1065_v2 = vsub.f32 1.5, %v1064_v0  ;;  %v1619_v3 = vsel %vm1328_vm5, %v1608_v1, 0 }
 0x22e   : > { %1627 = vmatpush.bf16.xpose.msra.mxu2 %v1619_v3 }
 0x22f   : > { %v1066_v5 = vmul.f32 %v3712_v58, %v1065_v2 }
 0x231   : > { %v1070_v6 = vsel %vm1069_vm11, %v3712_v58, %v1066_v5 }
 0x232   : > { %v1096_v7 = vmul.f32 %v1070_v6, %v4174_v20 }
 0x234   : > { %v1107_v30 = vmul.f32 %v4141_v48, %v1096_v7  ;;  %v1606_v10 = vpop.permute.xlu0 %1605 }
 0x235   : > { %v1616_v11 = vsel %vm1328_vm5, %v1606_v10, 0 }
 0x236   : > { %v1118_v13 = vadd.f32 %v4149_v31, %v1107_v30  ;;  %1628 = vmatpush.bf16.xpose.msra.mxu2 %v1616_v11 }
 0x238   : > { %v1123_v23 = vpack.c.bf16 %v1118_v13, %v1117_v12 }
 0x23a   : > { %3417 = vmatmul.msk.bf16.gmra.mxu0 %vm896_vm0, %v1123_v23  ;;  %3429 = vmatmul.msk.bf16.gmra.mxu1 %vm896_vm0, %v1123_v23  ;;  %v1230_v14 = vpop.f32.mrf.mxu3 }
 0x23b   : > { %3441 = vmatmul.msk.bf16.gmra.mxu2 %vm896_vm0, %v1123_v23  ;;  %v1231_v20 = vadd.f32 %v4191_v8, %v1230_v14 }
 0x23c   : > { %v4283_v32 = vpop.permute.xlu0 %1861 }
 0x23d   : > { %v1298_v48 = vpack.c.bf16 %v1231_v20, %v1231_v20 }
 0x23f   : > { %v1376_v19 = vunpack.c.l.b16 %v1298_v48 }
 0x242   : > { %v1232_v15 = vpop.f32.mrf.mxu3 }
 0x243   : > { %v1233_v16 = vadd.f32 %v4191_v8, %v1232_v15 }
 0x245   : > { %v1299_v18 = vpack.c.bf16 %v1233_v16, %v1233_v16 }
 0x247   : > { %v1377_v21 = vunpack.c.l.b16 %v1299_v18 }
 0x249   : > { %v4271_v22 = vpack.c.b16 %v1377_v21, %v1376_v19 }
 0x24a   : > { %3418 = vmatmul.msk.bf16.gmra.mxu0 %vm896_vm0, %v4195_v46 }
 0x24b   : > { %3442 = vmatmul.msk.bf16.gmra.mxu2 %vm896_vm0, %v4195_v46  ;;  %1646 = vrot.lane.b32.xlu0 %v4271_v22, %s3906_s21  ;;  %v1390_v31 = vsel %vm1328_vm5, %v4271_v22, 0 }
 0x24c   : > { %1398 = vmatpush.bf16.xpose.msra.mxu3 %v1390_v31  ;;  %v4338_v31 = vpop.permute.xlu1 %1601 }
 0x265   : > { %v4299_v59 = vpop.f32.mrf.mxu3 }
 0x2b7   : > { %v1176_v24 = vpop.f32.mrf.mxu0  ;;  %v1225_v26 = vpop.f32.mrf.mxu1 }
 0x2b8   : > { %v1177_v27 = vadd.f32 %v4186_v44, %v1176_v24  ;;  %v1226_v29 = vadd.f32 %v4191_v8, %v1225_v26  ;;  %v4342_v26 = vpop.permute.xlu1 %1857 }
 0x2ba   : > { %v1288_v36 = vpack.c.bf16 %v1177_v27, %v1177_v27  ;;  %v1296_v46 = vpack.c.bf16 %v1226_v29, %v1226_v29 }
 0x2bc   : > { %v1364_v47 = vunpack.c.l.b16 %v1288_v36  ;;  %v1374_v49 = vunpack.c.l.b16 %v1296_v46 }
 0x2bd   : > { %v1647_v52 = vpop.permute.xlu0 %1646 }
 0x2be   : > { %v1274_v33 = vpop.f32.mrf.mxu2  ;;  %v1658_v57 = vsel %vm1328_vm5, %v1647_v52, 0 }
 0x2bf   : > { %v1178_v34 = vpop.f32.mrf.mxu0  ;;  %v1227_v35 = vpop.f32.mrf.mxu1  ;;  %v1275_v41 = vadd.f32 %v4220_v9, %v1274_v33 }
 0x2c0   : > { %v1179_v37 = vadd.f32 %v4186_v44, %v1178_v34  ;;  %v1228_v40 = vadd.f32 %v4191_v8, %v1227_v35 }
 0x2c1   : > { %v1304_v13 = vpack.c.bf16 %v1275_v41, %v1275_v41 }
 0x2c2   : > { %v1289_v43 = vpack.c.bf16 %v1179_v37, %v1179_v37  ;;  %v1297_v28 = vpack.c.bf16 %v1228_v40, %v1228_v40 }
 0x2c3   : > { %v1568_v48 = vunpack.c.l.b16 %v1304_v13 }
 0x2c4   : > { %v1365_v50 = vunpack.c.l.b16 %v1289_v43  ;;  %v1375_v51 = vunpack.c.l.b16 %v1297_v28 }
 0x2c6   : > { %v4287_v53 = vpack.c.b16 %v1365_v50, %v1364_v47  ;;  %v4289_v54 = vpack.c.b16 %v1375_v51, %v1374_v49  ;;  %v1276_v55 = vpop.f32.mrf.mxu2 }
 0x2c7   : > { %v1181_v56 = vpop.f32.mrf.mxu0  ;;  %v1277_v5 = vadd.f32 %v4220_v9, %v1276_v55 }
 0x2c8   : > { %1644 = vrot.lane.b32.xlu1 %v4289_v54, %s3906_s21  ;;  %1640 = vrot.lane.b32.xlu2 %v4287_v53, %s3906_s21  ;;  %v1387_v8 = vsel %vm1328_vm5, %v4289_v54, 0  ;;  %v1182_v58 = vadd.f32 %v4186_v44, %v1181_v56 }
 0x2c9   : > { %1399 = vmatpush.bf16.xpose.msra.mxu3 %v1387_v8  ;;  %v1305_v11 = vpack.c.bf16 %v1277_v5, %v1277_v5 }
 0x2ca   : > { %v1290_v61 = vpack.c.bf16 %v1182_v58, %v1182_v58 }
 0x2cb   : > { %v1569_v20 = vunpack.c.l.b16 %v1305_v11 }
 0x2cc   : > { %v1366_v3 = vunpack.c.l.b16 %v1290_v61 }
 0x2ce   : > { %v1279_v42 = vpop.f32.mrf.mxu2 }
 0x2cf   : > { %v1183_v60 = vpop.f32.mrf.mxu0  ;;  %v1280_v2 = vadd.f32 %v4220_v9, %v1279_v42 }
 0x2d0   : > { %v1184_v0 = vadd.f32 %v4186_v44, %v1183_v60  ;;  %3445 = vmatmul.msk.bf16.vlgmr.msra.gmra.mxu3 %vm1328_vm5, %v4287_v53  ;;  %v4312_v44 = vpop.f32.mrf.mxu3 }
 0x2d1   : > { %1666 = vmatpush.bf16.xpose.msrb.mxu3 %v1658_v57  ;;  %v1306_v30 = vpack.c.bf16 %v1280_v2, %v1280_v2 }
 0x2d2   : > { %v1291_v1 = vpack.c.bf16 %v1184_v0, %v1184_v0 }
 0x2d3   : > { %v1570_v23 = vunpack.c.l.b16 %v1306_v30 }
 0x2d4   : > { %v1367_v4 = vunpack.c.l.b16 %v1291_v1 }
 0x2d6   : > { %v4306_v6 = vpack.c.b16 %v1367_v4, %v1366_v3  ;;  %v1281_v7 = vpop.f32.mrf.mxu2 }
 0x2d7   : > { %v1282_v10 = vadd.f32 %v4220_v9, %v1281_v7  ;;  %v4321_v9 = vpack.c.b16 %v1569_v20, %v1568_v48 }
 0x2d8   : > { %1642 = vrot.lane.b32.xlu0 %v4306_v6, %s3906_s21  ;;  %v1355_v16 = vpop.f32.mrf.mxu3 }
 0x2d9   : > { %v1307_v12 = vpack.c.bf16 %v1282_v10, %v1282_v10  ;;  %v1417_v21 = vsel %vm896_vm0, %v1355_v16, -inf }
 0x2db   : > { %v1571_v14 = vunpack.c.l.b16 %v1307_v12 }
 0x2dd   : > { %v4314_v15 = vpack.c.b16 %v1571_v14, %v1570_v23 }
 0x2df   : > { %1588 = vmatpush.bf16.msrb.mxu1 %v4314_v15 }
 0x2e0   : > { %2119 = vrot.lane.b32.xlu0 %v4226_v17, %s3908_s29  ;;  %3446 = vmatmul.msk.bf16.gmra.mxu3 %vm1328_vm5, %v4306_v6  ;;  %v1357_v18 = vpop.f32.mrf.mxu3  ;;  %v4336_v17 = vpop.permute.xlu2 %1603 }
 0x2e1   : > { %v1420_v19 = vsel %vm896_vm0, %v1357_v18, -inf }
 0x2e3   : > { %1589 = vmatpush.bf16.msrb.mxu1 %v4321_v9 }
 0x2e8   : > { %v4340_v24 = vpop.permute.xlu2 %1863 }
 0x2f0   : > { %v4344_v27 = vpop.permute.xlu2 %1859 }
 0x2f1   : > { %1421 = vmax.xlane.f32.xlu2 %v1420_v19  ;;  %v1875_v19 = vsel %vm1328_vm5, %v4340_v24, 0 }
 0x2f2   : > { %1418 = vmax.xlane.f32.xlu1 %v1417_v21 }
 0x309   : > { %1900 = vrot.lane.b32.xlu2 %v4289_v54, %s3907_s1 }
 0x30b   : > { %1902 = vrot.lane.b32.xlu1 %v4271_v22, %s3907_s1 }
 0x311   : > { %2113 = vrot.lane.b32.xlu2 %v4203_v62, %s3908_s29 }
 0x319   : > { %2158 = vrot.lane.b32.xlu2 %v4271_v22, %s3908_s29 }
 0x321   : > { %2154 = vrot.lane.b32.xlu2 %v4306_v6, %s3908_s29 }
 0x322   : > { %v1641_v62 = vpop.permute.xlu2 %1640 }
 0x33a   : > { %v1645_v29 = vpop.permute.xlu1 %1644 }
 0x33b   : > { %v1655_v33 = vsel %vm1328_vm5, %v1645_v29, 0 }
 0x33c   : > { %1667 = vmatpush.bf16.xpose.msrb.mxu3 %v1655_v33  ;;  %v1872_v33 = vsel %vm1328_vm5, %v4283_v32, 0 }
 0x343   : > { %3453 = vmatmul.msk.bf16.vlgmr.msrb.gmra.mxu3 %vm1328_vm5, %v1641_v62 }
 0x34a   : > { %v1643_v22 = vpop.permute.xlu0 %1642 }
 0x352   : > { %v2120_v41 = vpop.permute.xlu0 %2119 }
 0x353   : > { %v4348_v34 = vpop.f32.mrf.mxu3  ;;  %3454 = vmatmul.msk.bf16.gmra.mxu3 %vm1328_vm5, %v1643_v22  ;;  %v2131_v22 = vsel %vm1328_vm5, %v2120_v41, 0 }
 0x354   : > { %v1423_v35 = vsel %vm896_vm0, %v4348_v34, -inf }
 0x355   : > { %1424 = vmax.xlane.f32.xlu2 %v1423_v35 }
 0x35b   : > { %v4372_v60 = vpop.f32.mrf.mxu3 }
 0x363   : > { %v4374_v61 = vpop.f32.mrf.mxu3 }
 0x364   : > { %v1422_v36 = vpop.xlane.xlu2 %1421  ;;  %v1429_v5 = vsel %vm896_vm0, %v4374_v61, -inf }
 0x365   : > { %v1438_v46 = vsub.f32 %v1357_v18, %v1422_v36  ;;  %v1419_v37 = vpop.xlane.xlu1 %1418 }
 0x366   : > { %v1437_v40 = vsub.f32 %v1355_v16, %v1419_v37 }
 0x367   : > { %v1449_v43 = vmul.f32 1.442695, %v1438_v46 }
 0x368   : > { %v1447_v28 = vmul.f32 1.442695, %v1437_v40 }
 0x369   : > { %3713 = vpow2.f32 %v1449_v43 }
 0x36a   : > { %3715 = vpow2.f32 %v1447_v28 }
 0x36b   : > { %v4376_v0 = vpop.f32.mrf.mxu3 }
 0x36c   : > { %v1901_v50 = vpop.permute.xlu2 %1900 }
 0x36d   : > { %v1911_v58 = vsel %vm1328_vm5, %v1901_v50, 0 }
 0x36f   : > { %v3714_v47 = vpop.eup %3713 }
 0x370   : > { %v3716_v49 = vpop.eup %3715  ;;  %v1468_v51 = vsel %vm896_vm0, %v3714_v47, 0.0 }
 0x371   : > { %1469 = vadd.xlane.f32.xlu1 %v1468_v51  ;;  %v1465_v52 = vsel %vm896_vm0, %v3716_v49, 0.0 }
 0x372   : > { %1466 = vadd.xlane.f32.xlu0 %v1465_v52 }
 0x374   : > { %v4355_v55 = vpop.permute.xlu2 %2113 }
 0x37c   : > { %v2159_v57 = vpop.permute.xlu2 %2158 }
 0x37d   : > { %v1903_v56 = vpop.permute.xlu1 %1902  ;;  %v2170_v42 = vsel %vm1328_vm5, %v2159_v57, 0 }
 0x37e   : > { %v1914_v8 = vsel %vm1328_vm5, %v1903_v56, 0 }
 0x37f   : > { %1922 = vmatpush.bf16.xpose.msra.mxu3 %v1914_v8 }
 0x386   : > { %1896 = vrot.lane.b32.xlu0 %v4287_v53, %s3907_s1 }
 0x387   : > { %1923 = vmatpush.bf16.xpose.msra.mxu3 %v1911_v58 }
 0x38a   : > { %2117 = vrot.lane.b32.xlu1 %v4205_v63, %s3908_s29  ;;  %v1414_v63 = vsel %vm896_vm0, %v4312_v44, -inf }
 0x38e   : > { %2115 = vrot.lane.b32.xlu0 %v4236_v39, %s3908_s29  ;;  %v1411_v39 = vsel %vm896_vm0, %v4299_v59, -inf }
 0x38f   : > { %2178 = vmatpush.bf16.xpose.msrb.mxu3 %v2170_v42 }
 0x392   : > { %1898 = vrot.lane.b32.xlu1 %v4306_v6, %s3907_s1 }
 0x396   : > { %2152 = vrot.lane.b32.xlu0 %v4287_v53, %s3908_s29  ;;  %v1432_v53 = vsel %vm896_vm0, %v4376_v0, -inf }
 0x39a   : > { %2156 = vrot.lane.b32.xlu1 %v4289_v54, %s3908_s29  ;;  %v1426_v54 = vsel %vm896_vm0, %v4372_v60, -inf }
 0x3c0   : > { %1415 = vmax.xlane.f32.xlu0 %v1414_v63 }
 0x3c4   : > { %1412 = vmax.xlane.f32.xlu1 %v1411_v39 }
 0x3c6   : > { %v4382_v1 = vpop.f32.mrf.mxu3 }
 0x3c7   : > { %v1691_v3 = vsel %vm896_vm0, %v4382_v1, -inf }
 0x3c8   : > { %1433 = vmax.xlane.f32.xlu0 %v1432_v53 }
 0x3cc   : > { %1427 = vmax.xlane.f32.xlu1 %v1426_v54 }
 0x3ce   : > { %v4388_v2 = vpop.f32.mrf.mxu3 }
 0x3cf   : > { %v1694_v4 = vsel %vm896_vm0, %v4388_v2, -inf }
 0x3d0   : > { %1692 = vmax.xlane.f32.xlu0 %v1691_v3  ;;  %1695 = vmax.xlane.f32.xlu2 %v1694_v4 }
 0x3d4   : > { %1430 = vmax.xlane.f32.xlu1 %v1429_v5 }
 0x3d6   : > { %v4396_v6 = vpop.f32.mrf.mxu3 }
 0x3d7   : > { %v1697_v7 = vsel %vm896_vm0, %v4396_v6, -inf }
 0x3d8   : > { %1698 = vmax.xlane.f32.xlu0 %v1697_v7 }
 0x3e4   : > { %v1470_v30 = vpop.xlane.xlu1 %1469 }
 0x3e5   : > { %3717 = vrcp.f32 %v1470_v30  ;;  %v1467_v10 = vpop.xlane.xlu0 %1466 }
 0x3e6   : > { %3719 = vrcp.f32 %v1467_v10 }
 0x3eb   : > { %v3718_v11 = vpop.eup %3717 }
 0x3ec   : > { %v3720_v12 = vpop.eup %3719  ;;  %v1494_v13 = vmul.f32 %v3718_v11, %v3714_v47  ;;  %1785 = vrot.lane.b32.xlu0 %v4244_v45, %s3906_s21 }
 0x3ed   : > { %v1493_v23 = vmul.f32 %v3720_v12, %v3716_v49 }
 0x3ee   : > { %v1502_v14 = vpack.c.bf16 %v1494_v13, %v1494_v13 }
 0x3ef   : > { %v1501_v20 = vpack.c.bf16 %v1493_v23, %v1493_v23 }
 0x3f0   : > { %v1514_v48 = vunpack.c.l.b16 %v1502_v14 }
 0x3f1   : > { %v1513_v16 = vunpack.c.l.b16 %v1501_v20 }
 0x3f3   : > { %v1516_v18 = vpack.c.b16 %v1514_v48, %v1513_v16 }
 0x3f4   : > { %1828 = vrot.lane.b32.xlu0 %v4314_v15, %s3906_s21 }
 0x3f5   : > { %3448 = vmatmul.msk.bf16.vlgmr.msrb.gmra.mxu2 %vm896_vm0, %v1516_v18 }
 0x3f6   : > { %1883 = vmatpush.bf16.xpose.msrb.mxu2 %v1875_v19 }
 0x3f8   : > { %v1897_v21 = vpop.permute.xlu0 %1896 }
 0x3f9   : > { %3461 = vmatmul.msk.bf16.vlgmr.msra.gmra.mxu3 %vm1328_vm5, %v1897_v21 }
 0x3fc   : > { %v2118_v29 = vpop.permute.xlu1 %2117  ;;  %1826 = vrot.lane.b32.xlu0 %v4321_v9, %s3906_s21 }
 0x3fd   : > { %v2128_v35 = vsel %vm1328_vm5, %v2118_v29, 0 }
 0x3fe   : > { %1884 = vmatpush.bf16.xpose.msrb.mxu2 %v1872_v33 }
 0x400   : > { %v2116_v46 = vpop.permute.xlu0 %2115 }
 0x404   : > { %v1899_v62 = vpop.permute.xlu1 %1898 }
 0x405   : > { %3451 = vmatmul.msk.bf16.vlgmr.msra.gmra.mxu2 %vm1328_vm5, %v4338_v31  ;;  %v2155_v31 = vpop.permute.xlu2 %2154 }
 0x406   : > { %2139 = vmatpush.bf16.xpose.msra.mxu2 %v2131_v22 }
 0x408   : > { %v2153_v32 = vpop.permute.xlu0 %2152 }
 0x409   : > { %3462 = vmatmul.msk.bf16.gmra.mxu3 %vm1328_vm5, %v1899_v62 }
 0x40c   : > { %v2157_v24 = vpop.permute.xlu1 %2156 }
 0x40d   : > { %v2167_v36 = vsel %vm1328_vm5, %v2157_v24, 0  ;;  %v1425_v42 = vpop.xlane.xlu2 %1424 }
 0x40e   : > { %2140 = vmatpush.bf16.xpose.msra.mxu2 %v2128_v35  ;;  %2179 = vmatpush.bf16.xpose.msrb.mxu3 %v2167_v36  ;;  %v1439_v53 = vsub.f32 %v4348_v34, %v1425_v42 }
 0x410   : > { %v1451_v5 = vmul.f32 1.442695, %v1439_v53 }
 0x415   : > { %3452 = vmatmul.msk.bf16.gmra.mxu2 %vm1328_vm5, %v4336_v17 }
 0x419   : > { %3469 = vmatmul.msk.bf16.vlgmr.msrb.gmra.mxu3 %vm1328_vm5, %v2153_v32 }
 0x425   : > { %3459 = vmatmul.msk.bf16.vlgmr.msrb.gmra.mxu2 %vm1328_vm5, %v4342_v26 }
 0x429   : > { %3470 = vmatmul.msk.bf16.gmra.mxu3 %vm1328_vm5, %v2155_v31 }
 0x433   : > { %v1416_v37 = vpop.xlane.xlu0 %1415 }
 0x434   : > { %v1436_v40 = vsub.f32 %v4312_v44, %v1416_v37 }
 0x435   : > { %3460 = vmatmul.msk.bf16.gmra.mxu2 %vm1328_vm5, %v4344_v27  ;;  %v4438_v27 = vpop.f32.mrf.mxu3 }
 0x436   : > { %v1445_v43 = vmul.f32 1.442695, %v1436_v40 }
 0x437   : > { %v1413_v28 = vpop.xlane.xlu1 %1412 }
 0x438   : > { %3721 = vpow2.f32 %v1445_v43  ;;  %v1435_v17 = vsub.f32 %v4299_v59, %v1413_v28  ;;  %v1700_v59 = vsel %vm896_vm0, %v4438_v27, -inf }
 0x43a   : > { %v1443_v47 = vmul.f32 1.442695, %v1435_v17 }
 0x43b   : > { %v1434_v51 = vpop.xlane.xlu0 %1433 }
 0x43c   : > { %3723 = vpow2.f32 %v1443_v47  ;;  %v1442_v41 = vsub.f32 %v4376_v0, %v1434_v51 }
 0x43e   : > { %v4428_v49 = vpop.eup %3721  ;;  %v1457_v10 = vmul.f32 1.442695, %v1442_v41 }
 0x43f   : > { %v1462_v26 = vsel %vm896_vm0, %v4428_v49, 0.0  ;;  %v1428_v58 = vpop.xlane.xlu1 %1427 }
 0x440   : > { %1463 = vadd.xlane.f32.xlu1 %v1462_v26  ;;  %v1440_v39 = vsub.f32 %v4372_v60, %v1428_v58 }
 0x442   : > { %v4432_v50 = vpop.eup %3723  ;;  %v1453_v3 = vmul.f32 1.442695, %v1440_v39 }
 0x443   : > { %v1459_v44 = vsel %vm896_vm0, %v4432_v50, 0.0  ;;  %v4442_v52 = vpop.xlane.xlu0 %1692 }
 0x444   : > { %1460 = vadd.xlane.f32.xlu2 %v1459_v44  ;;  %3725 = vpow2.f32 %v1453_v3  ;;  %v1707_v37 = vsub.f32 %v4382_v1, %v4442_v52 }
 0x445   : > { %3467 = vmatmul.msk.bf16.vlgmr.msra.gmra.mxu2 %vm1328_vm5, %v4355_v55  ;;  %3727 = vpow2.f32 %v1451_v5 }
 0x446   : > { %3729 = vpow2.f32 %v1457_v10  ;;  %v1719_v47 = vmul.f32 1.442695, %v1707_v37 }
 0x447   : > { %v1431_v34 = vpop.xlane.xlu1 %1430 }
 0x448   : > { %v1441_v23 = vsub.f32 %v4374_v61, %v1431_v34 }
 0x44a   : > { %v4468_v60 = vpop.eup %3725  ;;  %v1455_v16 = vmul.f32 1.442695, %v1441_v23 }
 0x44b   : > { %v4445_v56 = vpop.xlane.xlu0 %1698  ;;  %v4472_v12 = vpop.eup %3727  ;;  %v1474_v13 = vsel %vm896_vm0, %v4468_v60, 0.0 }
 0x44c   : > { %1701 = vmax.xlane.f32.xlu2 %v1700_v59  ;;  %v1471_v14 = vsel %vm896_vm0, %v4472_v12, 0.0  ;;  %v4483_v48 = vpop.eup %3729  ;;  %3731 = vpow2.f32 %v1455_v16  ;;  %v1709_v1 = vsub.f32 %v4396_v6, %v4445_v56 }
 0x44d   : > { %v1480_v19 = vsel %vm896_vm0, %v4483_v48, 0.0 }
 0x452   : > { %v4495_v33 = vpop.eup %3731 }
 0x453   : > { %v1477_v22 = vsel %vm896_vm0, %v4495_v33, 0.0 }
 0x455   : > { %3468 = vmatmul.msk.bf16.gmra.mxu2 %vm1328_vm5, %v2116_v46  ;;  %v1696_v46 = vpop.xlane.xlu2 %1695 }
 0x456   : > { %v1708_v31 = vsub.f32 %v4388_v2, %v1696_v46 }
 0x458   : > { %v1721_v17 = vmul.f32 1.442695, %v1708_v31 }
 0x459   : > { %1787 = vrot.lane.b32.xlu1 %v4234_v38, %s3906_s21  ;;  %s5095_s21 = sshll.u32 %s5102_s0, 5 }
 0x45a   : > { %3733 = vpow2.f32 %v1721_v17  ;;  %s5034_s28 = scalar_lea.vmem %s5083_s19, %s5095_s21 }
 0x45b   : > { %3735 = vpow2.f32 %v1719_v47 }
 0x45e   : > { %v4449_v8 = vpop.permute.xlu0 %1785 }
 0x461   : > { %2043 = vrot.lane.b32.xlu1 %v4234_v38, %s3907_s1 }
 0x464   : > { %2041 = vrot.lane.b32.xlu2 %v4244_v45, %s3907_s1 }
 0x466   : > { %v1829_v55 = vpop.permute.xlu0 %1828 }
 0x467   : > { %1844 = vmatpush.bf16.msra.mxu1 %v1829_v55  ;;  %v4528_v55 = vpop.eup %3733 }
 0x468   : > { %v4532_v42 = vpop.eup %3735  ;;  %v1742_v39 = vsel %vm896_vm0, %v4528_v55, 0.0 }
 0x469   : > { %v1739_v53 = vsel %vm896_vm0, %v4532_v42, 0.0 }
 0x46e   : > { %v1827_v57 = vpop.permute.xlu0 %1826 }
 0x46f   : > { %1845 = vmatpush.bf16.msra.mxu1 %v1827_v57  ;;  %v1723_v57 = vmul.f32 1.442695, %v1709_v1 }
 0x478   : > { %v4455_v63 = vpop.f32.mrf.mxu2 }
 0x47c   : > { %v4459_v54 = vpop.f32.mrf.mxu3 }
 0x47d   : > { %v1947_v4 = vsel %vm896_vm0, %v4459_v54, -inf }
 0x47e   : > { %1948 = vmax.xlane.f32.xlu0 %v1947_v4 }
 0x480   : > { %v4463_v7 = vpop.f32.mrf.mxu2 }
 0x484   : > { %v4466_v30 = vpop.f32.mrf.mxu3 }
 0x485   : > { %v1950_v21 = vsel %vm896_vm0, %v4466_v30, -inf }
 0x488   : > { %v4470_v11 = vpop.f32.mrf.mxu2 }
 0x48b   : > { %1475 = vadd.xlane.f32.xlu1 %v1474_v13 }
 0x48c   : > { %v4477_v0 = vpop.f32.mrf.mxu3 }
 0x48d   : > { %1472 = vadd.xlane.f32.xlu2 %v1471_v14  ;;  %v1953_v20 = vsel %vm896_vm0, %v4477_v0, -inf }
 0x48e   : > { %1954 = vmax.xlane.f32.xlu0 %v1953_v20 }
 0x490   : > { %v4485_v18 = vpop.f32.mrf.mxu2 }
 0x491   : > { %v1682_v16 = vsel %vm896_vm0, %v4485_v18, -inf }
 0x493   : > { %1481 = vadd.xlane.f32.xlu1 %v1480_v19 }
 0x494   : > { %v4489_v61 = vpop.f32.mrf.mxu3 }
 0x495   : > { %1951 = vmax.xlane.f32.xlu2 %v1950_v21  ;;  %v1956_v36 = vsel %vm896_vm0, %v4489_v61, -inf }
 0x498   : > { %v4493_v29 = vpop.f32.mrf.mxu2 }
 0x499   : > { %v1685_v46 = vsel %vm896_vm0, %v4493_v29, -inf }
 0x49c   : > { %v4497_v62 = vpop.f32.mrf.mxu3 }
 0x49d   : > { %1478 = vadd.xlane.f32.xlu2 %v1477_v22  ;;  %v2203_v43 = vsel %vm896_vm0, %v4497_v62, -inf }
 0x4a0   : > { %v4501_v24 = vpop.f32.mrf.mxu2 }
 0x4a4   : > { %v4503_v35 = vpop.f32.mrf.mxu3 }
 0x4a5   : > { %1957 = vmax.xlane.f32.xlu2 %v1956_v36  ;;  %v2206_v44 = vsel %vm896_vm0, %v4503_v35, -inf }
 0x4a8   : > { %v4507_v32 = vpop.f32.mrf.mxu2 }
 0x4ac   : > { %v4512_v40 = vpop.f32.mrf.mxu3 }
 0x4ad   : > { %2204 = vmax.xlane.f32.xlu2 %v2203_v43  ;;  %v2209_v28 = vsel %vm896_vm0, %v4512_v40, -inf }
 0x4ae   : > { %2210 = vmax.xlane.f32.xlu0 %v2209_v28 }
 0x4b0   : > { %v4518_v26 = vpop.f32.mrf.mxu2 }
 0x4b3   : > { %v1464_v2 = vpop.xlane.xlu1 %1463 }
 0x4b4   : > { %3737 = vrcp.f32 %v1464_v2  ;;  %v4522_v51 = vpop.f32.mrf.mxu3 }
 0x4b5   : > { %2207 = vmax.xlane.f32.xlu2 %v2206_v44  ;;  %v2212_v59 = vsel %vm896_vm0, %v4522_v51, -inf }
 0x4b6   : > { %2213 = vmax.xlane.f32.xlu1 %v2212_v59 }
 0x4b7   : > { %v1461_v52 = vpop.xlane.xlu2 %1460 }
 0x4b8   : > { %3739 = vrcp.f32 %v1461_v52  ;;  %v4530_v58 = vpop.f32.mrf.mxu2 }
 0x4b9   : > { %3741 = vpow2.f32 %v1723_v57 }
 0x4ba   : > { %v3738_v6 = vpop.eup %3737 }
 0x4bb   : > { %v1492_v56 = vmul.f32 %v3738_v6, %v4428_v49 }
 0x4bd   : > { %1743 = vadd.xlane.f32.xlu2 %v1742_v39  ;;  %v1500_v4 = vpack.c.bf16 %v1492_v56, %v1492_v56 }
 0x4be   : > { %v3740_v3 = vpop.eup %3739  ;;  %1740 = vadd.xlane.f32.xlu1 %v1739_v53  ;;  %v1679_v53 = vsel %vm896_vm0, %v4470_v11, -inf }
 0x4bf   : > { %v1491_v5 = vmul.f32 %v3740_v3, %v4432_v50  ;;  %v1702_v41 = vpop.xlane.xlu2 %1701  ;;  %v4543_v49 = vpop.eup %3741  ;;  %v1512_v14 = vunpack.c.l.b16 %v1500_v4 }
 0x4c0   : > { %v1710_v10 = vsub.f32 %v4438_v27, %v1702_v41  ;;  %v4541_v34 = vpop.f32.mrf.mxu2  ;;  %v1745_v19 = vsel %vm896_vm0, %v4543_v49, 0.0 }
 0x4c1   : > { %v1499_v13 = vpack.c.bf16 %v1491_v5, %v1491_v5 }
 0x4c2   : > { %v1725_v23 = vmul.f32 1.442695, %v1710_v10 }
 0x4c3   : > { %v1511_v20 = vunpack.c.l.b16 %v1499_v13 }
 0x4c4   : > { %3743 = vpow2.f32 %v1725_v23 }
 0x4c5   : > { %1683 = vmax.xlane.f32.xlu2 %v1682_v16  ;;  %v1515_v50 = vpack.c.b16 %v1512_v14, %v1511_v20 }
 0x4c6   : > { %1746 = vadd.xlane.f32.xlu1 %v1745_v19  ;;  %v1938_v19 = vsel %vm896_vm0, %v4518_v26, -inf }
 0x4c7   : > { %3447 = vmatmul.msk.bf16.vlgmr.msrb.gmra.mxu0 %vm896_vm0, %v1515_v50  ;;  %v2042_v28 = vpop.permute.xlu2 %2041 }
 0x4c8   : > { %v4550_v27 = vpop.f32.mrf.mxu2 }
 0x4ca   : > { %v4552_v21 = vpop.eup %3743 }
 0x4cb   : > { %v1788_v22 = vpop.permute.xlu1 %1787  ;;  %v1748_v36 = vsel %vm896_vm0, %v4552_v21, 0.0 }
 0x4cc   : > { %1749 = vadd.xlane.f32.xlu0 %v1748_v36  ;;  %1803 = vmatpush.bf16.msra.mxu0 %v1788_v22 }
 0x4cd   : > { %1686 = vmax.xlane.f32.xlu2 %v1685_v46  ;;  %v1944_v46 = vsel %vm896_vm0, %v4541_v34, -inf }
 0x4d0   : > { %1804 = vmatpush.bf16.msra.mxu0 %v4449_v8  ;;  %v4559_v31 = vpop.f32.mrf.mxu2 }
 0x4d1   : > { %v2194_v43 = vsel %vm896_vm0, %v4559_v31, -inf }
 0x4d3   : > { %v2044_v37 = vpop.permute.xlu1 %2043 }
 0x4d4   : > { %2059 = vmatpush.bf16.msrb.mxu0 %v2044_v37 }
 0x4d5   : > { %2195 = vmax.xlane.f32.xlu2 %v2194_v43 }
 0x4d8   : > { %2060 = vmatpush.bf16.msrb.mxu0 %v2042_v28  ;;  %v4563_v17 = vpop.f32.mrf.mxu2 }
 0x4d9   : > { %v2197_v47 = vsel %vm896_vm0, %v4563_v17, -inf }
 0x4dd   : > { %2198 = vmax.xlane.f32.xlu2 %v2197_v47 }
 0x4e0   : > { %v4567_v2 = vpop.f32.mrf.mxu2 }
 0x4e1   : > { %v2200_v8 = vsel %vm896_vm0, %v4567_v2, -inf }
 0x4e5   : > { %2201 = vmax.xlane.f32.xlu2 %v2200_v8 }
 0x4f1   : > { %v1949_v1 = vpop.xlane.xlu0 %1948 }
 0x4f2   : > { %v1963_v44 = vsub.f32 %v4459_v54, %v1949_v1  ;;  %v1688_v1 = vsel %vm896_vm0, %v4501_v24, -inf }
 0x4f4   : > { %v1975_v59 = vmul.f32 1.442695, %v1963_v44 }
 0x4f6   : > { %3745 = vpow2.f32 %v1975_v59 }
 0x4fc   : > { %v4572_v52 = vpop.eup %3745 }
 0x4fd   : > { %v1995_v57 = vsel %vm896_vm0, %v4572_v52, 0.0 }
 0x4fe   : > { %v1476_v6 = vpop.xlane.xlu1 %1475  ;;  %1996 = vadd.xlane.f32.xlu0 %v1995_v57 }
 0x4ff   : > { %3747 = vrcp.f32 %v1476_v6 }
 0x500   : > { %v1473_v56 = vpop.xlane.xlu2 %1472 }
 0x501   : > { %3749 = vrcp.f32 %v1473_v56 }
 0x505   : > { %v3748_v39 = vpop.eup %3747 }
 0x506   : > { %v1496_v3 = vmul.f32 %v3748_v39, %v4468_v60  ;;  %1680 = vmax.xlane.f32.xlu0 %v1679_v53  ;;  %v1482_v41 = vpop.xlane.xlu1 %1481  ;;  %v1941_v53 = vsel %vm896_vm0, %v4530_v58, -inf }
 0x507   : > { %v3750_v54 = vpop.eup %3749  ;;  %3751 = vrcp.f32 %v1482_v41 }
 0x508   : > { %v1504_v4 = vpack.c.bf16 %v1496_v3, %v1496_v3  ;;  %v1495_v5 = vmul.f32 %v3750_v54, %v4472_v12  ;;  %v1952_v10 = vpop.xlane.xlu2 %1951  ;;  %v4609_v3 = vpop.xlane.xlu0 %1954 }
 0x509   : > { %v1964_v13 = vsub.f32 %v4466_v30, %v1952_v10 }
 0x50a   : > { %v1503_v23 = vpack.c.bf16 %v1495_v5, %v1495_v5  ;;  %v1559_v20 = vunpack.c.l.b16 %v1504_v4 }
 0x50b   : > { %v1977_v14 = vmul.f32 1.442695, %v1964_v13 }
 0x50c   : > { %v1558_v16 = vunpack.c.l.b16 %v1503_v23 }
 0x50d   : > { %3753 = vpow2.f32 %v1977_v14  ;;  %v3752_v22 = vpop.eup %3751 }
 0x50e   : > { %1939 = vmax.xlane.f32.xlu0 %v1938_v19  ;;  %v1562_v60 = vpack.c.b16 %v1559_v20, %v1558_v16  ;;  %v1498_v36 = vmul.f32 %v3752_v22, %v4483_v48  ;;  %v2191_v48 = vsel %vm896_vm0, %v4550_v27, -inf }
 0x510   : > { %v1479_v50 = vpop.xlane.xlu2 %1478  ;;  %3449 = vmatmul.msk.bf16.vlgmr.msrb.gmra.mxu1 %vm896_vm0, %v1562_v60  ;;  %v1506_v47 = vpack.c.bf16 %v1498_v36, %v1498_v36 }
 0x511   : > { %3755 = vrcp.f32 %v1479_v50 }
 0x512   : > { %v1561_v59 = vunpack.c.l.b16 %v1506_v47 }
 0x513   : > { %v4584_v12 = vpop.eup %3753 }
 0x514   : > { %v1998_v30 = vsel %vm896_vm0, %v4584_v12, 0.0 }
 0x515   : > { %1999 = vadd.xlane.f32.xlu1 %v1998_v30 }
 0x516   : > { %1945 = vmax.xlane.f32.xlu0 %v1944_v46 }
 0x517   : > { %v3756_v37 = vpop.eup %3755 }
 0x518   : > { %v4591_v43 = vpop.xlane.xlu2 %1957  ;;  %v1497_v28 = vmul.f32 %v3756_v37, %v4495_v33  ;;  %v1935_v33 = vsel %vm896_vm0, %v4507_v32, -inf }
 0x51a   : > { %v1505_v8 = vpack.c.bf16 %v1497_v28, %v1497_v28 }
 0x51c   : > { %v1560_v44 = vunpack.c.l.b16 %v1505_v8 }
 0x51d   : > { %1689 = vmax.xlane.f32.xlu1 %v1688_v1 }
 0x51e   : > { %2192 = vmax.xlane.f32.xlu0 %v2191_v48  ;;  %v1563_v57 = vpack.c.b16 %v1561_v59, %v1560_v44 }
 0x520   : > { %v4598_v6 = vpop.xlane.xlu2 %2204  ;;  %3450 = vmatmul.msk.bf16.gmra.mxu1 %vm896_vm0, %v1563_v57 }
 0x521   : > { %v4611_v41 = vpop.xlane.xlu0 %2210 }
 0x525   : > { %1936 = vmax.xlane.f32.xlu1 %v1935_v33 }
 0x528   : > { %v4603_v56 = vpop.xlane.xlu2 %2207 }
 0x529   : > { %v4605_v39 = vpop.xlane.xlu1 %2213 }
 0x52d   : > { %1942 = vmax.xlane.f32.xlu1 %v1941_v53 }
 0x530   : > { %v1744_v54 = vpop.xlane.xlu2 %1743 }
 0x531   : > { %3757 = vrcp.f32 %v1744_v54  ;;  %v1741_v4 = vpop.xlane.xlu1 %1740 }
 0x532   : > { %3759 = vrcp.f32 %v1741_v4 }
 0x537   : > { %v3758_v5 = vpop.eup %3757 }
 0x538   : > { %v3760_v10 = vpop.eup %3759  ;;  %v1764_v13 = vmul.f32 %v3758_v5, %v4528_v55  ;;  %v1684_v23 = vpop.xlane.xlu2 %1683 }
 0x539   : > { %v1763_v14 = vmul.f32 %v3760_v10, %v4532_v42  ;;  %v1704_v20 = vsub.f32 %v4485_v18, %v1684_v23  ;;  %v1747_v16 = vpop.xlane.xlu1 %1746 }
 0x53a   : > { %v1772_v19 = vpack.c.bf16 %v1764_v13, %v1764_v13  ;;  %3761 = vrcp.f32 %v1747_v16 }
 0x53b   : > { %v1771_v60 = vpack.c.bf16 %v1763_v14, %v1763_v14  ;;  %v1713_v50 = vmul.f32 1.442695, %v1704_v20 }
 0x53c   : > { %v1821_v22 = vunpack.c.l.b16 %v1772_v19 }
 0x53d   : > { %v1820_v30 = vunpack.c.l.b16 %v1771_v60  ;;  %3763 = vpow2.f32 %v1713_v50 }
 0x53f   : > { %v1824_v36 = vpack.c.b16 %v1821_v22, %v1820_v30  ;;  %v1750_v46 = vpop.xlane.xlu0 %1749 }
 0x540   : > { %3765 = vrcp.f32 %v1750_v46  ;;  %v1687_v37 = vpop.xlane.xlu2 %1686  ;;  %v3762_v55 = vpop.eup %3761 }
 0x541   : > { %v1705_v28 = vsub.f32 %v4493_v29, %v1687_v37  ;;  %3457 = vmatmul.msk.bf16.vlgmr.msra.gmra.mxu1 %vm896_vm0, %v1824_v36  ;;  %v1765_v8 = vmul.f32 %v3762_v55, %v4543_v49 }
 0x543   : > { %v4618_v42 = vpop.eup %3763  ;;  %v1715_v18 = vmul.f32 1.442695, %v1705_v28  ;;  %v1773_v59 = vpack.c.bf16 %v1765_v8, %v1765_v8 }
 0x544   : > { %v1730_v47 = vsel %vm896_vm0, %v4618_v42, 0.0 }
 0x545   : > { %3767 = vpow2.f32 %v1715_v18  ;;  %1731 = vadd.xlane.f32.xlu2 %v1730_v47  ;;  %v1822_v53 = vunpack.c.l.b16 %v1773_v59 }
 0x546   : > { %v3766_v1 = vpop.eup %3765 }
 0x547   : > { %v1766_v44 = vmul.f32 %v3766_v1, %v4552_v21 }
 0x549   : > { %v1774_v48 = vpack.c.bf16 %v1766_v44, %v1766_v44 }
 0x54b   : > { %v4624_v57 = vpop.eup %3767  ;;  %v1823_v29 = vunpack.c.l.b16 %v1774_v48 }
 0x54c   : > { %v1733_v33 = vsel %vm896_vm0, %v4624_v57, 0.0 }
 0x54d   : > { %1734 = vadd.xlane.f32.xlu2 %v1733_v33  ;;  %v1825_v54 = vpack.c.b16 %v1823_v29, %v1822_v53 }
 0x551   : > { %3458 = vmatmul.msk.bf16.gmra.mxu1 %vm896_vm0, %v1825_v54 }
 0x571   : > { %v1997_v4 = vpop.xlane.xlu0 %1996 }
 0x579   : > { %v1681_v5 = vpop.xlane.xlu0 %1680 }
 0x57a   : > { %v1703_v49 = vsub.f32 %v4470_v11, %v1681_v5 }
 0x57c   : > { %v1711_v10 = vmul.f32 1.442695, %v1703_v49 }
 0x57e   : > { %3769 = vpow2.f32 %v1711_v10 }
 0x57f   : > { %3771 = vrcp.f32 %v1997_v4 }
 0x581   : > { %v1940_v16 = vpop.xlane.xlu0 %1939 }
 0x582   : > { %v1960_v36 = vsub.f32 %v4518_v26, %v1940_v16 }
 0x584   : > { %v4630_v21 = vpop.eup %3769  ;;  %v1969_v55 = vmul.f32 1.442695, %v1960_v36 }
 0x585   : > { %v1727_v13 = vsel %vm896_vm0, %v4630_v21, 0.0  ;;  %v3772_v14 = vpop.eup %3771 }
 0x586   : > { %1728 = vadd.xlane.f32.xlu0 %v1727_v13  ;;  %v2019_v20 = vmul.f32 %v3772_v14, %v4572_v52  ;;  %v2196_v14 = vpop.xlane.xlu2 %2195 }
 0x588   : > { %v2000_v23 = vpop.xlane.xlu1 %1999  ;;  %v2027_v60 = vpack.c.bf16 %v2019_v20, %v2019_v20  ;;  %v1965_v20 = vsub.f32 %v4477_v0, %v4609_v3 }
 0x589   : > { %3773 = vrcp.f32 %v2000_v23  ;;  %v1946_v18 = vpop.xlane.xlu0 %1945 }
 0x58a   : > { %v4638_v37 = vunpack.c.l.b16 %v2027_v60  ;;  %v1962_v26 = vsub.f32 %v4541_v34, %v1946_v18  ;;  %v1979_v60 = vmul.f32 1.442695, %v1965_v20 }
 0x58c   : > { %v1973_v44 = vmul.f32 1.442695, %v1962_v26 }
 0x58e   : > { %v2199_v16 = vpop.xlane.xlu2 %2198 }
 0x58f   : > { %v3774_v19 = vpop.eup %3773 }
 0x590   : > { %v2020_v50 = vmul.f32 %v3774_v19, %v4584_v12  ;;  %v1690_v11 = vpop.xlane.xlu1 %1689 }
 0x591   : > { %v1706_v22 = vsub.f32 %v4501_v24, %v1690_v11  ;;  %v2193_v5 = vpop.xlane.xlu0 %2192  ;;  %v2219_v11 = vsub.f32 %v4497_v62, %v4598_v6  ;;  %v2217_v62 = vsub.f32 %v4563_v17, %v2199_v16 }
 0x592   : > { %v2028_v30 = vpack.c.bf16 %v2020_v50, %v2020_v50  ;;  %v2215_v49 = vsub.f32 %v4550_v27, %v2193_v5  ;;  %v1966_v27 = vsub.f32 %v4489_v61, %v4591_v43  ;;  %v2216_v50 = vsub.f32 %v4559_v31, %v2196_v14 }
 0x593   : > { %v1717_v46 = vmul.f32 1.442695, %v1706_v22 }
 0x594   : > { %v4640_v28 = vunpack.c.l.b16 %v2028_v30  ;;  %v2223_v10 = vmul.f32 1.442695, %v2215_v49  ;;  %v1981_v19 = vmul.f32 1.442695, %v1966_v27  ;;  %v2225_v22 = vmul.f32 1.442695, %v2216_v50 }
 0x595   : > { %3775 = vpow2.f32 %v1717_v46 }
 0x596   : > { %v2080_v52 = vpack.c.b16 %v4640_v28, %v4638_v37  ;;  %3777 = vpow2.f32 %v1969_v55  ;;  %v2202_v30 = vpop.xlane.xlu2 %2201  ;;  %v2227_v55 = vmul.f32 1.442695, %v2217_v62 }
 0x597   : > { %v2218_v61 = vsub.f32 %v4567_v2, %v2202_v30 }
 0x598   : > { %v1937_v47 = vpop.xlane.xlu1 %1936 }
 0x599   : > { %v1959_v12 = vsub.f32 %v4507_v32, %v1937_v47  ;;  %v2229_v31 = vmul.f32 1.442695, %v2218_v61 }
 0x59a   : > { %2299 = vrot.lane.b32.xlu0 %v4234_v38, %s3908_s29 }
 0x59b   : > { %v4647_v24 = vpop.eup %3775  ;;  %v1967_v8 = vmul.f32 1.442695, %v1959_v12  ;;  %v2220_v12 = vsub.f32 %v4503_v35, %v4603_v56  ;;  %v2221_v35 = vsub.f32 %v4512_v40, %v4611_v41 }
 0x59c   : > { %v1736_v1 = vsel %vm896_vm0, %v4647_v24, 0.0  ;;  %v4652_v48 = vpop.eup %3777 }
 0x59d   : > { %3779 = vpow2.f32 %v1967_v8  ;;  %1737 = vadd.xlane.f32.xlu2 %v1736_v1  ;;  %v1986_v34 = vsel %vm896_vm0, %v4652_v48, 0.0  ;;  %v2233_v1 = vmul.f32 1.442695, %v2220_v12 }
 0x59e   : > { %3781 = vpow2.f32 %v1973_v44 }
 0x5a0   : > { %v1943_v59 = vpop.xlane.xlu1 %1942 }
 0x5a1   : > { %v1961_v32 = vsub.f32 %v4530_v58, %v1943_v59 }
 0x5a3   : > { %v4655_v29 = vpop.eup %3779  ;;  %v1971_v38 = vmul.f32 1.442695, %v1961_v32 }
 0x5a4   : > { %v1983_v33 = vsel %vm896_vm0, %v4655_v29, 0.0  ;;  %v4661_v53 = vpop.eup %3781 }
 0x5a5   : > { %3783 = vpow2.f32 %v1971_v38  ;;  %1984 = vadd.xlane.f32.xlu1 %v1983_v33  ;;  %1987 = vadd.xlane.f32.xlu2 %v1986_v34  ;;  %v1992_v4 = vsel %vm896_vm0, %v4661_v53, 0.0 }
 0x5a6   : > { %3785 = vpow2.f32 %v2223_v10 }
 0x5a7   : > { %3787 = vpow2.f32 %v1981_v19 }
 0x5a8   : > { %3789 = vpow2.f32 %v1979_v60 }
 0x5a9   : > { %3791 = vpow2.f32 %v2225_v22 }
 0x5ab   : > { %v4663_v54 = vpop.eup %3783 }
 0x5ac   : > { %v1989_v58 = vsel %vm896_vm0, %v4663_v54, 0.0  ;;  %v4670_v13 = vpop.eup %3785 }
 0x5ad   : > { %1990 = vadd.xlane.f32.xlu2 %v1989_v58  ;;  %1993 = vadd.xlane.f32.xlu1 %v1992_v4  ;;  %v2239_v23 = vsel %vm896_vm0, %v4670_v13, 0.0  ;;  %v4687_v36 = vpop.eup %3787 }
 0x5ae   : > { %v4690_v43 = vpop.eup %3789  ;;  %v2004_v0 = vsel %vm896_vm0, %v4687_v36, 0.0 }
 0x5af   : > { %v2001_v3 = vsel %vm896_vm0, %v4690_v43, 0.0  ;;  %v4697_v46 = vpop.eup %3791 }
 0x5b0   : > { %v2242_v18 = vsel %vm896_vm0, %v4697_v46, 0.0 }
 0x5b8   : > { %v1732_v6 = vpop.xlane.xlu2 %1731 }
 0x5c0   : > { %v1735_v40 = vpop.xlane.xlu2 %1734 }
 0x5c4   : > { %2240 = vadd.xlane.f32.xlu0 %v2239_v23  ;;  %v2222_v23 = vsub.f32 %v4522_v51, %v4605_v39 }
 0x5c5   : > { %2082 = vrot.lane.b32.xlu2 %v4321_v9, %s3907_s1 }
 0x5c6   : > { %2084 = vrot.lane.b32.xlu1 %v4314_v15, %s3907_s1 }
 0x5d8   : > { %2297 = vrot.lane.b32.xlu0 %v4244_v45, %s3908_s29  ;;  %v2231_v45 = vmul.f32 1.442695, %v2219_v11 }
 0x5da   : > { %3793 = vpow2.f32 %v2231_v45 }
 0x5db   : > { %3795 = vpow2.f32 %v2229_v31 }
 0x5dc   : > { %3797 = vrcp.f32 %v1732_v6 }
 0x5dd   : > { %3799 = vpow2.f32 %v2227_v55 }
 0x5e0   : > { %v4699_v2 = vpop.eup %3793 }
 0x5e1   : > { %v2251_v47 = vsel %vm896_vm0, %v4699_v2, 0.0  ;;  %v4707_v17 = vpop.eup %3795 }
 0x5e2   : > { %v3798_v8 = vpop.eup %3797  ;;  %v2248_v59 = vsel %vm896_vm0, %v4707_v17, 0.0 }
 0x5e3   : > { %v1760_v44 = vmul.f32 %v3798_v8, %v4618_v42  ;;  %v4712_v32 = vpop.eup %3799  ;;  %v2235_v42 = vmul.f32 1.442695, %v2221_v35 }
 0x5e4   : > { %v2245_v34 = vsel %vm896_vm0, %v4712_v32, 0.0 }
 0x5e5   : > { %v1768_v56 = vpack.c.bf16 %v1760_v44, %v1760_v44 }
 0x5e7   : > { %v1780_v4 = vunpack.c.l.b16 %v1768_v56 }
 0x5ee   : > { %2005 = vadd.xlane.f32.xlu2 %v2004_v0 }
 0x5f0   : > { %2002 = vadd.xlane.f32.xlu1 %v2001_v3 }
 0x5f6   : > { %2243 = vadd.xlane.f32.xlu2 %v2242_v18 }
 0x5f8   : > { %2252 = vadd.xlane.f32.xlu1 %v2251_v47 }
 0x5f9   : > { %v1729_v26 = vpop.xlane.xlu0 %1728 }
 0x5fa   : > { %3801 = vrcp.f32 %v1729_v26 }
 0x5fb   : > { %3803 = vpow2.f32 %v2233_v1 }
 0x5fc   : > { %3805 = vpow2.f32 %v2235_v42 }
 0x5fd   : > { %3807 = vrcp.f32 %v1735_v40 }
 0x5fe   : > { %2249 = vadd.xlane.f32.xlu2 %v2248_v59 }
 0x600   : > { %v3802_v38 = vpop.eup %3801 }
 0x601   : > { %v1759_v33 = vmul.f32 %v3802_v38, %v4630_v21  ;;  %v4719_v49 = vpop.eup %3803  ;;  %v2237_v21 = vmul.f32 1.442695, %v2222_v23 }
 0x602   : > { %2246 = vadd.xlane.f32.xlu0 %v2245_v34  ;;  %v2254_v41 = vsel %vm896_vm0, %v4719_v49, 0.0  ;;  %v4726_v27 = vpop.eup %3805 }
 0x603   : > { %v1767_v58 = vpack.c.bf16 %v1759_v33, %v1759_v33  ;;  %3809 = vpow2.f32 %v2237_v21  ;;  %v3808_v16 = vpop.eup %3807  ;;  %v2257_v51 = vsel %vm896_vm0, %v4726_v27, 0.0 }
 0x604   : > { %v1761_v39 = vmul.f32 %v3808_v16, %v4624_v57 }
 0x605   : > { %v1779_v5 = vunpack.c.l.b16 %v1767_v58 }
 0x606   : > { %v1769_v30 = vpack.c.bf16 %v1761_v39, %v1761_v39 }
 0x607   : > { %v1783_v10 = vpack.c.b16 %v1780_v4, %v1779_v5 }
 0x608   : > { %v1781_v61 = vunpack.c.l.b16 %v1769_v30 }
 0x609   : > { %3455 = vmatmul.msk.bf16.vlgmr.msra.gmra.mxu0 %vm896_vm0, %v1783_v10  ;;  %v4733_v19 = vpop.eup %3809 }
 0x60a   : > { %2255 = vadd.xlane.f32.xlu0 %v2254_v41 }
 0x60c   : > { %v2300_v14 = vpop.permute.xlu0 %2299 }
 0x60d   : > { %2315 = vmatpush.bf16.msra.mxu0 %v2300_v14 }
 0x610   : > { %v1738_v20 = vpop.xlane.xlu2 %1737 }
 0x611   : > { %3811 = vrcp.f32 %v1738_v20  ;;  %2338 = vrot.lane.b32.xlu1 %v4321_v9, %s3908_s29  ;;  %v2260_v9 = vsel %vm896_vm0, %v4733_v19, 0.0 }
 0x612   : > { %2258 = vadd.xlane.f32.xlu0 %v2257_v51 }
 0x616   : > { %2340 = vrot.lane.b32.xlu2 %v4314_v15, %s3908_s29 }
 0x617   : > { %v3812_v60 = vpop.eup %3811 }
 0x618   : > { %v1985_v50 = vpop.xlane.xlu1 %1984  ;;  %v1988_v11 = vpop.xlane.xlu2 %1987  ;;  %v1762_v22 = vmul.f32 %v3812_v60, %v4647_v24 }
 0x619   : > { %3813 = vrcp.f32 %v1985_v50 }
 0x61a   : > { %3815 = vrcp.f32 %v1988_v11  ;;  %2261 = vadd.xlane.f32.xlu0 %v2260_v9  ;;  %v1770_v45 = vpack.c.bf16 %v1762_v22, %v1762_v22 }
 0x61c   : > { %v1782_v57 = vunpack.c.l.b16 %v1770_v45 }
 0x61e   : > { %v1784_v0 = vpack.c.b16 %v1782_v57, %v1781_v61 }
 0x61f   : > { %v3814_v31 = vpop.eup %3813 }
 0x620   : > { %v3816_v3 = vpop.eup %3815  ;;  %3456 = vmatmul.msk.bf16.gmra.mxu0 %vm896_vm0, %v1784_v0  ;;  %v2015_v15 = vmul.f32 %v3814_v31, %v4655_v29  ;;  %v1991_v24 = vpop.xlane.xlu2 %1990 }
 0x621   : > { %v2016_v62 = vmul.f32 %v3816_v3, %v4652_v48  ;;  %v1994_v18 = vpop.xlane.xlu1 %1993  ;;  %3817 = vrcp.f32 %v1991_v24 }
 0x622   : > { %v2023_v6 = vpack.c.bf16 %v2015_v15, %v2015_v15  ;;  %3819 = vrcp.f32 %v1994_v18 }
 0x623   : > { %v2024_v55 = vpack.c.bf16 %v2016_v62, %v2016_v62 }
 0x624   : > { %v2035_v47 = vunpack.c.l.b16 %v2023_v6 }
 0x625   : > { %v2036_v12 = vunpack.c.l.b16 %v2024_v55 }
 0x627   : > { %v3818_v26 = vpop.eup %3817  ;;  %v2039_v8 = vpack.c.b16 %v2036_v12, %v2035_v47 }
 0x628   : > { %v3820_v1 = vpop.eup %3819  ;;  %v2017_v44 = vmul.f32 %v3818_v26, %v4663_v54  ;;  %v2083_v33 = vpop.permute.xlu2 %2082 }
 0x629   : > { %v2018_v59 = vmul.f32 %v3820_v1, %v4661_v53  ;;  %v4751_v53 = vpop.f32.mrf.mxu1 }
 0x62a   : > { %v2025_v29 = vpack.c.bf16 %v2017_v44, %v2017_v44 }
 0x62b   : > { %v2026_v38 = vpack.c.bf16 %v2018_v59, %v2018_v59 }
 0x62c   : > { %v2037_v35 = vunpack.c.l.b16 %v2025_v29 }
 0x62d   : > { %v2038_v56 = vunpack.c.l.b16 %v2026_v38 }
 0x62f   : > { %v2040_v34 = vpack.c.b16 %v2038_v56, %v2037_v35 }
 0x630   : > { %3463 = vmatmul.msk.bf16.vlgmr.msrb.gmra.mxu0 %vm896_vm0, %v2039_v8 }
 0x631   : > { %v4753_v4 = vpop.f32.mrf.mxu1 }
 0x637   : > { %v2241_v58 = vpop.xlane.xlu0 %2240 }
 0x638   : > { %v2085_v48 = vpop.permute.xlu1 %2084 }
 0x639   : > { %2100 = vmatpush.bf16.msrb.mxu1 %v2085_v48  ;;  %v4757_v21 = vpop.f32.mrf.mxu1 }
 0x63d   : > { %2101 = vmatpush.bf16.msrb.mxu1 %v2083_v33 }
 0x640   : > { %3464 = vmatmul.msk.bf16.gmra.mxu0 %vm896_vm0, %v2040_v34  ;;  %3465 = vmatmul.msk.bf16.vlgmr.msrb.gmra.mxu1 %vm896_vm0, %v2080_v52 }
 0x64a   : > { %v2298_v54 = vpop.permute.xlu0 %2297 }
 0x64b   : > { %2316 = vmatpush.bf16.msra.mxu0 %v2298_v54 }
 0x661   : > { %v2006_v42 = vpop.xlane.xlu2 %2005 }
 0x662   : > { %3821 = vrcp.f32 %v2006_v42 }
 0x663   : > { %3823 = vrcp.f32 %v2241_v58  ;;  %v2003_v5 = vpop.xlane.xlu1 %2002 }
 0x664   : > { %3825 = vrcp.f32 %v2003_v5 }
 0x668   : > { %v3822_v10 = vpop.eup %3821 }
 0x669   : > { %v3824_v23 = vpop.eup %3823  ;;  %v2244_v40 = vpop.xlane.xlu2 %2243  ;;  %v2022_v41 = vmul.f32 %v3822_v10, %v4687_v36 }
 0x66a   : > { %v3826_v37 = vpop.eup %3825  ;;  %3827 = vrcp.f32 %v2244_v40  ;;  %v2271_v14 = vmul.f32 %v3824_v23, %v4670_v13  ;;  %v4762_v36 = vpop.f32.mrf.mxu0 }
 0x66b   : > { %v2021_v28 = vmul.f32 %v3826_v37, %v4690_v43  ;;  %v2030_v52 = vpack.c.bf16 %v2022_v41, %v2022_v41  ;;  %v2253_v45 = vpop.xlane.xlu1 %2252  ;;  %v4764_v13 = vpop.f32.mrf.mxu1 }
 0x66c   : > { %v2279_v60 = vpack.c.bf16 %v2271_v14, %v2271_v14 }
 0x66d   : > { %v2029_v20 = vpack.c.bf16 %v2021_v28, %v2021_v28  ;;  %v2079_v51 = vunpack.c.l.b16 %v2030_v52 }
 0x66e   : > { %v2291_v43 = vunpack.c.l.b16 %v2279_v60 }
 0x66f   : > { %v2078_v16 = vunpack.c.l.b16 %v2029_v20 }
 0x670   : > { %v3828_v39 = vpop.eup %3827 }
 0x671   : > { %v2272_v50 = vmul.f32 %v3828_v39, %v4697_v46  ;;  %v2250_v11 = vpop.xlane.xlu2 %2249  ;;  %v2081_v22 = vpack.c.b16 %v2079_v51, %v2078_v16 }
 0x672   : > { %3829 = vrcp.f32 %v2250_v11  ;;  %v4769_v6 = vpop.f32.mrf.mxu0 }
 0x673   : > { %v2280_v30 = vpack.c.bf16 %v2272_v50, %v2272_v50  ;;  %3466 = vmatmul.msk.bf16.gmra.mxu1 %vm896_vm0, %v2081_v22  ;;  %v1847_v55 = vpop.f32.mrf.mxu1 }
 0x675   : > { %v2292_v9 = vunpack.c.l.b16 %v2280_v30  ;;  %v2247_v61 = vpop.xlane.xlu0 %2246 }
 0x676   : > { %3831 = vrcp.f32 %v2247_v61 }
 0x677   : > { %v2295_v57 = vpack.c.b16 %v2292_v9, %v2291_v43  ;;  %3833 = vrcp.f32 %v2253_v45 }
 0x678   : > { %v3830_v46 = vpop.eup %3829 }
 0x679   : > { %v2341_v0 = vpop.permute.xlu2 %2340  ;;  %3471 = vmatmul.msk.bf16.vlgmr.msra.gmra.mxu0 %vm896_vm0, %v2295_v57  ;;  %v2274_v62 = vmul.f32 %v3830_v46, %v4707_v17  ;;  %v3542_v46 = vld [vmem:[%s5073_s9 + $0x8] sm:$0xff] }
 0x67a   : > { %2356 = vmatpush.bf16.msra.mxu1 %v2341_v0  ;;  %2533 = vmatpush.bf16.msrb.mxu2 %v3542_v46 }
 0x67b   : > { %v2282_v12 = vpack.c.bf16 %v2274_v62, %v2274_v62  ;;  %v1849_v35 = vpop.f32.mrf.mxu1 }
 0x67c   : > { %v3832_v31 = vpop.eup %3831  ;;  %v3654_v41 = vpack.i.bf16 %v1849_v35, %v1847_v55 }
 0x67d   : > { %v2256_v3 = vpop.xlane.xlu0 %2255  ;;  %v2273_v15 = vmul.f32 %v3832_v31, %v4712_v32  ;;  %v3834_v24 = vpop.eup %3833  ;;  %v2294_v32 = vunpack.c.l.b16 %v2282_v12 }
 0x67e   : > { %3835 = vrcp.f32 %v2256_v3  ;;  %v2275_v47 = vmul.f32 %v3834_v24, %v4699_v2 }
 0x67f   : > { %v2281_v18 = vpack.c.bf16 %v2273_v15, %v2273_v15  ;;  %v3541_v15 = vld [vmem:[%s5073_s9] sm:$0xff] }
 0x680   : > { %v2283_v44 = vpack.c.bf16 %v2275_v47, %v2275_v47  ;;  %2534 = vmatpush.bf16.msrb.mxu2 %v3541_v15 }
 0x681   : > { %v2293_v8 = vunpack.c.l.b16 %v2281_v18 }
 0x682   : > { %v2332_v56 = vunpack.c.l.b16 %v2283_v44 }
 0x683   : > { %v2339_v26 = vpop.permute.xlu1 %2338  ;;  %v2296_v48 = vpack.c.b16 %v2294_v32, %v2293_v8  ;;  %v1852_v5 = vpop.f32.mrf.mxu1 }
 0x684   : > { %v3836_v1 = vpop.eup %3835  ;;  %2357 = vmatpush.bf16.msra.mxu1 %v2339_v26 }
 0x685   : > { %v2276_v59 = vmul.f32 %v3836_v1, %v4719_v49  ;;  %v2259_v29 = vpop.xlane.xlu0 %2258 }
 0x686   : > { %v1806_v38 = vpop.f32.mrf.mxu0  ;;  %3837 = vrcp.f32 %v2259_v29 }
 0x687   : > { %v2284_v17 = vpack.c.bf16 %v2276_v59, %v2276_v59 }
 0x689   : > { %v2333_v33 = vunpack.c.l.b16 %v2284_v17  ;;  %3472 = vmatmul.msk.bf16.gmra.mxu0 %vm896_vm0, %v2296_v48 }
 0x68b   : > { %v2336_v2 = vpack.c.b16 %v2333_v33, %v2332_v56  ;;  %v1854_v20 = vpop.f32.mrf.mxu1 }
 0x68c   : > { %v3838_v58 = vpop.eup %3837  ;;  %v3669_v51 = vpack.i.bf16 %v1854_v20, %v1852_v5 }
 0x68d   : > { %3473 = vmatmul.msk.bf16.vlgmr.msra.gmra.mxu1 %vm896_vm0, %v2336_v2  ;;  %v2262_v34 = vpop.xlane.xlu0 %2261  ;;  %v2277_v49 = vmul.f32 %v3838_v58, %v4726_v27 }
 0x68e   : > { %3839 = vrcp.f32 %v2262_v34  ;;  %v1808_v54 = vpop.f32.mrf.mxu0 }
 0x68f   : > { %v3624_v42 = vpack.i.bf16 %v1808_v54, %v1806_v38  ;;  %v2285_v40 = vpack.c.bf16 %v2277_v49, %v2277_v49 }
 0x691   : > { %3625 = vrot.lane.b32.xlu0 %v3624_v42, %s3909_s22  ;;  %v2334_v28 = vunpack.c.l.b16 %v2285_v40 }
 0x694   : > { %v3840_v10 = vpop.eup %3839 }
 0x695   : > { %v2278_v23 = vmul.f32 %v3840_v10, %v4733_v19 }
 0x697   : > { %v2286_v37 = vpack.c.bf16 %v2278_v23, %v2278_v23 }
 0x699   : > { %3655 = vrot.lane.b32.xlu0 %v3654_v41, %s3909_s22  ;;  %v2335_v52 = vunpack.c.l.b16 %v2286_v37 }
 0x69b   : > { %v2337_v14 = vpack.c.b16 %v2335_v52, %v2334_v28 }
 0x69d   : > { %v1811_v16 = vpop.f32.mrf.mxu0  ;;  %3474 = vmatmul.msk.bf16.gmra.mxu1 %vm896_vm0, %v2337_v14 }
 0x6a1   : > { %3670 = vrot.lane.b32.xlu0 %v3669_v51, %s3909_s22 }
 0x6a5   : > { %v1813_v39 = vpop.f32.mrf.mxu0 }
 0x6a6   : > { %v3639_v19 = vpack.i.bf16 %v1813_v39, %v1811_v16 }
 0x6ad   : > { %v2062_v60 = vpop.f32.mrf.mxu0 }
 0x6b5   : > { %v2064_v27 = vpop.f32.mrf.mxu0 }
 0x6b6   : > { %v3629_v50 = vpack.i.bf16 %v2064_v27, %v2062_v60 }
 0x6b8   : > { %3630 = vrot.lane.b32.xlu2 %v3629_v50, %s3910_s2 }
 0x6bd   : > { %v2067_v11 = vpop.f32.mrf.mxu0  ;;  %v2103_v22 = vpop.f32.mrf.mxu1 }
 0x6c0   : > { %3640 = vrot.lane.b32.xlu2 %v3639_v19, %s3909_s22 }
 0x6c5   : > { %v2069_v30 = vpop.f32.mrf.mxu0  ;;  %v2105_v43 = vpop.f32.mrf.mxu1 }
 0x6c6   : > { %v3644_v3 = vpack.i.bf16 %v2069_v30, %v2067_v11  ;;  %v3659_v55 = vpack.i.bf16 %v2105_v43, %v2103_v22 }
 0x6f0   : > { %v2108_v45 = vpop.f32.mrf.mxu1 }
 0x6f6   : > { %v2318_v9 = vpop.f32.mrf.mxu0 }
 0x6f8   : > { %v2110_v0 = vpop.f32.mrf.mxu1 }
 0x6f9   : > { %v3674_v12 = vpack.i.bf16 %v2110_v0, %v2108_v45 }
 0x6fe   : > { %v2320_v61 = vpop.f32.mrf.mxu0 }
 0x6ff   : > { %v3634_v57 = vpack.i.bf16 %v2320_v61, %v2318_v9 }
 0x701   : > { %3635 = vrot.lane.b32.xlu1 %v3634_v57, %s3911_s23 }
 0x703   : > { %v3626_v59 = vpop.permute.xlu0 %3625 }
 0x704   : > { %v3628_v32 = vunpack.i.h.bf16 %v3626_v59  ;;  %v3627_v38 = vunpack.i.l.bf16 %v3626_v59 }
 0x706   : > { %v2323_v31 = vpop.f32.mrf.mxu0  ;;  %v2466_v56 = vsel %vm1328_vm5, %v4769_v6, %v3628_v32  ;;  %v2465_v33 = vsel %vm1328_vm5, %v4762_v36, %v3627_v38 }
 0x709   : > { %3645 = vrot.lane.b32.xlu1 %v3644_v3, %s3910_s2 }
 0x70a   : > { %v2359_v62 = vpop.f32.mrf.mxu1 }
 0x70b   : > { %v3656_v50 = vpop.permute.xlu0 %3655 }
 0x70c   : > { %v3658_v11 = vunpack.i.h.bf16 %v3656_v50 }
 0x70e   : > { %v2325_v24 = vpop.f32.mrf.mxu0  ;;  %v2470_v43 = vsel %vm1328_vm5, %v4753_v4, %v3658_v11  ;;  %v3879_v11 = vld [vmem:[#allocation2 + $0x30] sm:$0xff] }
 0x70f   : > { %v3649_v18 = vpack.i.bf16 %v2325_v24, %v2323_v31 }
 0x711   : > { %3660 = vrot.lane.b32.xlu1 %v3659_v55, %s3910_s2  ;;  %3650 = vrot.lane.b32.xlu2 %v3649_v18, %s3911_s23 }
 0x712   : > { %v2361_v47 = vpop.f32.mrf.mxu1  ;;  %v3631_v29 = vpop.permute.xlu2 %3630 }
 0x713   : > { %v3664_v26 = vpack.i.bf16 %v2361_v47, %v2359_v62  ;;  %v3633_v17 = vunpack.i.h.bf16 %v3631_v29  ;;  %v3632_v48 = vunpack.i.l.bf16 %v3631_v29  ;;  %v3671_v15 = vpop.permute.xlu0 %3670 }
 0x714   : > { %v3673_v24 = vunpack.i.h.bf16 %v3671_v15  ;;  %v3672_v4 = vunpack.i.l.bf16 %v3671_v15 }
 0x715   : > { %v2474_v58 = vsel %vm2473_vm12, %v2465_v33, %v3632_v48  ;;  %v2475_v54 = vsel %vm2473_vm12, %v2466_v56, %v3633_v17 }
 0x716   : > { %v2472_v47 = vsel %vm1328_vm5, %v4764_v13, %v3673_v24  ;;  %v3689_v13 = vld [vmem:[%s5074_s10] ss:$0 sm:$0xff] }
 0x719   : > { %3675 = vrot.lane.b32.xlu1 %v3674_v12, %s3910_s2  ;;  %3665 = vrot.lane.b32.xlu2 %v3664_v26, %s3911_s23  ;;  %v2471_v12 = vsel %vm1328_vm5, %v4757_v21, %v3672_v4  ;;  %v3873_v21 = vld [vmem:[#allocation2] sm:$0xff] }
 0x71a   : > { %v2364_v8 = vpop.f32.mrf.mxu1  ;;  %v3641_v5 = vpop.permute.xlu2 %3640 }
 0x71b   : > { %v3643_v40 = vunpack.i.h.bf16 %v3641_v5  ;;  %v3642_v6 = vunpack.i.l.bf16 %v3641_v5 }
 0x71d   : > { %v2468_v28 = vsel %vm1328_vm5, %v4463_v7, %v3643_v40  ;;  %v2467_v52 = vsel %vm1328_vm5, %v4455_v63, %v3642_v6  ;;  %v3657_v7 = vunpack.i.l.bf16 %v3656_v50  ;;  %v3876_v6 = vld [vmem:[#allocation2 + $0x18] sm:$0xff] }
 0x71f   : > { %v2469_v9 = vsel %vm1328_vm5, %v4751_v53, %v3657_v7 }
 0x722   : > { %v2366_v1 = vpop.f32.mrf.mxu1 }
 0x723   : > { %v3679_v44 = vpack.i.bf16 %v2366_v1, %v2364_v8 }
 0x725   : > { %3680 = vrot.lane.b32.xlu2 %v3679_v44, %s3911_s23 }
 0x76b   : > { %v3651_v36 = vpop.permute.xlu2 %3650 }
 0x76c   : > { %v3653_v16 = vunpack.i.h.bf16 %v3651_v36  ;;  %v3652_v51 = vunpack.i.l.bf16 %v3651_v36 }
 0x773   : > { %v3636_v35 = vpop.permute.xlu1 %3635  ;;  %v3666_v63 = vpop.permute.xlu2 %3665 }
 0x774   : > { %v3638_v2 = vunpack.i.h.bf16 %v3636_v35  ;;  %v3637_v34 = vunpack.i.l.bf16 %v3636_v35  ;;  %v3668_v57 = vunpack.i.h.bf16 %v3666_v63  ;;  %v3667_v0 = vunpack.i.l.bf16 %v3666_v63 }
 0x776   : > { %v2483_v42 = vsel %vm2482_vm13, %v2474_v58, %v3637_v34  ;;  %v2484_v49 = vsel %vm2482_vm13, %v2475_v54, %v3638_v2  ;;  %v3874_v2 = vld [vmem:[#allocation2 + $0x8] sm:$0xff] }
 0x777   : > { %v2491_v10 = vpack.c.bf16 %v2484_v49, %v2483_v42  ;;  %v3875_v49 = vld [vmem:[#allocation2 + $0x10] sm:$0xff] }
 0x779   : > { %3483 = vmatmul.msk.bf16.vlgmr.msrb.gmra.mxu2 %vm896_vm0, %v2491_v10 }
 0x77b   : > { %v3646_v23 = vpop.permute.xlu1 %3645 }
 0x77c   : > { %v3648_v41 = vunpack.i.h.bf16 %v3646_v23  ;;  %v3647_v37 = vunpack.i.l.bf16 %v3646_v23 }
 0x77e   : > { %v2477_v14 = vsel %vm2473_vm12, %v2468_v28, %v3648_v41  ;;  %v2476_v20 = vsel %vm2473_vm12, %v2467_v52, %v3647_v37  ;;  %v3877_v52 = vld [vmem:[#allocation2 + $0x20] sm:$0xff] }
 0x77f   : > { %v2485_v39 = vsel %vm2482_vm13, %v2476_v20, %v3652_v51  ;;  %v2486_v60 = vsel %vm2482_vm13, %v2477_v14, %v3653_v16  ;;  %v3681_v53 = vpop.permute.xlu2 %3680 }
 0x780   : > { %v2492_v27 = vpack.c.bf16 %v2486_v60, %v2485_v39  ;;  %v3683_v1 = vunpack.i.h.bf16 %v3681_v53  ;;  %v3682_v44 = vunpack.i.l.bf16 %v3681_v53  ;;  %v3878_v39 = vld [vmem:[#allocation2 + $0x28] sm:$0xff] }
 0x783   : > { %v3661_v19 = vpop.permute.xlu1 %3660 }
 0x784   : > { %v3663_v22 = vunpack.i.h.bf16 %v3661_v19  ;;  %v3662_v30 = vunpack.i.l.bf16 %v3661_v19 }
 0x786   : > { %v2478_v45 = vsel %vm2473_vm12, %v2469_v9, %v3662_v30  ;;  %v2479_v61 = vsel %vm2473_vm12, %v2470_v43, %v3663_v22 }
 0x787   : > { %v2487_v46 = vsel %vm2482_vm13, %v2478_v45, %v3667_v0  ;;  %v2488_v31 = vsel %vm2482_vm13, %v2479_v61, %v3668_v57 }
 0x788   : > { %v2493_v3 = vpack.c.bf16 %v2488_v31, %v2487_v46  ;;  %v3880_v31 = vld [vmem:[#allocation2 + $0x38] sm:$0xff] }
 0x789   : > { %3484 = vmatmul.msk.bf16.gmra.mxu2 %vm896_vm0, %v2492_v27 }
 0x78b   : > { %v3676_v62 = vpop.permute.xlu1 %3675 }
 0x78c   : > { %v3678_v55 = vunpack.i.h.bf16 %v3676_v62  ;;  %v3677_v18 = vunpack.i.l.bf16 %v3676_v62 }
 0x78e   : > { %v2480_v26 = vsel %vm2473_vm12, %v2471_v12, %v3677_v18  ;;  %v2481_v8 = vsel %vm2473_vm12, %v2472_v47, %v3678_v55 }
 0x78f   : > { %v2489_v59 = vsel %vm2482_vm13, %v2480_v26, %v3682_v44  ;;  %v2490_v29 = vsel %vm2482_vm13, %v2481_v8, %v3683_v1 }
 0x790   : > { %v2494_v32 = vpack.c.bf16 %v2490_v29, %v2489_v59 }
 0x799   : > { %3485 = vmatmul.msk.bf16.gmra.mxu2 %vm896_vm0, %v2493_v3 }
 0x7a9   : > { %3486 = vmatmul.msk.bf16.gmra.mxu2 %vm896_vm0, %v2494_v32 }
 0x7fc   : > { %v2536_v38 = vpop.f32.mrf.mxu2 }
 0x7fd   : > { %v2537_v17 = vadd.f32 %v3689_v13, %v2536_v38 }
 0x7ff   : > { %v4827_v48 = vadd.f32 %v3873_v21, %v2537_v17 }
 0x801   : > { %v2566_v35 = vsel %vm896_vm0, %v4827_v48, 0.0 }
 0x802   : > { %2567 = vadd.xlane.f32.xlu0 %v2566_v35 }
 0x804   : > { %v2538_v56 = vpop.f32.mrf.mxu2 }
 0x805   : > { %v2539_v33 = vadd.f32 %v3689_v13, %v2538_v56 }
 0x807   : > { %v4831_v34 = vadd.f32 %v3874_v2, %v2539_v33 }
 0x809   : > { %v2569_v58 = vsel %vm896_vm0, %v4831_v34, 0.0 }
 0x80a   : > { %2570 = vadd.xlane.f32.xlu1 %v2569_v58 }
 0x80c   : > { %v2541_v54 = vpop.f32.mrf.mxu2 }
 0x80d   : > { %v2542_v42 = vadd.f32 %v3689_v13, %v2541_v54 }
 0x80f   : > { %v4835_v5 = vadd.f32 %v3875_v49, %v2542_v42 }
 0x811   : > { %v2572_v10 = vsel %vm896_vm0, %v4835_v5, 0.0 }
 0x812   : > { %2573 = vadd.xlane.f32.xlu2 %v2572_v10 }
 0x814   : > { %v2543_v23 = vpop.f32.mrf.mxu2 }
 0x815   : > { %v2544_v40 = vadd.f32 %v3689_v13, %v2543_v23  ;;  %v3544_v23 = vld [vmem:[%s5077_s13 + $0x8] sm:$0xff] }
 0x816   : > { %2806 = vmatpush.bf16.msra.mxu3 %v3544_v23 }
 0x817   : > { %v4839_v41 = vadd.f32 %v3876_v6, %v2544_v40 }
 0x819   : > { %v2575_v37 = vsel %vm896_vm0, %v4839_v41, 0.0 }
 0x81a   : > { %2576 = vadd.xlane.f32.xlu0 %v2575_v37 }
 0x81c   : > { %v2546_v36 = vpop.f32.mrf.mxu2 }
 0x81d   : > { %v2547_v28 = vadd.f32 %v3689_v13, %v2546_v36  ;;  %v3543_v36 = vld [vmem:[%s5077_s13] sm:$0xff] }
 0x81e   : > { %2807 = vmatpush.bf16.msra.mxu3 %v3543_v36 }
 0x81f   : > { %v4843_v14 = vadd.f32 %v3877_v52, %v2547_v28 }
 0x821   : > { %v2578_v20 = vsel %vm896_vm0, %v4843_v14, 0.0 }
 0x822   : > { %2579 = vadd.xlane.f32.xlu1 %v2578_v20 }
 0x824   : > { %v2548_v16 = vpop.f32.mrf.mxu2 }
 0x825   : > { %v2549_v51 = vadd.f32 %v3689_v13, %v2548_v16 }
 0x827   : > { %v4847_v60 = vadd.f32 %v3878_v39, %v2549_v51 }
 0x829   : > { %v2581_v27 = vsel %vm896_vm0, %v4847_v60, 0.0 }
 0x82a   : > { %2582 = vadd.xlane.f32.xlu2 %v2581_v27 }
 0x82c   : > { %v2551_v50 = vpop.f32.mrf.mxu2 }
 0x82d   : > { %v2552_v19 = vadd.f32 %v3689_v13, %v2551_v50 }
 0x82f   : > { %v4851_v7 = vadd.f32 %v3879_v11, %v2552_v19 }
 0x831   : > { %v2584_v22 = vsel %vm896_vm0, %v4851_v7, 0.0 }
 0x832   : > { %2585 = vadd.xlane.f32.xlu2 %v2584_v22 }
 0x834   : > { %v2553_v9 = vpop.f32.mrf.mxu2 }
 0x835   : > { %v2554_v61 = vadd.f32 %v3689_v13, %v2553_v9 }
 0x837   : > { %v4863_v3 = vadd.f32 %v3880_v31, %v2554_v61 }
 0x839   : > { %v2587_v4 = vsel %vm896_vm0, %v4863_v3, 0.0 }
 0x875   : > { %v2568_v30 = vpop.xlane.xlu0 %2567 }
 0x876   : > { %v2590_v63 = vmul.f32 %v2568_v30, %v4055_v25 }
 0x878   : > { %v4857_v43 = vsub.f32 %v4827_v48, %v2590_v63 }
 0x87a   : > { %v2606_v45 = vmul.f32 %v4857_v43, %v4857_v43 }
 0x87c   : > { %v2614_v57 = vsel %vm896_vm0, %v2606_v45, 0.0 }
 0x87d   : > { %v2571_v0 = vpop.xlane.xlu1 %2570  ;;  %2615 = vadd.xlane.f32.xlu0 %v2614_v57 }
 0x87e   : > { %v2591_v46 = vmul.f32 %v2571_v0, %v4055_v25 }
 0x880   : > { %v4866_v15 = vsub.f32 %v4831_v34, %v2591_v46 }
 0x882   : > { %v2607_v62 = vmul.f32 %v4866_v15, %v4866_v15 }
 0x884   : > { %v2617_v24 = vsel %vm896_vm0, %v2607_v62, 0.0 }
 0x885   : > { %v2574_v55 = vpop.xlane.xlu2 %2573  ;;  %2618 = vadd.xlane.f32.xlu1 %v2617_v24  ;;  %2588 = vadd.xlane.f32.xlu0 %v2587_v4 }
 0x886   : > { %v2592_v18 = vmul.f32 %v2574_v55, %v4055_v25 }
 0x888   : > { %v4875_v53 = vsub.f32 %v4835_v5, %v2592_v18 }
 0x88a   : > { %v2608_v47 = vmul.f32 %v4875_v53, %v4875_v53 }
 0x88c   : > { %v2620_v12 = vsel %vm896_vm0, %v2608_v47, 0.0 }
 0x88d   : > { %2621 = vadd.xlane.f32.xlu1 %v2620_v12  ;;  %v2577_v26 = vpop.xlane.xlu0 %2576  ;;  %v4928_v12 = vld [vmem:[%s5075_s11] ss:$0 sm:$0xff] }
 0x88e   : > { %v2593_v8 = vmul.f32 %v2577_v26, %v4055_v25 }
 0x890   : > { %v4882_v1 = vsub.f32 %v4839_v41, %v2593_v8 }
 0x892   : > { %v2609_v44 = vmul.f32 %v4882_v1, %v4882_v1 }
 0x894   : > { %v2623_v59 = vsel %vm896_vm0, %v2609_v44, 0.0 }
 0x895   : > { %v2580_v29 = vpop.xlane.xlu1 %2579  ;;  %2624 = vadd.xlane.f32.xlu2 %v2623_v59 }
 0x896   : > { %v2594_v32 = vmul.f32 %v2580_v29, %v4055_v25 }
 0x898   : > { %v4889_v13 = vsub.f32 %v4843_v14, %v2594_v32 }
 0x89a   : > { %v2610_v38 = vmul.f32 %v4889_v13, %v4889_v13 }
 0x89c   : > { %v2626_v17 = vsel %vm896_vm0, %v2610_v38, 0.0  ;;  %v4934_v38 = vld [vmem:[%s5076_s12] ss:$0 sm:$0xff] }
 0x89d   : > { %v2583_v21 = vpop.xlane.xlu2 %2582  ;;  %2627 = vadd.xlane.f32.xlu0 %v2626_v17 }
 0x89e   : > { %v2595_v35 = vmul.f32 %v2583_v21, %v4055_v25 }
 0x8a0   : > { %v4896_v56 = vsub.f32 %v4847_v60, %v2595_v35 }
 0x8a2   : > { %v2611_v33 = vmul.f32 %v4896_v56, %v4896_v56 }
 0x8a4   : > { %v2629_v2 = vsel %vm896_vm0, %v2611_v33, 0.0 }
 0x8a5   : > { %v2586_v58 = vpop.xlane.xlu2 %2585  ;;  %2630 = vadd.xlane.f32.xlu1 %v2629_v2 }
 0x8a6   : > { %v2596_v54 = vmul.f32 %v2586_v58, %v4055_v25 }
 0x8a8   : > { %v4903_v42 = vsub.f32 %v4851_v7, %v2596_v54 }
 0x8aa   : > { %v2612_v49 = vmul.f32 %v4903_v42, %v4903_v42 }
 0x8ac   : > { %v2632_v10 = vsel %vm896_vm0, %v2612_v49, 0.0 }
 0x8ad   : > { %2633 = vadd.xlane.f32.xlu2 %v2632_v10 }
 0x8f0   : > { %v2616_v40 = vpop.xlane.xlu0 %2615 }
 0x8f1   : > { %v2638_v6 = vmul.f32 %v2616_v40, %v4055_v25 }
 0x8f3   : > { %v2646_v37 = vadd.f32 1e-05, %v2638_v6 }
 0x8f5   : > { %3841 = vrsqrt.f32 %v2646_v37  ;;  %vm2660_vm15 = vweird.f32 %v2646_v37 }
 0x8f8   : > { %v2619_v28 = vpop.xlane.xlu1 %2618  ;;  %v2589_v52 = vpop.xlane.xlu0 %2588 }
 0x8f9   : > { %v2639_v20 = vmul.f32 %v2619_v28, %v4055_v25  ;;  %v2597_v16 = vmul.f32 %v2589_v52, %v4055_v25 }
 0x8fb   : > { %v3842_v51 = vpop.eup %3841  ;;  %v2647_v39 = vadd.f32 1e-05, %v2639_v20  ;;  %v4918_v27 = vsub.f32 %v4863_v3, %v2597_v16 }
 0x8fc   : > { %v2655_v50 = vmul.f32 %v3842_v51, %v2646_v37  ;;  %vm2661_vm14 = vweird.f32 %v3842_v51 }
 0x8fd   : > { %3843 = vrsqrt.f32 %v2647_v39  ;;  %v2613_v19 = vmul.f32 %v4918_v27, %v4918_v27  ;;  %vm2662_vm1 = vmor %vm2660_vm15, %vm2661_vm14  ;;  %vm2670_vm3 = vweird.f32 %v2647_v39 }
 0x8fe   : > { %v2656_v11 = vmul.f32 %v3842_v51, %v2655_v50 }
 0x8ff   : > { %v2635_v22 = vsel %vm896_vm0, %v2613_v19, 0.0 }
 0x900   : > { %v2657_v30 = vmul.f32 0.5, %v2656_v11  ;;  %v2622_v63 = vpop.xlane.xlu1 %2621  ;;  %2636 = vadd.xlane.f32.xlu0 %v2635_v22 }
 0x901   : > { %v2640_v9 = vmul.f32 %v2622_v63, %v4055_v25 }
 0x902   : > { %v2658_v45 = vsub.f32 1.5, %v2657_v30 }
 0x903   : > { %v3844_v61 = vpop.eup %3843  ;;  %v2648_v57 = vadd.f32 1e-05, %v2640_v9 }
 0x904   : > { %v2659_v0 = vmul.f32 %v3842_v51, %v2658_v45  ;;  %v2665_v46 = vmul.f32 %v3844_v61, %v2647_v39  ;;  %vm2671_vm2 = vweird.f32 %v3844_v61 }
 0x905   : > { %3845 = vrsqrt.f32 %v2648_v57  ;;  %vm2672_vm4 = vmor %vm2670_vm3, %vm2671_vm2  ;;  %vm2680_vm6 = vweird.f32 %v2648_v57 }
 0x906   : > { %v2666_v31 = vmul.f32 %v3844_v61, %v2665_v46  ;;  %v2663_v62 = vsel %vm2662_vm1, %v3842_v51, %v2659_v0 }
 0x907   : > { %v2734_v26 = vmul.f32 %v2663_v62, %v4857_v43 }
 0x908   : > { %v2667_v24 = vmul.f32 0.5, %v2666_v31  ;;  %v2625_v4 = vpop.xlane.xlu2 %2624 }
 0x909   : > { %v2641_v55 = vmul.f32 %v2625_v4, %v4055_v25  ;;  %v2745_v17 = vmul.f32 %v4928_v12, %v2734_v26 }
 0x90a   : > { %v2668_v18 = vsub.f32 1.5, %v2667_v24 }
 0x90b   : > { %v3846_v47 = vpop.eup %3845  ;;  %v2649_v8 = vadd.f32 1e-05, %v2641_v55  ;;  %v2756_v49 = vadd.f32 %v4934_v38, %v2745_v17 }
 0x90c   : > { %v2669_v44 = vmul.f32 %v3844_v61, %v2668_v18  ;;  %v2675_v59 = vmul.f32 %v3846_v47, %v2648_v57  ;;  %vm2681_vm5 = vweird.f32 %v3846_v47 }
 0x90d   : > { %3847 = vrsqrt.f32 %v2649_v8  ;;  %vm2682_vm7 = vmor %vm2680_vm6, %vm2681_vm5  ;;  %vm2690_vm9 = vweird.f32 %v2649_v8 }
 0x90e   : > { %v2673_v29 = vsel %vm2672_vm4, %v3844_v61, %v2669_v44  ;;  %v2676_v32 = vmul.f32 %v3846_v47, %v2675_v59 }
 0x90f   : > { %v2735_v21 = vmul.f32 %v2673_v29, %v4866_v15 }
 0x910   : > { %v2677_v35 = vmul.f32 0.5, %v2676_v32  ;;  %v2628_v33 = vpop.xlane.xlu0 %2627 }
 0x911   : > { %v2746_v43 = vmul.f32 %v4928_v12, %v2735_v21  ;;  %v2642_v2 = vmul.f32 %v2628_v33, %v4055_v25 }
 0x912   : > { %v2678_v58 = vsub.f32 1.5, %v2677_v35 }
 0x913   : > { %v3848_v54 = vpop.eup %3847  ;;  %v2757_v10 = vadd.f32 %v4934_v38, %v2746_v43  ;;  %v2650_v23 = vadd.f32 1e-05, %v2642_v2 }
 0x914   : > { %v2679_v40 = vmul.f32 %v3846_v47, %v2678_v58  ;;  %v2685_v6 = vmul.f32 %v3848_v54, %v2649_v8  ;;  %vm2691_vm8 = vweird.f32 %v3848_v54 }
 0x915   : > { %3849 = vrsqrt.f32 %v2650_v23  ;;  %v2764_v37 = vpack.c.bf16 %v2757_v10, %v2756_v49  ;;  %vm2692_vm10 = vmor %vm2690_vm9, %vm2691_vm8  ;;  %vm2700_vm12 = vweird.f32 %v2650_v23  ;;  %vm2941_vm8 = vcmask 523264  }
 0x916   : > { %v2686_v15 = vmul.f32 %v3848_v54, %v2685_v6  ;;  %v2683_v36 = vsel %vm2682_vm7, %v3846_v47, %v2679_v40  ;;  %vm3099_vm9 = vcmask 257024  }
 0x917   : > { %3495 = vmatmul.msk.bf16.vlgmr.msra.gmra.mxu3 %vm896_vm0, %v2764_v37  ;;  %v2736_v39 = vmul.f32 %v2683_v36, %v4875_v53 }
 0x918   : > { %v2687_v28 = vmul.f32 0.5, %v2686_v15  ;;  %v2631_v52 = vpop.xlane.xlu1 %2630 }
 0x919   : > { %v2643_v20 = vmul.f32 %v2631_v52, %v4055_v25  ;;  %v2747_v9 = vmul.f32 %v4928_v12, %v2736_v39 }
 0x91a   : > { %v2688_v16 = vsub.f32 1.5, %v2687_v28 }
 0x91b   : > { %v3850_v51 = vpop.eup %3849  ;;  %v2651_v50 = vadd.f32 1e-05, %v2643_v20  ;;  %v2758_v46 = vadd.f32 %v4934_v38, %v2747_v9 }
 0x91c   : > { %v2689_v19 = vmul.f32 %v3848_v54, %v2688_v16  ;;  %v2695_v11 = vmul.f32 %v3850_v51, %v2650_v23  ;;  %vm2701_vm11 = vweird.f32 %v3850_v51 }
 0x91d   : > { %3851 = vrsqrt.f32 %v2651_v50  ;;  %vm2702_vm13 = vmor %vm2700_vm12, %vm2701_vm11  ;;  %vm2710_vm15 = vweird.f32 %v2651_v50 }
 0x91e   : > { %v2693_v22 = vsel %vm2692_vm10, %v3848_v54, %v2689_v19  ;;  %v2696_v30 = vmul.f32 %v3850_v51, %v2695_v11 }
 0x91f   : > { %v2737_v63 = vmul.f32 %v2693_v22, %v4882_v1  ;;  %v3548_v22 = vld [vmem:[%s5079_s15 + $0x18] sm:$0xff] }
 0x920   : > { %v2697_v45 = vmul.f32 0.5, %v2696_v30  ;;  %v2634_v35 = vpop.xlane.xlu2 %2633  ;;  %2958 = vmatpush.bf16.msrb.mxu0 %v3548_v22 }
 0x921   : > { %v2748_v61 = vmul.f32 %v4928_v12, %v2737_v63  ;;  %v3545_v63 = vld [vmem:[%s5079_s15] sm:$0xff] }
 0x922   : > { %v2698_v57 = vsub.f32 1.5, %v2697_v45 }
 0x923   : > { %v3852_v0 = vpop.eup %3851  ;;  %v2759_v53 = vadd.f32 %v4934_v38, %v2748_v61 }
 0x924   : > { %v2699_v31 = vmul.f32 %v3850_v51, %v2698_v57  ;;  %v2705_v62 = vmul.f32 %v3852_v0, %v2651_v50  ;;  %vm2711_vm14 = vweird.f32 %v3852_v0 }
 0x925   : > { %v2765_v24 = vpack.c.bf16 %v2759_v53, %v2758_v46  ;;  %vm2712_vm1 = vmor %vm2710_vm15, %vm2711_vm14 }
 0x926   : > { %v2706_v4 = vmul.f32 %v3852_v0, %v2705_v62  ;;  %v2703_v1 = vsel %vm2702_vm13, %v3850_v51, %v2699_v31 }
 0x927   : > { %3496 = vmatmul.msk.bf16.gmra.mxu3 %vm896_vm0, %v2765_v24  ;;  %v2738_v47 = vmul.f32 %v2703_v1, %v4889_v13  ;;  %v2644_v13 = vmul.f32 %v2634_v35, %v4055_v25 }
 0x928   : > { %v2707_v55 = vmul.f32 0.5, %v2706_v4 }
 0x929   : > { %v2749_v59 = vmul.f32 %v4928_v12, %v2738_v47  ;;  %v2652_v33 = vadd.f32 1e-05, %v2644_v13 }
 0x92a   : > { %v2708_v18 = vsub.f32 1.5, %v2707_v55 }
 0x92b   : > { %v2760_v32 = vadd.f32 %v4934_v38, %v2749_v59  ;;  %3853 = vrsqrt.f32 %v2652_v33  ;;  %vm2720_vm3 = vweird.f32 %v2652_v33 }
 0x92c   : > { %v2709_v26 = vmul.f32 %v3852_v0, %v2708_v18 }
 0x92e   : > { %v2713_v8 = vsel %vm2712_vm1, %v3852_v0, %v2709_v26 }
 0x92f   : > { %v2739_v44 = vmul.f32 %v2713_v8, %v4896_v56 }
 0x931   : > { %v2750_v29 = vmul.f32 %v4928_v12, %v2739_v44  ;;  %v3854_v43 = vpop.eup %3853 }
 0x932   : > { %v2715_v2 = vmul.f32 %v3854_v43, %v2652_v33  ;;  %vm2721_vm2 = vweird.f32 %v3854_v43 }
 0x933   : > { %v2761_v17 = vadd.f32 %v4934_v38, %v2750_v29  ;;  %vm2722_vm4 = vmor %vm2720_vm3, %vm2721_vm2 }
 0x934   : > { %v2716_v58 = vmul.f32 %v3854_v43, %v2715_v2 }
 0x935   : > { %v2766_v21 = vpack.c.bf16 %v2761_v17, %v2760_v32 }
 0x936   : > { %v2717_v10 = vmul.f32 0.5, %v2716_v58 }
 0x937   : > { %3497 = vmatmul.msk.bf16.gmra.mxu3 %vm896_vm0, %v2766_v21 }
 0x938   : > { %v2718_v23 = vsub.f32 1.5, %v2717_v10 }
 0x93a   : > { %v2719_v6 = vmul.f32 %v3854_v43, %v2718_v23 }
 0x93c   : > { %v2723_v36 = vsel %vm2722_vm4, %v3854_v43, %v2719_v6 }
 0x93d   : > { %v2740_v20 = vmul.f32 %v2723_v36, %v4903_v42  ;;  %v3547_v42 = vld [vmem:[%s5079_s15 + $0x10] sm:$0xff] }
 0x93e   : > { %2959 = vmatpush.bf16.msrb.mxu0 %v3547_v42 }
 0x93f   : > { %v2751_v39 = vmul.f32 %v4928_v12, %v2740_v20 }
 0x941   : > { %v2762_v19 = vadd.f32 %v4934_v38, %v2751_v39 }
 0x973   : > { %v2637_v56 = vpop.xlane.xlu0 %2636 }
 0x974   : > { %v2645_v54 = vmul.f32 %v2637_v56, %v4055_v25 }
 0x976   : > { %v2653_v49 = vadd.f32 1e-05, %v2645_v54 }
 0x978   : > { %3855 = vrsqrt.f32 %v2653_v49  ;;  %vm2730_vm6 = vweird.f32 %v2653_v49 }
 0x97e   : > { %v3856_v40 = vpop.eup %3855 }
 0x97f   : > { %v2725_v37 = vmul.f32 %v3856_v40, %v2653_v49  ;;  %vm2731_vm5 = vweird.f32 %v3856_v40 }
 0x980   : > { %vm2732_vm7 = vmor %vm2730_vm6, %vm2731_vm5 }
 0x981   : > { %v2726_v15 = vmul.f32 %v3856_v40, %v2725_v37 }
 0x983   : > { %v2727_v28 = vmul.f32 0.5, %v2726_v15 }
 0x985   : > { %v2728_v52 = vsub.f32 1.5, %v2727_v28 }
 0x987   : > { %v2729_v16 = vmul.f32 %v3856_v40, %v2728_v52 }
 0x989   : > { %v2733_v25 = vsel %vm2732_vm7, %v3856_v40, %v2729_v16 }
 0x98a   : > { %v2741_v51 = vmul.f32 %v2733_v25, %v4918_v27  ;;  %v3546_v27 = vld [vmem:[%s5079_s15 + $0x8] sm:$0xff] }
 0x98b   : > { %2960 = vmatpush.bf16.msrb.mxu0 %v3546_v27 }
 0x98c   : > { %v2752_v50 = vmul.f32 %v4928_v12, %v2741_v51  ;;  %v4979_v12 = vld [vmem:[%s5078_s14] ss:$0 sm:$0xff] }
 0x98e   : > { %v2763_v11 = vadd.f32 %v4934_v38, %v2752_v50 }
 0x98f   : > { %2961 = vmatpush.bf16.msrb.mxu0 %v3545_v63 }
 0x990   : > { %v2767_v30 = vpack.c.bf16 %v2763_v11, %v2762_v19 }
 0x992   : > { %3498 = vmatmul.msk.bf16.gmra.mxu3 %vm896_vm0, %v2767_v30 }
 0x99a   : > { %v2809_v38 = vpop.f32.mrf.mxu3 }
 0x99b   : > { %v2810_v9 = vadd.f32 %v4979_v12, %v2809_v38 }
 0x99d   : > { %v2829_v45 = vmul.f32 %v2810_v9, %v2810_v9 }
 0x99f   : > { %v2837_v61 = vmul.f32 %v2829_v45, %v2810_v9 }
 0x9a1   : > { %v2845_v57 = vmul.f32 0.044715, %v2837_v61 }
 0x9a2   : > { %v2811_v0 = vpop.f32.mrf.mxu3 }
 0x9a3   : > { %v2853_v46 = vadd.f32 %v2845_v57, %v2810_v9  ;;  %v2812_v53 = vadd.f32 %v4979_v12, %v2811_v0 }
 0x9a5   : > { %v2861_v31 = vmul.f32 0.7978846, %v2853_v46  ;;  %v2830_v62 = vmul.f32 %v2812_v53, %v2812_v53 }
 0x9a7   : > { %v2838_v24 = vmul.f32 %v2830_v62, %v2812_v53  ;;  %3857 = vtanh.f32 %v2861_v31 }
 0x9a9   : > { %v2846_v4 = vmul.f32 0.044715, %v2838_v24 }
 0x9aa   : > { %v2814_v1 = vpop.f32.mrf.mxu3 }
 0x9ab   : > { %v2854_v55 = vadd.f32 %v2846_v4, %v2812_v53  ;;  %v2815_v18 = vadd.f32 %v4979_v12, %v2814_v1 }
 0x9ad   : > { %v2862_v47 = vmul.f32 0.7978846, %v2854_v55  ;;  %v2831_v26 = vmul.f32 %v2815_v18, %v2815_v18  ;;  %v3858_v8 = vpop.eup %3857 }
 0x9ae   : > { %v2877_v29 = vadd.f32 1.0, %v3858_v8 }
 0x9af   : > { %3859 = vtanh.f32 %v2862_v47  ;;  %v2839_v44 = vmul.f32 %v2831_v26, %v2815_v18 }
 0x9b0   : > { %v2885_v43 = vmul.f32 0.5, %v2877_v29 }
 0x9b1   : > { %v2847_v59 = vmul.f32 0.044715, %v2839_v44 }
 0x9b2   : > { %v2816_v32 = vpop.f32.mrf.mxu3  ;;  %v2893_v49 = vmul.f32 %v2885_v43, %v2810_v9 }
 0x9b3   : > { %v2855_v17 = vadd.f32 %v2847_v59, %v2815_v18  ;;  %v2817_v21 = vadd.f32 %v4979_v12, %v2816_v32 }
 0x9b5   : > { %v3860_v35 = vpop.eup %3859  ;;  %v2863_v13 = vmul.f32 0.7978846, %v2855_v17  ;;  %v2832_v33 = vmul.f32 %v2817_v21, %v2817_v21 }
 0x9b6   : > { %v2878_v2 = vadd.f32 1.0, %v3860_v35 }
 0x9b7   : > { %v2840_v58 = vmul.f32 %v2832_v33, %v2817_v21  ;;  %3861 = vtanh.f32 %v2863_v13  ;;  %v3550_v13 = vld [vmem:[%s5081_s17 + $0x8] sm:$0xff] }
 0x9b8   : > { %v2886_v56 = vmul.f32 0.5, %v2878_v2  ;;  %3044 = vmatpush.bf16.msrb.mxu1 %v3550_v13  ;;  %v3549_v2 = vld [vmem:[%s5081_s17] sm:$0xff] }
 0x9b9   : > { %v2848_v54 = vmul.f32 0.044715, %v2840_v58 }
 0x9ba   : > { %v2894_v10 = vmul.f32 %v2886_v56, %v2812_v53  ;;  %v2819_v23 = vpop.f32.mrf.mxu3 }
 0x9bb   : > { %v2856_v40 = vadd.f32 %v2848_v54, %v2817_v21  ;;  %v2820_v6 = vadd.f32 %v4979_v12, %v2819_v23 }
 0x9bc   : > { %v2901_v37 = vpack.c.bf16 %v2894_v10, %v2893_v49  ;;  %3045 = vmatpush.bf16.msrb.mxu1 %v3549_v2 }
 0x9bd   : > { %v2864_v15 = vmul.f32 0.7978846, %v2856_v40  ;;  %v2833_v36 = vmul.f32 %v2820_v6, %v2820_v6  ;;  %v3862_v28 = vpop.eup %3861 }
 0x9be   : > { %3515 = vmatmul.msk.bf16.vlgmr.msrb.gmra.mxu0 %vm2941_vm8, %v2901_v37  ;;  %v2879_v16 = vadd.f32 1.0, %v3862_v28 }
 0x9bf   : > { %3863 = vtanh.f32 %v2864_v15  ;;  %v2841_v52 = vmul.f32 %v2833_v36, %v2820_v6  ;;  %v3693_v15 = vld [vmem:[%s5080_s16] ss:$0 sm:$0xff] }
 0x9c0   : > { %v2887_v22 = vmul.f32 0.5, %v2879_v16 }
 0x9c1   : > { %v2849_v20 = vmul.f32 0.044715, %v2841_v52 }
 0x9c2   : > { %v2821_v25 = vpop.f32.mrf.mxu3  ;;  %v2895_v63 = vmul.f32 %v2887_v22, %v2815_v18 }
 0x9c3   : > { %v2857_v51 = vadd.f32 %v2849_v20, %v2820_v6  ;;  %v2822_v39 = vadd.f32 %v4979_v12, %v2821_v25 }
 0x9c5   : > { %v3864_v50 = vpop.eup %3863  ;;  %v2865_v19 = vmul.f32 0.7978846, %v2857_v51  ;;  %v2834_v11 = vmul.f32 %v2822_v39, %v2822_v39 }
 0x9c6   : > { %v2880_v30 = vadd.f32 1.0, %v3864_v50 }
 0x9c7   : > { %v2842_v42 = vmul.f32 %v2834_v11, %v2822_v39  ;;  %3865 = vtanh.f32 %v2865_v19 }
 0x9c8   : > { %v2888_v27 = vmul.f32 0.5, %v2880_v30 }
 0x9c9   : > { %v2850_v38 = vmul.f32 0.044715, %v2842_v42 }
 0x9ca   : > { %v2896_v9 = vmul.f32 %v2888_v27, %v2817_v21 }
 0x9cb   : > { %v2858_v45 = vadd.f32 %v2850_v38, %v2822_v39 }
 0x9cc   : > { %v2902_v61 = vpack.c.bf16 %v2896_v9, %v2895_v63 }
 0x9cd   : > { %v2866_v57 = vmul.f32 0.7978846, %v2858_v45  ;;  %v3866_v0 = vpop.eup %3865 }
 0x9ce   : > { %3516 = vmatmul.msk.bf16.gmra.mxu0 %vm2941_vm8, %v2902_v61  ;;  %v2881_v46 = vadd.f32 1.0, %v3866_v0 }
 0x9cf   : > { %3867 = vtanh.f32 %v2866_v57 }
 0x9d0   : > { %v2889_v31 = vmul.f32 0.5, %v2881_v46 }
 0x9d2   : > { %v2897_v4 = vmul.f32 %v2889_v31, %v2820_v6 }
 0x9d5   : > { %v3868_v53 = vpop.eup %3867 }
 0x9d6   : > { %v2882_v62 = vadd.f32 1.0, %v3868_v53  ;;  %v3694_v53 = vld [vmem:[%s5082_s18] ss:$0 sm:$0xff] }
 0x9d8   : > { %v2890_v24 = vmul.f32 0.5, %v2882_v62 }
 0x9da   : > { %v2898_v1 = vmul.f32 %v2890_v24, %v2822_v39 }
 0x9dc   : > { %v2903_v55 = vpack.c.bf16 %v2898_v1, %v2897_v4 }
 0x9de   : > { %3517 = vmatmul.msk.bf16.gmra.mxu0 %vm2941_vm8, %v2903_v55 }
 0xa15   : > { %v2824_v47 = vpop.f32.mrf.mxu3 }
 0xa16   : > { %v2825_v18 = vadd.f32 %v4979_v12, %v2824_v47 }
 0xa18   : > { %v2835_v26 = vmul.f32 %v2825_v18, %v2825_v18 }
 0xa1a   : > { %v2843_v8 = vmul.f32 %v2835_v26, %v2825_v18 }
 0xa1c   : > { %v2851_v44 = vmul.f32 0.044715, %v2843_v8 }
 0xa1d   : > { %v2826_v59 = vpop.f32.mrf.mxu3 }
 0xa1e   : > { %v2859_v29 = vadd.f32 %v2851_v44, %v2825_v18  ;;  %v2827_v32 = vadd.f32 %v4979_v12, %v2826_v59 }
 0xa20   : > { %v2867_v17 = vmul.f32 0.7978846, %v2859_v29  ;;  %v2836_v21 = vmul.f32 %v2827_v32, %v2827_v32 }
 0xa22   : > { %v2844_v35 = vmul.f32 %v2836_v21, %v2827_v32  ;;  %3869 = vtanh.f32 %v2867_v17 }
 0xa24   : > { %v2852_v33 = vmul.f32 0.044715, %v2844_v35 }
 0xa26   : > { %v2860_v43 = vadd.f32 %v2852_v33, %v2827_v32  ;;  %v3587_v33 = vld [vmem:[%s4038_s24 + $0x10] sm:$0xff]  }
 0xa27   : > { %v3577_v2 = vunpack.c.l.bf16 %v3587_v33 }
 0xa28   : > { %v2868_v58 = vmul.f32 0.7978846, %v2860_v43  ;;  %v3870_v56 = vpop.eup %3869 }
 0xa29   : > { %v2883_v12 = vadd.f32 1.0, %v3870_v56 }
 0xa2a   : > { %3871 = vtanh.f32 %v2868_v58 }
 0xa2b   : > { %v2891_v49 = vmul.f32 0.5, %v2883_v12 }
 0xa2d   : > { %v2899_v40 = vmul.f32 %v2891_v49, %v2825_v18  ;;  %v3586_v18 = vld [vmem:[%s4038_s24 + $0x8] sm:$0xff]   ;;  %v3578_v49 = vunpack.c.h.bf16 %v3587_v33 }
 0xa2e   : > { %v3573_v8 = vunpack.c.l.bf16 %v3586_v18  ;;  %v3574_v17 = vunpack.c.h.bf16 %v3586_v18 }
 0xa30   : > { %v3872_v54 = vpop.eup %3871 }
 0xa31   : > { %v2884_v10 = vadd.f32 1.0, %v3872_v54 }
 0xa33   : > { %v2892_v23 = vmul.f32 0.5, %v2884_v10 }
 0xa35   : > { %v2900_v6 = vmul.f32 %v2892_v23, %v2827_v32 }
 0xa37   : > { %v2904_v37 = vpack.c.bf16 %v2900_v6, %v2899_v40 }
 0xa39   : > { %3518 = vmatmul.msk.bf16.gmra.mxu0 %vm2941_vm8, %v2904_v37  ;;  %v3588_v37 = vld [vmem:[%s4038_s24 + $0x18] sm:$0xff]  }
 0xa3b   : > { %v2963_v36 = vpop.f32.mrf.mxu0 }
 0xa3c   : > { %v2964_v28 = vadd.f32 %v3693_v15, %v2963_v36 }
 0xa3e   : > { %v2983_v52 = vadd.f32 %v2964_v28, %v4827_v48 }
 0xa40   : > { %2991 = vst.msk [vmem:[#allocation2] sm:$0xff] %vm896_vm0, %v2983_v52 }
 0xa43   : > { %v2965_v20 = vpop.f32.mrf.mxu0 }
 0xa44   : > { %v2966_v16 = vadd.f32 %v3693_v15, %v2965_v20 }
 0xa46   : > { %v2984_v25 = vadd.f32 %v2966_v16, %v4831_v34  ;;  %v3582_v16 = vunpack.c.h.bf16 %v3588_v37 }
 0xa48   : > { %2992 = vst.msk [vmem:[#allocation2 + $0x8] sm:$0xff] %vm896_vm0, %v2984_v25  ;;  %v3002_v51 = vpack.c.bf16 %v2984_v25, %v2983_v52 }
 0xa4a   : > { %3527 = vmatmul.msk.bf16.vlgmr.msrb.gmra.mxu1 %vm896_vm0, %v3002_v51 }
 0xa4b   : > { %v2968_v39 = vpop.f32.mrf.mxu0 }
 0xa4c   : > { %v2969_v50 = vadd.f32 %v3693_v15, %v2968_v39 }
 0xa4e   : > { %v2985_v19 = vadd.f32 %v2969_v50, %v4835_v5 }
 0xa50   : > { %2993 = vst.msk [vmem:[#allocation2 + $0x10] sm:$0xff] %vm896_vm0, %v2985_v19 }
 0xa53   : > { %v2970_v11 = vpop.f32.mrf.mxu0 }
 0xa54   : > { %v2971_v22 = vadd.f32 %v3693_v15, %v2970_v11 }
 0xa56   : > { %v2986_v48 = vadd.f32 %v2971_v22, %v4839_v41 }
 0xa58   : > { %2994 = vst.msk [vmem:[#allocation2 + $0x18] sm:$0xff] %vm896_vm0, %v2986_v48  ;;  %v3003_v30 = vpack.c.bf16 %v2986_v48, %v2985_v19 }
 0xa5a   : > { %3528 = vmatmul.msk.bf16.gmra.mxu1 %vm896_vm0, %v3003_v30 }
 0xa5b   : > { %v2973_v34 = vpop.f32.mrf.mxu0 }
 0xa5c   : > { %v2974_v42 = vadd.f32 %v3693_v15, %v2973_v34 }
 0xa5e   : > { %v2987_v27 = vadd.f32 %v2974_v42, %v4843_v14 }
 0xa60   : > { %2995 = vst.msk [vmem:[#allocation2 + $0x20] sm:$0xff] %vm896_vm0, %v2987_v27 }
 0xa63   : > { %v2975_v38 = vpop.f32.mrf.mxu0 }
 0xa64   : > { %v2976_v5 = vadd.f32 %v3693_v15, %v2975_v38 }
 0xa66   : > { %v2988_v63 = vadd.f32 %v2976_v5, %v4847_v60  ;;  %v3568_v60 = vld [vmem:[%s4038_s24] sm:$0xff]  }
 0xa67   : > { %v3569_v31 = vunpack.c.l.bf16 %v3568_v60  ;;  %v3570_v4 = vunpack.c.h.bf16 %v3568_v60 }
 0xa68   : > { %2996 = vst.msk [vmem:[#allocation2 + $0x28] sm:$0xff] %vm896_vm0, %v2988_v63  ;;  %v3004_v9 = vpack.c.bf16 %v2988_v63, %v2987_v27 }
 0xa6a   : > { %3529 = vmatmul.msk.bf16.gmra.mxu1 %vm896_vm0, %v3004_v9 }
 0xab6   : > { %v2978_v41 = vpop.f32.mrf.mxu0 }
 0xab7   : > { %v2979_v45 = vadd.f32 %v3693_v15, %v2978_v41 }
 0xab9   : > { %v2989_v61 = vadd.f32 %v2979_v45, %v4851_v7 }
 0xabb   : > { %2997 = vst.msk [vmem:[#allocation2 + $0x30] sm:$0xff] %vm896_vm0, %v2989_v61 }
 0xabe   : > { %v2980_v14 = vpop.f32.mrf.mxu0 }
 0xabf   : > { %v2981_v57 = vadd.f32 %v3693_v15, %v2980_v14  ;;  %v3581_v15 = vunpack.c.l.bf16 %v3588_v37 }
 0xac1   : > { %v2990_v0 = vadd.f32 %v2981_v57, %v4863_v3 }
 0xac3   : > { %2998 = vst.msk [vmem:[#allocation2 + $0x38] sm:$0xff] %vm896_vm0, %v2990_v0  ;;  %v3005_v46 = vpack.c.bf16 %v2990_v0, %v2989_v61 }
 0xac5   : > { %3530 = vmatmul.msk.bf16.gmra.mxu1 %vm896_vm0, %v3005_v46 }
 0xac7   : > { %v3047_v62 = vpop.f32.mrf.mxu1 }
 0xac8   : > { %v3048_v7 = vadd.f32 %v3694_v53, %v3047_v62 }
 0xaca   : > { %v3083_v24 = vadd.f32 %v3569_v31, %v3048_v7 }
 0xacc   : > { %v3091_v3 = vpack.c.bf16 %v3083_v24, %v3083_v24 }
 0xace   : > { %3100 = vst.msk [vmem:[%s5034_s28] sm:$0xf] %vm3099_vm9, %v3091_v3 }
 0xacf   : > { %v3049_v1 = vpop.f32.mrf.mxu1 }
 0xad0   : > { %v3050_v55 = vadd.f32 %v3694_v53, %v3049_v1 }
 0xad2   : > { %v3084_v47 = vadd.f32 %v3570_v4, %v3050_v55 }
 0xad4   : > { %v3092_v26 = vpack.c.bf16 %v3084_v47, %v3084_v47 }
 0xad6   : > { %3101 = vst.msk [vmem:[%s5034_s28 + $0x4] sm:$0xf] %vm3099_vm9, %v3092_v26 }
 0xad7   : > { %v3052_v44 = vpop.f32.mrf.mxu1 }
 0xad8   : > { %v3053_v59 = vadd.f32 %v3694_v53, %v3052_v44 }
 0xada   : > { %v3085_v29 = vadd.f32 %v3573_v8, %v3053_v59 }
 0xadc   : > { %v3093_v32 = vpack.c.bf16 %v3085_v29, %v3085_v29 }
 0xade   : > { %3102 = vst.msk [vmem:[%s5034_s28 + $0x8] sm:$0xf] %vm3099_vm9, %v3093_v32 }
 0xadf   : > { %v3054_v21 = vpop.f32.mrf.mxu1 }
 0xae0   : > { %v3055_v35 = vadd.f32 %v3694_v53, %v3054_v21 }
 0xae2   : > { %v3086_v13 = vadd.f32 %v3574_v17, %v3055_v35 }
 0xae4   : > { %v3094_v43 = vpack.c.bf16 %v3086_v13, %v3086_v13 }
 0xae6   : > { %3103 = vst.msk [vmem:[%s5034_s28 + $0xc] sm:$0xf] %vm3099_vm9, %v3094_v43 }
 0xae7   : > { %v3057_v58 = vpop.f32.mrf.mxu1 }
 0xae8   : > { %v3058_v56 = vadd.f32 %v3694_v53, %v3057_v58 }
 0xaea   : > { %v3087_v12 = vadd.f32 %v3577_v2, %v3058_v56 }
 0xaec   : > { %v3095_v54 = vpack.c.bf16 %v3087_v12, %v3087_v12 }
 0xaee   : > { %3104 = vst.msk [vmem:[%s5034_s28 + $0x10] sm:$0xf] %vm3099_vm9, %v3095_v54 }
 0xaef   : > { %v3059_v10 = vpop.f32.mrf.mxu1 }
 0xaf0   : > { %v3060_v23 = vadd.f32 %v3694_v53, %v3059_v10 }
 0xaf2   : > { %v3088_v40 = vadd.f32 %v3578_v49, %v3060_v23 }
 0xaf4   : > { %v3096_v6 = vpack.c.bf16 %v3088_v40, %v3088_v40 }
 0xaf6   : > { %3105 = vst.msk [vmem:[%s5034_s28 + $0x14] sm:$0xf] %vm3099_vm9, %v3096_v6 }
 0xb42   : > { %v3062_v36 = vpop.f32.mrf.mxu1 }
 0xb43   : > { %v3063_v28 = vadd.f32 %v3694_v53, %v3062_v36 }
 0xb45   : > { %v3089_v52 = vadd.f32 %v3581_v15, %v3063_v28 }
 0xb47   : > { %v3097_v20 = vpack.c.bf16 %v3089_v52, %v3089_v52 }
 0xb49   : > { %3106 = vst.msk [vmem:[%s5034_s28 + $0x18] sm:$0xf] %vm3099_vm9, %v3097_v20 }
 0xb4a   : > { %v3064_v25 = vpop.f32.mrf.mxu1 }
 0xb4b   : > { %v3065_v51 = vadd.f32 %v3694_v53, %v3064_v25 }
 0xb4d   : > { %v3090_v39 = vadd.f32 %v3582_v16, %v3065_v51 }
 0xb4f   : > { %v3098_v50 = vpack.c.bf16 %v3090_v39, %v3090_v39 }
 0xb51   : > { %3107 = vst.msk [vmem:[%s5034_s28 + $0x1c] sm:$0xf] %vm3099_vm9, %v3098_v50 }
 0xb52 PF: > { %s29_s20 = sadd.s32 1, %s3903_s20   ;;  %s5096_s24 = sld [smem:[#allocation3_spill]] }
 0xb53   : > { %p26_p5 = scmp.ge.s32.totalorder %s29_s20, 6   ;;  %s5097_s0 = smov %s3899_s30 }
 0xb55   :  { %28 = sbr.rel (!%p26_p5) target bundleno = 5 (0x5), region = 182 }
 0xb58   : > { %s5098_s30 = smov %s5096_s24 }

// kernel: stage_forward.10
= control target key start
LH: loop header
LB: loop body
LE: loop exit
PB: predicated region body
PF: predicated region fallthrough
CT: control target
= control target key end

     0   :  { %s1064_s12 = smov 0   ;;  %s1469_s0 = inlined_call_operand.vmem [shape: bf16[3,10,10,32], index: 0, kind: input, shape index: {}]   ;;  %s1470_s1 = inlined_call_operand.vmem [shape: bf16[288,32], index: 1, kind: input, shape index: {}]   ;;  %s1471_s2 = inlined_call_operand.vmem [shape: f32[1,32], index: 2, kind: input, shape index: {}]   ;;  %s1472_s3 = inlined_call_operand.vmem [shape: bf16[3,8,8,32], index: 3, kind: output, shape index: {}]  }
   0x1 LB: > { %s889_s13 = sadd.s32 4294967295, %s1039_s12   ;;  %p893_p0 = scmp.ge.s32.totalorder %s1039_s12, 1  ;;  %s1039_s12 = sphi %s1064_s12, %s13_s12  }
   0x2   : > { %p137_p1 = scmp.lt.s32.totalorder %s1039_s12, 4 }
   0x4   : > { %p138_p2 = pnand %p893_p0, %p137_p1 }
   0x5   : > { %p161_p3 = scmp.lt.s32.totalorder (!%p138_p2), %s889_s13, 2  ;;  %s1041_s18 = smov (!%p138_p2), 96  }
   0x6   : > { %141 = sbr.rel (%p138_p2) target bundleno = 341 (0x155), region = 32  ;;  %s1042_s19 = smov (!%p138_p2), 64  }
   0x7   : > { %s1043_s20 = smov (!%p138_p2), 32  }
   0xb   : > { %s1478_s13 = smov (!%p161_p3, %s889_s13), 2  ;;  %vm323_vm0 = vcmask 1042432   ;;  %vm324_vm1 = vcmask 1046532   ;;  %vm192_vm2 = vsmask.f32 3328  ;;  %v1003_v38 = vld [vmem:[%s1470_s1 + $0x88] sm:$0xff] }
   0xc   : > { %s1020_s14 = smul.u32 80, %s1478_s13  ;;  %vm193_vm3 = vsmask.f32 7440  ;;  %vm1097_vm4 = vmor %vm323_vm0, %vm324_vm1  ;;  %794 = vmatpush.bf16.msra.mxu2 %v1003_v38  ;;  %vm503_vm6 = vcmask 261120   ;;  %vm516_vm7 = vcmask 523264   ;;  %vm525_vm8 = vcmask 785408  }
   0xd   : > { %vm1118_vm5 = vmor %vm192_vm2, %vm193_vm3  ;;  %s985_s7 = sshll.u32 %s1478_s13, 5  ;;  %vm825_vm9 = vcmask 257024  }
   0xe   : > { %s1078_s17 = scalar_lea.vmem %s1469_s0, %s1020_s14  ;;  %s1448_s10 = scalar_lea.vmem %s1472_s3, %s985_s7 }
   0xf   : > { %v1081_v0 = vld [vmem:[%s1078_s17 + $0x18] sm:$0xf]  ;;  %v180_v1 = vld [vmem:[%s1078_s17 + $0x20] sm:$0xf]  ;;  %v1085_v2 = vld [vmem:[%s1078_s17 + $0x10] sm:$0xf] }
  0x10   : > { %v252_v3 = vshrl.u32 %v180_v1, 16  ;;  %v255_v4 = vshll.u32 %v180_v1, 16  ;;  %v401_v5 = vunpack.c.l.b16 %v1081_v0  ;;  %v402_v6 = vunpack.c.l.b16 %v180_v1  ;;  %v177_v7 = vld [vmem:[%s1078_s17 + $0x14] sm:$0x1]  ;;  %v179_v8 = vld [vmem:[%s1078_s17 + $0x1c] sm:$0x1] }
  0x11   : > { %v238_v9 = vshrl.u32 %v1081_v0, 16  ;;  %v241_v10 = vshll.u32 %v1081_v0, 16  ;;  %v233_v11 = vshll.u32 %v177_v7, 16  ;;  %v247_v12 = vshll.u32 %v179_v8, 16  ;;  %v181_v13 = vld [vmem:[%s1078_s17 + $0x24] sm:$0x1] }
  0x12   : > { %v254_v14 = vrot.slane %v252_v3, 4  ;;  %v257_v15 = vrot.slane %v255_v4, 5  ;;  %v452_v16 = vpack.c.b16 %v402_v6, %v401_v5  ;;  %v899_v18 = vrot.slane %v1085_v2, 9  ;;  %v183_v31 = vld [vmem:[%s1078_s17 + $0x2c] sm:$0x1] }
  0x13   : > { %v240_v19 = vrot.slane %v238_v9, 4  ;;  %v243_v20 = vrot.slane %v241_v10, 5  ;;  %v336_v21 = vrot.slane %v177_v7, 5  ;;  %v900_v22 = vrot.slane %v1081_v0, 9  ;;  %v182_v41 = vld [vmem:[%s1078_s17 + $0x28] sm:$0xf] }
  0x14   : > { %457 = vrot.lane.b32.xlu1 %v452_v16, %s1041_s18  ;;  %v340_v23 = vrot.slane %v179_v8, 5  ;;  %v901_v24 = vrot.slane %v180_v1, 9  ;;  %v344_v25 = vrot.slane %v181_v13, 5  ;;  %v224_v26 = vshrl.u32 %v1085_v2, 16  ;;  %v1136_v54 = vld [vmem:[%s1078_s17 + $0x30] sm:$0xf] }
  0x15   : > { %v1107_v27 = vsel %vm1097_vm4, %v899_v18, %v336_v21  ;;  %v227_v28 = vshll.u32 %v1085_v2, 16  ;;  %v235_v29 = vrot.slane %v233_v11, 5  ;;  %v244_v30 = vor.u32 %v243_v20, %v240_v19  ;;  %v1139_v55 = vld [vmem:[%s1078_s17 + $0x34] sm:$0x1]  ;;  %v1159_v10 = vld [vmem:[%s1078_s17 + $0x4] sm:$0x1] }
  0x16   : > { %v341_v32 = vsel %vm1097_vm4, %v900_v22, %v340_v23  ;;  %v432_v33 = vunpack.c.l.b16 %v1107_v27  ;;  %v345_v34 = vsel %vm1097_vm4, %v901_v24, %v344_v25  ;;  %v226_v35 = vrot.slane %v224_v26, 4  ;;  %v1162_v11 = vld [vmem:[%s1078_s17 + $0x8] sm:$0xf]  ;;  %v175_v20 = vld [vmem:[%s1078_s17 + $0xc] sm:$0x1] }
  0x17   : > { %v433_v36 = vunpack.c.l.b16 %v341_v32  ;;  %v434_v37 = vunpack.c.l.b16 %v345_v34  ;;  %v229_v39 = vrot.slane %v227_v28, 5  ;;  %v245_v40 = vrot.slane %v244_v30, 4 }
  0x18   : > { %v249_v42 = vrot.slane %v247_v12, 5  ;;  %v902_v43 = vrot.slane %v182_v41, 9  ;;  %v348_v44 = vrot.slane %v183_v31, 5  ;;  %v403_v45 = vunpack.c.l.b16 %v182_v41 }
  0x19   : > { %v1125_v46 = vpack.c.b16 %v433_v36, %v432_v33  ;;  %v470_v47 = vpack.c.b16 %v434_v37, %v433_v36  ;;  %v230_v48 = vor.u32 %v229_v39, %v226_v35  ;;  %v258_v49 = vor.u32 %v257_v15, %v254_v14 }
  0x1a   : > { %v250_v50 = vsel %vm1118_vm5, %v245_v40, %v249_v42  ;;  %v1131_v51 = vsel %vm1097_vm4, %v902_v43, %v348_v44  ;;  %v1133_v52 = vpack.c.b16 %v403_v45, %v402_v6  ;;  %v261_v53 = vshll.u32 %v181_v13, 16  ;;  %v1154_v6 = vld [vmem:[%s1078_s17] sm:$0xf]  ;;  %v1198_v44 = vld [vmem:[%s1078_s17 + $0x38] sm:$0xf] }
  0x1b   : > { %444 = vrot.lane.b32.xlu0 %v1125_v46, %s1042_s19  ;;  %v231_v56 = vrot.slane %v230_v48, 4  ;;  %v1143_v57 = vunpack.c.l.b16 %v250_v50  ;;  %v435_v58 = vunpack.c.l.b16 %v1131_v51  ;;  %v259_v59 = vrot.slane %v258_v49, 4 }
  0x1c   : > { %475 = vrot.lane.b32.xlu1 %v470_v47, %s1043_s20  ;;  %485 = vrot.lane.b32.xlu2 %v1133_v52, %s1042_s19  ;;  %v263_v60 = vrot.slane %v261_v53, 5  ;;  %v266_v61 = vshrl.u32 %v182_v41, 16  ;;  %v269_v62 = vshll.u32 %v182_v41, 16  ;;  %v275_v63 = vshll.u32 %v183_v31, 16 }
  0x1d   : > { %v236_v1 = vsel %vm1118_vm5, %v231_v56, %v235_v29  ;;  %v903_v3 = vrot.slane %v1136_v54, 9  ;;  %v352_v4 = vrot.slane %v1139_v55, 5  ;;  %v1164_v12 = vpack.c.b16 %v435_v58, %v434_v37  ;;  %v187_v56 = vld [vmem:[%s1078_s17 + $0x3c] sm:$0x1] }
  0x1e   : > { %v1156_v7 = vunpack.c.l.b16 %v236_v1  ;;  %v268_v8 = vrot.slane %v266_v61, 4  ;;  %v271_v9 = vrot.slane %v269_v62, 5  ;;  %v264_v13 = vsel %vm1118_vm5, %v259_v59, %v263_v60 }
  0x1f   : > { %v277_v14 = vrot.slane %v275_v63, 5  ;;  %v404_v15 = vunpack.c.l.b16 %v1136_v54  ;;  %v1175_v19 = vsel %vm1097_vm4, %v903_v3, %v352_v4  ;;  %v196_v21 = vshrl.u32 %v1154_v6, 16 }
  0x20   : > { %v1171_v16 = vpack.c.b16 %v1143_v57, %v1156_v7  ;;  %v272_v18 = vor.u32 %v271_v9, %v268_v8  ;;  %v199_v23 = vshll.u32 %v1154_v6, 16  ;;  %v205_v24 = vshll.u32 %v1159_v10, 16 }
  0x21   : > { %v453_v22 = vpack.c.b16 %v404_v15, %v403_v45  ;;  %v210_v25 = vshrl.u32 %v1162_v11, 16  ;;  %v198_v28 = vrot.slane %v196_v21, 4  ;;  %v213_v29 = vshll.u32 %v1162_v11, 16 }
  0x22   : > { %v273_v26 = vrot.slane %v272_v18, 4  ;;  %v1187_v30 = vunpack.c.l.b16 %v264_v13  ;;  %v201_v31 = vrot.slane %v199_v23, 5  ;;  %v219_v34 = vshll.u32 %v175_v20, 16 }
  0x23   : > { %424 = vrot.lane.b32.xlu0 %v1171_v16, %s1043_s20  ;;  %v212_v32 = vrot.slane %v210_v25, 4  ;;  %v436_v36 = vunpack.c.l.b16 %v1175_v19  ;;  %v215_v37 = vrot.slane %v213_v29, 5  ;;  %v207_v41 = vrot.slane %v205_v24, 5  ;;  %v1288_v19 = vld [vmem:[%s1078_s17 + $0x48] sm:$0xf] }
  0x24   : > { %446 = vrot.lane.b32.xlu1 %v1164_v12, %s1042_s19  ;;  %v278_v35 = vsel %vm1118_vm5, %v273_v26, %v277_v14  ;;  %459 = vrot.lane.b32.xlu2 %v453_v22, %s1041_s18  ;;  %v202_v40 = vor.u32 %v201_v31, %v198_v28  ;;  %v221_v43 = vrot.slane %v219_v34, 5  ;;  %v280_v48 = vshrl.u32 %v1136_v54, 16 }
  0x25   : > { %v1195_v39 = vunpack.c.l.b16 %v278_v35  ;;  %v216_v42 = vor.u32 %v215_v37, %v212_v32  ;;  %v471_v49 = vpack.c.b16 %v436_v36, %v435_v58  ;;  %v283_v51 = vshll.u32 %v1136_v54, 16 }
  0x26   : > { %v203_v47 = vrot.slane %v202_v40, 4  ;;  %v282_v59 = vrot.slane %v280_v48, 4  ;;  %v294_v60 = vshrl.u32 %v1198_v44, 16  ;;  %v399_v62 = vunpack.c.l.b16 %v1162_v11 }
  0x27   : > { %v420_v45 = vpack.c.b16 %v1195_v39, %v1187_v30  ;;  %v217_v50 = vrot.slane %v216_v42, 4  ;;  %v400_v63 = vunpack.c.l.b16 %v1085_v2  ;;  %v285_v1 = vrot.slane %v283_v51, 5  ;;  %v1240_v42 = vld [vmem:[%s1078_s17 + $0x40] sm:$0xf] }
  0x28   : > { %v208_v53 = vsel %vm1118_vm5, %v203_v47, %v207_v41  ;;  %v296_v4 = vrot.slane %v294_v60, 4  ;;  %v297_v8 = vshll.u32 %v1198_v44, 16  ;;  %v904_v9 = vrot.slane %v1198_v44, 9 }
  0x29   : > { %v222_v61 = vsel %vm1118_vm5, %v217_v50, %v221_v43  ;;  %v410_v58 = vunpack.c.l.b16 %v208_v53  ;;  %v356_v13 = vrot.slane %v187_v56, 5  ;;  %v286_v14 = vor.u32 %v285_v1, %v282_v59 }
  0x2a   : > { %v1215_v3 = vunpack.c.l.b16 %v222_v61  ;;  %v289_v18 = vshll.u32 %v1139_v55, 16  ;;  %v299_v21 = vrot.slane %v297_v8, 5  ;;  %v303_v22 = vshll.u32 %v187_v56, 16  ;;  %v993_v56 = vld [vmem:[%s1470_s1 + $0x38] sm:$0xff] }
  0x2b   : > { %426 = vrot.lane.b32.xlu0 %v420_v45, %s1043_s20  ;;  %v898_v23 = vrot.slane %v1162_v11, 9  ;;  %v332_v24 = vrot.slane %v175_v20, 5  ;;  %v897_v25 = vrot.slane %v1154_v6, 9  ;;  %v328_v31 = vrot.slane %v1159_v10, 5  ;;  %v189_v10 = vld [vmem:[%s1078_s17 + $0x44] sm:$0x1]  ;;  %1004 = vmatpush.bf16.msra.mxu3 %v993_v56 }
  0x2c   : > { %477 = vrot.lane.b32.xlu1 %v471_v49, %s1043_s20  ;;  %495 = vrot.lane.b32.xlu2 %v420_v45, %s1041_s18  ;;  %v418_v26 = vpack.c.b16 %v1215_v3, %v410_v58  ;;  %v300_v28 = vor.u32 %v299_v21, %v296_v4  ;;  %v451_v55 = vpack.c.b16 %v400_v63, %v399_v62  ;;  %v291_v20 = vrot.slane %v289_v18, 5  ;;  %v1278_v58 = vld [vmem:[%s1470_s1 + $0x70] sm:$0xff]  ;;  %v1305_v18 = vld [vmem:[%s1470_s1 + $0x68] sm:$0xff] }
  0x2d   : > { %v1227_v29 = vsel %vm1097_vm4, %v898_v23, %v332_v24  ;;  %v357_v32 = vsel %vm1097_vm4, %v904_v9, %v356_v13  ;;  %v287_v35 = vrot.slane %v286_v14, 4  ;;  %v305_v40 = vrot.slane %v303_v22, 5  ;;  %730 = vmatpush.bf16.msra.mxu0 %v993_v56  ;;  %v991_v21 = vld [vmem:[%s1470_s1 + $0x28] sm:$0xff] }
  0x2e   : > { %v431_v34 = vunpack.c.l.b16 %v1227_v29  ;;  %v301_v37 = vrot.slane %v300_v28, 4  ;;  %v329_v41 = vsel %vm1097_vm4, %v897_v25, %v328_v31  ;;  %v405_v45 = vunpack.c.l.b16 %v1198_v44  ;;  %v1257_v44 = vld [vmem:[%s1470_s1 + $0x78] sm:$0xff]  ;;  %v1315_v31 = vld [vmem:[%s1078_s17 + $0x4c] sm:$0x1] }
  0x2f   : > { %v430_v43 = vunpack.c.l.b16 %v329_v41  ;;  %v437_v47 = vunpack.c.l.b16 %v357_v32  ;;  %v292_v49 = vsel %vm1118_vm5, %v287_v35, %v291_v20  ;;  %v905_v51 = vrot.slane %v1240_v42, 9  ;;  %1012 = vmatpush.bf16.msra.mxu1 %v1257_v44  ;;  %v997_v29 = vld [vmem:[%s1470_s1 + $0x58] sm:$0xff]  ;;  %v987_v56 = vld [vmem:[%s1470_s1 + $0x8] sm:$0xff] }
  0x30   : > { %v306_v50 = vsel %vm1118_vm5, %v301_v37, %v305_v40  ;;  %v376_v53 = vrot.slane %v189_v10, 5  ;;  %v1264_v59 = vpack.c.b16 %v405_v45, %v404_v15  ;;  %v1270_v61 = vunpack.c.l.b16 %v292_v49  ;;  %v992_v15 = vld [vmem:[%s1470_s1 + $0x30] sm:$0xff]  ;;  %v989_v49 = vld [vmem:[%s1470_s1 + $0x18] sm:$0xff] }
  0x31   : > { %v438_v48 = vpack.c.b16 %v431_v34, %v430_v43  ;;  %v1268_v60 = vpack.c.b16 %v437_v47, %v436_v36  ;;  %v1272_v1 = vunpack.c.l.b16 %v306_v50  ;;  %v359_v36 = vshrl.u32 %v1240_v42, 16  ;;  %1005 = vmatpush.bf16.msra.mxu3 %v992_v15  ;;  %731 = vmatpush.bf16.msra.mxu0 %v992_v15  ;;  %v996_v50 = vld [vmem:[%s1470_s1 + $0x50] sm:$0xff]  ;;  %v986_v15 = vld [vmem:[%s1470_s1] sm:$0xff] }
  0x32   : > { %v1282_v54 = vsel %vm1097_vm4, %v905_v51, %v376_v53  ;;  %v362_v4 = vshll.u32 %v1240_v42, 16  ;;  %v379_v8 = vshrl.u32 %v1288_v19, 16  ;;  %v382_v9 = vshll.u32 %v1288_v19, 16  ;;  %v988_v51 = vld [vmem:[%s1470_s1 + $0x10] sm:$0xff]  ;;  %v995_v53 = vld [vmem:[%s1470_s1 + $0x48] sm:$0xff] }
  0x33   : > { %422 = vrot.lane.b32.xlu0 %v418_v26, %s1043_s20  ;;  %v421_v13 = vpack.c.b16 %v1272_v1, %v1270_v61  ;;  %v468_v14 = vunpack.c.l.b16 %v1282_v54  ;;  %1013 = vmatpush.bf16.msra.mxu1 %v1278_v58  ;;  %v361_v22 = vrot.slane %v359_v36, 4  ;;  %v450_v28 = vunpack.c.l.b16 %v1240_v42 }
  0x34   : > { %455 = vrot.lane.b32.xlu1 %v451_v55, %s1041_s18  ;;  %442 = vrot.lane.b32.xlu2 %v438_v48, %s1042_s19  ;;  %v364_v23 = vrot.slane %v362_v4, 5  ;;  %v381_v24 = vrot.slane %v379_v8, 4  ;;  %v384_v25 = vrot.slane %v382_v9, 5  ;;  %v1321_v55 = vld [vmem:[%s1470_s1 + $0x60] sm:$0xff]  ;;  %v368_v35 = vshll.u32 %v189_v10, 16 }
  0x35   : > { %v472_v26 = vpack.c.b16 %v468_v14, %v437_v47  ;;  %1006 = vmatpush.bf16.msra.mxu3 %v991_v21  ;;  %732 = vmatpush.bf16.msra.mxu0 %v991_v21  ;;  %v454_v32 = vpack.c.b16 %v450_v28, %v405_v45  ;;  %v388_v40 = vshll.u32 %v1315_v31, 16  ;;  %v469_v41 = vpack.c.b16 %v432_v33, %v431_v34  ;;  %v1002_v34 = vld [vmem:[%s1470_s1 + $0x80] sm:$0xff] }
  0x36   : > { %v365_v20 = vor.u32 %v364_v23, %v361_v22  ;;  %v385_v37 = vor.u32 %v384_v25, %v381_v24  ;;  %v370_v43 = vrot.slane %v368_v35, 5  ;;  %v1336_v10 = vpack.c.b16 %v401_v5, %v400_v63  ;;  %795 = vmatpush.bf16.msra.mxu2 %v1002_v34 }
  0x37   : > { %1014 = vmatpush.bf16.msra.mxu1 %v1305_v18  ;;  %v390_v47 = vrot.slane %v388_v40, 5  ;;  %v481_v48 = vunpack.c.l.b16 %v1288_v19  ;;  %v465_v9 = vpack.c.b16 %v1187_v30, %v1143_v57  ;;  %v906_v22 = vrot.slane %v1288_v19, 9 }
  0x38   : > { %v366_v42 = vrot.slane %v365_v20, 4  ;;  %v386_v45 = vrot.slane %v385_v37, 4  ;;  %v396_v57 = vrot.slane %v1315_v31, 5  ;;  %v398_v20 = vunpack.c.l.b16 %v1154_v6 }
  0x39   : > { %v482_v5 = vpack.c.b16 %v481_v48, %v450_v28  ;;  %979 = vmatmul.msk.bf16.vlgmr.msra.gmra.mxu2 %vm503_vm6, %v1125_v46  ;;  %v994_v46 = vld [vmem:[%s1470_s1 + $0x40] sm:$0xff]  ;;  %v466_v6 = vpack.c.b16 %v1270_v61, %v1195_v39  ;;  %v464_v61 = vpack.c.b16 %v1156_v7, %v1215_v3 }
  0x3a   : > { %v371_v27 = vsel %vm1118_vm5, %v366_v42, %v370_v43  ;;  %v391_v33 = vsel %vm1118_vm5, %v386_v45, %v390_v47  ;;  %v397_v25 = vsel %vm1097_vm4, %v906_v22, %v396_v57  ;;  %v406_v17 = vpack.c.b16 %v399_v62, %v398_v20 }
  0x3b   : > { %487 = vrot.lane.b32.xlu0 %v1264_v59, %s1042_s19  ;;  %1015 = vmatpush.bf16.msra.mxu1 %v1321_v55  ;;  %v1348_v2 = vunpack.c.l.b16 %v371_v27  ;;  %v491_v0 = vunpack.c.l.b16 %v391_v33  ;;  %v501_v28 = vunpack.c.l.b16 %v397_v25 }
  0x3c   : > { %448 = vrot.lane.b32.xlu1 %v1268_v60, %s1042_s19  ;;  %497 = vrot.lane.b32.xlu2 %v421_v13, %s1041_s18 }
  0x3d   : > { %v492_v63 = vpack.c.b16 %v491_v0, %v1348_v2 }
  0x3f   : > { %1016 = vmatpush.bf16.msra.mxu1 %v997_v29 }
  0x43   : > { %428 = vrot.lane.b32.xlu0 %v421_v13, %s1043_s20  ;;  %1017 = vmatpush.bf16.msra.mxu1 %v996_v50 }
  0x44   : > { %479 = vrot.lane.b32.xlu1 %v472_v26, %s1043_s20  ;;  %461 = vrot.lane.b32.xlu2 %v454_v32, %s1041_s18 }
  0x47   : > { %1018 = vmatpush.bf16.msra.mxu1 %v995_v53 }
  0x49   : > { %980 = vmatmul.msk.bf16.gmra.mxu2 %vm503_vm6, %v1164_v12 }
  0x4b   : > { %473 = vrot.lane.b32.xlu0 %v469_v41, %s1043_s20  ;;  %1019 = vmatpush.bf16.msra.mxu1 %v994_v46 }
  0x4c   : > { %493 = vrot.lane.b32.xlu1 %v1171_v16, %s1041_s18  ;;  %483 = vrot.lane.b32.xlu2 %v1336_v10, %s1042_s19  ;;  %v990_v16 = vld [vmem:[%s1470_s1 + $0x20] sm:$0xff] }
  0x4d   : > { %1007 = vmatpush.bf16.msra.mxu3 %v990_v16  ;;  %733 = vmatpush.bf16.msra.mxu0 %v990_v16 }
  0x51   : > { %1008 = vmatpush.bf16.msra.mxu3 %v989_v49  ;;  %734 = vmatpush.bf16.msra.mxu0 %v989_v49 }
  0x53   : > { %489 = vrot.lane.b32.xlu0 %v482_v5, %s1042_s19 }
  0x54   : > { %499 = vrot.lane.b32.xlu2 %v492_v63, %s1041_s18 }
  0x55   : > { %1009 = vmatpush.bf16.msra.mxu3 %v988_v51  ;;  %735 = vmatpush.bf16.msra.mxu0 %v988_v51 }
  0x59   : > { %1010 = vmatpush.bf16.msra.mxu3 %v987_v56  ;;  %736 = vmatpush.bf16.msra.mxu0 %v987_v56 }
  0x5a   : > { %981 = vmatmul.msk.bf16.gmra.mxu2 %vm503_vm6, %v1268_v60 }
  0x5d   : > { %1011 = vmatpush.bf16.msra.mxu3 %v986_v15  ;;  %737 = vmatpush.bf16.msra.mxu0 %v986_v15 }
  0x61   : > { %759 = vmatpush.bf16.msrb.mxu0 %v1257_v44 }
  0x65   : > { %760 = vmatpush.bf16.msrb.mxu0 %v1278_v58 }
  0x69   : > { %761 = vmatpush.bf16.msrb.mxu0 %v1305_v18 }
  0x6d   : > { %762 = vmatpush.bf16.msrb.mxu0 %v1321_v55  ;;  %v502_v55 = vpack.c.b16 %v501_v28, %v468_v14 }
  0x6f   : > { %982 = vmatmul.msk.bf16.gmra.mxu2 %vm503_vm6, %v502_v55 }
  0x71   : > { %763 = vmatpush.bf16.msrb.mxu0 %v997_v29 }
  0x75   : > { %764 = vmatpush.bf16.msrb.mxu0 %v996_v50 }
  0x76   : > { %v486_v36 = vpop.permute.xlu2 %485 }
  0x79   : > { %765 = vmatpush.bf16.msrb.mxu0 %v995_v53 }
  0x7d   : > { %766 = vmatpush.bf16.msrb.mxu0 %v994_v46 }
  0x7e   : > { %v460_v4 = vpop.permute.xlu2 %459 }
  0x86   : > { %v458_v8 = vpop.permute.xlu1 %457  ;;  %v496_v13 = vpop.permute.xlu2 %495 }
  0x8d   : > { %v445_v12 = vpop.permute.xlu0 %444 }
  0x8e   : > { %v476_v44 = vpop.permute.xlu1 %475  ;;  %v443_v32 = vpop.permute.xlu2 %442 }
  0x8f   : > { %v543_v58 = vsel %vm503_vm6, %v465_v9, %v476_v44 }
  0x90   : > { %v553_v18 = vsel %vm516_vm7, %v543_v58, %v486_v36  ;;  %v1032_v36 = vld [vmem:[%s1471_s2] ss:$0 sm:$0xff] }
  0x91   : > { %v562_v21 = vsel %vm525_vm8, %v553_v18, %v496_v13 }
  0x92   : > { %772 = vmatmul.bf16.vlgmr.msra.gmra.mxu1 %v562_v21 }
  0x95   : > { %v425_v60 = vpop.permute.xlu0 %424 }
  0x96   : > { %v509_v30 = vsel %vm503_vm6, %v1336_v10, %v425_v60  ;;  %v447_v23 = vpop.permute.xlu1 %446  ;;  %v498_v14 = vpop.permute.xlu2 %497 }
  0x97   : > { %v520_v24 = vsel %vm516_vm7, %v509_v30, %v445_v12 }
  0x98   : > { %v530_v26 = vsel %vm525_vm8, %v520_v24, %v458_v8 }
  0x99   : > { %743 = vmatmul.bf16.vlgmr.msra.gmra.mxu3 %v530_v26 }
  0x9d   : > { %v427_v19 = vpop.permute.xlu0 %426 }
  0x9e   : > { %v478_v31 = vpop.permute.xlu1 %477  ;;  %v512_v35 = vsel %vm503_vm6, %v1133_v52, %v427_v19  ;;  %v462_v48 = vpop.permute.xlu2 %461 }
  0x9f   : > { %v522_v40 = vsel %vm516_vm7, %v512_v35, %v447_v23  ;;  %v546_v52 = vsel %vm503_vm6, %v466_v6, %v478_v31 }
  0xa0   : > { %v533_v43 = vsel %vm525_vm8, %v522_v40, %v460_v4 }
  0xa5   : > { %v423_v37 = vpop.permute.xlu0 %422 }
  0xa6   : > { %v506_v41 = vsel %vm503_vm6, %v406_v17, %v423_v37  ;;  %v456_v54 = vpop.permute.xlu1 %455  ;;  %v484_v63 = vpop.permute.xlu2 %483 }
  0xa7   : > { %v518_v42 = vsel %vm516_vm7, %v506_v41, %v443_v32 }
  0xa8   : > { %v527_v45 = vsel %vm525_vm8, %v518_v42, %v456_v54 }
  0xa9   : > { %748 = vmatmul.bf16.gmra.mxu3 %v533_v43  ;;  %738 = vmatmul.bf16.vlgmr.msra.gmra.mxu0 %v527_v45 }
  0xad   : > { %v488_v11 = vpop.permute.xlu0 %487 }
  0xae   : > { %v555_v62 = vsel %vm516_vm7, %v546_v52, %v488_v11  ;;  %v449_v47 = vpop.permute.xlu1 %448  ;;  %v500_v50 = vpop.permute.xlu2 %499 }
  0xaf   : > { %v565_v10 = vsel %vm525_vm8, %v555_v62, %v498_v14 }
  0xb0   : > { %777 = vmatmul.bf16.gmra.mxu1 %v565_v10 }
  0xb5   : > { %v429_v27 = vpop.permute.xlu0 %428 }
  0xb6   : > { %v515_v33 = vsel %vm503_vm6, %v1264_v59, %v429_v27  ;;  %v480_v0 = vpop.permute.xlu1 %479  ;;  %v467_v59 = vpack.c.b16 %v1348_v2, %v1272_v1 }
  0xb7   : > { %v524_v5 = vsel %vm516_vm7, %v515_v33, %v449_v47 }
  0xb8   : > { %v536_v39 = vsel %vm525_vm8, %v524_v5, %v462_v48  ;;  %v549_v51 = vsel %vm503_vm6, %v467_v59, %v480_v0 }
  0xb9   : > { %753 = vmatmul.bf16.gmra.mxu3 %v536_v39 }
  0xbc   : > { %v797_v56 = vpop.f32.mrf.mxu2 }
  0xbd   : > { %v474_v38 = vpop.permute.xlu0 %473 }
  0xbe   : > { %v540_v16 = vsel %vm503_vm6, %v464_v61, %v474_v38  ;;  %v494_v29 = vpop.permute.xlu1 %493 }
  0xbf   : > { %v551_v34 = vsel %vm516_vm7, %v540_v16, %v484_v63 }
  0xc0   : > { %v559_v49 = vsel %vm525_vm8, %v551_v34, %v494_v29 }
  0xc1   : > { %767 = vmatmul.bf16.vlgmr.msrb.gmra.mxu0 %v559_v49 }
  0xc4   : > { %v799_v46 = vpop.f32.mrf.mxu2 }
  0xc5   : > { %v490_v53 = vpop.permute.xlu0 %489 }
  0xc6   : > { %v557_v7 = vsel %vm516_vm7, %v549_v51, %v490_v53 }
  0xc7   : > { %v568_v3 = vsel %vm525_vm8, %v557_v7, %v500_v50 }
  0xc8   : > { %782 = vmatmul.bf16.gmra.mxu1 %v568_v3 }
  0xcc   : > { %v802_v15 = vpop.f32.mrf.mxu2 }
  0xd4   : > { %v804_v12 = vpop.f32.mrf.mxu2 }
  0xdd   : > { %v807_v57 = vpop.f32.mrf.mxu2 }
  0xe5   : > { %v809_v35 = vpop.f32.mrf.mxu2 }
  0xf2   : > { %v812_v11 = vpop.f32.mrf.mxu2 }
  0xfa   : > { %v814_v16 = vpop.f32.mrf.mxu2 }
 0x10f   : > { %v773_v4 = vpop.f32.mrf.mxu1 }
 0x117   : > { %v775_v58 = vpop.f32.mrf.mxu1 }
 0x11c   : > { %v744_v8 = vpop.f32.mrf.mxu3 }
 0x11d   : > { %v745_v1 = vadd.f32 %v1032_v36, %v744_v8 }
 0x11f   : > { %v774_v2 = vadd.f32 %v773_v4, %v745_v1 }
 0x121   : > { %v803_v9 = vadd.f32 %v802_v15, %v774_v2 }
 0x123   : > { %v819_v44 = vpack.c.bf16 %v803_v9, %v803_v9 }
 0x124   : > { %v746_v13 = vpop.f32.mrf.mxu3 }
 0x125   : > { %828 = vst.msk [vmem:[%s1448_s10 + $0x8] sm:$0xf] %vm825_vm9, %v819_v44  ;;  %v747_v18 = vadd.f32 %v1032_v36, %v746_v13 }
 0x126   : > { %v739_v30 = vpop.f32.mrf.mxu0 }
 0x127   : > { %v776_v21 = vadd.f32 %v775_v58, %v747_v18  ;;  %v740_v41 = vadd.f32 %v1032_v36, %v739_v30 }
 0x129   : > { %v805_v60 = vadd.f32 %v804_v12, %v776_v21 }
 0x12b   : > { %v820_v22 = vpack.c.bf16 %v805_v60, %v805_v60 }
 0x12c   : > { %v749_v23 = vpop.f32.mrf.mxu3 }
 0x12d   : > { %829 = vst.msk [vmem:[%s1448_s10 + $0xc] sm:$0xf] %vm825_vm9, %v820_v22  ;;  %v750_v24 = vadd.f32 %v1032_v36, %v749_v23  ;;  %v778_v25 = vpop.f32.mrf.mxu1 }
 0x12e   : > { %v741_v20 = vpop.f32.mrf.mxu0 }
 0x12f   : > { %v779_v26 = vadd.f32 %v778_v25, %v750_v24  ;;  %v742_v52 = vadd.f32 %v1032_v36, %v741_v20 }
 0x131   : > { %v808_v28 = vadd.f32 %v807_v57, %v779_v26 }
 0x133   : > { %v821_v55 = vpack.c.bf16 %v808_v28, %v808_v28 }
 0x134   : > { %v751_v32 = vpop.f32.mrf.mxu3 }
 0x135   : > { %830 = vst.msk [vmem:[%s1448_s10 + $0x10] sm:$0xf] %vm825_vm9, %v821_v55  ;;  %v752_v19 = vadd.f32 %v1032_v36, %v751_v32  ;;  %v780_v31 = vpop.f32.mrf.mxu1 }
 0x137   : > { %v781_v17 = vadd.f32 %v780_v31, %v752_v19 }
 0x139   : > { %v810_v37 = vadd.f32 %v809_v35, %v781_v17 }
 0x13b   : > { %v822_v40 = vpack.c.bf16 %v810_v37, %v810_v37 }
 0x13c   : > { %v754_v14 = vpop.f32.mrf.mxu3 }
 0x13d   : > { %831 = vst.msk [vmem:[%s1448_s10 + $0x14] sm:$0xf] %vm825_vm9, %v822_v40  ;;  %v755_v6 = vadd.f32 %v1032_v36, %v754_v14 }
 0x13e   : > { %v768_v54 = vpop.f32.mrf.mxu0 }
 0x13f   : > { %v769_v42 = vadd.f32 %v768_v54, %v740_v41 }
 0x141   : > { %v798_v43 = vadd.f32 %v797_v56, %v769_v42 }
 0x143   : > { %v817_v45 = vpack.c.bf16 %v798_v43, %v798_v43 }
 0x144   : > { %v756_v33 = vpop.f32.mrf.mxu3 }
 0x145   : > { %826 = vst.msk [vmem:[%s1448_s10] sm:$0xf] %vm825_vm9, %v817_v45  ;;  %v783_v62 = vpop.f32.mrf.mxu1  ;;  %v757_v61 = vadd.f32 %v1032_v36, %v756_v33 }
 0x146   : > { %v784_v47 = vadd.f32 %v783_v62, %v755_v6  ;;  %v770_v10 = vpop.f32.mrf.mxu0 }
 0x147   : > { %v771_v48 = vadd.f32 %v770_v10, %v742_v52 }
 0x148   : > { %v813_v27 = vadd.f32 %v812_v11, %v784_v47 }
 0x149   : > { %v800_v0 = vadd.f32 %v799_v46, %v771_v48 }
 0x14a   : > { %v823_v5 = vpack.c.bf16 %v813_v27, %v813_v27 }
 0x14b   : > { %v818_v39 = vpack.c.bf16 %v800_v0, %v800_v0 }
 0x14c   : > { %832 = vst.msk [vmem:[%s1448_s10 + $0x18] sm:$0xf] %vm825_vm9, %v823_v5 }
 0x14d   : > { %827 = vst.msk [vmem:[%s1448_s10 + $0x4] sm:$0xf] %vm825_vm9, %v818_v39  ;;  %v785_v63 = vpop.f32.mrf.mxu1 }
 0x14e   : > { %v786_v38 = vadd.f32 %v785_v63, %v757_v61 }
 0x150   : > { %v815_v29 = vadd.f32 %v814_v16, %v786_v38 }
 0x152   : > { %v824_v34 = vpack.c.bf16 %v815_v29, %v815_v29 }
 0x154   : > { %833 = vst.msk [vmem:[%s1448_s10 + $0x1c] sm:$0xf] %vm825_vm9, %v824_v34 }
 0x155 PF: > { %s13_s12 = sadd.s32 1, %s1039_s12  }
 0x156   : > { %p10_p4 = scmp.ge.s32.totalorder %s13_s12, 5  }
 0x158   :  { %12 = sbr.rel (!%p10_p4) target bundleno = 1 (0x1), region = 62 }

// kernel: stage_forward.11
= control target key start
LH: loop header
LB: loop body
LE: loop exit
PB: predicated region body
PF: predicated region fallthrough
CT: control target
= control target key end

     0   :  { %vm231_vm0 = vcmask 261120   ;;  %s3483_s0 = inlined_call_operand.vmem [shape: bf16[256,32], index: 0, kind: input, shape index: {}]   ;;  %s3484_s1 = inlined_call_operand.vmem [shape: bf16[256,32], index: 1, kind: input, shape index: {}]   ;;  %s3485_s2 = inlined_call_operand.vmem [shape: bf16[256,32], index: 2, kind: input, shape index: {}]   ;;  %s3486_s3 = inlined_call_operand.vmem [shape: bf16[3,32,96], index: 3, kind: input, shape index: {}]   ;;  %s3487_s4 = inlined_call_operand.vmem [shape: f32[1,96], index: 4, kind: input, shape index: {}]   ;;  %s3488_s5 = inlined_call_operand.vmem [shape: bf16[3,32,96], index: 5, kind: input, shape index: {}]   ;;  %s3489_s6 = inlined_call_operand.vmem [shape: f32[1,96], index: 6, kind: input, shape index: {}]   ;;  %s3490_s7 = inlined_call_operand.vmem [shape: bf16[96,32], index: 7, kind: input, shape index: {}]   ;;  %s3491_s8 = inlined_call_operand.vmem [shape: f32[1,32], index: 8, kind: input, shape index: {}]   ;;  %s3492_s9 = inlined_call_operand.hbm [shape: f32[256,32], index: 9, kind: output, shape index: {}]  }
   0x1   :  { %v2304_v0 = vld [vmem:[%s3486_s3 + $0x18] sm:$0xff]  ;;  %v2302_v1 = vld [vmem:[%s3486_s3 + $0x8] sm:$0xff]  ;;  %v2303_v3 = vld [vmem:[%s3486_s3 + $0x10] sm:$0xff] }
   0x2   :  { %v2306_v2 = vld [vmem:[%s3486_s3 + $0x28] sm:$0xff]  ;;  %286 = vmatpush.bf16.msra.mxu0 %v2304_v0  ;;  %2319 = vmatpush.bf16.msra.mxu3 %v2304_v0  ;;  %v2301_v4 = vld [vmem:[%s3486_s3] sm:$0xff] }
   0x3   :  { %515 = vmatpush.bf16.msra.mxu1 %v2302_v1  ;;  %749 = vmatpush.bf16.msra.mxu2 %v2306_v2  ;;  %v2305_v5 = vld [vmem:[%s3486_s3 + $0x20] sm:$0xff]  ;;  %v2308_v8 = vld [vmem:[%s3488_s5 + $0x8] sm:$0xff] }
   0x4   :  { %v2498_v6 = vld [vmem:[%s3484_s1] sm:$0xff] }
   0x5   :  { %v2503_v7 = vld [vmem:[%s3484_s1 + $0x60] sm:$0xff] }
   0x6   :  { %v2511_v9 = vld [vmem:[%s3483_s0] sm:$0xff]  ;;  %287 = vmatpush.bf16.msra.mxu0 %v2303_v3  ;;  %2320 = vmatpush.bf16.msra.mxu3 %v2303_v3 }
   0x7   :  { %v2516_v10 = vld [vmem:[%s3485_s2] sm:$0xff] }
   0x8   :  { %14 = vsyncpa [#allocation3], 0  ;;  %516 = vmatpush.bf16.msra.mxu1 %v2301_v4  ;;  %750 = vmatpush.bf16.msra.mxu2 %v2305_v5  ;;  %v2312_v11 = vld [vmem:[%s3488_s5 + $0x28] sm:$0xff]  ;;  %v2560_v16 = vld [vmem:[%s3484_s1 + $0x10] sm:$0xff]  ;;  %vm1673_vm1 = vcmask 785408   ;;  %s1849_s16 = sshll.u32 %s3492_s9, 4  ;;  %s1850_s16 = int_to_ptr.hbm [resolvable:$true] %s1849_s16 }
   0x9   :  { %1937 = vmatmul.msk.bf16.vlgmr.msra.gmra.mxu0 %vm231_vm0, %v2498_v6  ;;  %1949 = vmatmul.msk.bf16.vlgmr.msra.gmra.mxu3 %vm231_vm0, %v2503_v7  ;;  %v2532_v12 = vld [vmem:[%s3484_s1 + $0x8] sm:$0xff]  ;;  %v2565_v17 = vld [vmem:[%s3484_s1 + $0x70] sm:$0xff]  ;;  %v2588_v20 = vld [vmem:[%s3484_s1 + $0x18] sm:$0xff]  ;;  %s2425_s17 = smov 128   ;;  %s2426_s18 = smov 8  }
   0xa   :  { %2321 = vmatpush.bf16.msrb.mxu3 %v2302_v1  ;;  %1028 = vmatpush.bf16.msrb.mxu0 %v2308_v8  ;;  %v2537_v13 = vld [vmem:[%s3484_s1 + $0x68] sm:$0xff]  ;;  %3500 = vst [vmem:[#allocation5_spill] sm:$0xff] %v2565_v17  ;;  %v2570_v18 = vld [vmem:[%s3483_s0 + $0x10] sm:$0xff]  ;;  %v2284_v21 = vld [vmem:[%s3484_s1 + $0x78] sm:$0xff] }
   0xb   :  { %2025 = vmatmul.msk.bf16.vlgmr.msra.gmra.mxu1 %vm231_vm0, %v2511_v9  ;;  %2117 = vmatmul.msk.bf16.vlgmr.msra.gmra.mxu2 %vm231_vm0, %v2516_v10  ;;  %v2542_v14 = vld [vmem:[%s3483_s0 + $0x8] sm:$0xff]  ;;  %v2575_v19 = vld [vmem:[%s3485_s2 + $0x10] sm:$0xff]  ;;  %v2596_v22 = vld [vmem:[%s3483_s0 + $0x18] sm:$0xff] }
   0xc   :  { %1134 = vmatpush.bf16.msrb.mxu1 %v2312_v11  ;;  %v2547_v15 = vld [vmem:[%s3485_s2 + $0x8] sm:$0xff]  ;;  %v2601_v23 = vld [vmem:[%s3485_s2 + $0x18] sm:$0xff]  ;;  %v2613_v24 = vld [vmem:[%s3484_s1 + $0x20] sm:$0xff] }
   0xd   :  { %v2618_v25 = vld [vmem:[%s3483_s0 + $0x60] sm:$0xff]  ;;  %v2647_v30 = vld [vmem:[%s3484_s1 + $0x28] sm:$0xff]  ;;  %v2675_v34 = vld [vmem:[%s3484_s1 + $0x30] sm:$0xff] }
   0xe   :  { %2322 = vmatpush.bf16.msrb.mxu3 %v2301_v4  ;;  %v2623_v26 = vld [vmem:[%s3483_s0 + $0x20] sm:$0xff]  ;;  %v2652_v31 = vld [vmem:[%s3483_s0 + $0x68] sm:$0xff]  ;;  %v2680_v35 = vld [vmem:[%s3483_s0 + $0x70] sm:$0xff] }
   0xf   :  { %v2628_v27 = vld [vmem:[%s3485_s2 + $0x20] sm:$0xff]  ;;  %3501 = vst [vmem:[#allocation6_spill] sm:$0xff] %v2652_v31  ;;  %v2657_v32 = vld [vmem:[%s3483_s0 + $0x28] sm:$0xff]  ;;  %v2685_v36 = vld [vmem:[%s3483_s0 + $0x30] sm:$0xff] }
  0x10   :  { %v2307_v28 = vld [vmem:[%s3488_s5] sm:$0xff]  ;;  %v2662_v33 = vld [vmem:[%s3485_s2 + $0x28] sm:$0xff]  ;;  %3502 = vst [vmem:[#allocation7_spill] sm:$0xff] %v2680_v35  ;;  %v2690_v37 = vld [vmem:[%s3485_s2 + $0x30] sm:$0xff] }
  0x11   :  { %v2311_v29 = vld [vmem:[%s3488_s5 + $0x20] sm:$0xff]  ;;  %1029 = vmatpush.bf16.msrb.mxu0 %v2307_v28  ;;  %v2310_v38 = vld [vmem:[%s3488_s5 + $0x18] sm:$0xff]  ;;  %v2309_v50 = vld [vmem:[%s3488_s5 + $0x10] sm:$0xff] }
  0x12   :  { %2323 = vmatpush.bf16.msra.mxu3 %v2306_v2  ;;  %1135 = vmatpush.bf16.msrb.mxu1 %v2311_v29  ;;  %v2706_v39 = vld [vmem:[%s3484_s1 + $0x38] sm:$0xff]  ;;  %v2734_v43 = vld [vmem:[%s3484_s1 + $0x40] sm:$0xff]  ;;  %v2773_v56 = vld [vmem:[%s3484_s1 + $0x48] sm:$0xff] }
  0x13   :  { %v2711_v40 = vld [vmem:[%s3483_s0 + $0x78] sm:$0xff]  ;;  %v2739_v44 = vld [vmem:[%s3485_s2 + $0x60] sm:$0xff]  ;;  %v2778_v57 = vld [vmem:[%s3485_s2 + $0x68] sm:$0xff] }
  0x14   :  { %3503 = vst [vmem:[#allocation8_spill] sm:$0xff] %v2711_v40  ;;  %v2716_v41 = vld [vmem:[%s3483_s0 + $0x38] sm:$0xff]  ;;  %v2744_v46 = vld [vmem:[%s3483_s0 + $0x40] sm:$0xff]  ;;  %v2783_v59 = vld [vmem:[%s3483_s0 + $0x48] sm:$0xff] }
  0x15   :  { %v2721_v42 = vld [vmem:[%s3485_s2 + $0x38] sm:$0xff]  ;;  %v2749_v47 = vld [vmem:[%s3485_s2 + $0x40] sm:$0xff]  ;;  %3504 = vst [vmem:[#allocation9_spill] sm:$0xff] %v2778_v57  ;;  %v2788_v60 = vld [vmem:[%s3485_s2 + $0x48] sm:$0xff] }
  0x16   :  { %2324 = vmatpush.bf16.msra.mxu3 %v2305_v5  ;;  %v2318_v63 = vld [vmem:[%s3490_s7 + $0x28] sm:$0xff]  ;;  %v2808_v5 = vld [vmem:[%s3484_s1 + $0x50] sm:$0xff] }
  0x17   :  { %1724 = vmatpush.bf16.msrb.mxu2 %v2318_v63  ;;  %v2813_v8 = vld [vmem:[%s3485_s2 + $0x70] sm:$0xff] }
  0x18   :  { %3505 = vst [vmem:[#allocation10_spill] sm:$0xff] %v2813_v8  ;;  %v2823_v28 = vld [vmem:[%s3485_s2 + $0x50] sm:$0xff] }
  0x19   :  { %1938 = vmatmul.msk.bf16.gmra.mxu0 %vm231_vm0, %v2532_v12  ;;  %1950 = vmatmul.msk.bf16.gmra.mxu3 %vm231_vm0, %v2537_v13 }
  0x1b   :  { %2026 = vmatmul.msk.bf16.gmra.mxu1 %vm231_vm0, %v2542_v14  ;;  %2118 = vmatmul.msk.bf16.gmra.mxu2 %vm231_vm0, %v2547_v15 }
  0x29   :  { %1939 = vmatmul.msk.bf16.gmra.mxu0 %vm231_vm0, %v2560_v16  ;;  %1951 = vmatmul.msk.bf16.gmra.mxu3 %vm231_vm0, %v2565_v17 }
  0x2b   :  { %2027 = vmatmul.msk.bf16.gmra.mxu1 %vm231_vm0, %v2570_v18  ;;  %2119 = vmatmul.msk.bf16.gmra.mxu2 %vm231_vm0, %v2575_v19 }
  0x39   :  { %1940 = vmatmul.msk.bf16.gmra.mxu0 %vm231_vm0, %v2588_v20  ;;  %1952 = vmatmul.msk.bf16.gmra.mxu3 %vm231_vm0, %v2284_v21  ;;  %v2818_v21 = vld [vmem:[%s3483_s0 + $0x50] sm:$0xff] }
  0x3b   :  { %2028 = vmatmul.msk.bf16.gmra.mxu1 %vm231_vm0, %v2596_v22  ;;  %2120 = vmatmul.msk.bf16.gmra.mxu2 %vm231_vm0, %v2601_v23 }
  0x49   :  { %1941 = vmatmul.msk.bf16.gmra.mxu0 %vm231_vm0, %v2613_v24  ;;  %2037 = vmatmul.msk.bf16.vlgmr.msrb.gmra.mxu3 %vm231_vm0, %v2618_v25 }
  0x4a   :  { %927 = vmatpush.bf16.msrb.mxu3 %v2310_v38 }
  0x4b   :  { %2029 = vmatmul.msk.bf16.gmra.mxu1 %vm231_vm0, %v2623_v26  ;;  %2121 = vmatmul.msk.bf16.gmra.mxu2 %vm231_vm0, %v2628_v27 }
  0x4e   :  { %928 = vmatpush.bf16.msrb.mxu3 %v2309_v50 }
  0x59   :  { %1942 = vmatmul.msk.bf16.gmra.mxu0 %vm231_vm0, %v2647_v30  ;;  %2038 = vmatmul.msk.bf16.gmra.mxu3 %vm231_vm0, %v2652_v31 }
  0x5b   :  { %2030 = vmatmul.msk.bf16.gmra.mxu1 %vm231_vm0, %v2657_v32  ;;  %2122 = vmatmul.msk.bf16.gmra.mxu2 %vm231_vm0, %v2662_v33 }
  0x69   :  { %1943 = vmatmul.msk.bf16.gmra.mxu0 %vm231_vm0, %v2675_v34  ;;  %2039 = vmatmul.msk.bf16.gmra.mxu3 %vm231_vm0, %v2680_v35 }
  0x6b   :  { %2031 = vmatmul.msk.bf16.gmra.mxu1 %vm231_vm0, %v2685_v36  ;;  %2123 = vmatmul.msk.bf16.gmra.mxu2 %vm231_vm0, %v2690_v37 }
  0x79   :  { %1944 = vmatmul.msk.bf16.gmra.mxu0 %vm231_vm0, %v2706_v39  ;;  %2040 = vmatmul.msk.bf16.gmra.mxu3 %vm231_vm0, %v2711_v40 }
  0x7b   :  { %2032 = vmatmul.msk.bf16.gmra.mxu1 %vm231_vm0, %v2716_v41  ;;  %2124 = vmatmul.msk.bf16.gmra.mxu2 %vm231_vm0, %v2721_v42 }
  0x86   :  { %v289_v45 = vpop.f32.mrf.mxu0 }
  0x88   :  { %v518_v48 = vpop.f32.mrf.mxu1 }
  0x89   :  { %v2751_v49 = vadd.f32 %v518_v48, %v289_v45  ;;  %1945 = vmatmul.msk.bf16.gmra.mxu0 %vm231_vm0, %v2734_v43  ;;  %2129 = vmatmul.msk.bf16.vlgmr.msra.gmra.mxu3 %vm231_vm0, %v2739_v44 }
  0x8b   :  { %2033 = vmatmul.msk.bf16.gmra.mxu1 %vm231_vm0, %v2744_v46  ;;  %2125 = vmatmul.msk.bf16.gmra.mxu2 %vm231_vm0, %v2749_v47 }
  0x8c   :  { %v2764_v51 = vpop.f32.mrf.mxu3 }
  0x8e   :  { %v291_v52 = vpop.f32.mrf.mxu0 }
  0x90   :  { %v520_v53 = vpop.f32.mrf.mxu1 }
  0x91   :  { %v2766_v54 = vadd.f32 %v520_v53, %v291_v52 }
  0x94   :  { %v2768_v55 = vpop.f32.mrf.mxu3 }
  0x96   :  { %v294_v58 = vpop.f32.mrf.mxu0 }
  0x98   :  { %v523_v61 = vpop.f32.mrf.mxu1 }
  0x99   :  { %v2790_v62 = vadd.f32 %v523_v61, %v294_v58  ;;  %1946 = vmatmul.msk.bf16.gmra.mxu0 %vm231_vm0, %v2773_v56  ;;  %2130 = vmatmul.msk.bf16.gmra.mxu3 %vm231_vm0, %v2778_v57  ;;  %v2840_v58 = vld [vmem:[%s3484_s1 + $0x58] sm:$0xff] }
  0x9a   :  { %v2845_v61 = vld [vmem:[%s3485_s2 + $0x78] sm:$0xff] }
  0x9b   :  { %2034 = vmatmul.msk.bf16.gmra.mxu1 %vm231_vm0, %v2783_v59  ;;  %2126 = vmatmul.msk.bf16.gmra.mxu2 %vm231_vm0, %v2788_v60  ;;  %3506 = vst [vmem:[#allocation11_spill] sm:$0xff] %v2845_v61 }
  0x9c   :  { %v354_v0 = vpop.f32.mrf.mxu3 }
  0x9e   :  { %v296_v1 = vpop.f32.mrf.mxu0 }
  0xa0   :  { %v525_v2 = vpop.f32.mrf.mxu1 }
  0xa1   :  { %v2803_v3 = vadd.f32 %v525_v2, %v296_v1  ;;  %v2850_v1 = vld [vmem:[%s3483_s0 + $0x58] sm:$0xff] }
  0xa2   :  { %v2855_v2 = vld [vmem:[%s3485_s2 + $0x58] sm:$0xff] }
  0xa4   :  { %v356_v4 = vpop.f32.mrf.mxu3 }
  0xa6   :  { %v299_v11 = vpop.f32.mrf.mxu0 }
  0xa8   :  { %v528_v29 = vpop.f32.mrf.mxu1 }
  0xa9   :  { %v2825_v38 = vadd.f32 %v528_v29, %v299_v11  ;;  %1947 = vmatmul.msk.bf16.gmra.mxu0 %vm231_vm0, %v2808_v5  ;;  %2131 = vmatmul.msk.bf16.gmra.mxu3 %vm231_vm0, %v2813_v8 }
  0xab   :  { %2035 = vmatmul.msk.bf16.gmra.mxu1 %vm231_vm0, %v2818_v21  ;;  %2127 = vmatmul.msk.bf16.gmra.mxu2 %vm231_vm0, %v2823_v28 }
  0xac   :  { %v359_v45 = vpop.f32.mrf.mxu3 }
  0xae   :  { %v301_v48 = vpop.f32.mrf.mxu0 }
  0xb0   :  { %v530_v50 = vpop.f32.mrf.mxu1 }
  0xb1   :  { %v2835_v52 = vadd.f32 %v530_v50, %v301_v48  ;;  %v2317_v48 = vld [vmem:[%s3490_s7 + $0x20] sm:$0xff] }
  0xb2   :  { %1725 = vmatpush.bf16.msrb.mxu2 %v2317_v48 }
  0xb4   :  { %v361_v53 = vpop.f32.mrf.mxu3 }
  0xb6   :  { %v304_v63 = vpop.f32.mrf.mxu0 }
  0xb8   :  { %v533_v11 = vpop.f32.mrf.mxu1 }
  0xb9   :  { %v2857_v29 = vadd.f32 %v533_v11, %v304_v63  ;;  %1948 = vmatmul.msk.bf16.gmra.mxu0 %vm231_vm0, %v2840_v58  ;;  %2132 = vmatmul.msk.bf16.gmra.mxu3 %vm231_vm0, %v2845_v61 }
  0xbb   :  { %3507 = vst [vmem:[#allocation12_spill] sm:$0xff] %v2857_v29  ;;  %2036 = vmatmul.msk.bf16.gmra.mxu1 %vm231_vm0, %v2850_v1  ;;  %2128 = vmatmul.msk.bf16.gmra.mxu2 %vm231_vm0, %v2855_v2 }
  0xbc   :  { %v364_v50 = vpop.f32.mrf.mxu3 }
  0xbe   :  { %v306_v63 = vpop.f32.mrf.mxu0 }
  0xc0   :  { %v535_v11 = vpop.f32.mrf.mxu1 }
  0xc1   :  { %v2870_v40 = vadd.f32 %v535_v11, %v306_v63 }
  0xc3   :  { %3508 = vst [vmem:[#allocation13_spill] sm:$0xff] %v2870_v40 }
  0xc4   :  { %v366_v8 = vpop.f32.mrf.mxu3 }
  0xc6   :  { %v309_v35 = vpop.f32.mrf.mxu0 }
  0xc8   :  { %v538_v17 = vpop.f32.mrf.mxu1 }
  0xc9   :  { %v2872_v29 = vadd.f32 %v538_v17, %v309_v35  ;;  %2145 = vmatmul.msk.bf16.vlgmr.msrb.gmra.mxu3 %vm231_vm0, %v2498_v6  ;;  %2169 = vmatmul.msk.bf16.vlgmr.msrb.gmra.mxu0 %vm231_vm0, %v2511_v9  ;;  %v2316_v6 = vld [vmem:[%s3490_s7 + $0x18] sm:$0xff] }
  0xca   :  { %1726 = vmatpush.bf16.msrb.mxu2 %v2316_v6 }
  0xcb   :  { %3509 = vst [vmem:[#allocation14_spill] sm:$0xff] %v2872_v29  ;;  %2197 = vmatmul.msk.bf16.vlgmr.msrb.gmra.mxu1 %vm231_vm0, %v2516_v10 }
  0xcc   :  { %v578_v48 = vpop.f32.mrf.mxu3 }
  0xcd   :  { %v579_v61 = vadd.f32 %v578_v48, %v2764_v51 }
  0xce   :  { %v311_v57 = vpop.f32.mrf.mxu0 }
  0xd0   :  { %v540_v63 = vpop.f32.mrf.mxu1 }
  0xd1   :  { %v2881_v11 = vadd.f32 %v540_v63, %v311_v57 }
  0xd4   :  { %v580_v40 = vpop.f32.mrf.mxu3 }
  0xd5   :  { %v581_v17 = vadd.f32 %v580_v40, %v2768_v55 }
  0xd6   :  { %v314_v35 = vpop.f32.mrf.mxu0 }
  0xd8   :  { %v543_v29 = vpop.f32.mrf.mxu1 }
  0xd9   :  { %v2884_v31 = vadd.f32 %v543_v29, %v314_v35  ;;  %2146 = vmatmul.msk.bf16.gmra.mxu3 %vm231_vm0, %v2532_v12  ;;  %2170 = vmatmul.msk.bf16.gmra.mxu0 %vm231_vm0, %v2542_v14 }
  0xdb   :  { %2198 = vmatmul.msk.bf16.gmra.mxu1 %vm231_vm0, %v2547_v15 }
  0xdc   :  { %v583_v9 = vpop.f32.mrf.mxu3 }
  0xdd   :  { %v584_v10 = vadd.f32 %v583_v9, %v354_v0 }
  0xde   :  { %v316_v40 = vpop.f32.mrf.mxu0 }
  0xe0   :  { %v545_v51 = vpop.f32.mrf.mxu1 }
  0xe1   :  { %v2895_v55 = vadd.f32 %v545_v51, %v316_v40 }
  0xe4   :  { %v585_v57 = vpop.f32.mrf.mxu3 }
  0xe5   :  { %v586_v29 = vadd.f32 %v585_v57, %v356_v4 }
  0xe6   :  { %v319_v48 = vpop.f32.mrf.mxu0 }
  0xe8   :  { %v548_v63 = vpop.f32.mrf.mxu1 }
  0xe9   :  { %v2897_v35 = vadd.f32 %v548_v63, %v319_v48  ;;  %2147 = vmatmul.msk.bf16.gmra.mxu3 %vm231_vm0, %v2560_v16  ;;  %2171 = vmatmul.msk.bf16.gmra.mxu0 %vm231_vm0, %v2570_v18  ;;  %v2315_v16 = vld [vmem:[%s3490_s7 + $0x10] sm:$0xff] }
  0xea   :  { %1727 = vmatpush.bf16.msrb.mxu2 %v2315_v16 }
  0xeb   :  { %2199 = vmatmul.msk.bf16.gmra.mxu1 %vm231_vm0, %v2575_v19 }
  0xec   :  { %v588_v12 = vpop.f32.mrf.mxu3 }
  0xed   :  { %v589_v14 = vadd.f32 %v588_v12, %v359_v45 }
  0xee   :  { %v321_v15 = vpop.f32.mrf.mxu0 }
  0xf0   :  { %v550_v0 = vpop.f32.mrf.mxu1 }
  0xf1   :  { %v2905_v6 = vadd.f32 %v550_v0, %v321_v15 }
  0xf4   :  { %v590_v4 = vpop.f32.mrf.mxu3 }
  0xf5   :  { %v591_v9 = vadd.f32 %v590_v4, %v361_v53 }
  0xf6   :  { %v324_v40 = vpop.f32.mrf.mxu0 }
  0xf8   :  { %v553_v51 = vpop.f32.mrf.mxu1 }
  0xf9   :  { %v2907_v57 = vadd.f32 %v553_v51, %v324_v40  ;;  %2148 = vmatmul.msk.bf16.gmra.mxu3 %vm231_vm0, %v2588_v20  ;;  %2172 = vmatmul.msk.bf16.gmra.mxu0 %vm231_vm0, %v2596_v22  ;;  %v2928_v20 = vpop.f32.mrf.mxu2 }
  0xfb   :  { %2200 = vmatmul.msk.bf16.gmra.mxu1 %vm231_vm0, %v2601_v23 }
  0xfc   :  { %v593_v18 = vpop.f32.mrf.mxu3 }
  0xfd   :  { %v594_v19 = vadd.f32 %v593_v18, %v364_v50 }
  0xfe   :  { %v326_v45 = vpop.f32.mrf.mxu0 }
 0x100   :  { %v555_v53 = vpop.f32.mrf.mxu1 }
 0x101   :  { %v2918_v48 = vadd.f32 %v555_v53, %v326_v45  ;;  %v2934_v16 = vpop.f32.mrf.mxu2 }
 0x104   :  { %v595_v63 = vpop.f32.mrf.mxu3 }
 0x105   :  { %v596_v12 = vadd.f32 %v595_v63, %v366_v8 }
 0x106   :  { %v329_v15 = vpop.f32.mrf.mxu0 }
 0x108   :  { %v558_v0 = vpop.f32.mrf.mxu1 }
 0x109   :  { %v2920_v4 = vadd.f32 %v558_v0, %v329_v15  ;;  %2149 = vmatmul.msk.bf16.gmra.mxu3 %vm231_vm0, %v2613_v24  ;;  %2173 = vmatmul.msk.bf16.gmra.mxu0 %vm231_vm0, %v2623_v26  ;;  %v2951_v63 = vpop.f32.mrf.mxu2 }
 0x10b   :  { %2201 = vmatmul.msk.bf16.gmra.mxu1 %vm231_vm0, %v2628_v27  ;;  %v2314_v27 = vld [vmem:[%s3490_s7 + $0x8] sm:$0xff] }
 0x10c   :  { %v812_v22 = vpop.f32.mrf.mxu3  ;;  %1728 = vmatpush.bf16.msrb.mxu2 %v2314_v27 }
 0x10d   :  { %v2930_v23 = vadd.f32 %v812_v22, %v579_v61 }
 0x10e   :  { %v331_v50 = vpop.f32.mrf.mxu0 }
 0x10f   :  { %3510 = vst [vmem:[#allocation15_spill] sm:$0xff] %v2930_v23 }
 0x110   :  { %v560_v8 = vpop.f32.mrf.mxu1 }
 0x111   :  { %v2932_v40 = vadd.f32 %v560_v8, %v331_v50 }
 0x114   :  { %v814_v51 = vpop.f32.mrf.mxu3 }
 0x115   :  { %v2936_v18 = vadd.f32 %v814_v51, %v581_v17 }
 0x116   :  { %v334_v24 = vpop.f32.mrf.mxu0 }
 0x117   :  { %3511 = vst [vmem:[#allocation16_spill] sm:$0xff] %v2936_v18 }
 0x118   :  { %v563_v45 = vpop.f32.mrf.mxu1 }
 0x119   :  { %v2938_v26 = vadd.f32 %v563_v45, %v334_v24  ;;  %2150 = vmatmul.msk.bf16.gmra.mxu3 %vm231_vm0, %v2647_v30  ;;  %2174 = vmatmul.msk.bf16.gmra.mxu0 %vm231_vm0, %v2657_v32  ;;  %v2959_v32 = vpop.f32.mrf.mxu2 }
 0x11b   :  { %2202 = vmatmul.msk.bf16.gmra.mxu1 %vm231_vm0, %v2662_v33 }
 0x11c   :  { %v817_v61 = vpop.f32.mrf.mxu3 }
 0x11d   :  { %v2949_v17 = vadd.f32 %v817_v61, %v584_v10 }
 0x11e   :  { %v336_v53 = vpop.f32.mrf.mxu0 }
 0x11f   :  { %3512 = vst [vmem:[#allocation17_spill] sm:$0xff] %v2949_v17 }
 0x120   :  { %v565_v15 = vpop.f32.mrf.mxu1 }
 0x121   :  { %v2953_v0 = vadd.f32 %v565_v15, %v336_v53  ;;  %v2971_v27 = vpop.f32.mrf.mxu2 }
 0x124   :  { %v819_v22 = vpop.f32.mrf.mxu3 }
 0x125   :  { %v2955_v50 = vadd.f32 %v819_v22, %v586_v29 }
 0x126   :  { %v339_v30 = vpop.f32.mrf.mxu0 }
 0x127   :  { %3513 = vst [vmem:[#allocation18_spill] sm:$0xff] %v2955_v50 }
 0x128   :  { %v568_v8 = vpop.f32.mrf.mxu1 }
 0x129   :  { %v2957_v51 = vadd.f32 %v568_v8, %v339_v30  ;;  %2151 = vmatmul.msk.bf16.gmra.mxu3 %vm231_vm0, %v2675_v34  ;;  %2175 = vmatmul.msk.bf16.gmra.mxu0 %vm231_vm0, %v2685_v36 }
 0x12b   :  { %2203 = vmatmul.msk.bf16.gmra.mxu1 %vm231_vm0, %v2690_v37  ;;  %v2983_v37 = vpop.f32.mrf.mxu2 }
 0x12c   :  { %v822_v33 = vpop.f32.mrf.mxu3 }
 0x12d   :  { %v2967_v10 = vadd.f32 %v822_v33, %v589_v14 }
 0x12e   :  { %v341_v29 = vpop.f32.mrf.mxu0 }
 0x12f   :  { %3514 = vst [vmem:[#allocation19_spill] sm:$0xff] %v2967_v10 }
 0x130   :  { %v570_v24 = vpop.f32.mrf.mxu1 }
 0x131   :  { %v2969_v45 = vadd.f32 %v570_v24, %v341_v29 }
 0x134   :  { %v824_v61 = vpop.f32.mrf.mxu3 }
 0x135   :  { %v2973_v53 = vadd.f32 %v824_v61, %v591_v9 }
 0x136   :  { %v344_v15 = vpop.f32.mrf.mxu0 }
 0x137   :  { %3515 = vst [vmem:[#allocation20_spill] sm:$0xff] %v2973_v53 }
 0x138   :  { %v573_v34 = vpop.f32.mrf.mxu1 }
 0x139   :  { %v2975_v22 = vadd.f32 %v573_v34, %v344_v15  ;;  %2152 = vmatmul.msk.bf16.gmra.mxu3 %vm231_vm0, %v2706_v39  ;;  %2176 = vmatmul.msk.bf16.gmra.mxu0 %vm231_vm0, %v2716_v41  ;;  %v2991_v39 = vpop.f32.mrf.mxu2 }
 0x13b   :  { %2204 = vmatmul.msk.bf16.gmra.mxu1 %vm231_vm0, %v2721_v42 }
 0x13c   :  { %v827_v36 = vpop.f32.mrf.mxu3 }
 0x13d   :  { %v2985_v14 = vadd.f32 %v827_v36, %v594_v19  ;;  %v3002_v19 = vld [vmem:[%s3489_s6] ss:$0 sm:$0xff] }
 0x13e   :  { %v346_v9 = vpop.f32.mrf.mxu0 }
 0x13f   :  { %3516 = vst [vmem:[#allocation21_spill] sm:$0xff] %v2985_v14 }
 0x140   :  { %v575_v30 = vpop.f32.mrf.mxu1 }
 0x141   :  { %v2987_v8 = vadd.f32 %v575_v30, %v346_v9  ;;  %v3007_v36 = vpop.f32.mrf.mxu2 }
 0x144   :  { %v829_v33 = vpop.f32.mrf.mxu3 }
 0x145   :  { %v2989_v29 = vadd.f32 %v829_v33, %v596_v12 }
 0x146   :  { %v1031_v24 = vpop.f32.mrf.mxu0 }
 0x147   :  { %3517 = vst [vmem:[#allocation22_spill] sm:$0xff] %v2989_v29 }
 0x148   :  { %v1137_v61 = vpop.f32.mrf.mxu1 }
 0x149   :  { %2153 = vmatmul.msk.bf16.gmra.mxu3 %vm231_vm0, %v2734_v43  ;;  %2177 = vmatmul.msk.bf16.gmra.mxu0 %vm231_vm0, %v2744_v46  ;;  %v2313_v43 = vld [vmem:[%s3490_s7] sm:$0xff] }
 0x14a   :  { %1729 = vmatpush.bf16.msrb.mxu2 %v2313_v43 }
 0x14b   :  { %2205 = vmatmul.msk.bf16.gmra.mxu1 %vm231_vm0, %v2749_v47 }
 0x14c   :  { %v930_v41 = vpop.f32.mrf.mxu3 }
 0x14d   :  { %v1032_v42 = vadd.f32 %v1031_v24, %v930_v41 }
 0x14e   :  { %v1033_v12 = vpop.f32.mrf.mxu0 }
 0x14f   :  { %v1217_v15 = vadd.f32 %v1137_v61, %v1032_v42  ;;  %v3017_v42 = vpop.f32.mrf.mxu2 }
 0x150   :  { %v1139_v34 = vpop.f32.mrf.mxu1 }
 0x151   :  { %v1253_v46 = vadd.f32 %v3002_v19, %v1217_v15 }
 0x153   :  { %v1285_v47 = vmul.f32 %v1253_v46, %v1253_v46 }
 0x154   :  { %v932_v9 = vpop.f32.mrf.mxu3 }
 0x155   :  { %v1317_v30 = vmul.f32 %v1285_v47, %v1253_v46  ;;  %v1034_v33 = vadd.f32 %v1033_v12, %v932_v9 }
 0x156   :  { %v1036_v24 = vpop.f32.mrf.mxu0 }
 0x157   :  { %v1349_v41 = vmul.f32 0.044715, %v1317_v30  ;;  %v1218_v29 = vadd.f32 %v1139_v34, %v1034_v33 }
 0x158   :  { %v1142_v14 = vpop.f32.mrf.mxu1 }
 0x159   :  { %v1381_v53 = vadd.f32 %v1349_v41, %v1253_v46  ;;  %v1254_v61 = vadd.f32 %v3002_v19, %v1218_v29  ;;  %2154 = vmatmul.msk.bf16.gmra.mxu3 %vm231_vm0, %v2773_v56  ;;  %2178 = vmatmul.msk.bf16.gmra.mxu0 %vm231_vm0, %v2783_v59 }
 0x15b   :  { %2206 = vmatmul.msk.bf16.gmra.mxu1 %vm231_vm0, %v2788_v60  ;;  %v1413_v15 = vmul.f32 0.7978846, %v1381_v53  ;;  %v1286_v12 = vmul.f32 %v1254_v61, %v1254_v61  ;;  %v3024_v53 = vpop.f32.mrf.mxu2 }
 0x15c   :  { %v935_v43 = vpop.f32.mrf.mxu3 }
 0x15d   :  { %2331 = vtanh.f32 %v1413_v15  ;;  %v1318_v34 = vmul.f32 %v1286_v12, %v1254_v61  ;;  %v1037_v47 = vadd.f32 %v1036_v24, %v935_v43 }
 0x15e   :  { %v1038_v9 = vpop.f32.mrf.mxu0 }
 0x15f   :  { %v1350_v30 = vmul.f32 0.044715, %v1318_v34  ;;  %v1219_v29 = vadd.f32 %v1142_v14, %v1037_v47 }
 0x160   :  { %v1144_v33 = vpop.f32.mrf.mxu1 }
 0x161   :  { %v1382_v41 = vadd.f32 %v1350_v30, %v1254_v61  ;;  %v3020_v56 = vadd.f32 %v3002_v19, %v1219_v29 }
 0x163   :  { %v2332_v59 = vpop.eup %2331  ;;  %v1414_v10 = vmul.f32 0.7978846, %v1382_v41  ;;  %v1287_v60 = vmul.f32 %v3020_v56, %v3020_v56  ;;  %v832_v41 = vadd.f32 %v2928_v20, %v2751_v49 }
 0x164   :  { %v937_v50 = vpop.f32.mrf.mxu3  ;;  %v1477_v12 = vadd.f32 1.0, %v2332_v59  ;;  %v3044_v59 = vld [vmem:[%s3487_s4] ss:$0 sm:$0xff] }
 0x165   :  { %2333 = vtanh.f32 %v1414_v10  ;;  %v1319_v15 = vmul.f32 %v1287_v60, %v3020_v56  ;;  %v1039_v24 = vadd.f32 %v1038_v9, %v937_v50  ;;  %v868_v17 = vadd.f32 %v3044_v59, %v832_v41 }
 0x166   :  { %v1041_v43 = vpop.f32.mrf.mxu0  ;;  %v1509_v10 = vmul.f32 0.5, %v1477_v12 }
 0x167   :  { %v1351_v14 = vmul.f32 0.044715, %v1319_v15  ;;  %v1220_v34 = vadd.f32 %v1144_v33, %v1039_v24 }
 0x168   :  { %v1147_v47 = vpop.f32.mrf.mxu1  ;;  %v1541_v24 = vmul.f32 %v1509_v10, %v1253_v46 }
 0x169   :  { %v1383_v30 = vadd.f32 %v1351_v14, %v3020_v56  ;;  %v3029_v29 = vadd.f32 %v3002_v19, %v1220_v34  ;;  %2155 = vmatmul.msk.bf16.gmra.mxu3 %vm231_vm0, %v2808_v5  ;;  %2179 = vmatmul.msk.bf16.gmra.mxu0 %vm231_vm0, %v2818_v21  ;;  %v833_v5 = vadd.f32 %v2934_v16, %v2766_v54  ;;  %v3049_v34 = vpop.f32.mrf.mxu2 }
 0x16b   :  { %2207 = vmatmul.msk.bf16.gmra.mxu1 %vm231_vm0, %v2823_v28  ;;  %v2334_v50 = vpop.eup %2333  ;;  %v1415_v9 = vmul.f32 0.7978846, %v1383_v30  ;;  %v1288_v33 = vmul.f32 %v3029_v29, %v3029_v29  ;;  %v869_v18 = vadd.f32 %v3044_v59, %v833_v5 }
 0x16c   :  { %v1478_v21 = vadd.f32 1.0, %v2334_v50  ;;  %v940_v60 = vpop.f32.mrf.mxu3  ;;  %v1573_v50 = vmul.f32 %v1541_v24, %v868_v17 }
 0x16d   :  { %2335 = vtanh.f32 %v1415_v9  ;;  %v1320_v28 = vmul.f32 %v1288_v33, %v3029_v29  ;;  %v1042_v15 = vadd.f32 %v1041_v43, %v940_v60 }
 0x16e   :  { %v1510_v12 = vmul.f32 0.5, %v1478_v21  ;;  %v1043_v14 = vpop.f32.mrf.mxu0 }
 0x16f   :  { %v1352_v49 = vmul.f32 0.044715, %v1320_v28  ;;  %v1221_v20 = vadd.f32 %v1147_v47, %v1042_v15 }
 0x170   :  { %v1149_v30 = vpop.f32.mrf.mxu1  ;;  %v1542_v23 = vmul.f32 %v1510_v12, %v1254_v61 }
 0x171   :  { %v1384_v54 = vadd.f32 %v1352_v49, %v3029_v29  ;;  %v3055_v16 = vadd.f32 %v3002_v19, %v1221_v20  ;;  %v834_v20 = vadd.f32 %v2951_v63, %v2790_v62 }
 0x172   :  { %v1574_v43 = vmul.f32 %v1542_v23, %v869_v18  ;;  %v3061_v23 = vpop.f32.mrf.mxu2 }
 0x173   :  { %v2336_v46 = vpop.eup %2335  ;;  %v1416_v10 = vmul.f32 0.7978846, %v1384_v54  ;;  %v1289_v9 = vmul.f32 %v3055_v16, %v3055_v16 }
 0x174   :  { %v942_v47 = vpop.f32.mrf.mxu3  ;;  %v1605_v33 = vpack.c.bf16 %v1574_v43, %v1573_v50  ;;  %v1479_v21 = vadd.f32 1.0, %v2336_v46 }
 0x175   :  { %2337 = vtanh.f32 %v1416_v10  ;;  %v1321_v41 = vmul.f32 %v1289_v9, %v3055_v16  ;;  %v1044_v5 = vadd.f32 %v1043_v14, %v942_v47 }
 0x176   :  { %v1046_v61 = vpop.f32.mrf.mxu0  ;;  %2237 = vmatmul.msk.bf16.vlgmr.msrb.gmra.mxu2 %vm1673_vm1, %v1605_v33  ;;  %v1511_v24 = vmul.f32 0.5, %v1479_v21  ;;  %v870_v33 = vadd.f32 %v3044_v59, %v834_v20 }
 0x177   :  { %v1353_v60 = vmul.f32 0.044715, %v1321_v41  ;;  %v1222_v28 = vadd.f32 %v1149_v30, %v1044_v5  ;;  %v835_v30 = vadd.f32 %v2959_v32, %v2803_v3 }
 0x178   :  { %v1152_v17 = vpop.f32.mrf.mxu1  ;;  %v1543_v46 = vmul.f32 %v1511_v24, %v3020_v56 }
 0x179   :  { %v1385_v18 = vadd.f32 %v1353_v60, %v3055_v16  ;;  %v3065_v15 = vadd.f32 %v3002_v19, %v1222_v28  ;;  %2156 = vmatmul.msk.bf16.gmra.mxu3 %vm231_vm0, %v2840_v58  ;;  %2180 = vmatmul.msk.bf16.gmra.mxu0 %vm231_vm0, %v2850_v1  ;;  %v871_v62 = vadd.f32 %v3044_v59, %v835_v30 }
 0x17a   :  { %v1575_v41 = vmul.f32 %v1543_v46, %v870_v33  ;;  %v3088_v21 = vpop.f32.mrf.mxu2  ;;  %v837_v46 = vadd.f32 %v2983_v37, %v2835_v52 }
 0x17b   :  { %2208 = vmatmul.msk.bf16.gmra.mxu1 %vm231_vm0, %v2855_v2  ;;  %v2338_v12 = vpop.eup %2337  ;;  %v1417_v14 = vmul.f32 0.7978846, %v1385_v18  ;;  %v1290_v49 = vmul.f32 %v3065_v15, %v3065_v15 }
 0x17c   :  { %v945_v54 = vpop.f32.mrf.mxu3  ;;  %v1480_v58 = vadd.f32 1.0, %v2338_v12 }
 0x17d   :  { %2339 = vtanh.f32 %v1417_v14  ;;  %v1322_v1 = vmul.f32 %v1290_v49, %v3065_v15  ;;  %v1047_v50 = vadd.f32 %v1046_v61, %v945_v54 }
 0x17e   :  { %v1048_v43 = vpop.f32.mrf.mxu0  ;;  %v1512_v2 = vmul.f32 0.5, %v1480_v58 }
 0x17f   :  { %v1354_v10 = vmul.f32 0.044715, %v1322_v1  ;;  %v1223_v9 = vadd.f32 %v1152_v17, %v1047_v50 }
 0x180   :  { %v1154_v47 = vpop.f32.mrf.mxu1  ;;  %v1544_v63 = vmul.f32 %v1512_v2, %v3029_v29  ;;  %v836_v2 = vadd.f32 %v2971_v27, %v2825_v38  ;;  %v873_v27 = vadd.f32 %v3044_v59, %v837_v46 }
 0x181   :  { %v1386_v3 = vadd.f32 %v1354_v10, %v3065_v15  ;;  %v3086_v32 = vadd.f32 %v3002_v19, %v1223_v9 }
 0x182   :  { %v1576_v5 = vmul.f32 %v1544_v63, %v871_v62  ;;  %v3110_v9 = vpop.f32.mrf.mxu2  ;;  %v872_v38 = vadd.f32 %v3044_v59, %v836_v2 }
 0x183   :  { %v2340_v61 = vpop.eup %2339  ;;  %v1418_v56 = vmul.f32 0.7978846, %v1386_v3  ;;  %v1291_v60 = vmul.f32 %v3086_v32, %v3086_v32 }
 0x184   :  { %v947_v28 = vpop.f32.mrf.mxu3  ;;  %v1606_v17 = vpack.c.bf16 %v1576_v5, %v1575_v41  ;;  %v1481_v12 = vadd.f32 1.0, %v2340_v61 }
 0x185   :  { %2341 = vtanh.f32 %v1418_v56  ;;  %v1323_v18 = vmul.f32 %v1291_v60, %v3086_v32  ;;  %v1049_v29 = vadd.f32 %v1048_v43, %v947_v28 }
 0x186   :  { %v1051_v24 = vpop.f32.mrf.mxu0  ;;  %2238 = vmatmul.msk.bf16.gmra.mxu2 %vm1673_vm1, %v1606_v17  ;;  %v1513_v58 = vmul.f32 0.5, %v1481_v12 }
 0x187   :  { %v1355_v14 = vmul.f32 0.044715, %v1323_v18  ;;  %v1224_v49 = vadd.f32 %v1154_v47, %v1049_v29 }
 0x188   :  { %v1157_v20 = vpop.f32.mrf.mxu1  ;;  %v1545_v62 = vmul.f32 %v1513_v58, %v3055_v16 }
 0x189   :  { %v1387_v30 = vadd.f32 %v1355_v14, %v3086_v32  ;;  %v3096_v54 = vadd.f32 %v3002_v19, %v1224_v49  ;;  %2157 = vmatmul.msk.bf16.gmra.mxu3 %vm231_vm0, %v2503_v7  ;;  %2181 = vmatmul.msk.bf16.gmra.mxu0 %vm231_vm0, %v2618_v25 }
 0x18a   :  { %v1577_v61 = vmul.f32 %v1545_v62, %v872_v38  ;;  %v3125_v14 = vpop.f32.mrf.mxu2 }
 0x18b   :  { %2209 = vmatmul.msk.bf16.gmra.mxu1 %vm231_vm0, %v2739_v44  ;;  %v2342_v1 = vpop.eup %2341  ;;  %v1419_v50 = vmul.f32 0.7978846, %v1387_v30  ;;  %v1292_v43 = vmul.f32 %v3096_v54, %v3096_v54 }
 0x18c   :  { %v950_v10 = vpop.f32.mrf.mxu3  ;;  %v1482_v7 = vadd.f32 1.0, %v2342_v1 }
 0x18d   :  { %2343 = vtanh.f32 %v1419_v50  ;;  %v1324_v25 = vmul.f32 %v1292_v43, %v3096_v54  ;;  %v1052_v44 = vadd.f32 %v1051_v24, %v950_v10  ;;  %v3518_v50 = vld [vmem:[#allocation6_spill] sm:$0xff]  ;;  %v3519_v43 = vld [vmem:[#allocation9_spill] sm:$0xff] }
 0x18e   :  { %v1053_v47 = vpop.f32.mrf.mxu0  ;;  %v1514_v33 = vmul.f32 0.5, %v1482_v7 }
 0x18f   :  { %v1356_v63 = vmul.f32 0.044715, %v1324_v25  ;;  %v1225_v3 = vadd.f32 %v1157_v20, %v1052_v44  ;;  %v3520_v25 = vld [vmem:[#allocation12_spill] sm:$0xff] }
 0x190   :  { %v1159_v41 = vpop.f32.mrf.mxu1  ;;  %v1546_v52 = vmul.f32 %v1514_v33, %v3065_v15  ;;  %v838_v44 = vadd.f32 %v2991_v39, %v3520_v25  ;;  %v3524_v25 = vld [vmem:[#allocation10_spill] sm:$0xff] }
 0x191   :  { %v1388_v37 = vadd.f32 %v1356_v63, %v3096_v54  ;;  %v3119_v5 = vadd.f32 %v3002_v19, %v1225_v3 }
 0x192   :  { %v1578_v56 = vmul.f32 %v1546_v52, %v873_v27 }
 0x193   :  { %v2344_v60 = vpop.eup %2343  ;;  %v1420_v28 = vmul.f32 0.7978846, %v1388_v37  ;;  %v1293_v16 = vmul.f32 %v3119_v5, %v3119_v5 }
 0x194   :  { %v952_v17 = vpop.f32.mrf.mxu3  ;;  %v1607_v18 = vpack.c.bf16 %v1578_v56, %v1577_v61  ;;  %v1483_v15 = vadd.f32 1.0, %v2344_v60  ;;  %v874_v56 = vadd.f32 %v3044_v59, %v838_v44 }
 0x195   :  { %2345 = vtanh.f32 %v1420_v28  ;;  %v1325_v29 = vmul.f32 %v1293_v16, %v3119_v5  ;;  %v1054_v24 = vadd.f32 %v1053_v47, %v952_v17  ;;  %v3521_v47 = vld [vmem:[#allocation13_spill] sm:$0xff] }
 0x196   :  { %v1056_v12 = vpop.f32.mrf.mxu0  ;;  %2239 = vmatmul.msk.bf16.gmra.mxu2 %vm1673_vm1, %v1607_v18  ;;  %v1515_v2 = vmul.f32 0.5, %v1483_v15  ;;  %v839_v33 = vadd.f32 %v3007_v36, %v3521_v47  ;;  %v3148_v36 = vpop.f32.mrf.mxu2 }
 0x197   :  { %v1357_v49 = vmul.f32 0.044715, %v1325_v29  ;;  %v1226_v20 = vadd.f32 %v1159_v41, %v1054_v24 }
 0x198   :  { %v1162_v30 = vpop.f32.mrf.mxu1  ;;  %v1547_v27 = vmul.f32 %v1515_v2, %v3086_v32  ;;  %v875_v39 = vadd.f32 %v3044_v59, %v839_v33 }
 0x199   :  { %v1389_v58 = vadd.f32 %v1357_v49, %v3119_v5  ;;  %v3129_v1 = vadd.f32 %v3002_v19, %v1226_v20  ;;  %2158 = vmatmul.msk.bf16.gmra.mxu3 %vm231_vm0, %v2537_v13  ;;  %2182 = vmatmul.msk.bf16.gmra.mxu0 %vm231_vm0, %v3518_v50 }
 0x19a   :  { %v1579_v17 = vmul.f32 %v1547_v27, %v874_v56 }
 0x19b   :  { %2210 = vmatmul.msk.bf16.gmra.mxu1 %vm231_vm0, %v3519_v43  ;;  %v2346_v46 = vpop.eup %2345  ;;  %v1421_v10 = vmul.f32 0.7978846, %v1389_v58  ;;  %v1294_v7 = vmul.f32 %v3129_v1, %v3129_v1 }
 0x19c   :  { %v955_v62 = vpop.f32.mrf.mxu3  ;;  %v1484_v13 = vadd.f32 1.0, %v2346_v46 }
 0x19d   :  { %2347 = vtanh.f32 %v1421_v10  ;;  %v1326_v63 = vmul.f32 %v1294_v7, %v3129_v1  ;;  %v1057_v3 = vadd.f32 %v1056_v12, %v955_v62  ;;  %v3522_v10 = vld [vmem:[#allocation5_spill] sm:$0xff]  ;;  %v3523_v7 = vld [vmem:[#allocation7_spill] sm:$0xff] }
 0x19e   :  { %v1058_v41 = vpop.f32.mrf.mxu0  ;;  %v1516_v38 = vmul.f32 0.5, %v1484_v13  ;;  %v3168_v33 = vpop.f32.mrf.mxu2 }
 0x19f   :  { %v1358_v52 = vmul.f32 0.044715, %v1326_v63  ;;  %v1227_v37 = vadd.f32 %v1162_v30, %v1057_v3  ;;  %v3525_v63 = vld [vmem:[#allocation14_spill] sm:$0xff] }
 0x1a0   :  { %v1164_v61 = vpop.f32.mrf.mxu1  ;;  %v1548_v60 = vmul.f32 %v1516_v38, %v3096_v54  ;;  %v840_v3 = vadd.f32 %v3017_v42, %v3525_v63 }
 0x1a1   :  { %v1390_v28 = vadd.f32 %v1358_v52, %v3129_v1  ;;  %v3152_v16 = vadd.f32 %v3002_v19, %v1227_v37 }
 0x1a2   :  { %v1580_v18 = vmul.f32 %v1548_v60, %v875_v39 }
 0x1a3   :  { %v2348_v29 = vpop.eup %2347  ;;  %v1422_v32 = vmul.f32 0.7978846, %v1390_v28  ;;  %v1295_v24 = vmul.f32 %v3152_v16, %v3152_v16 }
 0x1a4   :  { %v957_v12 = vpop.f32.mrf.mxu3  ;;  %v1608_v15 = vpack.c.bf16 %v1580_v18, %v1579_v17  ;;  %v1485_v30 = vadd.f32 1.0, %v2348_v29  ;;  %v876_v18 = vadd.f32 %v3044_v59, %v840_v3 }
 0x1a5   :  { %2349 = vtanh.f32 %v1422_v32  ;;  %v1327_v49 = vmul.f32 %v1295_v24, %v3152_v16  ;;  %v1059_v54 = vadd.f32 %v1058_v41, %v957_v12  ;;  %v841_v41 = vadd.f32 %v3024_v53, %v2881_v11 }
 0x1a6   :  { %v1061_v20 = vpop.f32.mrf.mxu0  ;;  %2240 = vmatmul.msk.bf16.gmra.mxu2 %vm1673_vm1, %v1608_v15  ;;  %v1517_v44 = vmul.f32 0.5, %v1485_v30 }
 0x1a7   :  { %v1359_v58 = vmul.f32 0.044715, %v1327_v49  ;;  %v1228_v50 = vadd.f32 %v1164_v61, %v1059_v54  ;;  %v877_v42 = vadd.f32 %v3044_v59, %v841_v41 }
 0x1a8   :  { %v1167_v43 = vpop.f32.mrf.mxu1  ;;  %v1549_v39 = vmul.f32 %v1517_v44, %v3119_v5  ;;  %v2395_v44 = vld [vmem:[%s3484_s1 + $0x78] sm:$0xff] }
 0x1a9   :  { %v1391_v2 = vadd.f32 %v1359_v58, %v3152_v16  ;;  %v3160_v46 = vadd.f32 %v3002_v19, %v1228_v50  ;;  %2159 = vmatmul.msk.bf16.gmra.mxu3 %vm231_vm0, %v3522_v10  ;;  %2183 = vmatmul.msk.bf16.gmra.mxu0 %vm231_vm0, %v3523_v7 }
 0x1aa   :  { %v1581_v32 = vmul.f32 %v1549_v39, %v876_v18 }
 0x1ab   :  { %2211 = vmatmul.msk.bf16.gmra.mxu1 %vm231_vm0, %v3524_v25  ;;  %v2350_v47 = vpop.eup %2349  ;;  %v1423_v62 = vmul.f32 0.7978846, %v1391_v2  ;;  %v1296_v13 = vmul.f32 %v3160_v46, %v3160_v46 }
 0x1ac   :  { %v960_v38 = vpop.f32.mrf.mxu3  ;;  %v1486_v27 = vadd.f32 1.0, %v2350_v47  ;;  %v3526_v47 = vld [vmem:[#allocation8_spill] sm:$0xff] }
 0x1ad   :  { %2351 = vtanh.f32 %v1423_v62  ;;  %v1328_v52 = vmul.f32 %v1296_v13, %v3160_v46  ;;  %v1062_v37 = vadd.f32 %v1061_v20, %v960_v38  ;;  %v3187_v20 = vpop.f32.mrf.mxu2  ;;  %v3527_v62 = vld [vmem:[#allocation11_spill] sm:$0xff]  ;;  %v842_v38 = vadd.f32 %v3049_v34, %v2884_v31 }
 0x1ae   :  { %v1063_v61 = vpop.f32.mrf.mxu0  ;;  %v1518_v56 = vmul.f32 0.5, %v1486_v27  ;;  %v843_v27 = vadd.f32 %v3061_v23, %v2895_v55 }
 0x1af   :  { %v1360_v60 = vmul.f32 0.044715, %v1328_v52  ;;  %v1229_v28 = vadd.f32 %v1167_v43, %v1062_v37  ;;  %v878_v31 = vadd.f32 %v3044_v59, %v842_v38 }
 0x1b0   :  { %v1169_v17 = vpop.f32.mrf.mxu1  ;;  %v1550_v29 = vmul.f32 %v1518_v56, %v3129_v1  ;;  %v879_v34 = vadd.f32 %v3044_v59, %v843_v27 }
 0x1b1   :  { %v1392_v11 = vadd.f32 %v1360_v60, %v3160_v46  ;;  %v3183_v53 = vadd.f32 %v3002_v19, %v1229_v28 }
 0x1b2   :  { %v1582_v24 = vmul.f32 %v1550_v29, %v877_v42 }
 0x1b3   :  { %v2352_v12 = vpop.eup %2351  ;;  %v1424_v15 = vmul.f32 0.7978846, %v1392_v11  ;;  %v1297_v5 = vmul.f32 %v3183_v53, %v3183_v53 }
 0x1b4   :  { %v962_v49 = vpop.f32.mrf.mxu3  ;;  %v1609_v54 = vpack.c.bf16 %v1582_v24, %v1581_v32  ;;  %v1487_v50 = vadd.f32 1.0, %v2352_v12 }
 0x1b5   :  { %2353 = vtanh.f32 %v1424_v15  ;;  %v1329_v30 = vmul.f32 %v1297_v5, %v3183_v53  ;;  %v1064_v1 = vadd.f32 %v1063_v61, %v962_v49 }
 0x1b6   :  { %v1066_v58 = vpop.f32.mrf.mxu0  ;;  %2241 = vmatmul.msk.bf16.gmra.mxu2 %vm1673_vm1, %v1609_v54  ;;  %v1519_v13 = vmul.f32 0.5, %v1487_v50 }
 0x1b7   :  { %v1361_v43 = vmul.f32 0.044715, %v1329_v30  ;;  %v1230_v2 = vadd.f32 %v1169_v17, %v1064_v1  ;;  %v3211_v17 = vpop.f32.mrf.mxu2 }
 0x1b8   :  { %v1172_v10 = vpop.f32.mrf.mxu1  ;;  %v1551_v28 = vmul.f32 %v1519_v13, %v3152_v16 }
 0x1b9   :  { %v1393_v7 = vadd.f32 %v1361_v43, %v3183_v53  ;;  %v3193_v25 = vadd.f32 %v3002_v19, %v1230_v2  ;;  %2160 = vmatmul.msk.bf16.gmra.mxu3 %vm231_vm0, %v2395_v44  ;;  %2184 = vmatmul.msk.bf16.gmra.mxu0 %vm231_vm0, %v3526_v47 }
 0x1ba   :  { %v1583_v32 = vmul.f32 %v1551_v28, %v878_v31 }
 0x1bb   :  { %2212 = vmatmul.msk.bf16.gmra.mxu1 %vm231_vm0, %v3527_v62  ;;  %v2354_v63 = vpop.eup %2353  ;;  %v1425_v3 = vmul.f32 0.7978846, %v1393_v7  ;;  %v1298_v41 = vmul.f32 %v3193_v25, %v3193_v25 }
 0x1bc   :  { %v965_v52 = vpop.f32.mrf.mxu3  ;;  %v1488_v37 = vadd.f32 1.0, %v2354_v63  ;;  %v844_v63 = vadd.f32 %v3088_v21, %v2897_v35 }
 0x1bd   :  { %2355 = vtanh.f32 %v1425_v3  ;;  %v1330_v61 = vmul.f32 %v1298_v41, %v3193_v25  ;;  %v1067_v56 = vadd.f32 %v1066_v58, %v965_v52  ;;  %v845_v3 = vadd.f32 %v3110_v9, %v2905_v6 }
 0x1be   :  { %v1068_v39 = vpop.f32.mrf.mxu0  ;;  %v1520_v60 = vmul.f32 0.5, %v1488_v37 }
 0x1bf   :  { %v1362_v18 = vmul.f32 0.044715, %v1330_v61  ;;  %v1231_v42 = vadd.f32 %v1172_v10, %v1067_v56  ;;  %v3224_v2 = vpop.f32.mrf.mxu2 }
 0x1c0   :  { %v1174_v29 = vpop.f32.mrf.mxu1  ;;  %v1552_v55 = vmul.f32 %v1520_v60, %v3160_v46 }
 0x1c1   :  { %v1394_v23 = vadd.f32 %v1362_v18, %v3193_v25  ;;  %v3218_v11 = vadd.f32 %v3002_v19, %v1231_v42  ;;  %v880_v18 = vadd.f32 %v3044_v59, %v844_v63  ;;  %v881_v42 = vadd.f32 %v3044_v59, %v845_v3 }
 0x1c2   :  { %v1584_v24 = vmul.f32 %v1552_v55, %v879_v34 }
 0x1c3   :  { %v2356_v12 = vpop.eup %2355  ;;  %v1426_v16 = vmul.f32 0.7978846, %v1394_v23  ;;  %v1299_v15 = vmul.f32 %v3218_v11, %v3218_v11 }
 0x1c4   :  { %v967_v5 = vpop.f32.mrf.mxu3  ;;  %v1610_v49 = vpack.c.bf16 %v1584_v24, %v1583_v32  ;;  %v1489_v46 = vadd.f32 1.0, %v2356_v12 }
 0x1c5   :  { %2357 = vtanh.f32 %v1426_v16  ;;  %v1331_v54 = vmul.f32 %v1299_v15, %v3218_v11  ;;  %v1069_v30 = vadd.f32 %v1068_v39, %v967_v5 }
 0x1c6   :  { %v1071_v1 = vpop.f32.mrf.mxu0  ;;  %2242 = vmatmul.msk.bf16.gmra.mxu2 %vm1673_vm1, %v1610_v49  ;;  %v1521_v44 = vmul.f32 0.5, %v1489_v46 }
 0x1c7   :  { %v1363_v58 = vmul.f32 0.044715, %v1331_v54  ;;  %v1232_v50 = vadd.f32 %v1174_v29, %v1069_v30  ;;  %v3239_v34 = vpop.f32.mrf.mxu2 }
 0x1c8   :  { %v1177_v43 = vpop.f32.mrf.mxu1  ;;  %v1553_v56 = vmul.f32 %v1521_v44, %v3183_v53 }
 0x1c9   :  { %v1395_v10 = vadd.f32 %v1363_v58, %v3218_v11  ;;  %v1268_v7 = vadd.f32 %v3002_v19, %v1232_v50 }
 0x1ca   :  { %v1585_v9 = vmul.f32 %v1553_v56, %v880_v18 }
 0x1cb   :  { %v2358_v47 = vpop.eup %2357  ;;  %v1427_v62 = vmul.f32 0.7978846, %v1395_v10  ;;  %v1300_v13 = vmul.f32 %v1268_v7, %v1268_v7  ;;  %v847_v10 = vadd.f32 %v3148_v36, %v2918_v48 }
 0x1cc   :  { %v970_v41 = vpop.f32.mrf.mxu3  ;;  %v1490_v38 = vadd.f32 1.0, %v2358_v47 }
 0x1cd   :  { %2359 = vtanh.f32 %v1427_v62  ;;  %v1332_v27 = vmul.f32 %v1300_v13, %v1268_v7  ;;  %v1072_v52 = vadd.f32 %v1071_v1, %v970_v41 }
 0x1ce   :  { %v1073_v37 = vpop.f32.mrf.mxu0  ;;  %v1522_v61 = vmul.f32 0.5, %v1490_v38 }
 0x1cf   :  { %v1364_v39 = vmul.f32 0.044715, %v1332_v27  ;;  %v1233_v60 = vadd.f32 %v1177_v43, %v1072_v52  ;;  %v846_v43 = vadd.f32 %v3125_v14, %v2907_v57  ;;  %v3251_v62 = vpop.f32.mrf.mxu2  ;;  %v883_v57 = vadd.f32 %v3044_v59, %v847_v10 }
 0x1d0   :  { %v1179_v28 = vpop.f32.mrf.mxu1  ;;  %v1554_v35 = vmul.f32 %v1522_v61, %v3193_v25 }
 0x1d1   :  { %v1396_v21 = vadd.f32 %v1364_v39, %v1268_v7  ;;  %v3237_v6 = vadd.f32 %v3002_v19, %v1233_v60  ;;  %v882_v61 = vadd.f32 %v3044_v59, %v846_v43 }
 0x1d2   :  { %v1586_v29 = vmul.f32 %v1554_v35, %v881_v42 }
 0x1d3   :  { %v2360_v31 = vpop.eup %2359  ;;  %v1428_v55 = vmul.f32 0.7978846, %v1396_v21  ;;  %v1301_v53 = vmul.f32 %v3237_v6, %v3237_v6 }
 0x1d4   :  { %v972_v23 = vpop.f32.mrf.mxu3  ;;  %v1611_v32 = vpack.c.bf16 %v1586_v29, %v1585_v9  ;;  %v1491_v16 = vadd.f32 1.0, %v2360_v31 }
 0x1d5   :  { %2361 = vtanh.f32 %v1428_v55  ;;  %v1333_v24 = vmul.f32 %v1301_v53, %v3237_v6  ;;  %v1074_v12 = vadd.f32 %v1073_v37, %v972_v23 }
 0x1d6   :  { %v1076_v25 = vpop.f32.mrf.mxu0  ;;  %2243 = vmatmul.msk.bf16.gmra.mxu2 %vm1673_vm1, %v1611_v32  ;;  %v1523_v1 = vmul.f32 0.5, %v1491_v16 }
 0x1d7   :  { %v1365_v15 = vmul.f32 0.044715, %v1333_v24  ;;  %v1234_v5 = vadd.f32 %v1179_v28, %v1074_v12  ;;  %v3263_v29 = vpop.f32.mrf.mxu2 }
 0x1d8   :  { %v1182_v49 = vpop.f32.mrf.mxu1  ;;  %v1555_v38 = vmul.f32 %v1523_v1, %v3218_v11 }
 0x1d9   :  { %v1397_v54 = vadd.f32 %v1365_v15, %v3237_v6  ;;  %v1270_v30 = vadd.f32 %v3002_v19, %v1234_v5  ;;  %v848_v15 = vadd.f32 %v3168_v33, %v2920_v4  ;;  %v849_v5 = vadd.f32 %v3187_v20, %v2932_v40 }
 0x1da   :  { %v1587_v56 = vmul.f32 %v1555_v38, %v882_v61 }
 0x1db   :  { %v2362_v46 = vpop.eup %2361  ;;  %v1429_v58 = vmul.f32 0.7978846, %v1397_v54  ;;  %v1302_v50 = vmul.f32 %v1270_v30, %v1270_v30  ;;  %v885_v4 = vadd.f32 %v3044_v59, %v849_v5 }
 0x1dc   :  { %v975_v44 = vpop.f32.mrf.mxu3  ;;  %v1492_v47 = vadd.f32 1.0, %v2362_v46 }
 0x1dd   :  { %2363 = vtanh.f32 %v1429_v58  ;;  %v1334_v13 = vmul.f32 %v1302_v50, %v1270_v30  ;;  %v1077_v63 = vadd.f32 %v1076_v25, %v975_v44 }
 0x1de   :  { %v1078_v3 = vpop.f32.mrf.mxu0  ;;  %v1524_v41 = vmul.f32 0.5, %v1492_v47 }
 0x1df   :  { %v1366_v27 = vmul.f32 0.044715, %v1334_v13  ;;  %v1235_v52 = vadd.f32 %v1182_v49, %v1077_v63  ;;  %v884_v13 = vadd.f32 %v3044_v59, %v848_v15  ;;  %v3279_v63 = vpop.f32.mrf.mxu2 }
 0x1e0   :  { %v1184_v37 = vpop.f32.mrf.mxu1  ;;  %v1556_v14 = vmul.f32 %v1524_v41, %v1268_v7 }
 0x1e1   :  { %v1398_v48 = vadd.f32 %v1366_v27, %v1270_v30  ;;  %v3257_v36 = vadd.f32 %v3002_v19, %v1235_v52 }
 0x1e2   :  { %v1588_v39 = vmul.f32 %v1556_v14, %v883_v57  ;;  %v3292_v14 = vld [vmem:[%s3491_s8] ss:$0 sm:$0xff] }
 0x1e3   :  { %v2364_v60 = vpop.eup %2363  ;;  %v1430_v28 = vmul.f32 0.7978846, %v1398_v48  ;;  %v1303_v18 = vmul.f32 %v3257_v36, %v3257_v36 }
 0x1e4   :  { %v977_v11 = vpop.f32.mrf.mxu3  ;;  %v1612_v42 = vpack.c.bf16 %v1588_v39, %v1587_v56  ;;  %v1493_v7 = vadd.f32 1.0, %v2364_v60 }
 0x1e5   :  { %2365 = vtanh.f32 %v1430_v28  ;;  %v1335_v35 = vmul.f32 %v1303_v18, %v3257_v36  ;;  %v1079_v21 = vadd.f32 %v1078_v3, %v977_v11 }
 0x1e6   :  { %v1081_v9 = vpop.f32.mrf.mxu0  ;;  %2244 = vmatmul.msk.bf16.gmra.mxu2 %vm1673_vm1, %v1612_v42  ;;  %v1525_v24 = vmul.f32 0.5, %v1493_v7 }
 0x1e7   :  { %v1367_v31 = vmul.f32 0.044715, %v1335_v35  ;;  %v1236_v55 = vadd.f32 %v1184_v37, %v1079_v21 }
 0x1e8   :  { %v1187_v53 = vpop.f32.mrf.mxu1  ;;  %v1557_v43 = vmul.f32 %v1525_v24, %v3237_v6 }
 0x1e9   :  { %v1399_v23 = vadd.f32 %v1367_v31, %v3257_v36  ;;  %v3267_v32 = vadd.f32 %v3002_v19, %v1236_v55  ;;  %v850_v31 = vadd.f32 %v3211_v17, %v2938_v26  ;;  %v851_v55 = vadd.f32 %v3224_v2, %v2953_v0 }
 0x1ea   :  { %v1589_v3 = vmul.f32 %v1557_v43, %v884_v13 }
 0x1eb   :  { %v2366_v12 = vpop.eup %2365  ;;  %v1431_v25 = vmul.f32 0.7978846, %v1399_v23  ;;  %v1304_v16 = vmul.f32 %v3267_v32, %v3267_v32  ;;  %v886_v26 = vadd.f32 %v3044_v59, %v850_v31  ;;  %v887_v17 = vadd.f32 %v3044_v59, %v851_v55  ;;  %v3342_v55 = vld [vmem:[%s3489_s6] ss:$0 sm:$0xff] }
 0x1ec   :  { %v980_v49 = vpop.f32.mrf.mxu3  ;;  %v1494_v54 = vadd.f32 1.0, %v2366_v12 }
 0x1ed   :  { %2367 = vtanh.f32 %v1431_v25  ;;  %v1336_v1 = vmul.f32 %v1304_v16, %v3267_v32  ;;  %v1082_v46 = vadd.f32 %v1081_v9, %v980_v49 }
 0x1ee   :  { %v1083_v58 = vpop.f32.mrf.mxu0  ;;  %v1526_v50 = vmul.f32 0.5, %v1494_v54 }
 0x1ef   :  { %v1368_v10 = vmul.f32 0.044715, %v1336_v1  ;;  %v1237_v44 = vadd.f32 %v1187_v53, %v1082_v46 }
 0x1f0   :  { %v1189_v47 = vpop.f32.mrf.mxu1  ;;  %v1558_v33 = vmul.f32 %v1526_v50, %v1270_v30 }
 0x1f1   :  { %v1400_v40 = vadd.f32 %v1368_v10, %v3267_v32  ;;  %v3283_v20 = vadd.f32 %v3002_v19, %v1237_v44 }
 0x1f2   :  { %v1590_v41 = vmul.f32 %v1558_v33, %v885_v4 }
 0x1f3   :  { %v2368_v38 = vpop.eup %2367  ;;  %v1432_v27 = vmul.f32 0.7978846, %v1400_v40  ;;  %v1305_v6 = vmul.f32 %v3283_v20, %v3283_v20 }
 0x1f4   :  { %v982_v52 = vpop.f32.mrf.mxu3  ;;  %v1613_v37 = vpack.c.bf16 %v1590_v41, %v1589_v3  ;;  %v1495_v48 = vadd.f32 1.0, %v2368_v38 }
 0x1f5   :  { %2369 = vtanh.f32 %v1432_v27  ;;  %v1337_v61 = vmul.f32 %v1305_v6, %v3283_v20  ;;  %v1084_v30 = vadd.f32 %v1083_v58, %v982_v52 }
 0x1f6   :  { %v1086_v57 = vpop.f32.mrf.mxu0  ;;  %2245 = vmatmul.msk.bf16.gmra.mxu2 %vm1673_vm1, %v1613_v37  ;;  %v1527_v35 = vmul.f32 0.5, %v1495_v48 }
 0x1f7   :  { %v1369_v56 = vmul.f32 0.044715, %v1337_v61  ;;  %v1238_v39 = vadd.f32 %v1189_v47, %v1084_v30 }
 0x1f8   :  { %v1192_v60 = vpop.f32.mrf.mxu1  ;;  %v1559_v15 = vmul.f32 %v1527_v35, %v3257_v36 }
 0x1f9   :  { %v1401_v28 = vadd.f32 %v1369_v56, %v3283_v20  ;;  %v3296_v18 = vadd.f32 %v3002_v19, %v1238_v39  ;;  %v1731_v11 = vpop.f32.mrf.mxu2  ;;  %v852_v56 = vadd.f32 %v3239_v34, %v2957_v51  ;;  %v853_v39 = vadd.f32 %v3251_v62, %v2969_v45 }
 0x1fa   :  { %v1732_v42 = vadd.f32 %v3292_v14, %v1731_v11  ;;  %v1591_v50 = vmul.f32 %v1559_v15, %v886_v26 }
 0x1fb   :  { %v2370_v21 = vpop.eup %2369  ;;  %v1433_v9 = vmul.f32 0.7978846, %v1401_v28  ;;  %v1306_v7 = vmul.f32 %v3296_v18, %v3296_v18  ;;  %v888_v51 = vadd.f32 %v3044_v59, %v852_v56  ;;  %v889_v34 = vadd.f32 %v3044_v59, %v853_v39 }
 0x1fc   :  { %1811 = vst.msk [vmem:[#allocation2] sm:$0xff] %vm231_vm0, %v1732_v42  ;;  %v985_v53 = vpop.f32.mrf.mxu3  ;;  %v1496_v23 = vadd.f32 1.0, %v2370_v21 }
 0x1fd   :  { %2371 = vtanh.f32 %v1433_v9  ;;  %v1338_v24 = vmul.f32 %v1306_v7, %v3296_v18  ;;  %v1087_v12 = vadd.f32 %v1086_v57, %v985_v53 }
 0x1fe   :  { %v1088_v25 = vpop.f32.mrf.mxu0  ;;  %v1528_v16 = vmul.f32 0.5, %v1496_v23 }
 0x1ff   :  { %v1370_v5 = vmul.f32 0.044715, %v1338_v24  ;;  %v1239_v49 = vadd.f32 %v1192_v60, %v1087_v12 }
 0x200   :  { %v1194_v54 = vpop.f32.mrf.mxu1  ;;  %v1560_v0 = vmul.f32 %v1528_v16, %v3267_v32 }
 0x201   :  { %v1402_v2 = vadd.f32 %v1370_v5, %v3296_v18  ;;  %v3313_v1 = vadd.f32 %v3002_v19, %v1239_v49  ;;  %v1733_v46 = vpop.f32.mrf.mxu2 }
 0x202   :  { %v1734_v58 = vadd.f32 %v3292_v14, %v1733_v46  ;;  %v1592_v43 = vmul.f32 %v1560_v0, %v887_v17 }
 0x203   :  { %v2372_v36 = vpop.eup %2371  ;;  %v1434_v10 = vmul.f32 0.7978846, %v1402_v2  ;;  %v1307_v44 = vmul.f32 %v3313_v1, %v3313_v1 }
 0x204   :  { %1812 = vst.msk [vmem:[#allocation2 + $0x8] sm:$0xff] %vm231_vm0, %v1734_v58  ;;  %v987_v47 = vpop.f32.mrf.mxu3  ;;  %v1614_v13 = vpack.c.bf16 %v1592_v43, %v1591_v50  ;;  %v1497_v40 = vadd.f32 1.0, %v2372_v36 }
 0x205   :  { %2373 = vtanh.f32 %v1434_v10  ;;  %v1339_v32 = vmul.f32 %v1307_v44, %v3313_v1  ;;  %v1089_v4 = vadd.f32 %v1088_v25, %v987_v47 }
 0x206   :  { %v1091_v33 = vpop.f32.mrf.mxu0  ;;  %2246 = vmatmul.msk.bf16.gmra.mxu2 %vm1673_vm1, %v1614_v13  ;;  %v1529_v61 = vmul.f32 0.5, %v1497_v40 }
 0x207   :  { %v1371_v3 = vmul.f32 0.044715, %v1339_v32  ;;  %v1240_v41 = vadd.f32 %v1194_v54, %v1089_v4  ;;  %v854_v32 = vadd.f32 %v3263_v29, %v2975_v22  ;;  %v855_v4 = vadd.f32 %v3279_v63, %v2987_v8 }
 0x208   :  { %v1197_v38 = vpop.f32.mrf.mxu1  ;;  %v1561_v21 = vmul.f32 %v1529_v61, %v3283_v20 }
 0x209   :  { %v1403_v27 = vadd.f32 %v1371_v3, %v3313_v1  ;;  %v3323_v6 = vadd.f32 %v3002_v19, %v1240_v41  ;;  %v1736_v52 = vpop.f32.mrf.mxu2  ;;  %v890_v22 = vadd.f32 %v3044_v59, %v854_v32  ;;  %v891_v29 = vadd.f32 %v3044_v59, %v855_v4 }
 0x20a   :  { %v1737_v37 = vadd.f32 %v3292_v14, %v1736_v52  ;;  %v1593_v24 = vmul.f32 %v1561_v21, %v888_v51 }
 0x20b   :  { %v2374_v30 = vpop.eup %2373  ;;  %v1435_v57 = vmul.f32 0.7978846, %v1403_v27  ;;  %v1308_v48 = vmul.f32 %v3323_v6, %v3323_v6 }
 0x20c   :  { %1813 = vst.msk [vmem:[#allocation2 + $0x10] sm:$0xff] %vm231_vm0, %v1737_v37  ;;  %v990_v60 = vpop.f32.mrf.mxu3  ;;  %v1498_v19 = vadd.f32 1.0, %v2374_v30 }
 0x20d   :  { %2375 = vtanh.f32 %v1435_v57  ;;  %v1340_v28 = vmul.f32 %v1308_v48, %v3323_v6  ;;  %v1092_v11 = vadd.f32 %v1091_v33, %v990_v60 }
 0x20e   :  { %v1093_v42 = vpop.f32.mrf.mxu0  ;;  %v1530_v35 = vmul.f32 0.5, %v1498_v19 }
 0x20f   :  { %v1372_v9 = vmul.f32 0.044715, %v1340_v28  ;;  %v1241_v7 = vadd.f32 %v1197_v38, %v1092_v11 }
 0x210   :  { %v1199_v31 = vpop.f32.mrf.mxu1  ;;  %v1562_v45 = vmul.f32 %v1530_v35, %v3296_v18 }
 0x211   :  { %v1404_v62 = vadd.f32 %v1372_v9, %v3323_v6  ;;  %v3345_v53 = vadd.f32 %v3342_v55, %v1241_v7  ;;  %v1738_v20 = vpop.f32.mrf.mxu2 }
 0x212   :  { %v1739_v23 = vadd.f32 %v3292_v14, %v1738_v20  ;;  %v1594_v12 = vmul.f32 %v1562_v45, %v889_v34 }
 0x213   :  { %v2376_v25 = vpop.eup %2375  ;;  %v1436_v16 = vmul.f32 0.7978846, %v1404_v62  ;;  %v1309_v18 = vmul.f32 %v3345_v53, %v3345_v53 }
 0x214   :  { %1814 = vst.msk [vmem:[#allocation2 + $0x18] sm:$0xff] %vm231_vm0, %v1739_v23  ;;  %v992_v15 = vpop.f32.mrf.mxu3  ;;  %v1615_v5 = vpack.c.bf16 %v1594_v12, %v1593_v24  ;;  %v1499_v17 = vadd.f32 1.0, %v2376_v25 }
 0x215   :  { %2377 = vtanh.f32 %v1436_v16  ;;  %v1341_v49 = vmul.f32 %v1309_v18, %v3345_v53  ;;  %v1094_v54 = vadd.f32 %v1093_v42, %v992_v15 }
 0x216   :  { %v1096_v26 = vpop.f32.mrf.mxu0  ;;  %2247 = vmatmul.msk.bf16.gmra.mxu2 %vm1673_vm1, %v1615_v5  ;;  %v1531_v10 = vmul.f32 0.5, %v1499_v17  ;;  %v3393_v17 = vld [vmem:[%s3487_s4] ss:$0 sm:$0xff]  ;;  %s2424_s4 = smov [#allocation2]  }
 0x217   :  { %v1373_v0 = vmul.f32 0.044715, %v1341_v49  ;;  %v1242_v2 = vadd.f32 %v1199_v31, %v1094_v54  ;;  %s1847_s13 = sshll.u32 %s2424_s4, 4  ;;  %s1848_s13 = int_to_ptr.vmem [resolvable:$true] %s1847_s13 }
 0x218   :  { %v1202_v46 = vpop.f32.mrf.mxu1  ;;  %v1563_v52 = vmul.f32 %v1531_v10, %v3313_v1 }
 0x219   :  { %v1405_v58 = vadd.f32 %v1373_v0, %v3345_v53  ;;  %v3355_v50 = vadd.f32 %v3342_v55, %v1242_v2  ;;  %v1741_v43 = vpop.f32.mrf.mxu2  ;;  %v3528_v0 = vld [vmem:[#allocation15_spill] sm:$0xff] }
 0x21a   :  { %v1742_v36 = vadd.f32 %v3292_v14, %v1741_v43  ;;  %v1595_v39 = vmul.f32 %v1563_v52, %v890_v22  ;;  %v892_v2 = vadd.f32 %v3393_v17, %v3528_v0 }
 0x21b   :  { %v2378_v44 = vpop.eup %2377  ;;  %v1437_v47 = vmul.f32 0.7978846, %v1405_v58  ;;  %v1310_v13 = vmul.f32 %v3355_v50, %v3355_v50 }
 0x21c   :  { %1815 = vst.msk [vmem:[#allocation2 + $0x20] sm:$0xff] %vm231_vm0, %v1742_v36  ;;  %v995_v33 = vpop.f32.mrf.mxu3  ;;  %v1500_v40 = vadd.f32 1.0, %v2378_v44 }
 0x21d   :  { %2379 = vtanh.f32 %v1437_v47  ;;  %v1342_v3 = vmul.f32 %v1310_v13, %v3355_v50  ;;  %v1097_v41 = vadd.f32 %v1096_v26, %v995_v33 }
 0x21e   :  { %v1098_v38 = vpop.f32.mrf.mxu0  ;;  %v1532_v27 = vmul.f32 0.5, %v1500_v40 }
 0x21f   :  { %v1374_v37 = vmul.f32 0.044715, %v1342_v3  ;;  %v1243_v61 = vadd.f32 %v1202_v46, %v1097_v41  ;;  %v3529_v46 = vld [vmem:[#allocation16_spill] sm:$0xff] }
 0x220   :  { %v1204_v30 = vpop.f32.mrf.mxu1  ;;  %v1564_v8 = vmul.f32 %v1532_v27, %v3323_v6  ;;  %v893_v58 = vadd.f32 %v3393_v17, %v3529_v46 }
 0x221   :  { %v1406_v63 = vadd.f32 %v1374_v37, %v3355_v50  ;;  %v3372_v57 = vadd.f32 %v3342_v55, %v1243_v61  ;;  %v1743_v48 = vpop.f32.mrf.mxu2 }
 0x222   :  { %v1744_v56 = vadd.f32 %v3292_v14, %v1743_v48  ;;  %v1596_v60 = vmul.f32 %v1564_v8, %v891_v29 }
 0x223   :  { %v2380_v1 = vpop.eup %2379  ;;  %v1438_v19 = vmul.f32 0.7978846, %v1406_v63  ;;  %v1311_v28 = vmul.f32 %v3372_v57, %v3372_v57 }
 0x224   :  { %1816 = vst.msk [vmem:[#allocation2 + $0x28] sm:$0xff] %vm231_vm0, %v1744_v56  ;;  %v997_v59 = vpop.f32.mrf.mxu3  ;;  %v1616_v11 = vpack.c.bf16 %v1596_v60, %v1595_v39  ;;  %v1501_v21 = vadd.f32 1.0, %v2380_v1 }
 0x225   :  { %2381 = vtanh.f32 %v1438_v19  ;;  %v1343_v6 = vmul.f32 %v1311_v28, %v3372_v57  ;;  %v1099_v42 = vadd.f32 %v1098_v38, %v997_v59 }
 0x226   :  { %v1101_v35 = vpop.f32.mrf.mxu0  ;;  %2248 = vmatmul.msk.bf16.gmra.mxu2 %vm1673_vm1, %v1616_v11  ;;  %v1533_v20 = vmul.f32 0.5, %v1501_v21 }
 0x227   :  { %v1375_v9 = vmul.f32 0.044715, %v1343_v6  ;;  %v1244_v7 = vadd.f32 %v1204_v30, %v1099_v42 }
 0x228   :  { %v1207_v31 = vpop.f32.mrf.mxu1  ;;  %v1565_v49 = vmul.f32 %v1533_v20, %v3345_v53 }
 0x229   :  { %v1407_v51 = vadd.f32 %v1375_v9, %v3372_v57  ;;  %v3382_v34 = vadd.f32 %v3342_v55, %v1244_v7  ;;  %v1746_v45 = vpop.f32.mrf.mxu2  ;;  %v3530_v9 = vld [vmem:[#allocation17_spill] sm:$0xff] }
 0x22a   :  { %v1747_v62 = vadd.f32 %v3292_v14, %v1746_v45  ;;  %v1597_v32 = vmul.f32 %v1565_v49, %v892_v2  ;;  %v894_v7 = vadd.f32 %v3393_v17, %v3530_v9 }
 0x22b   :  { %v2382_v23 = vpop.eup %2381  ;;  %v1439_v24 = vmul.f32 0.7978846, %v1407_v51  ;;  %v1312_v12 = vmul.f32 %v3382_v34, %v3382_v34 }
 0x22c   :  { %1817 = vst.msk [vmem:[#allocation2 + $0x30] sm:$0xff] %vm231_vm0, %v1747_v62  ;;  %v1000_v25 = vpop.f32.mrf.mxu3  ;;  %v1502_v16 = vadd.f32 1.0, %v2382_v23 }
 0x22d   :  { %2383 = vtanh.f32 %v1439_v24  ;;  %v1344_v18 = vmul.f32 %v1312_v12, %v3382_v34  ;;  %v1102_v15 = vadd.f32 %v1101_v35, %v1000_v25 }
 0x22e   :  { %v1534_v5 = vmul.f32 0.5, %v1502_v16  ;;  %v1103_v43 = vpop.f32.mrf.mxu0 }
 0x22f   :  { %v1376_v54 = vmul.f32 0.044715, %v1344_v18  ;;  %v1245_v26 = vadd.f32 %v1207_v31, %v1102_v15  ;;  %v3531_v31 = vld [vmem:[#allocation18_spill] sm:$0xff] }
 0x230   :  { %v1566_v36 = vmul.f32 %v1534_v5, %v3355_v50  ;;  %v1209_v47 = vpop.f32.mrf.mxu1  ;;  %v895_v51 = vadd.f32 %v3393_v17, %v3531_v31 }
 0x231   :  { %v1408_v10 = vadd.f32 %v1376_v54, %v3382_v34  ;;  %v3402_v53 = vadd.f32 %v3342_v55, %v1245_v26  ;;  %v1748_v44 = vpop.f32.mrf.mxu2 }
 0x232   :  { %v1749_v13 = vadd.f32 %v3292_v14, %v1748_v44  ;;  %v1598_v4 = vmul.f32 %v1566_v36, %v893_v58 }
 0x233   :  { %v2384_v33 = vpop.eup %2383  ;;  %v1440_v40 = vmul.f32 0.7978846, %v1408_v10  ;;  %v1313_v3 = vmul.f32 %v3402_v53, %v3402_v53 }
 0x234   :  { %1818 = vst.msk [vmem:[#allocation2 + $0x38] sm:$0xff] %vm231_vm0, %v1749_v13  ;;  %v1002_v41 = vpop.f32.mrf.mxu3  ;;  %v1617_v50 = vpack.c.bf16 %v1598_v4, %v1597_v32  ;;  %v1503_v52 = vadd.f32 1.0, %v2384_v33 }
 0x235   :  { %2385 = vtanh.f32 %v1440_v40  ;;  %v1345_v38 = vmul.f32 %v1313_v3, %v3402_v53  ;;  %v1104_v27 = vadd.f32 %v1103_v43, %v1002_v41 }
 0x236   :  { %2249 = vmatmul.msk.bf16.gmra.mxu2 %vm1673_vm1, %v1617_v50  ;;  %v1106_v8 = vpop.f32.mrf.mxu0  ;;  %v1535_v48 = vmul.f32 0.5, %v1503_v52  ;;  %v3532_v50 = vld [vmem:[#allocation19_spill] sm:$0xff] }
 0x237   :  { %v1377_v37 = vmul.f32 0.044715, %v1345_v38  ;;  %v1246_v61 = vadd.f32 %v1209_v47, %v1104_v27  ;;  %v896_v38 = vadd.f32 %v3393_v17, %v3532_v50 }
 0x238   :  { %v1212_v1 = vpop.f32.mrf.mxu1  ;;  %v1567_v42 = vmul.f32 %v1535_v48, %v3372_v57 }
 0x239   :  { %v1409_v30 = vadd.f32 %v1377_v37, %v3402_v53  ;;  %v1282_v22 = vadd.f32 %v3342_v55, %v1246_v61  ;;  %v1751_v29 = vpop.f32.mrf.mxu2 }
 0x23a   :  { %v1752_v63 = vadd.f32 %v3292_v14, %v1751_v29  ;;  %v1599_v12 = vmul.f32 %v1567_v42, %v894_v7  ;;  %v3535_v42 = vld [vmem:[#allocation22_spill] sm:$0xff] }
 0x23b   :  { %v2386_v56 = vpop.eup %2385  ;;  %v1441_v39 = vmul.f32 0.7978846, %v1409_v30  ;;  %v1314_v60 = vmul.f32 %v1282_v22, %v1282_v22 }
 0x23c   :  { %1819 = vst.msk [vmem:[#allocation2 + $0x40] sm:$0xff] %vm231_vm0, %v1752_v63  ;;  %v1005_v19 = vpop.f32.mrf.mxu3  ;;  %v1504_v28 = vadd.f32 1.0, %v2386_v56 }
 0x23d   :  { %2387 = vtanh.f32 %v1441_v39  ;;  %v1346_v59 = vmul.f32 %v1314_v60, %v1282_v22  ;;  %v1107_v11 = vadd.f32 %v1106_v8, %v1005_v19 }
 0x23e   :  { %v1536_v6 = vmul.f32 0.5, %v1504_v28  ;;  %v1108_v15 = vpop.f32.mrf.mxu0 }
 0x23f   :  { %v1378_v35 = vmul.f32 0.044715, %v1346_v59  ;;  %v1247_v21 = vadd.f32 %v1212_v1, %v1107_v11  ;;  %v3534_v11 = vld [vmem:[#allocation21_spill] sm:$0xff] }
 0x240   :  { %v1568_v45 = vmul.f32 %v1536_v6, %v3382_v34  ;;  %v1214_v34 = vpop.f32.mrf.mxu1  ;;  %v898_v6 = vadd.f32 %v3393_v17, %v3534_v11 }
 0x241   :  { %v1410_v62 = vadd.f32 %v1378_v35, %v1282_v22  ;;  %v1283_v20 = vadd.f32 %v3342_v55, %v1247_v21  ;;  %v1753_v23 = vpop.f32.mrf.mxu2  ;;  %v899_v35 = vadd.f32 %v3393_v17, %v3535_v42 }
 0x242   :  { %v1754_v24 = vadd.f32 %v3292_v14, %v1753_v23  ;;  %v1600_v25 = vmul.f32 %v1568_v45, %v895_v51 }
 0x243   :  { %v2388_v16 = vpop.eup %2387  ;;  %v1442_v57 = vmul.f32 0.7978846, %v1410_v62  ;;  %v1315_v18 = vmul.f32 %v1283_v20, %v1283_v20 }
 0x244   :  { %1820 = vst.msk [vmem:[#allocation2 + $0x48] sm:$0xff] %vm231_vm0, %v1754_v24  ;;  %v1007_v5 = vpop.f32.mrf.mxu3  ;;  %v1618_v49 = vpack.c.bf16 %v1600_v25, %v1599_v12  ;;  %v1505_v0 = vadd.f32 1.0, %v2388_v16 }
 0x245   :  { %2389 = vtanh.f32 %v1442_v57  ;;  %v1347_v54 = vmul.f32 %v1315_v18, %v1283_v20  ;;  %v1109_v26 = vadd.f32 %v1108_v15, %v1007_v5 }
 0x246   :  { %2250 = vmatmul.msk.bf16.gmra.mxu2 %vm1673_vm1, %v1618_v49  ;;  %v1537_v44 = vmul.f32 0.5, %v1505_v0 }
 0x247   :  { %v1379_v2 = vmul.f32 0.044715, %v1347_v54  ;;  %v1248_v46 = vadd.f32 %v1214_v34, %v1109_v26 }
 0x248   :  { %v1569_v3 = vmul.f32 %v1537_v44, %v3402_v53 }
 0x249   :  { %v1411_v58 = vadd.f32 %v1379_v2, %v1283_v20  ;;  %v1284_v43 = vadd.f32 %v3342_v55, %v1248_v46  ;;  %v1756_v36 = vpop.f32.mrf.mxu2  ;;  %v3533_v55 = vld [vmem:[#allocation20_spill] sm:$0xff] }
 0x24a   :  { %v1757_v10 = vadd.f32 %v3292_v14, %v1756_v36  ;;  %v897_v27 = vadd.f32 %v3393_v17, %v3533_v55  ;;  %v1601_v29 = vmul.f32 %v1569_v3, %v896_v38 }
 0x24b   :  { %v2390_v47 = vpop.eup %2389  ;;  %v1443_v13 = vmul.f32 0.7978846, %v1411_v58  ;;  %v1316_v32 = vmul.f32 %v1284_v43, %v1284_v43 }
 0x24c   :  { %1821 = vst.msk [vmem:[#allocation2 + $0x50] sm:$0xff] %vm231_vm0, %v1757_v10  ;;  %v1506_v4 = vadd.f32 1.0, %v2390_v47 }
 0x24d   :  { %2391 = vtanh.f32 %v1443_v13  ;;  %v1348_v33 = vmul.f32 %v1316_v32, %v1284_v43 }
 0x24e   :  { %v1538_v40 = vmul.f32 0.5, %v1506_v4 }
 0x24f   :  { %v1380_v41 = vmul.f32 0.044715, %v1348_v33 }
 0x250   :  { %v1570_v52 = vmul.f32 %v1538_v40, %v1282_v22 }
 0x251   :  { %v1412_v37 = vadd.f32 %v1380_v41, %v1284_v43  ;;  %v1758_v61 = vpop.f32.mrf.mxu2 }
 0x252   :  { %v1759_v30 = vadd.f32 %v3292_v14, %v1758_v61  ;;  %v1602_v8 = vmul.f32 %v1570_v52, %v897_v27 }
 0x253   :  { %v2392_v63 = vpop.eup %2391  ;;  %v1444_v48 = vmul.f32 0.7978846, %v1412_v37 }
 0x254   :  { %1822 = vst.msk [vmem:[#allocation2 + $0x58] sm:$0xff] %vm231_vm0, %v1759_v30  ;;  %v1619_v56 = vpack.c.bf16 %v1602_v8, %v1601_v29  ;;  %v1507_v53 = vadd.f32 1.0, %v2392_v63 }
 0x255   :  { %2393 = vtanh.f32 %v1444_v48 }
 0x256   :  { %2251 = vmatmul.msk.bf16.gmra.mxu2 %vm1673_vm1, %v1619_v56  ;;  %v1539_v1 = vmul.f32 0.5, %v1507_v53 }
 0x258   :  { %v1571_v59 = vmul.f32 %v1539_v1, %v1283_v20 }
 0x259   :  { %v1761_v39 = vpop.f32.mrf.mxu2 }
 0x25a   :  { %v1762_v60 = vadd.f32 %v3292_v14, %v1761_v39  ;;  %v1603_v31 = vmul.f32 %v1571_v59, %v898_v6 }
 0x25b   :  { %v2394_v22 = vpop.eup %2393 }
 0x25c   :  { %1823 = vst.msk [vmem:[#allocation2 + $0x60] sm:$0xff] %vm231_vm0, %v1762_v60  ;;  %v1508_v19 = vadd.f32 1.0, %v2394_v22 }
 0x25e   :  { %v1540_v28 = vmul.f32 0.5, %v1508_v19 }
 0x260   :  { %v1572_v21 = vmul.f32 %v1540_v28, %v1284_v43 }
 0x261   :  { %v1763_v9 = vpop.f32.mrf.mxu2 }
 0x262   :  { %v1764_v7 = vadd.f32 %v3292_v14, %v1763_v9  ;;  %v1604_v51 = vmul.f32 %v1572_v21, %v899_v35 }
 0x264   :  { %1824 = vst.msk [vmem:[#allocation2 + $0x68] sm:$0xff] %vm231_vm0, %v1764_v7  ;;  %v1620_v45 = vpack.c.bf16 %v1604_v51, %v1603_v31 }
 0x266   :  { %2252 = vmatmul.msk.bf16.gmra.mxu2 %vm1673_vm1, %v1620_v45 }
 0x269   :  { %v1766_v62 = vpop.f32.mrf.mxu2 }
 0x26a   :  { %v1767_v20 = vadd.f32 %v3292_v14, %v1766_v62 }
 0x26c   :  { %1825 = vst.msk [vmem:[#allocation2 + $0x70] sm:$0xff] %vm231_vm0, %v1767_v20 }
 0x271   :  { %v1768_v23 = vpop.f32.mrf.mxu2 }
 0x272   :  { %v1769_v24 = vadd.f32 %v3292_v14, %v1768_v23 }
 0x274   :  { %1826 = vst.msk [vmem:[#allocation2 + $0x78] sm:$0xff] %vm231_vm0, %v1769_v24 }
 0x279   :  { %v1771_v17 = vpop.f32.mrf.mxu2 }
 0x27a   :  { %v1772_v12 = vadd.f32 %v3292_v14, %v1771_v17 }
 0x27c   :  { %1827 = vst.msk [vmem:[#allocation2 + $0x80] sm:$0xff] %vm231_vm0, %v1772_v12 }
 0x281   :  { %v1773_v25 = vpop.f32.mrf.mxu2 }
 0x282   :  { %v1774_v16 = vadd.f32 %v3292_v14, %v1773_v25 }
 0x284   :  { %1828 = vst.msk [vmem:[#allocation2 + $0x88] sm:$0xff] %vm231_vm0, %v1774_v16 }
 0x289   :  { %v1776_v57 = vpop.f32.mrf.mxu2 }
 0x28a   :  { %v1777_v18 = vadd.f32 %v3292_v14, %v1776_v57 }
 0x28c   :  { %1829 = vst.msk [vmem:[#allocation2 + $0x90] sm:$0xff] %vm231_vm0, %v1777_v18 }
 0x291   :  { %v1778_v15 = vpop.f32.mrf.mxu2 }
 0x292   :  { %v1779_v5 = vadd.f32 %v3292_v14, %v1778_v15 }
 0x294   :  { %1830 = vst.msk [vmem:[#allocation2 + $0x98] sm:$0xff] %vm231_vm0, %v1779_v5 }
 0x299   :  { %v1781_v49 = vpop.f32.mrf.mxu2 }
 0x29a   :  { %v1782_v54 = vadd.f32 %v3292_v14, %v1781_v49 }
 0x29c   :  { %1831 = vst.msk [vmem:[#allocation2 + $0xa0] sm:$0xff] %vm231_vm0, %v1782_v54 }
 0x2a1   :  { %v1783_v26 = vpop.f32.mrf.mxu2 }
 0x2a2   :  { %v1784_v34 = vadd.f32 %v3292_v14, %v1783_v26 }
 0x2a4   :  { %1832 = vst.msk [vmem:[#allocation2 + $0xa8] sm:$0xff] %vm231_vm0, %v1784_v34 }
 0x2a9   :  { %v1786_v0 = vpop.f32.mrf.mxu2 }
 0x2aa   :  { %v1787_v2 = vadd.f32 %v3292_v14, %v1786_v0 }
 0x2ac   :  { %1833 = vst.msk [vmem:[#allocation2 + $0xb0] sm:$0xff] %vm231_vm0, %v1787_v2 }
 0x2b1   :  { %v1788_v46 = vpop.f32.mrf.mxu2 }
 0x2b2   :  { %v1789_v58 = vadd.f32 %v3292_v14, %v1788_v46 }
 0x2b4   :  { %1834 = vst.msk [vmem:[#allocation2 + $0xb8] sm:$0xff] %vm231_vm0, %v1789_v58 }
 0x2b9   :  { %v1791_v43 = vpop.f32.mrf.mxu2 }
 0x2ba   :  { %v1792_v36 = vadd.f32 %v3292_v14, %v1791_v43 }
 0x2bc   :  { %1835 = vst.msk [vmem:[#allocation2 + $0xc0] sm:$0xff] %vm231_vm0, %v1792_v36 }
 0x2c1   :  { %v1793_v10 = vpop.f32.mrf.mxu2 }
 0x2c2   :  { %v1794_v44 = vadd.f32 %v3292_v14, %v1793_v10 }
 0x2c4   :  { %1836 = vst.msk [vmem:[#allocation2 + $0xc8] sm:$0xff] %vm231_vm0, %v1794_v44 }
 0x2c9   :  { %v1796_v47 = vpop.f32.mrf.mxu2 }
 0x2ca   :  { %v1797_v13 = vadd.f32 %v3292_v14, %v1796_v47 }
 0x2cc   :  { %1837 = vst.msk [vmem:[#allocation2 + $0xd0] sm:$0xff] %vm231_vm0, %v1797_v13 }
 0x2d1   :  { %v1798_v32 = vpop.f32.mrf.mxu2 }
 0x2d2   :  { %v1799_v4 = vadd.f32 %v3292_v14, %v1798_v32 }
 0x2d4   :  { %1838 = vst.msk [vmem:[#allocation2 + $0xd8] sm:$0xff] %vm231_vm0, %v1799_v4 }
 0x2d9   :  { %v1801_v33 = vpop.f32.mrf.mxu2 }
 0x2da   :  { %v1802_v40 = vadd.f32 %v3292_v14, %v1801_v33 }
 0x2dc   :  { %1839 = vst.msk [vmem:[#allocation2 + $0xe0] sm:$0xff] %vm231_vm0, %v1802_v40 }
 0x2e1   :  { %v1803_v3 = vpop.f32.mrf.mxu2 }
 0x2e2   :  { %v1804_v41 = vadd.f32 %v3292_v14, %v1803_v3 }
 0x2e4   :  { %1840 = vst.msk [vmem:[#allocation2 + $0xe8] sm:$0xff] %vm231_vm0, %v1804_v41 }
 0x2e9   :  { %v1806_v50 = vpop.f32.mrf.mxu2 }
 0x2ea   :  { %v1807_v38 = vadd.f32 %v3292_v14, %v1806_v50 }
 0x2ec   :  { %1841 = vst.msk [vmem:[#allocation2 + $0xf0] sm:$0xff] %vm231_vm0, %v1807_v38 }
 0x2f1   :  { %v1808_v55 = vpop.f32.mrf.mxu2 }
 0x2f2   :  { %v1809_v27 = vadd.f32 %v3292_v14, %v1808_v55 }
 0x2f4   :  { %1842 = vst.msk [vmem:[#allocation2 + $0xf8] sm:$0xff] %vm231_vm0, %v1809_v27 }
 0x2f5   :  { %1855 = dma.vmem_to_hbm [thread:$0]  %s1848_s13, 4096, %s1850_s16, [#allocation3], %s2425_s17, %s2425_s17, %s2426_s18  }
 0x2f6   :  { %2422 = dma.done.wait [#allocation3], 4096  }
 0x2f7   :  { %2423 = vsyncadd [#allocation3], 4294963200 }
 0x2f8   :  { %1860 = vsyncpa [#allocation3], 1 }

</bundles_post_ra>
